<compile_context>
chip_gen: v7x
topology: tpu7x:2x2x1
jax: 0.10.0
libtpu: 0.0.40
codegen_flags: <defaults>
</compile_context>

<pallas_src>
import functools

import jax
import jax.numpy as jnp
import numpy as np
from jax import lax
from jax.experimental import pallas as pl
from jax.experimental.pallas import tpu as pltpu

_HI = lax.Precision.HIGHEST
# 3x3 tap offsets in (ky, kx) raster order -- matches the (9, out, in) weight stacks.
_OFFSETS = tuple((ky - 1, kx - 1) for ky in range(3) for kx in range(3))


# ----------------------------- Pallas kernel ------------------------------- #

def _keypoint_kernel(x_ref, cm1_ref, cm2_ref, w1_ref, b1_ref, w2_ref, b2_ref,
                     sel_ref, fw_ref, fb_ref, o_ref, *, B, H, W):
    # Channel-major: x_ref is (C, N) with N = B*H*W lanes (row-major spatial,
    # images concatenated).  Weights come as (9, out, in) stacks so tap `idx` is a
    # free leading-dim load.  cm1/cm2 are (9, 1, N) {0,1} border masks (SAME
    # padding + no cross-image leakage through the cyclic rolls).  sel is the
    # (N, B) avg-pool selection matrix (1/(H2*W2) on each image's valid lanes).
    N = B * H * W

    def shift(v, s):
        # out[:, p] = v[:, (p + s) mod N]; borders are handled by the cm* masks.
        return v if s == 0 else pltpu.roll(v, shift=(-s) % N, axis=1)

    x = x_ref[...]                                            # (C, N)

    # conv1 (3x3, pad=1): 9 shifted (16,C)@(C,N) MXU pushes, then bias + ReLU.
    acc1 = jnp.zeros((w1_ref.shape[1], N), jnp.float32)
    for idx, (dy, dx) in enumerate(_OFFSETS):
        xs = shift(x, dy * W + dx)
        if dy or dx:
            xs = xs * cm1_ref[idx]
        acc1 = acc1 + jnp.dot(w1_ref[idx], xs, precision=_HI,
                              preferred_element_type=jnp.float32)
    y1 = jnp.maximum(acc1 + b1_ref[...], 0.0)                 # (16, N)

    # MaxPool2d(2): two roll+max passes; results live at even-h/even-w lanes
    # (the other lanes hold finite garbage that sel/cm2 never read).
    m = jnp.maximum(y1, shift(y1, 1))
    pooled = jnp.maximum(m, shift(m, W))                      # (16, N)

    # conv2 (3x3, pad=1) on the pooled grid: stride-2 lane offsets + masks.
    acc2 = jnp.zeros((w2_ref.shape[1], N), jnp.float32)
    for idx, (dy, dx) in enumerate(_OFFSETS):
        ps = shift(pooled, 2 * (dy * W + dx))
        if dy or dx:
            ps = ps * cm2_ref[idx]
        acc2 = acc2 + jnp.dot(w2_ref[idx], ps, precision=_HI,
                              preferred_element_type=jnp.float32)
    y2 = jnp.maximum(acc2 + b2_ref[...], 0.0)                 # (32, N)

    # AdaptiveAvgPool2d(1) as a selection matmul, then Linear(32, 2k) + clamp.
    feat = jnp.dot(y2, sel_ref[...], precision=_HI,
                   preferred_element_type=jnp.float32)        # (32, B)
    out = jnp.dot(fw_ref[...], feat, precision=_HI,
                  preferred_element_type=jnp.float32) + fb_ref[...]
    o_ref[...] = jnp.clip(out, -1.0, 1.0)                     # (2k, B)


# ------------------------------- JAX glue ---------------------------------- #

def keypoint_detector_forward(x_nchw, params, k):
    w1, b1, w2, b2, fcw, fcb = params
    B, C, H, W = x_nchw.shape
    assert H % 2 == 0 and W % 2 == 0, "MaxPool2d(2) path assumes even H, W"
    H2, W2 = H // 2, W // 2
    HW, N = H * W, B * H * W

    # Channel-major input: the only host-side data movement (a tiny transpose).
    xr = jnp.transpose(x_nchw, (1, 0, 2, 3)).reshape(C, N).astype(jnp.float32)

    # Host-precomputed constants (a few KB): border masks + pool/avg selection.
    pp = np.arange(HW, dtype=np.int64)
    h_all = np.tile(pp // W, B)
    w_all = np.tile(pp % W, B)

    def border_mask(dy, dx, scale):
        ok = ((h_all + scale * dy >= 0) & (h_all + scale * dy <= H - 1) &
              (w_all + scale * dx >= 0) & (w_all + scale * dx <= W - 1))
        return ok.astype(np.float32)

    cm1 = np.stack([border_mask(dy, dx, 1) for dy, dx in _OFFSETS]).reshape(9, 1, N)
    cm2 = np.stack([border_mask(dy, dx, 2) for dy, dx in _OFFSETS]).reshape(9, 1, N)

    img = np.repeat(np.arange(B), HW)
    valid = ((h_all % 2 == 0) & (w_all % 2 == 0)).astype(np.float32) / (H2 * W2)
    sel = np.zeros((N, B), np.float32)
    sel[np.arange(N), img] = valid

    # Weights as (9, out, in) tap stacks; fc stays in PyTorch (out, in) layout for
    # the channel-major (2k,32)@(32,B) head matmul.
    w1s = jnp.transpose(w1, (2, 3, 0, 1)).reshape(9, 16, C)
    w2s = jnp.transpose(w2, (2, 3, 0, 1)).reshape(9, 32, 16)
    b1c = b1.reshape(16, 1)
    b2c = b2.reshape(32, 1)
    fbc = fcb.reshape(2 * k, 1)

    flops = 2 * N * (9 * 16 * C + 9 * 32 * 16 + 32 * B) + 2 * B * 32 * 2 * k
    bytes_accessed = 4 * (C * N + 2 * 9 * N + 9 * 16 * C + 16 + 9 * 32 * 16 + 32
                          + N * B + 32 * 2 * k + 2 * k + 2 * k * B)

    kernel = functools.partial(_keypoint_kernel, B=B, H=H, W=W)

    def full(shape):
        return pl.BlockSpec(shape, lambda *_: (0,) * len(shape))

    out_cm = pl.pallas_call(
        kernel,
        out_shape=jax.ShapeDtypeStruct((2 * k, B), jnp.float32),
        grid=(1,),   # whole batch in one step: no per-image pipeline overhead
        in_specs=[
            full((C, N)),            # x (channel-major)
            full((9, 1, N)),         # conv1 border masks
            full((9, 1, N)),         # conv2 border masks
            full((9, 16, C)),        # conv1 weights
            full((16, 1)),           # conv1 bias
            full((9, 32, 16)),       # conv2 weights
            full((32, 1)),           # conv2 bias
            full((N, B)),            # avg-pool selection matrix
            full((2 * k, 32)),       # fc weight
            full((2 * k, 1)),        # fc bias
        ],
        out_specs=full((2 * k, B)),
        compiler_params=pltpu.CompilerParams(
            dimension_semantics=("arbitrary",)),
        cost_estimate=pl.CostEstimate(flops=flops, transcendentals=0,
                                      bytes_accessed=bytes_accessed),
    )(xr, jnp.asarray(cm1), jnp.asarray(cm2), w1s, b1c, w2s, b2c,
      jnp.asarray(sel), fcw, fbc)

    # (2k, B) channel-major output -> (B, k, 2); trivial 2k*B-element transpose.
    return jnp.transpose(out_cm, (1, 0)).reshape(B, k, 2)


# ------------------------------ reference ---------------------------------- #

def reference_forward(x_nchw, params, k):
    w1, b1, w2, b2, fcw, fcb = params
    x = jnp.transpose(x_nchw, (0, 2, 3, 1)).astype(jnp.float32)          # NHWC
    dn = ("NHWC", "OIHW", "NHWC")
    y1 = lax.conv_general_dilated(x, w1, (1, 1), "SAME", dimension_numbers=dn,
                                  precision=lax.Precision.HIGHEST)
    y1 = jax.nn.relu(y1 + b1)
    B, H, W, _ = y1.shape
    y1 = y1.reshape(B, H // 2, 2, W // 2, 2, 16).max(axis=(2, 4))        # maxpool 2
    y2 = lax.conv_general_dilated(y1, w2, (1, 1), "SAME", dimension_numbers=dn,
                                  precision=lax.Precision.HIGHEST)
    y2 = jax.nn.relu(y2 + b2)
    feat = y2.mean(axis=(1, 2))                                          # (B, 32)
    out = jnp.dot(feat, fcw.T, precision=lax.Precision.HIGHEST) + fcb
    return jnp.clip(out, -1.0, 1.0).reshape(B, k, 2)


# --------------------------------- main ------------------------------------ #

if __name__ == "__main__":
    B, C, H, W = 2, 4, 16, 16
    K = 8

    key = jax.random.PRNGKey(0)
    kx, k1, k2, k3, k4, k5, k6 = jax.random.split(key, 7)

    x = jax.random.normal(kx, (B, C, H, W), dtype=jnp.float32)           # NCHW input

    # PyTorch shapes: Conv (O, I, KH, KW), Linear (out, in)
    w1 = 0.1 * jax.random.normal(k1, (16, C, 3, 3), dtype=jnp.float32)
    b1 = 0.1 * jax.random.normal(k2, (16,), dtype=jnp.float32)
    w2 = 0.1 * jax.random.normal(k3, (32, 16, 3, 3), dtype=jnp.float32)
    b2 = 0.1 * jax.random.normal(k4, (32,), dtype=jnp.float32)
    fcw = 0.1 * jax.random.normal(k5, (2 * K, 32), dtype=jnp.float32)
    fcb = 0.1 * jax.random.normal(k6, (2 * K,), dtype=jnp.float32)
    params = (w1, b1, w2, b2, fcw, fcb)

    coords = keypoint_detector_forward(x, params, K)
    coords = jax.block_until_ready(coords)
    assert coords.shape == (B, K, 2), coords.shape

    ref = jax.block_until_ready(reference_forward(x, params, K))
    # All in-kernel dots use precision=HIGHEST, so agreement with the fp32
    # reference is tight again.
    np.testing.assert_allclose(np.asarray(coords), np.asarray(ref),
                               rtol=1e-4, atol=1e-5)

    print("KERNEL_OK")
</pallas_src>

<mosaic_0001>
module attributes {stable_mosaic.version = 11 : i64} {
  func.func @_keypoint_kernel(%arg0: i32, %arg1: memref<4x512xf32, #tpu.memory_space<vmem>>, %arg2: memref<9x1x512xf32, #tpu.memory_space<vmem>>, %arg3: memref<9x1x512xf32, #tpu.memory_space<vmem>>, %arg4: memref<9x16x4xf32, #tpu.memory_space<vmem>>, %arg5: memref<16x1xf32, #tpu.memory_space<vmem>>, %arg6: memref<9x32x16xf32, #tpu.memory_space<vmem>>, %arg7: memref<32x1xf32, #tpu.memory_space<vmem>>, %arg8: memref<512x2xf32, #tpu.memory_space<vmem>>, %arg9: memref<16x32xf32, #tpu.memory_space<vmem>>, %arg10: memref<16x1xf32, #tpu.memory_space<vmem>>, %arg11: memref<16x2xf32, #tpu.memory_space<vmem>>) attributes {dimension_semantics = [#tpu.dimension_semantics<arbitrary>], iteration_bounds = array<i64: 1>, scalar_prefetch = 0 : i64, scratch_operands = 0 : i64, tpu.core_type = #tpu.core_type<tc>, window_params = [{pipeline_mode = #tpu.pipeline_mode<synchronous>, transform_indices = @transform_0, window_bounds = array<i64: 4, 512>}, {pipeline_mode = #tpu.pipeline_mode<synchronous>, transform_indices = @transform_1, window_bounds = array<i64: 9, 1, 512>}, {pipeline_mode = #tpu.pipeline_mode<synchronous>, transform_indices = @transform_2, window_bounds = array<i64: 9, 1, 512>}, {pipeline_mode = #tpu.pipeline_mode<synchronous>, transform_indices = @transform_3, window_bounds = array<i64: 9, 16, 4>}, {pipeline_mode = #tpu.pipeline_mode<synchronous>, transform_indices = @transform_4, window_bounds = array<i64: 16, 1>}, {pipeline_mode = #tpu.pipeline_mode<synchronous>, transform_indices = @transform_5, window_bounds = array<i64: 9, 32, 16>}, {pipeline_mode = #tpu.pipeline_mode<synchronous>, transform_indices = @transform_6, window_bounds = array<i64: 32, 1>}, {pipeline_mode = #tpu.pipeline_mode<synchronous>, transform_indices = @transform_7, window_bounds = array<i64: 512, 2>}, {pipeline_mode = #tpu.pipeline_mode<synchronous>, transform_indices = @transform_8, window_bounds = array<i64: 16, 32>}, {pipeline_mode = #tpu.pipeline_mode<synchronous>, transform_indices = @transform_9, window_bounds = array<i64: 16, 1>}, {pipeline_mode = #tpu.pipeline_mode<synchronous>, transform_indices = @transform_10, window_bounds = array<i64: 16, 2>}]} {
    %c0 = arith.constant 0 : index
    %c0_0 = arith.constant 0 : index
    %0 = vector.load %arg1[%c0, %c0_0] : memref<4x512xf32, #tpu.memory_space<vmem>>, vector<4x512xf32>
    %cst = arith.constant 0.000000e+00 : f32
    %1 = vector.broadcast %cst : f32 to vector<16x512xf32>
    %c17_i32 = arith.constant 17 : i32
    %2 = tpu.dynamic_rotate %0 by %c17_i32 dim 1 : vector<4x512xf32>, i32 -> vector<4x512xf32>
    %c0_1 = arith.constant 0 : index
    %c0_2 = arith.constant 0 : index
    %c0_3 = arith.constant 0 : index
    %3 = vector.load %arg2[%c0_1, %c0_2, %c0_3] : memref<9x1x512xf32, #tpu.memory_space<vmem>>, vector<1x1x512xf32>
    %4 = vector.shape_cast %3 : vector<1x1x512xf32> to vector<1x512xf32>
    %5 = vector.broadcast %4 : vector<1x512xf32> to vector<4x512xf32>
    %6 = arith.mulf %2, %5 : vector<4x512xf32>
    %c0_4 = arith.constant 0 : index
    %c0_5 = arith.constant 0 : index
    %c0_6 = arith.constant 0 : index
    %7 = vector.load %arg4[%c0_4, %c0_5, %c0_6] : memref<9x16x4xf32, #tpu.memory_space<vmem>>, vector<1x16x4xf32>
    %8 = vector.shape_cast %7 : vector<1x16x4xf32> to vector<16x4xf32>
    %cst_7 = arith.constant dense<0.000000e+00> : vector<16x512xf32>
    %9 = tpu.matmul %8, %6, %cst_7 {dimension_numbers = #tpu.dot_dimension_numbers<[1], [0], [0], [1], [0, 0, 1, 1], [], []>, precision = #tpu.contract_precision<fp32>} : vector<16x4xf32>, vector<4x512xf32>, vector<16x512xf32> -> vector<16x512xf32>
    %10 = arith.addf %1, %9 : vector<16x512xf32>
    %c16_i32 = arith.constant 16 : i32
    %11 = tpu.dynamic_rotate %0 by %c16_i32 dim 1 : vector<4x512xf32>, i32 -> vector<4x512xf32>
    %c1 = arith.constant 1 : index
    %c0_8 = arith.constant 0 : index
    %c0_9 = arith.constant 0 : index
    %12 = vector.load %arg2[%c1, %c0_8, %c0_9] : memref<9x1x512xf32, #tpu.memory_space<vmem>>, vector<1x1x512xf32>
    %13 = vector.shape_cast %12 : vector<1x1x512xf32> to vector<1x512xf32>
    %14 = vector.broadcast %13 : vector<1x512xf32> to vector<4x512xf32>
    %15 = arith.mulf %11, %14 : vector<4x512xf32>
    %c1_10 = arith.constant 1 : index
    %c0_11 = arith.constant 0 : index
    %c0_12 = arith.constant 0 : index
    %16 = vector.load %arg4[%c1_10, %c0_11, %c0_12] : memref<9x16x4xf32, #tpu.memory_space<vmem>>, vector<1x16x4xf32>
    %17 = vector.shape_cast %16 : vector<1x16x4xf32> to vector<16x4xf32>
    %cst_13 = arith.constant dense<0.000000e+00> : vector<16x512xf32>
    %18 = tpu.matmul %17, %15, %cst_13 {dimension_numbers = #tpu.dot_dimension_numbers<[1], [0], [0], [1], [0, 0, 1, 1], [], []>, precision = #tpu.contract_precision<fp32>} : vector<16x4xf32>, vector<4x512xf32>, vector<16x512xf32> -> vector<16x512xf32>
    %19 = arith.addf %10, %18 : vector<16x512xf32>
    %c15_i32 = arith.constant 15 : i32
    %20 = tpu.dynamic_rotate %0 by %c15_i32 dim 1 : vector<4x512xf32>, i32 -> vector<4x512xf32>
    %c2 = arith.constant 2 : index
    %c0_14 = arith.constant 0 : index
    %c0_15 = arith.constant 0 : index
    %21 = vector.load %arg2[%c2, %c0_14, %c0_15] : memref<9x1x512xf32, #tpu.memory_space<vmem>>, vector<1x1x512xf32>
    %22 = vector.shape_cast %21 : vector<1x1x512xf32> to vector<1x512xf32>
    %23 = vector.broadcast %22 : vector<1x512xf32> to vector<4x512xf32>
    %24 = arith.mulf %20, %23 : vector<4x512xf32>
    %c2_16 = arith.constant 2 : index
    %c0_17 = arith.constant 0 : index
    %c0_18 = arith.constant 0 : index
    %25 = vector.load %arg4[%c2_16, %c0_17, %c0_18] : memref<9x16x4xf32, #tpu.memory_space<vmem>>, vector<1x16x4xf32>
    %26 = vector.shape_cast %25 : vector<1x16x4xf32> to vector<16x4xf32>
    %cst_19 = arith.constant dense<0.000000e+00> : vector<16x512xf32>
    %27 = tpu.matmul %26, %24, %cst_19 {dimension_numbers = #tpu.dot_dimension_numbers<[1], [0], [0], [1], [0, 0, 1, 1], [], []>, precision = #tpu.contract_precision<fp32>} : vector<16x4xf32>, vector<4x512xf32>, vector<16x512xf32> -> vector<16x512xf32>
    %28 = arith.addf %19, %27 : vector<16x512xf32>
    %c1_i32 = arith.constant 1 : i32
    %29 = tpu.dynamic_rotate %0 by %c1_i32 dim 1 : vector<4x512xf32>, i32 -> vector<4x512xf32>
    %c3 = arith.constant 3 : index
    %c0_20 = arith.constant 0 : index
    %c0_21 = arith.constant 0 : index
    %30 = vector.load %arg2[%c3, %c0_20, %c0_21] : memref<9x1x512xf32, #tpu.memory_space<vmem>>, vector<1x1x512xf32>
    %31 = vector.shape_cast %30 : vector<1x1x512xf32> to vector<1x512xf32>
    %32 = vector.broadcast %31 : vector<1x512xf32> to vector<4x512xf32>
    %33 = arith.mulf %29, %32 : vector<4x512xf32>
    %c3_22 = arith.constant 3 : index
    %c0_23 = arith.constant 0 : index
    %c0_24 = arith.constant 0 : index
    %34 = vector.load %arg4[%c3_22, %c0_23, %c0_24] : memref<9x16x4xf32, #tpu.memory_space<vmem>>, vector<1x16x4xf32>
    %35 = vector.shape_cast %34 : vector<1x16x4xf32> to vector<16x4xf32>
    %cst_25 = arith.constant dense<0.000000e+00> : vector<16x512xf32>
    %36 = tpu.matmul %35, %33, %cst_25 {dimension_numbers = #tpu.dot_dimension_numbers<[1], [0], [0], [1], [0, 0, 1, 1], [], []>, precision = #tpu.contract_precision<fp32>} : vector<16x4xf32>, vector<4x512xf32>, vector<16x512xf32> -> vector<16x512xf32>
    %37 = arith.addf %28, %36 : vector<16x512xf32>
    %c4 = arith.constant 4 : index
    %c0_26 = arith.constant 0 : index
    %c0_27 = arith.constant 0 : index
    %38 = vector.load %arg4[%c4, %c0_26, %c0_27] : memref<9x16x4xf32, #tpu.memory_space<vmem>>, vector<1x16x4xf32>
    %39 = vector.shape_cast %38 : vector<1x16x4xf32> to vector<16x4xf32>
    %cst_28 = arith.constant dense<0.000000e+00> : vector<16x512xf32>
    %40 = tpu.matmul %39, %0, %cst_28 {dimension_numbers = #tpu.dot_dimension_numbers<[1], [0], [0], [1], [0, 0, 1, 1], [], []>, precision = #tpu.contract_precision<fp32>} : vector<16x4xf32>, vector<4x512xf32>, vector<16x512xf32> -> vector<16x512xf32>
    %41 = arith.addf %37, %40 : vector<16x512xf32>
    %c511_i32 = arith.constant 511 : i32
    %42 = tpu.dynamic_rotate %0 by %c511_i32 dim 1 : vector<4x512xf32>, i32 -> vector<4x512xf32>
    %c5 = arith.constant 5 : index
    %c0_29 = arith.constant 0 : index
    %c0_30 = arith.constant 0 : index
    %43 = vector.load %arg2[%c5, %c0_29, %c0_30] : memref<9x1x512xf32, #tpu.memory_space<vmem>>, vector<1x1x512xf32>
    %44 = vector.shape_cast %43 : vector<1x1x512xf32> to vector<1x512xf32>
    %45 = vector.broadcast %44 : vector<1x512xf32> to vector<4x512xf32>
    %46 = arith.mulf %42, %45 : vector<4x512xf32>
    %c5_31 = arith.constant 5 : index
    %c0_32 = arith.constant 0 : index
    %c0_33 = arith.constant 0 : index
    %47 = vector.load %arg4[%c5_31, %c0_32, %c0_33] : memref<9x16x4xf32, #tpu.memory_space<vmem>>, vector<1x16x4xf32>
    %48 = vector.shape_cast %47 : vector<1x16x4xf32> to vector<16x4xf32>
    %cst_34 = arith.constant dense<0.000000e+00> : vector<16x512xf32>
    %49 = tpu.matmul %48, %46, %cst_34 {dimension_numbers = #tpu.dot_dimension_numbers<[1], [0], [0], [1], [0, 0, 1, 1], [], []>, precision = #tpu.contract_precision<fp32>} : vector<16x4xf32>, vector<4x512xf32>, vector<16x512xf32> -> vector<16x512xf32>
    %50 = arith.addf %41, %49 : vector<16x512xf32>
    %c497_i32 = arith.constant 497 : i32
    %51 = tpu.dynamic_rotate %0 by %c497_i32 dim 1 : vector<4x512xf32>, i32 -> vector<4x512xf32>
    %c6 = arith.constant 6 : index
    %c0_35 = arith.constant 0 : index
    %c0_36 = arith.constant 0 : index
    %52 = vector.load %arg2[%c6, %c0_35, %c0_36] : memref<9x1x512xf32, #tpu.memory_space<vmem>>, vector<1x1x512xf32>
    %53 = vector.shape_cast %52 : vector<1x1x512xf32> to vector<1x512xf32>
    %54 = vector.broadcast %53 : vector<1x512xf32> to vector<4x512xf32>
    %55 = arith.mulf %51, %54 : vector<4x512xf32>
    %c6_37 = arith.constant 6 : index
    %c0_38 = arith.constant 0 : index
    %c0_39 = arith.constant 0 : index
    %56 = vector.load %arg4[%c6_37, %c0_38, %c0_39] : memref<9x16x4xf32, #tpu.memory_space<vmem>>, vector<1x16x4xf32>
    %57 = vector.shape_cast %56 : vector<1x16x4xf32> to vector<16x4xf32>
    %cst_40 = arith.constant dense<0.000000e+00> : vector<16x512xf32>
    %58 = tpu.matmul %57, %55, %cst_40 {dimension_numbers = #tpu.dot_dimension_numbers<[1], [0], [0], [1], [0, 0, 1, 1], [], []>, precision = #tpu.contract_precision<fp32>} : vector<16x4xf32>, vector<4x512xf32>, vector<16x512xf32> -> vector<16x512xf32>
    %59 = arith.addf %50, %58 : vector<16x512xf32>
    %c496_i32 = arith.constant 496 : i32
    %60 = tpu.dynamic_rotate %0 by %c496_i32 dim 1 : vector<4x512xf32>, i32 -> vector<4x512xf32>
    %c7 = arith.constant 7 : index
    %c0_41 = arith.constant 0 : index
    %c0_42 = arith.constant 0 : index
    %61 = vector.load %arg2[%c7, %c0_41, %c0_42] : memref<9x1x512xf32, #tpu.memory_space<vmem>>, vector<1x1x512xf32>
    %62 = vector.shape_cast %61 : vector<1x1x512xf32> to vector<1x512xf32>
    %63 = vector.broadcast %62 : vector<1x512xf32> to vector<4x512xf32>
    %64 = arith.mulf %60, %63 : vector<4x512xf32>
    %c7_43 = arith.constant 7 : index
    %c0_44 = arith.constant 0 : index
    %c0_45 = arith.constant 0 : index
    %65 = vector.load %arg4[%c7_43, %c0_44, %c0_45] : memref<9x16x4xf32, #tpu.memory_space<vmem>>, vector<1x16x4xf32>
    %66 = vector.shape_cast %65 : vector<1x16x4xf32> to vector<16x4xf32>
    %cst_46 = arith.constant dense<0.000000e+00> : vector<16x512xf32>
    %67 = tpu.matmul %66, %64, %cst_46 {dimension_numbers = #tpu.dot_dimension_numbers<[1], [0], [0], [1], [0, 0, 1, 1], [], []>, precision = #tpu.contract_precision<fp32>} : vector<16x4xf32>, vector<4x512xf32>, vector<16x512xf32> -> vector<16x512xf32>
    %68 = arith.addf %59, %67 : vector<16x512xf32>
    %c495_i32 = arith.constant 495 : i32
    %69 = tpu.dynamic_rotate %0 by %c495_i32 dim 1 : vector<4x512xf32>, i32 -> vector<4x512xf32>
    %c8 = arith.constant 8 : index
    %c0_47 = arith.constant 0 : index
    %c0_48 = arith.constant 0 : index
    %70 = vector.load %arg2[%c8, %c0_47, %c0_48] : memref<9x1x512xf32, #tpu.memory_space<vmem>>, vector<1x1x512xf32>
    %71 = vector.shape_cast %70 : vector<1x1x512xf32> to vector<1x512xf32>
    %72 = vector.broadcast %71 : vector<1x512xf32> to vector<4x512xf32>
    %73 = arith.mulf %69, %72 : vector<4x512xf32>
    %c8_49 = arith.constant 8 : index
    %c0_50 = arith.constant 0 : index
    %c0_51 = arith.constant 0 : index
    %74 = vector.load %arg4[%c8_49, %c0_50, %c0_51] : memref<9x16x4xf32, #tpu.memory_space<vmem>>, vector<1x16x4xf32>
    %75 = vector.shape_cast %74 : vector<1x16x4xf32> to vector<16x4xf32>
    %cst_52 = arith.constant dense<0.000000e+00> : vector<16x512xf32>
    %76 = tpu.matmul %75, %73, %cst_52 {dimension_numbers = #tpu.dot_dimension_numbers<[1], [0], [0], [1], [0, 0, 1, 1], [], []>, precision = #tpu.contract_precision<fp32>} : vector<16x4xf32>, vector<4x512xf32>, vector<16x512xf32> -> vector<16x512xf32>
    %77 = arith.addf %68, %76 : vector<16x512xf32>
    %c0_53 = arith.constant 0 : index
    %c0_54 = arith.constant 0 : index
    %78 = vector.load %arg5[%c0_53, %c0_54] : memref<16x1xf32, #tpu.memory_space<vmem>>, vector<16x1xf32>
    %79 = vector.broadcast %78 : vector<16x1xf32> to vector<16x512xf32>
    %80 = arith.addf %77, %79 : vector<16x512xf32>
    %cst_55 = arith.constant 0.000000e+00 : f32
    %81 = vector.broadcast %cst_55 : f32 to vector<16x512xf32>
    %82 = arith.maximumf %80, %81 : vector<16x512xf32>
    %c511_i32_56 = arith.constant 511 : i32
    %83 = tpu.dynamic_rotate %82 by %c511_i32_56 dim 1 : vector<16x512xf32>, i32 -> vector<16x512xf32>
    %84 = arith.maximumf %82, %83 : vector<16x512xf32>
    %c496_i32_57 = arith.constant 496 : i32
    %85 = tpu.dynamic_rotate %84 by %c496_i32_57 dim 1 : vector<16x512xf32>, i32 -> vector<16x512xf32>
    %86 = arith.maximumf %84, %85 : vector<16x512xf32>
    %cst_58 = arith.constant 0.000000e+00 : f32
    %87 = vector.broadcast %cst_58 : f32 to vector<32x512xf32>
    %c34_i32 = arith.constant 34 : i32
    %88 = tpu.dynamic_rotate %86 by %c34_i32 dim 1 : vector<16x512xf32>, i32 -> vector<16x512xf32>
    %c0_59 = arith.constant 0 : index
    %c0_60 = arith.constant 0 : index
    %c0_61 = arith.constant 0 : index
    %89 = vector.load %arg3[%c0_59, %c0_60, %c0_61] : memref<9x1x512xf32, #tpu.memory_space<vmem>>, vector<1x1x512xf32>
    %90 = vector.shape_cast %89 : vector<1x1x512xf32> to vector<1x512xf32>
    %91 = vector.broadcast %90 : vector<1x512xf32> to vector<16x512xf32>
    %92 = arith.mulf %88, %91 : vector<16x512xf32>
    %c0_62 = arith.constant 0 : index
    %c0_63 = arith.constant 0 : index
    %c0_64 = arith.constant 0 : index
    %93 = vector.load %arg6[%c0_62, %c0_63, %c0_64] : memref<9x32x16xf32, #tpu.memory_space<vmem>>, vector<1x32x16xf32>
    %94 = vector.shape_cast %93 : vector<1x32x16xf32> to vector<32x16xf32>
    %cst_65 = arith.constant dense<0.000000e+00> : vector<32x512xf32>
    %95 = tpu.matmul %94, %92, %cst_65 {dimension_numbers = #tpu.dot_dimension_numbers<[1], [0], [0], [1], [0, 0, 1, 1], [], []>, precision = #tpu.contract_precision<fp32>} : vector<32x16xf32>, vector<16x512xf32>, vector<32x512xf32> -> vector<32x512xf32>
    %96 = arith.addf %87, %95 : vector<32x512xf32>
    %c32_i32 = arith.constant 32 : i32
    %97 = tpu.dynamic_rotate %86 by %c32_i32 dim 1 : vector<16x512xf32>, i32 -> vector<16x512xf32>
    %c1_66 = arith.constant 1 : index
    %c0_67 = arith.constant 0 : index
    %c0_68 = arith.constant 0 : index
    %98 = vector.load %arg3[%c1_66, %c0_67, %c0_68] : memref<9x1x512xf32, #tpu.memory_space<vmem>>, vector<1x1x512xf32>
    %99 = vector.shape_cast %98 : vector<1x1x512xf32> to vector<1x512xf32>
    %100 = vector.broadcast %99 : vector<1x512xf32> to vector<16x512xf32>
    %101 = arith.mulf %97, %100 : vector<16x512xf32>
    %c1_69 = arith.constant 1 : index
    %c0_70 = arith.constant 0 : index
    %c0_71 = arith.constant 0 : index
    %102 = vector.load %arg6[%c1_69, %c0_70, %c0_71] : memref<9x32x16xf32, #tpu.memory_space<vmem>>, vector<1x32x16xf32>
    %103 = vector.shape_cast %102 : vector<1x32x16xf32> to vector<32x16xf32>
    %cst_72 = arith.constant dense<0.000000e+00> : vector<32x512xf32>
    %104 = tpu.matmul %103, %101, %cst_72 {dimension_numbers = #tpu.dot_dimension_numbers<[1], [0], [0], [1], [0, 0, 1, 1], [], []>, precision = #tpu.contract_precision<fp32>} : vector<32x16xf32>, vector<16x512xf32>, vector<32x512xf32> -> vector<32x512xf32>
    %105 = arith.addf %96, %104 : vector<32x512xf32>
    %c30_i32 = arith.constant 30 : i32
    %106 = tpu.dynamic_rotate %86 by %c30_i32 dim 1 : vector<16x512xf32>, i32 -> vector<16x512xf32>
    %c2_73 = arith.constant 2 : index
    %c0_74 = arith.constant 0 : index
    %c0_75 = arith.constant 0 : index
    %107 = vector.load %arg3[%c2_73, %c0_74, %c0_75] : memref<9x1x512xf32, #tpu.memory_space<vmem>>, vector<1x1x512xf32>
    %108 = vector.shape_cast %107 : vector<1x1x512xf32> to vector<1x512xf32>
    %109 = vector.broadcast %108 : vector<1x512xf32> to vector<16x512xf32>
    %110 = arith.mulf %106, %109 : vector<16x512xf32>
    %c2_76 = arith.constant 2 : index
    %c0_77 = arith.constant 0 : index
    %c0_78 = arith.constant 0 : index
    %111 = vector.load %arg6[%c2_76, %c0_77, %c0_78] : memref<9x32x16xf32, #tpu.memory_space<vmem>>, vector<1x32x16xf32>
    %112 = vector.shape_cast %111 : vector<1x32x16xf32> to vector<32x16xf32>
    %cst_79 = arith.constant dense<0.000000e+00> : vector<32x512xf32>
    %113 = tpu.matmul %112, %110, %cst_79 {dimension_numbers = #tpu.dot_dimension_numbers<[1], [0], [0], [1], [0, 0, 1, 1], [], []>, precision = #tpu.contract_precision<fp32>} : vector<32x16xf32>, vector<16x512xf32>, vector<32x512xf32> -> vector<32x512xf32>
    %114 = arith.addf %105, %113 : vector<32x512xf32>
    %c2_i32 = arith.constant 2 : i32
    %115 = tpu.dynamic_rotate %86 by %c2_i32 dim 1 : vector<16x512xf32>, i32 -> vector<16x512xf32>
    %c3_80 = arith.constant 3 : index
    %c0_81 = arith.constant 0 : index
    %c0_82 = arith.constant 0 : index
    %116 = vector.load %arg3[%c3_80, %c0_81, %c0_82] : memref<9x1x512xf32, #tpu.memory_space<vmem>>, vector<1x1x512xf32>
    %117 = vector.shape_cast %116 : vector<1x1x512xf32> to vector<1x512xf32>
    %118 = vector.broadcast %117 : vector<1x512xf32> to vector<16x512xf32>
    %119 = arith.mulf %115, %118 : vector<16x512xf32>
    %c3_83 = arith.constant 3 : index
    %c0_84 = arith.constant 0 : index
    %c0_85 = arith.constant 0 : index
    %120 = vector.load %arg6[%c3_83, %c0_84, %c0_85] : memref<9x32x16xf32, #tpu.memory_space<vmem>>, vector<1x32x16xf32>
    %121 = vector.shape_cast %120 : vector<1x32x16xf32> to vector<32x16xf32>
    %cst_86 = arith.constant dense<0.000000e+00> : vector<32x512xf32>
    %122 = tpu.matmul %121, %119, %cst_86 {dimension_numbers = #tpu.dot_dimension_numbers<[1], [0], [0], [1], [0, 0, 1, 1], [], []>, precision = #tpu.contract_precision<fp32>} : vector<32x16xf32>, vector<16x512xf32>, vector<32x512xf32> -> vector<32x512xf32>
    %123 = arith.addf %114, %122 : vector<32x512xf32>
    %c4_87 = arith.constant 4 : index
    %c0_88 = arith.constant 0 : index
    %c0_89 = arith.constant 0 : index
    %124 = vector.load %arg6[%c4_87, %c0_88, %c0_89] : memref<9x32x16xf32, #tpu.memory_space<vmem>>, vector<1x32x16xf32>
    %125 = vector.shape_cast %124 : vector<1x32x16xf32> to vector<32x16xf32>
    %cst_90 = arith.constant dense<0.000000e+00> : vector<32x512xf32>
    %126 = tpu.matmul %125, %86, %cst_90 {dimension_numbers = #tpu.dot_dimension_numbers<[1], [0], [0], [1], [0, 0, 1, 1], [], []>, precision = #tpu.contract_precision<fp32>} : vector<32x16xf32>, vector<16x512xf32>, vector<32x512xf32> -> vector<32x512xf32>
    %127 = arith.addf %123, %126 : vector<32x512xf32>
    %c510_i32 = arith.constant 510 : i32
    %128 = tpu.dynamic_rotate %86 by %c510_i32 dim 1 : vector<16x512xf32>, i32 -> vector<16x512xf32>
    %c5_91 = arith.constant 5 : index
    %c0_92 = arith.constant 0 : index
    %c0_93 = arith.constant 0 : index
    %129 = vector.load %arg3[%c5_91, %c0_92, %c0_93] : memref<9x1x512xf32, #tpu.memory_space<vmem>>, vector<1x1x512xf32>
    %130 = vector.shape_cast %129 : vector<1x1x512xf32> to vector<1x512xf32>
    %131 = vector.broadcast %130 : vector<1x512xf32> to vector<16x512xf32>
    %132 = arith.mulf %128, %131 : vector<16x512xf32>
    %c5_94 = arith.constant 5 : index
    %c0_95 = arith.constant 0 : index
    %c0_96 = arith.constant 0 : index
    %133 = vector.load %arg6[%c5_94, %c0_95, %c0_96] : memref<9x32x16xf32, #tpu.memory_space<vmem>>, vector<1x32x16xf32>
    %134 = vector.shape_cast %133 : vector<1x32x16xf32> to vector<32x16xf32>
    %cst_97 = arith.constant dense<0.000000e+00> : vector<32x512xf32>
    %135 = tpu.matmul %134, %132, %cst_97 {dimension_numbers = #tpu.dot_dimension_numbers<[1], [0], [0], [1], [0, 0, 1, 1], [], []>, precision = #tpu.contract_precision<fp32>} : vector<32x16xf32>, vector<16x512xf32>, vector<32x512xf32> -> vector<32x512xf32>
    %136 = arith.addf %127, %135 : vector<32x512xf32>
    %c482_i32 = arith.constant 482 : i32
    %137 = tpu.dynamic_rotate %86 by %c482_i32 dim 1 : vector<16x512xf32>, i32 -> vector<16x512xf32>
    %c6_98 = arith.constant 6 : index
    %c0_99 = arith.constant 0 : index
    %c0_100 = arith.constant 0 : index
    %138 = vector.load %arg3[%c6_98, %c0_99, %c0_100] : memref<9x1x512xf32, #tpu.memory_space<vmem>>, vector<1x1x512xf32>
    %139 = vector.shape_cast %138 : vector<1x1x512xf32> to vector<1x512xf32>
    %140 = vector.broadcast %139 : vector<1x512xf32> to vector<16x512xf32>
    %141 = arith.mulf %137, %140 : vector<16x512xf32>
    %c6_101 = arith.constant 6 : index
    %c0_102 = arith.constant 0 : index
    %c0_103 = arith.constant 0 : index
    %142 = vector.load %arg6[%c6_101, %c0_102, %c0_103] : memref<9x32x16xf32, #tpu.memory_space<vmem>>, vector<1x32x16xf32>
    %143 = vector.shape_cast %142 : vector<1x32x16xf32> to vector<32x16xf32>
    %cst_104 = arith.constant dense<0.000000e+00> : vector<32x512xf32>
    %144 = tpu.matmul %143, %141, %cst_104 {dimension_numbers = #tpu.dot_dimension_numbers<[1], [0], [0], [1], [0, 0, 1, 1], [], []>, precision = #tpu.contract_precision<fp32>} : vector<32x16xf32>, vector<16x512xf32>, vector<32x512xf32> -> vector<32x512xf32>
    %145 = arith.addf %136, %144 : vector<32x512xf32>
    %c480_i32 = arith.constant 480 : i32
    %146 = tpu.dynamic_rotate %86 by %c480_i32 dim 1 : vector<16x512xf32>, i32 -> vector<16x512xf32>
    %c7_105 = arith.constant 7 : index
    %c0_106 = arith.constant 0 : index
    %c0_107 = arith.constant 0 : index
    %147 = vector.load %arg3[%c7_105, %c0_106, %c0_107] : memref<9x1x512xf32, #tpu.memory_space<vmem>>, vector<1x1x512xf32>
    %148 = vector.shape_cast %147 : vector<1x1x512xf32> to vector<1x512xf32>
    %149 = vector.broadcast %148 : vector<1x512xf32> to vector<16x512xf32>
    %150 = arith.mulf %146, %149 : vector<16x512xf32>
    %c7_108 = arith.constant 7 : index
    %c0_109 = arith.constant 0 : index
    %c0_110 = arith.constant 0 : index
    %151 = vector.load %arg6[%c7_108, %c0_109, %c0_110] : memref<9x32x16xf32, #tpu.memory_space<vmem>>, vector<1x32x16xf32>
    %152 = vector.shape_cast %151 : vector<1x32x16xf32> to vector<32x16xf32>
    %cst_111 = arith.constant dense<0.000000e+00> : vector<32x512xf32>
    %153 = tpu.matmul %152, %150, %cst_111 {dimension_numbers = #tpu.dot_dimension_numbers<[1], [0], [0], [1], [0, 0, 1, 1], [], []>, precision = #tpu.contract_precision<fp32>} : vector<32x16xf32>, vector<16x512xf32>, vector<32x512xf32> -> vector<32x512xf32>
    %154 = arith.addf %145, %153 : vector<32x512xf32>
    %c478_i32 = arith.constant 478 : i32
    %155 = tpu.dynamic_rotate %86 by %c478_i32 dim 1 : vector<16x512xf32>, i32 -> vector<16x512xf32>
    %c8_112 = arith.constant 8 : index
    %c0_113 = arith.constant 0 : index
    %c0_114 = arith.constant 0 : index
    %156 = vector.load %arg3[%c8_112, %c0_113, %c0_114] : memref<9x1x512xf32, #tpu.memory_space<vmem>>, vector<1x1x512xf32>
    %157 = vector.shape_cast %156 : vector<1x1x512xf32> to vector<1x512xf32>
    %158 = vector.broadcast %157 : vector<1x512xf32> to vector<16x512xf32>
    %159 = arith.mulf %155, %158 : vector<16x512xf32>
    %c8_115 = arith.constant 8 : index
    %c0_116 = arith.constant 0 : index
    %c0_117 = arith.constant 0 : index
    %160 = vector.load %arg6[%c8_115, %c0_116, %c0_117] : memref<9x32x16xf32, #tpu.memory_space<vmem>>, vector<1x32x16xf32>
    %161 = vector.shape_cast %160 : vector<1x32x16xf32> to vector<32x16xf32>
    %cst_118 = arith.constant dense<0.000000e+00> : vector<32x512xf32>
    %162 = tpu.matmul %161, %159, %cst_118 {dimension_numbers = #tpu.dot_dimension_numbers<[1], [0], [0], [1], [0, 0, 1, 1], [], []>, precision = #tpu.contract_precision<fp32>} : vector<32x16xf32>, vector<16x512xf32>, vector<32x512xf32> -> vector<32x512xf32>
    %163 = arith.addf %154, %162 : vector<32x512xf32>
    %c0_119 = arith.constant 0 : index
    %c0_120 = arith.constant 0 : index
    %164 = vector.load %arg7[%c0_119, %c0_120] : memref<32x1xf32, #tpu.memory_space<vmem>>, vector<32x1xf32>
    %165 = vector.broadcast %164 : vector<32x1xf32> to vector<32x512xf32>
    %166 = arith.addf %163, %165 : vector<32x512xf32>
    %cst_121 = arith.constant 0.000000e+00 : f32
    %167 = vector.broadcast %cst_121 : f32 to vector<32x512xf32>
    %168 = arith.maximumf %166, %167 : vector<32x512xf32>
    %c0_122 = arith.constant 0 : index
    %c0_123 = arith.constant 0 : index
    %169 = vector.load %arg8[%c0_122, %c0_123] : memref<512x2xf32, #tpu.memory_space<vmem>>, vector<512x2xf32>
    %cst_124 = arith.constant dense<0.000000e+00> : vector<32x2xf32>
    %170 = tpu.matmul %168, %169, %cst_124 {dimension_numbers = #tpu.dot_dimension_numbers<[1], [0], [0], [1], [0, 0, 1, 1], [], []>, precision = #tpu.contract_precision<fp32>} : vector<32x512xf32>, vector<512x2xf32>, vector<32x2xf32> -> vector<32x2xf32>
    %c0_125 = arith.constant 0 : index
    %c0_126 = arith.constant 0 : index
    %171 = vector.load %arg9[%c0_125, %c0_126] : memref<16x32xf32, #tpu.memory_space<vmem>>, vector<16x32xf32>
    %cst_127 = arith.constant dense<0.000000e+00> : vector<16x2xf32>
    %172 = tpu.matmul %171, %170, %cst_127 {dimension_numbers = #tpu.dot_dimension_numbers<[1], [0], [0], [1], [0, 0, 1, 1], [], []>, precision = #tpu.contract_precision<fp32>} : vector<16x32xf32>, vector<32x2xf32>, vector<16x2xf32> -> vector<16x2xf32>
    %c0_128 = arith.constant 0 : index
    %c0_129 = arith.constant 0 : index
    %173 = vector.load %arg10[%c0_128, %c0_129] : memref<16x1xf32, #tpu.memory_space<vmem>>, vector<16x1xf32>
    %174 = vector.broadcast %173 : vector<16x1xf32> to vector<16x2xf32>
    %175 = arith.addf %172, %174 : vector<16x2xf32>
    %cst_130 = arith.constant -1.000000e+00 : f32
    %cst_131 = arith.constant 1.000000e+00 : f32
    %176 = vector.broadcast %cst_130 : f32 to vector<16x2xf32>
    %177 = arith.maximumf %176, %175 : vector<16x2xf32>
    %178 = vector.broadcast %cst_131 : f32 to vector<16x2xf32>
    %179 = arith.minimumf %178, %177 : vector<16x2xf32>
    %c0_132 = arith.constant 0 : index
    %c0_133 = arith.constant 0 : index
    %180 = vector.load %arg11[%c0_132, %c0_133] : memref<16x2xf32, #tpu.memory_space<vmem>>, vector<16x2xf32>
    tpu.vector_store %arg11[%c0_132, %c0_133], %179 {strides = array<i32>} : memref<16x2xf32, #tpu.memory_space<vmem>>, vector<16x2xf32>,
    return
  }
  func.func @transform_0(%arg0: i32) -> (i32, i32) {
    %c0_i32 = arith.constant 0 : i32
    %c0_i32_0 = arith.constant 0 : i32
    %c0_i32_1 = arith.constant 0 : i32
    return %c0_i32, %c0_i32_0 : i32, i32
  }
  func.func @transform_1(%arg0: i32) -> (i32, i32, i32) {
    %c0_i32 = arith.constant 0 : i32
    %c0_i32_0 = arith.constant 0 : i32
    %c0_i32_1 = arith.constant 0 : i32
    %c0_i32_2 = arith.constant 0 : i32
    return %c0_i32, %c0_i32_0, %c0_i32_1 : i32, i32, i32
  }
  func.func @transform_2(%arg0: i32) -> (i32, i32, i32) {
    %c0_i32 = arith.constant 0 : i32
    %c0_i32_0 = arith.constant 0 : i32
    %c0_i32_1 = arith.constant 0 : i32
    %c0_i32_2 = arith.constant 0 : i32
    return %c0_i32, %c0_i32_0, %c0_i32_1 : i32, i32, i32
  }
  func.func @transform_3(%arg0: i32) -> (i32, i32, i32) {
    %c0_i32 = arith.constant 0 : i32
    %c0_i32_0 = arith.constant 0 : i32
    %c0_i32_1 = arith.constant 0 : i32
    %c0_i32_2 = arith.constant 0 : i32
    return %c0_i32, %c0_i32_0, %c0_i32_1 : i32, i32, i32
  }
  func.func @transform_4(%arg0: i32) -> (i32, i32) {
    %c0_i32 = arith.constant 0 : i32
    %c0_i32_0 = arith.constant 0 : i32
    %c0_i32_1 = arith.constant 0 : i32
    return %c0_i32, %c0_i32_0 : i32, i32
  }
  func.func @transform_5(%arg0: i32) -> (i32, i32, i32) {
    %c0_i32 = arith.constant 0 : i32
    %c0_i32_0 = arith.constant 0 : i32
    %c0_i32_1 = arith.constant 0 : i32
    %c0_i32_2 = arith.constant 0 : i32
    return %c0_i32, %c0_i32_0, %c0_i32_1 : i32, i32, i32
  }
  func.func @transform_6(%arg0: i32) -> (i32, i32) {
    %c0_i32 = arith.constant 0 : i32
    %c0_i32_0 = arith.constant 0 : i32
    %c0_i32_1 = arith.constant 0 : i32
    return %c0_i32, %c0_i32_0 : i32, i32
  }
  func.func @transform_7(%arg0: i32) -> (i32, i32) {
    %c0_i32 = arith.constant 0 : i32
    %c0_i32_0 = arith.constant 0 : i32
    %c0_i32_1 = arith.constant 0 : i32
    return %c0_i32, %c0_i32_0 : i32, i32
  }
  func.func @transform_8(%arg0: i32) -> (i32, i32) {
    %c0_i32 = arith.constant 0 : i32
    %c0_i32_0 = arith.constant 0 : i32
    %c0_i32_1 = arith.constant 0 : i32
    return %c0_i32, %c0_i32_0 : i32, i32
  }
  func.func @transform_9(%arg0: i32) -> (i32, i32) {
    %c0_i32 = arith.constant 0 : i32
    %c0_i32_0 = arith.constant 0 : i32
    %c0_i32_1 = arith.constant 0 : i32
    return %c0_i32, %c0_i32_0 : i32, i32
  }
  func.func @transform_10(%arg0: i32) -> (i32, i32) {
    %c0_i32 = arith.constant 0 : i32
    %c0_i32_0 = arith.constant 0 : i32
    %c0_i32_1 = arith.constant 0 : i32
    return %c0_i32, %c0_i32_0 : i32, i32
  }
}

</mosaic_0001>

<bundles_post_ra>
// kernel: tpu_custom_call.1
= control target key start
LH: loop header
LB: loop body
LE: loop exit
PB: predicated region body
PF: predicated region fallthrough
CT: control target
= control target key end

     0   :  { %v34099_v2 = vmov 0.0   ;;  %s27753_s17 = smov 16   ;;  %s27754_s18 = smov 17   ;;  %vm129_vm0 = vcmask 31744   ;;  %v51_v8 = vlaneseq  ;;  %vm136_vm2 = vcmask 1043456   ;;  %s34084_s0 = inlined_call_operand.vmem [shape: f32[4,512], index: 0, kind: input, shape index: {}]   ;;  %s34085_s3 = inlined_call_operand.vmem [shape: f32[9,16,4], index: 3, kind: input, shape index: {}]   ;;  %s34086_s1 = inlined_call_operand.vmem [shape: f32[9,1,512], index: 1, kind: input, shape index: {}]   ;;  %s34087_s4 = inlined_call_operand.vmem [shape: f32[16,1], index: 4, kind: input, shape index: {}]   ;;  %s34088_s5 = inlined_call_operand.vmem [shape: f32[9,32,16], index: 5, kind: input, shape index: {}]   ;;  %s34089_s2 = inlined_call_operand.vmem [shape: f32[9,1,512], index: 2, kind: input, shape index: {}]   ;;  %s34090_s6 = inlined_call_operand.vmem [shape: f32[32,1], index: 6, kind: input, shape index: {}]   ;;  %s34091_s9 = inlined_call_operand.vmem [shape: f32[16,1], index: 9, kind: input, shape index: {}]   ;;  %s34092_s7 = inlined_call_operand.vmem [shape: f32[512,2], index: 7, kind: input, shape index: {}]   ;;  %s34093_s8 = inlined_call_operand.vmem [shape: f32[16,32], index: 8, kind: input, shape index: {}]   ;;  %s34094_s10 = inlined_call_operand.vmem [shape: f32[16,2], index: 10, kind: output, shape index: {}]  }
   0x1   :  { %v27828_v0 = vld [vmem:[%s34084_s0 + $0x8] sm:$0xff]  ;;  %v27833_v1 = vld [vmem:[%s34084_s0] sm:$0xff]  ;;  %215 = vmatprep.mubr.f32.mxu0 %v34099_v2  ;;  %729 = vmatprep.mubr.f32.mxu1 %v34099_v2  ;;  %s27755_s19 = smov 15   ;;  %s27756_s20 = smov 1   ;;  %v24887_v5 = vld [vmem:[%s34085_s3 + $0x10] sm:$0xff]  ;;  %vm10070_vm10 = vcmask 130048  }
   0x2   :  { %90 = vrot.lane.b32.xlu1 %v27828_v0, %s27753_s17  ;;  %86 = vrot.lane.b32.xlu0 %v27833_v1, %s27753_s17  ;;  %v27841_v3 = vcombine.high %v27828_v0, %v27828_v0  ;;  %v27845_v4 = vcombine.high %v27833_v1, %v27833_v1  ;;  %v131_v6 = vsel %vm129_vm0, %v24887_v5, 0  ;;  %v24888_v7 = vld [vmem:[%s34085_s3 + $0x18] sm:$0xff]  ;;  %s27757_s25 = smov 127   ;;  %v61_v11 = vshrl.u32 %v51_v8, 7  ;;  %v24886_v19 = vld [vmem:[%s34086_s1 + $0x4] sm:$0xf] }
   0x3   :  { %v27868_v9 = vand.u32 4294901760, %v131_v6  ;;  %v134_v10 = vsel %vm129_vm0, %v24888_v7, 0  ;;  %v27880_v14 = vand.u32 127, %v51_v8  ;;  %s27758_s14 = smov 113   ;;  %s27759_s21 = smov 112  }
   0x4   :  { %v27878_v13 = vand.u32 4294901760, %v134_v10  ;;  %v27886_v15 = vsub.s32 0, %v61_v11  ;;  %v27888_v16 = vsub.s32 3, %v61_v11  ;;  %v27890_v17 = vsub.s32 1, %v61_v11  ;;  %s27760_s29 = smov 111   ;;  %s27765_s26 = smov 2  }
   0x5   :  { %v27876_v12 = vsub.f32 %v131_v6, %v27868_v9  ;;  %34441 = vst [vmem:[#allocation2_spill] sm:$0xff] %v27880_v14  ;;  %v27892_v18 = vsub.s32 2, %v61_v11  ;;  %vm94_vm1 = vcmp.lt.s32.totalorder %v27880_v14, 16  ;;  %v58_v11 = vld [vmem:[%s34086_s1] sm:$0xf]  ;;  %vm53_vm3 = vcmp.lt.s32.totalorder %v27880_v14, 17 }
   0x6   :  { %92 = vrot.lane.b32.xlu1 %v27841_v3, %s27753_s17  ;;  %88 = vrot.lane.b32.xlu0 %v27845_v4, %s27753_s17  ;;  %34442 = vst [vmem:[#allocation3_spill] sm:$0xff] %v27886_v15  ;;  %34443 = vst [vmem:[#allocation4_spill] sm:$0xff] %v27888_v16  ;;  %v27901_v21 = vsub.f32 %v134_v10, %v27878_v13  ;;  %v105_v24 = vrot.slane %v24886_v19, %v27886_v15  ;;  %vm2231_vm4 = vcmp.lt.s32.totalorder %v27880_v14, 15  ;;  %s27766_s27 = smov 126   ;;  %s27767_s28 = smov 98  }
   0x7   :  { %34444 = vst [vmem:[#allocation5_spill] sm:$0xff] %v27890_v17  ;;  %34445 = vst [vmem:[#allocation6_spill] sm:$0xff] %v27892_v18  ;;  %v27898_v20 = vand.u32 4294901760, %v27876_v12  ;;  %v117_v25 = vrot.slane %v24886_v19, %v27888_v16  ;;  %v109_v26 = vrot.slane %v24886_v19, %v27890_v17  ;;  %v113_v27 = vrot.slane %v24886_v19, %v27892_v18  ;;  %s27769_s30 = smov 94  }
   0x8   :  { %v27911_v29 = vand.u32 4294901760, %v27901_v21  ;;  %vm3328_vm5 = vcmp.lt.s32.totalorder %v27880_v14, 1  ;;  %vm5478_vm6 = vcmp.lt.s32.totalorder %v27880_v14, 127  ;;  %vm6575_vm7 = vcmp.lt.s32.totalorder %v27880_v14, 113 }
   0x9   :  { %v219_v28 = vsub.f32 %v27876_v12, %v27898_v20  ;;  %vm7672_vm8 = vcmp.lt.s32.totalorder %v27880_v14, 112  ;;  %vm8769_vm9 = vcmp.lt.s32.totalorder %v27880_v14, 111  ;;  %vm10025_vm11 = vcmp.lt.s32.totalorder %v27880_v14, 32 }
   0xa   :  { %45 = vrot.lane.b32.xlu1 %v27845_v4, %s27754_s18  ;;  %43 = vrot.lane.b32.xlu0 %v27833_v1, %s27754_s18  ;;  %v230_v41 = vsub.f32 %v27901_v21, %v27911_v29  ;;  %vm9966_vm12 = vcmp.lt.s32.totalorder %v27880_v14, 34  ;;  %vm12663_vm13 = vcmp.lt.s32.totalorder %v27880_v14, 30  ;;  %vm14028_vm14 = vcmp.lt.s32.totalorder %v27880_v14, 2 }
   0xb   :  { %v220_v40 = vand.u32 4294901760, %v219_v28  ;;  %vm18067_vm15 = vcmp.lt.s32.totalorder %v27880_v14, 98 }
   0xc   :  { %v231_v54 = vand.u32 4294901760, %v230_v41  ;;  %v85_v41 = vld [vmem:[%s34085_s3 + $0x8] sm:$0xff] }
   0xe   :  { %49 = vrot.lane.b32.xlu1 %v27841_v3, %s27754_s18  ;;  %47 = vrot.lane.b32.xlu0 %v27828_v0, %s27754_s18 }
  0x12   :  { %2225 = vrot.lane.b32.xlu1 %v27845_v4, %s27755_s19  ;;  %2223 = vrot.lane.b32.xlu0 %v27833_v1, %s27755_s19 }
  0x16   :  { %2229 = vrot.lane.b32.xlu1 %v27841_v3, %s27755_s19  ;;  %2227 = vrot.lane.b32.xlu0 %v27828_v0, %s27755_s19 }
  0x1a   :  { %3322 = vrot.lane.b32.xlu1 %v27845_v4, %s27756_s20  ;;  %3320 = vrot.lane.b32.xlu0 %v27833_v1, %s27756_s20 }
  0x1e   :  { %3326 = vrot.lane.b32.xlu1 %v27841_v3, %s27756_s20  ;;  %3324 = vrot.lane.b32.xlu0 %v27828_v0, %s27756_s20 }
  0x22   :  { %5472 = vrot.lane.b32.xlu1 %v27845_v4, %s27757_s25  ;;  %5470 = vrot.lane.b32.xlu0 %v27833_v1, %s27757_s25 }
  0x26   :  { %5476 = vrot.lane.b32.xlu1 %v27841_v3, %s27757_s25  ;;  %5474 = vrot.lane.b32.xlu0 %v27828_v0, %s27757_s25 }
  0x2a   :  { %6569 = vrot.lane.b32.xlu1 %v27845_v4, %s27758_s14  ;;  %6567 = vrot.lane.b32.xlu0 %v27833_v1, %s27758_s14 }
  0x2e   :  { %6573 = vrot.lane.b32.xlu1 %v27841_v3, %s27758_s14  ;;  %6571 = vrot.lane.b32.xlu0 %v27828_v0, %s27758_s14 }
  0x32   :  { %7666 = vrot.lane.b32.xlu1 %v27845_v4, %s27759_s21  ;;  %7664 = vrot.lane.b32.xlu0 %v27833_v1, %s27759_s21 }
  0x36   :  { %7670 = vrot.lane.b32.xlu1 %v27841_v3, %s27759_s21  ;;  %7668 = vrot.lane.b32.xlu0 %v27828_v0, %s27759_s21 }
  0x3a   :  { %8763 = vrot.lane.b32.xlu1 %v27845_v4, %s27760_s29  ;;  %8761 = vrot.lane.b32.xlu0 %v27833_v1, %s27760_s29 }
  0x3e   :  { %8767 = vrot.lane.b32.xlu1 %v27841_v3, %s27760_s29  ;;  %8765 = vrot.lane.b32.xlu0 %v27828_v0, %s27760_s29  ;;  %s27768_s29 = smov 96  }
  0x74   :  { %v91_v22 = vpop.permute.xlu1 %90  ;;  %v87_v23 = vpop.permute.xlu0 %86 }
  0x78   :  { %v93_v30 = vpop.permute.xlu1 %92  ;;  %v89_v31 = vpop.permute.xlu0 %88 }
  0x79   :  { %v95_v32 = vsel %vm94_vm1, %v91_v22, %v93_v30  ;;  %v98_v33 = vsel %vm94_vm1, %v93_v30, %v87_v23  ;;  %v96_v34 = vsel %vm94_vm1, %v89_v31, %v91_v22  ;;  %v97_v35 = vsel %vm94_vm1, %v87_v23, %v89_v31 }
  0x7a   :  { %v122_v36 = vmul.f32 %v105_v24, %v98_v33  ;;  %v125_v37 = vmul.f32 %v117_v25, %v95_v32  ;;  %v123_v38 = vmul.f32 %v109_v26, %v97_v35  ;;  %v124_v39 = vmul.f32 %v113_v27, %v96_v34 }
  0x7b   :  { %v75_v23 = vrot.slane %v58_v11, %v27888_v16  ;;  %v67_v24 = vrot.slane %v58_v11, %v27890_v17  ;;  %v63_v30 = vrot.slane %v58_v11, %v27886_v15  ;;  %v71_v32 = vrot.slane %v58_v11, %v27892_v18 }
  0x7c   :  { %v138_v42 = vsel %vm136_vm2, %v122_v36, 0  ;;  %v147_v43 = vsel %vm136_vm2, %v125_v37, 0  ;;  %v141_v44 = vsel %vm136_vm2, %v123_v38, 0  ;;  %v144_v45 = vsel %vm136_vm2, %v124_v39, 0  ;;  %v46_v8 = vpop.permute.xlu1 %45  ;;  %v44_v10 = vpop.permute.xlu0 %43  ;;  %v84_v36 = vld [vmem:[%s34085_s3] sm:$0xff] }
  0x7d   :  { %v27919_v46 = vand.u32 4294901760, %v138_v42  ;;  %v27921_v47 = vand.u32 4294901760, %v147_v43  ;;  %v27923_v48 = vand.u32 4294901760, %v141_v44  ;;  %v27925_v49 = vand.u32 4294901760, %v144_v45 }
  0x7e   :  { %v56_v26 = vsel %vm53_vm3, %v44_v10, %v46_v8  ;;  %vm20797_vm1 = vcmp.lt.s32.totalorder %v27880_v14, 94 }
  0x7f   :  { %v27928_v50 = vsub.f32 %v138_v42, %v27919_v46  ;;  %v27931_v51 = vsub.f32 %v147_v43, %v27921_v47  ;;  %v239_v52 = vsub.f32 %v141_v44, %v27923_v48  ;;  %v27935_v53 = vsub.f32 %v144_v45, %v27925_v49  ;;  %150 = vmatprep.subr.mxu0 %v27923_v48 }
  0x80   :  { %664 = vmatprep.subr.mxu1 %v27921_v47  ;;  %152 = vmatpush1.msra.mxu0 %v27919_v46  ;;  %v50_v19 = vpop.permute.xlu1 %49  ;;  %v48_v22 = vpop.permute.xlu0 %47  ;;  %v81_v28 = vmul.f32 %v67_v24, %v56_v26 }
  0x81   :  { %666 = vmatpush1.msra.mxu1 %v27925_v49  ;;  %221 = vmatmul.mubr.f32.vlgmr.msra.gmra.mrb[0].mxu0 %v220_v40  ;;  %v240_v55 = vand.u32 4294901760, %v239_v52  ;;  %v754_v56 = vand.u32 4294901760, %v27931_v51  ;;  %v246_v57 = vand.u32 4294901760, %v27928_v50  ;;  %v760_v58 = vand.u32 4294901760, %v27935_v53 }
  0x82   :  { %735 = vmatmul.mubr.f32.vlgmr.msra.gmra.mrb[0].mxu1 %v220_v40  ;;  %226 = vmatprep.mubr.f32.mxu0 %v34099_v2  ;;  %v54_v25 = vsel %vm53_vm3, %v48_v22, %v50_v19  ;;  %v57_v31 = vsel %vm53_vm3, %v50_v19, %v44_v10  ;;  %v1187_v34 = vsel %vm136_vm2, %v81_v28, 0  ;;  %v24889_v19 = vld [vmem:[%s34086_s1 + $0x8] sm:$0xf] }
  0x83   :  { %740 = vmatprep.mubr.f32.mxu1 %v34099_v2  ;;  %v241_v59 = vsub.f32 %v239_v52, %v240_v55  ;;  %v755_v60 = vsub.f32 %v27931_v51, %v754_v56  ;;  %v247_v61 = vsub.f32 %v27928_v50, %v246_v57  ;;  %v761_v62 = vsub.f32 %v27935_v53, %v760_v58 }
  0x84   :  { %v83_v27 = vmul.f32 %v75_v23, %v54_v25  ;;  %v80_v35 = vmul.f32 %v63_v30, %v57_v31  ;;  %v28002_v39 = vand.u32 4294901760, %v1187_v34  ;;  %v2224_v11 = vpop.permute.xlu0 %2223  ;;  %v2254_v24 = vrot.slane %v24889_v19, %v27888_v16 }
  0x85   :  { %232 = vmatmul.mubr.f32.gmra.mrb[2].mxu0 %v231_v54  ;;  %v242_v63 = vand.u32 4294901760, %v241_v59  ;;  %v756_v5 = vand.u32 4294901760, %v755_v60  ;;  %v248_v6 = vand.u32 4294901760, %v247_v61  ;;  %v762_v7 = vand.u32 4294901760, %v761_v62 }
  0x86   :  { %746 = vmatmul.mubr.f32.gmra.mrb[2].mxu1 %v231_v54  ;;  %312 = vmatprep.mubr.f32.mxu0 %v34099_v2  ;;  %v1193_v33 = vsel %vm136_vm2, %v83_v27, 0  ;;  %v1184_v40 = vsel %vm136_vm2, %v80_v35, 0  ;;  %v28024_v43 = vsub.f32 %v1187_v34, %v28002_v39  ;;  %v2246_v25 = vrot.slane %v24889_v19, %v27890_v17 }
  0x87   :  { %243 = vmatprep.subr.mxu0 %v242_v63  ;;  %757 = vmatprep.subr.mxu1 %v756_v5  ;;  %v27999_v38 = vand.u32 4294901760, %v1193_v33  ;;  %v28030_v45 = vand.u32 4294901760, %v1184_v40  ;;  %v2242_v31 = vrot.slane %v24889_v19, %v27886_v15 }
  0x88   :  { %249 = vmatpush1.msra.mxu0 %v248_v6  ;;  %763 = vmatpush1.msra.mxu1 %v762_v7  ;;  %v2228_v23 = vpop.permute.xlu0 %2227 }
  0x89   :  { %826 = vmatprep.mubr.f32.mxu1 %v34099_v2  ;;  %314 = vmatmul.mubr.f32.vlgmr.msra.gmra.mrb[0].mxu0 %v27868_v9 }
  0x8a   :  { %329 = vmatprep.subr.mxu0 %v239_v52  ;;  %828 = vmatmul.mubr.f32.vlgmr.msra.gmra.mrb[0].mxu1 %v27868_v9 }
  0x8b   :  { %843 = vmatprep.subr.mxu1 %v27931_v51  ;;  %332 = vmatpush1.msra.mxu0 %v27928_v50 }
  0x8c   :  { %846 = vmatpush1.msra.mxu1 %v27935_v53  ;;  %413 = vmatprep.subr.mxu0 %v27923_v48  ;;  %v28047_v53 = vsub.f32 %v1184_v40, %v28030_v45 }
  0x8d   :  { %927 = vmatprep.subr.mxu1 %v27921_v47  ;;  %319 = vmatprep.mubr.f32.mxu0 %v34099_v2 }
  0x8e   :  { %833 = vmatprep.mubr.f32.mxu1 %v34099_v2  ;;  %321 = vmatmul.mubr.f32.gmra.mrb[2].mxu0 %v27878_v13 }
  0x8f   :  { %835 = vmatmul.mubr.f32.gmra.mrb[2].mxu1 %v27878_v13  ;;  %395 = vmatprep.mubr.f32.mxu0 %v34099_v2 }
  0x90   :  { %909 = vmatprep.mubr.f32.mxu1 %v34099_v2 }
  0x92   :  { %398 = vmatmul.mubr.f32.vlgmr.msra.gmra.mrb[0].mxu0 %v27876_v12 }
  0x93   :  { %415 = vmatpush1.msra.mxu0 %v27919_v46  ;;  %912 = vmatmul.mubr.f32.vlgmr.msra.gmra.mrb[0].mxu1 %v27876_v12  ;;  %v55_v12 = vsel %vm53_vm3, %v46_v8, %v48_v22  ;;  %vm24340_vm3 = vcmask 261120  }
  0x94   :  { %929 = vmatpush1.msra.mxu1 %v27925_v49  ;;  %500 = vmatprep.subr.mxu0 %v240_v55  ;;  %v82_v37 = vmul.f32 %v71_v32, %v55_v12  ;;  %v2250_v12 = vrot.slane %v24889_v19, %v27892_v18  ;;  %v3321_v19 = vpop.permute.xlu0 %3320 }
  0x95   :  { %1014 = vmatprep.subr.mxu1 %v754_v56  ;;  %403 = vmatprep.mubr.f32.mxu0 %v34099_v2 }
  0x96   :  { %917 = vmatprep.mubr.f32.mxu1 %v34099_v2  ;;  %406 = vmatmul.mubr.f32.gmra.mrb[2].mxu0 %v27901_v21  ;;  %v1190_v42 = vsel %vm136_vm2, %v82_v37, 0  ;;  %v24890_v37 = vld [vmem:[%s34085_s3 + $0x20] sm:$0xff] }
  0x97   :  { %920 = vmatmul.mubr.f32.gmra.mrb[2].mxu1 %v27901_v21  ;;  %478 = vmatprep.mubr.f32.mxu0 %v34099_v2  ;;  %v1178_v21 = vsel %vm129_vm0, %v84_v36, 0 }
  0x98   :  { %992 = vmatprep.mubr.f32.mxu1 %v34099_v2  ;;  %v28026_v44 = vand.u32 4294901760, %v1178_v21 }
  0x9a   :  { %482 = vmatmul.mubr.f32.vlgmr.msra.gmra.mrb[0].mxu0 %v27898_v20  ;;  %v28042_v51 = vsub.f32 %v1178_v21, %v28026_v44 }
  0x9b   :  { %504 = vmatpush1.msra.mxu0 %v246_v57  ;;  %996 = vmatmul.mubr.f32.vlgmr.msra.gmra.mrb[0].mxu1 %v27898_v20  ;;  %v28019_v20 = vsub.f32 %v1193_v33, %v27999_v38  ;;  %v1292_v57 = vand.u32 4294901760, %v28047_v53 }
  0x9c   :  { %1018 = vmatpush1.msra.mxu1 %v760_v58  ;;  %583 = vmatprep.subr.mxu0 %v27923_v48  ;;  %v28034_v48 = vand.u32 4294901760, %v1190_v42 }
  0x9d   :  { %1097 = vmatprep.subr.mxu1 %v27921_v47  ;;  %487 = vmatprep.mubr.f32.mxu0 %v34099_v2  ;;  %v1181_v47 = vsel %vm129_vm0, %v85_v41, 0  ;;  %v1800_v50 = vand.u32 4294901760, %v28019_v20  ;;  %v1293_v63 = vsub.f32 %v28047_v53, %v1292_v57 }
  0x9e   :  { %1001 = vmatprep.mubr.f32.mxu1 %v34099_v2  ;;  %491 = vmatmul.mubr.f32.gmra.mrb[2].mxu0 %v27911_v29  ;;  %v28044_v52 = vand.u32 4294901760, %v1181_v47  ;;  %v28053_v54 = vsub.f32 %v1190_v42, %v28034_v48  ;;  %v2267_v42 = vsel %vm129_vm0, %v24890_v37, 0 }
  0x9f   :  { %1005 = vmatmul.mubr.f32.gmra.mrb[2].mxu1 %v27911_v29  ;;  %567 = vmatprep.mubr.f32.mxu0 %v34099_v2  ;;  %v1286_v29 = vand.u32 4294901760, %v28024_v43  ;;  %v1801_v55 = vsub.f32 %v28019_v20, %v1800_v50  ;;  %v1294_v7 = vand.u32 4294901760, %v1293_v63 }
  0xa0   :  { %1081 = vmatprep.mubr.f32.mxu1 %v34099_v2  ;;  %v28070_v56 = vsub.f32 %v1181_v47, %v28044_v52  ;;  %v1806_v58 = vand.u32 4294901760, %v28053_v54 }
  0xa1   :  { %v1802_v59 = vand.u32 4294901760, %v1801_v55 }
  0xa2   :  { %569 = vmatmul.mubr.f32.vlgmr.msra.gmra.mrb[0].mxu0 %v27868_v9  ;;  %v28083_v62 = vand.u32 4294901760, %v28070_v56  ;;  %v1807_v5 = vsub.f32 %v28053_v54, %v1806_v58 }
  0xa3   :  { %585 = vmatpush1.msra.mxu0 %v27919_v46  ;;  %1083 = vmatmul.mubr.f32.vlgmr.msra.gmra.mrb[0].mxu1 %v27868_v9  ;;  %v1287_v46 = vsub.f32 %v28024_v43, %v1286_v29 }
  0xa4   :  { %1099 = vmatpush1.msra.mxu1 %v27925_v49  ;;  %574 = vmatprep.mubr.f32.mxu0 %v34099_v2  ;;  %v28067_v49 = vand.u32 4294901760, %v28042_v51  ;;  %v1276_v6 = vsub.f32 %v28070_v56, %v28083_v62  ;;  %v1808_v8 = vand.u32 4294901760, %v1807_v5 }
  0xa5   :  { %1088 = vmatprep.mubr.f32.mxu1 %v34099_v2  ;;  %1710 = vmatprep.subr.mxu1 %v27999_v38  ;;  %v1288_v60 = vand.u32 4294901760, %v1287_v46 }
  0xa6   :  { %576 = vmatmul.mubr.f32.gmra.mrb[2].mxu0 %v27878_v13  ;;  %1196 = vmatprep.subr.mxu0 %v28002_v39  ;;  %v1265_v61 = vsub.f32 %v28042_v51, %v28067_v49  ;;  %v1277_v10 = vand.u32 4294901760, %v1276_v6 }
  0xa7   :  { %1090 = vmatmul.mubr.f32.gmra.mrb[2].mxu1 %v27878_v13  ;;  %648 = vmatprep.mubr.f32.mxu0 %v34099_v2 }
  0xa8   :  { %1162 = vmatprep.mubr.f32.mxu1 %v34099_v2 }
  0xaa   :  { %650 = vmatmul.mubr.f32.vlgmr.msra.gmra.mrb[0].mxu0 %v27868_v9 }
  0xab   :  { %1164 = vmatmul.mubr.f32.vlgmr.msra.gmra.mrb[0].mxu1 %v27868_v9  ;;  %655 = vmatprep.mubr.f32.mxu0 %v34099_v2  ;;  %v1266_v9 = vand.u32 4294901760, %v1265_v61 }
  0xac   :  { %1169 = vmatprep.mubr.f32.mxu1 %v34099_v2  ;;  %1712 = vmatpush1.msra.mxu1 %v28034_v48 }
  0xad   :  { %1198 = vmatpush1.msra.mxu0 %v28030_v45  ;;  %1803 = vmatprep.subr.mxu1 %v1802_v59 }
  0xae   :  { %657 = vmatmul.mubr.f32.gmra.mrb[2].mxu0 %v27878_v13  ;;  %1289 = vmatprep.subr.mxu0 %v1288_v60 }
  0xaf   :  { %1171 = vmatmul.mubr.f32.gmra.mrb[2].mxu1 %v27878_v13  ;;  %1261 = vmatprep.mubr.f32.mxu0 %v34099_v2  ;;  %v2226_v13 = vpop.permute.xlu1 %2225 }
  0xb0   :  { %1775 = vmatprep.mubr.f32.mxu1 %v34099_v2  ;;  %v2234_v27 = vsel %vm2231_vm4, %v2224_v11, %v2226_v13  ;;  %v2233_v33 = vsel %vm2231_vm4, %v2226_v13, %v2228_v23 }
  0xb1   :  { %v2260_v30 = vmul.f32 %v2246_v25, %v2234_v27  ;;  %v2261_v21 = vmul.f32 %v2250_v12, %v2233_v33 }
  0xb2   :  { %1267 = vmatmul.mubr.f32.vlgmr.msra.gmra.mrb[0].mxu0 %v1266_v9 }
  0xb3   :  { %1295 = vmatpush1.msra.mxu0 %v1294_v7  ;;  %1781 = vmatmul.mubr.f32.vlgmr.msra.gmra.mrb[0].mxu1 %v1266_v9  ;;  %v2230_v22 = vpop.permute.xlu1 %2229  ;;  %v2276_v35 = vsel %vm136_vm2, %v2260_v30, 0  ;;  %v2279_v47 = vsel %vm136_vm2, %v2261_v21, 0  ;;  %v24893_v21 = vld [vmem:[%s34085_s3 + $0x30] sm:$0xff] }
  0xb4   :  { %1809 = vmatpush1.msra.mxu1 %v1808_v8  ;;  %1375 = vmatprep.subr.mxu0 %v28024_v43  ;;  %v2232_v26 = vsel %vm2231_vm4, %v2228_v23, %v2230_v22  ;;  %v2235_v32 = vsel %vm2231_vm4, %v2230_v22, %v2224_v11  ;;  %v28158_v41 = vand.u32 4294901760, %v2276_v35  ;;  %v24891_v43 = vld [vmem:[%s34085_s3 + $0x28] sm:$0xff]  ;;  %vm24879_vm4 = vcmask 15360  }
  0xb5   :  { %1889 = vmatprep.subr.mxu1 %v28019_v20  ;;  %1272 = vmatprep.mubr.f32.mxu0 %v34099_v2  ;;  %v2262_v28 = vmul.f32 %v2254_v24, %v2232_v26  ;;  %v2259_v36 = vmul.f32 %v2242_v31, %v2235_v32  ;;  %v24892_v22 = vld [vmem:[%s34086_s1 + $0xc] sm:$0xf]  ;;  %v3325_v24 = vpop.permute.xlu0 %3324 }
  0xb6   :  { %1786 = vmatprep.mubr.f32.mxu1 %v34099_v2  ;;  %1278 = vmatmul.mubr.f32.gmra.mrb[2].mxu0 %v1277_v10  ;;  %v3351_v25 = vrot.slane %v24892_v22, %v27888_v16  ;;  %v3343_v26 = vrot.slane %v24892_v22, %v27890_v17  ;;  %v3339_v32 = vrot.slane %v24892_v22, %v27886_v15 }
  0xb7   :  { %1792 = vmatmul.mubr.f32.gmra.mrb[2].mxu1 %v1277_v10  ;;  %1358 = vmatprep.mubr.f32.mxu0 %v34099_v2  ;;  %v2282_v34 = vsel %vm136_vm2, %v2262_v28, 0  ;;  %v2273_v20 = vsel %vm136_vm2, %v2259_v36, 0  ;;  %v3347_v33 = vrot.slane %v24892_v22, %v27892_v18 }
  0xb8   :  { %1872 = vmatprep.mubr.f32.mxu1 %v34099_v2  ;;  %v28155_v40 = vand.u32 4294901760, %v2282_v34 }
  0xba   :  { %1360 = vmatmul.mubr.f32.vlgmr.msra.gmra.mrb[0].mxu0 %v28026_v44 }
  0xbb   :  { %1378 = vmatpush1.msra.mxu0 %v28047_v53  ;;  %1874 = vmatmul.mubr.f32.vlgmr.msra.gmra.mrb[0].mxu1 %v28026_v44  ;;  %v28190_v53 = vand.u32 4294901760, %v2279_v47 }
  0xbc   :  { %1892 = vmatpush1.msra.mxu1 %v28053_v54  ;;  %1459 = vmatprep.subr.mxu0 %v28002_v39 }
  0xbd   :  { %1973 = vmatprep.subr.mxu1 %v27999_v38  ;;  %1365 = vmatprep.mubr.f32.mxu0 %v34099_v2 }
  0xbe   :  { %1879 = vmatprep.mubr.f32.mxu1 %v34099_v2  ;;  %1367 = vmatmul.mubr.f32.gmra.mrb[2].mxu0 %v28044_v52 }
  0xbf   :  { %1881 = vmatmul.mubr.f32.gmra.mrb[2].mxu1 %v28044_v52  ;;  %1441 = vmatprep.mubr.f32.mxu0 %v34099_v2 }
  0xc0   :  { %1955 = vmatprep.mubr.f32.mxu1 %v34099_v2 }
  0xc2   :  { %1444 = vmatmul.mubr.f32.vlgmr.msra.gmra.mrb[0].mxu0 %v28042_v51 }
  0xc3   :  { %1461 = vmatpush1.msra.mxu0 %v28030_v45  ;;  %1958 = vmatmul.mubr.f32.vlgmr.msra.gmra.mrb[0].mxu1 %v28042_v51  ;;  %v2270_v51 = vsel %vm129_vm0, %v24891_v43, 0 }
  0xc4   :  { %1975 = vmatpush1.msra.mxu1 %v28034_v48  ;;  %1546 = vmatprep.subr.mxu0 %v1286_v29  ;;  %v28182_v29 = vand.u32 4294901760, %v2267_v42 }
  0xc5   :  { %2060 = vmatprep.subr.mxu1 %v1800_v50  ;;  %1449 = vmatprep.mubr.f32.mxu0 %v34099_v2  ;;  %v28175_v50 = vsub.f32 %v2282_v34, %v28155_v40 }
  0xc6   :  { %1963 = vmatprep.mubr.f32.mxu1 %v34099_v2  ;;  %1452 = vmatmul.mubr.f32.gmra.mrb[2].mxu0 %v28070_v56  ;;  %v28200_v46 = vsub.f32 %v2267_v42, %v28182_v29 }
  0xc7   :  { %1966 = vmatmul.mubr.f32.gmra.mrb[2].mxu1 %v28070_v56  ;;  %1524 = vmatprep.mubr.f32.mxu0 %v34099_v2  ;;  %v2889_v54 = vand.u32 4294901760, %v28175_v50 }
  0xc8   :  { %2038 = vmatprep.mubr.f32.mxu1 %v34099_v2 }
  0xca   :  { %1528 = vmatmul.mubr.f32.vlgmr.msra.gmra.mrb[0].mxu0 %v28067_v49 }
  0xcb   :  { %1550 = vmatpush1.msra.mxu0 %v1292_v57  ;;  %2042 = vmatmul.mubr.f32.vlgmr.msra.gmra.mrb[0].mxu1 %v28067_v49  ;;  %v28202_v49 = vand.u32 4294901760, %v2270_v51  ;;  %v28211_v57 = vsub.f32 %v2279_v47, %v28190_v53  ;;  %v3364_v47 = vsel %vm129_vm0, %v24893_v21, 0 }
  0xcc   :  { %2064 = vmatpush1.msra.mxu1 %v1806_v58  ;;  %1629 = vmatprep.subr.mxu0 %v28002_v39  ;;  %v28180_v39 = vsub.f32 %v2276_v35, %v28158_v41  ;;  %v2890_v58 = vsub.f32 %v28175_v50, %v2889_v54 }
  0xcd   :  { %2143 = vmatprep.subr.mxu1 %v27999_v38  ;;  %1533 = vmatprep.mubr.f32.mxu0 %v34099_v2  ;;  %v28186_v38 = vand.u32 4294901760, %v2273_v20  ;;  %v28228_v59 = vsub.f32 %v2270_v51, %v28202_v49  ;;  %v2895_v61 = vand.u32 4294901760, %v28211_v57 }
  0xce   :  { %2047 = vmatprep.mubr.f32.mxu1 %v34099_v2  ;;  %1537 = vmatmul.mubr.f32.gmra.mrb[2].mxu0 %v28083_v62  ;;  %v2375_v55 = vand.u32 4294901760, %v28180_v39 }
  0xcf   :  { %2051 = vmatmul.mubr.f32.gmra.mrb[2].mxu1 %v28083_v62  ;;  %1613 = vmatprep.mubr.f32.mxu0 %v34099_v2  ;;  %v28205_v56 = vsub.f32 %v2273_v20, %v28186_v38  ;;  %v2891_v62 = vand.u32 4294901760, %v2890_v58  ;;  %v28243_v9 = vand.u32 4294901760, %v28228_v59  ;;  %v2896_v7 = vsub.f32 %v28211_v57, %v2895_v61 }
  0xd0   :  { %2127 = vmatprep.mubr.f32.mxu1 %v34099_v2 }
  0xd1   :  { %v2381_v60 = vand.u32 4294901760, %v28205_v56  ;;  %v2365_v8 = vsub.f32 %v28228_v59, %v28243_v9  ;;  %v2897_v13 = vand.u32 4294901760, %v2896_v7 }
  0xd2   :  { %1615 = vmatmul.mubr.f32.vlgmr.msra.gmra.mrb[0].mxu0 %v28026_v44 }
  0xd3   :  { %1631 = vmatpush1.msra.mxu0 %v28030_v45  ;;  %2129 = vmatmul.mubr.f32.vlgmr.msra.gmra.mrb[0].mxu1 %v28026_v44  ;;  %v2376_v45 = vsub.f32 %v28180_v39, %v2375_v55  ;;  %v2382_v6 = vsub.f32 %v28205_v56, %v2381_v60  ;;  %v2366_v11 = vand.u32 4294901760, %v2365_v8 }
  0xd4   :  { %2145 = vmatpush1.msra.mxu1 %v28034_v48  ;;  %1620 = vmatprep.mubr.f32.mxu0 %v34099_v2  ;;  %v28225_v48 = vand.u32 4294901760, %v28200_v46 }
  0xd5   :  { %2134 = vmatprep.mubr.f32.mxu1 %v34099_v2  ;;  %2799 = vmatprep.subr.mxu1 %v28155_v40  ;;  %v2377_v63 = vand.u32 4294901760, %v2376_v45  ;;  %v2383_v10 = vand.u32 4294901760, %v2382_v6 }
  0xd6   :  { %1622 = vmatmul.mubr.f32.gmra.mrb[2].mxu0 %v28044_v52  ;;  %2285 = vmatprep.subr.mxu0 %v28158_v41  ;;  %v2354_v5 = vsub.f32 %v28200_v46, %v28225_v48 }
  0xd7   :  { %2136 = vmatmul.mubr.f32.gmra.mrb[2].mxu1 %v28044_v52  ;;  %1694 = vmatprep.mubr.f32.mxu0 %v34099_v2 }
  0xd8   :  { %2208 = vmatprep.mubr.f32.mxu1 %v34099_v2 }
  0xda   :  { %1696 = vmatmul.mubr.f32.vlgmr.msra.gmra.mrb[0].mxu0 %v28026_v44 }
  0xdb   :  { %2210 = vmatmul.mubr.f32.vlgmr.msra.gmra.mrb[0].mxu1 %v28026_v44  ;;  %1701 = vmatprep.mubr.f32.mxu0 %v34099_v2  ;;  %v2355_v44 = vand.u32 4294901760, %v2354_v5 }
  0xdc   :  { %2215 = vmatprep.mubr.f32.mxu1 %v34099_v2  ;;  %2801 = vmatpush1.msra.mxu1 %v28190_v53 }
  0xdd   :  { %2287 = vmatpush1.msra.mxu0 %v28186_v38  ;;  %2892 = vmatprep.subr.mxu1 %v2891_v62 }
  0xde   :  { %1703 = vmatmul.mubr.f32.gmra.mrb[2].mxu0 %v28044_v52  ;;  %2378 = vmatprep.subr.mxu0 %v2377_v63 }
  0xdf   :  { %2217 = vmatmul.mubr.f32.gmra.mrb[2].mxu1 %v28044_v52  ;;  %2350 = vmatprep.mubr.f32.mxu0 %v34099_v2  ;;  %v3323_v52 = vpop.permute.xlu1 %3322 }
  0xe0   :  { %2864 = vmatprep.mubr.f32.mxu1 %v34099_v2  ;;  %v3331_v28 = vsel %vm3328_vm5, %v3321_v19, %v3323_v52  ;;  %v3330_v34 = vsel %vm3328_vm5, %v3323_v52, %v3325_v24  ;;  %v4432_v52 = vsel %vm136_vm2, %v27841_v3, 0  ;;  %v24896_v3 = vld [vmem:[%s34085_s3 + $0x48] sm:$0xff] }
  0xe1   :  { %v3357_v31 = vmul.f32 %v3343_v26, %v3331_v28  ;;  %v3358_v42 = vmul.f32 %v3347_v33, %v3330_v34 }
  0xe2   :  { %2356 = vmatmul.mubr.f32.vlgmr.msra.gmra.mrb[0].mxu0 %v2355_v44 }
  0xe3   :  { %2384 = vmatpush1.msra.mxu0 %v2383_v10  ;;  %2870 = vmatmul.mubr.f32.vlgmr.msra.gmra.mrb[0].mxu1 %v2355_v44  ;;  %v3327_v23 = vpop.permute.xlu1 %3326  ;;  %v3373_v36 = vsel %vm136_vm2, %v3357_v31, 0  ;;  %v3376_v51 = vsel %vm136_vm2, %v3358_v42, 0 }
  0xe4   :  { %2898 = vmatpush1.msra.mxu1 %v2897_v13  ;;  %2464 = vmatprep.subr.mxu0 %v28180_v39  ;;  %v3329_v27 = vsel %vm3328_vm5, %v3325_v24, %v3327_v23  ;;  %v3332_v12 = vsel %vm3328_vm5, %v3327_v23, %v3321_v19  ;;  %v28318_v43 = vand.u32 4294901760, %v3373_v36  ;;  %v24894_v39 = vld [vmem:[%s34085_s3 + $0x38] sm:$0xff]  ;;  %v24895_v19 = vld [vmem:[%s34085_s3 + $0x40] sm:$0xff]  ;;  %v28460_v23 = vand.u32 4294901760, %v4432_v52 }
  0xe5   :  { %2978 = vmatprep.subr.mxu1 %v28175_v50  ;;  %2361 = vmatprep.mubr.f32.mxu0 %v34099_v2  ;;  %v3359_v30 = vmul.f32 %v3351_v25, %v3329_v27  ;;  %v3356_v37 = vmul.f32 %v3339_v32, %v3332_v12  ;;  %v27750_v24 = vld [vmem:[%s34084_s0] sm:$0xff]  ;;  %v27751_v27 = vld [vmem:[%s34084_s0 + $0x8] sm:$0xff]  ;;  %v4424_v32 = vsel %vm129_vm0, %v24896_v3, 0 }
  0xe6   :  { %2875 = vmatprep.mubr.f32.mxu1 %v34099_v2  ;;  %2367 = vmatmul.mubr.f32.gmra.mrb[2].mxu0 %v2366_v11  ;;  %v4426_v25 = vsel %vm136_vm2, %v27750_v24, 0  ;;  %v4430_v28 = vsel %vm136_vm2, %v27751_v27, 0  ;;  %v28490_v31 = vsub.f32 %v4432_v52, %v28460_v23  ;;  %v24899_v24 = vld [vmem:[%s34085_s3 + $0x58] sm:$0xff] }
  0xe7   :  { %2881 = vmatmul.mubr.f32.gmra.mrb[2].mxu1 %v2366_v11  ;;  %2447 = vmatprep.mubr.f32.mxu0 %v34099_v2  ;;  %v3379_v35 = vsel %vm136_vm2, %v3359_v30, 0  ;;  %v3370_v50 = vsel %vm136_vm2, %v3356_v37, 0  ;;  %v28496_v12 = vand.u32 4294901760, %v4426_v25  ;;  %v28498_v33 = vand.u32 4294901760, %v4430_v28 }
  0xe8   :  { %2961 = vmatprep.mubr.f32.mxu1 %v34099_v2  ;;  %v28315_v20 = vand.u32 4294901760, %v3379_v35  ;;  %v5039_v37 = vand.u32 4294901760, %v28490_v31 }
  0xe9   :  { %v28513_v21 = vsub.f32 %v4426_v25, %v28496_v12  ;;  %v28518_v42 = vsub.f32 %v4430_v28, %v28498_v33 }
  0xea   :  { %2449 = vmatmul.mubr.f32.vlgmr.msra.gmra.mrb[0].mxu0 %v28182_v29 }
  0xeb   :  { %2467 = vmatpush1.msra.mxu0 %v28205_v56  ;;  %2963 = vmatmul.mubr.f32.vlgmr.msra.gmra.mrb[0].mxu1 %v28182_v29  ;;  %v28350_v56 = vand.u32 4294901760, %v3376_v51 }
  0xec   :  { %2981 = vmatpush1.msra.mxu1 %v28211_v57  ;;  %2548 = vmatprep.subr.mxu0 %v28158_v41 }
  0xed   :  { %3062 = vmatprep.subr.mxu1 %v28155_v40  ;;  %2454 = vmatprep.mubr.f32.mxu0 %v34099_v2  ;;  %v28369_v1 = vsub.f32 %v3376_v51, %v28350_v56 }
  0xee   :  { %2968 = vmatprep.mubr.f32.mxu1 %v34099_v2  ;;  %2456 = vmatmul.mubr.f32.gmra.mrb[2].mxu0 %v28202_v49 }
  0xef   :  { %2970 = vmatmul.mubr.f32.gmra.mrb[2].mxu1 %v28202_v49  ;;  %2530 = vmatprep.mubr.f32.mxu0 %v34099_v2  ;;  %v3992_v63 = vand.u32 4294901760, %v28369_v1 }
  0xf0   :  { %3044 = vmatprep.mubr.f32.mxu1 %v34099_v2 }
  0xf1   :  { %v3993_v0 = vsub.f32 %v28369_v1, %v3992_v63 }
  0xf2   :  { %2533 = vmatmul.mubr.f32.vlgmr.msra.gmra.mrb[0].mxu0 %v28200_v46 }
  0xf3   :  { %2550 = vmatpush1.msra.mxu0 %v28186_v38  ;;  %3047 = vmatmul.mubr.f32.vlgmr.msra.gmra.mrb[0].mxu1 %v28200_v46  ;;  %v3367_v46 = vsel %vm129_vm0, %v24894_v39, 0  ;;  %v3994_v13 = vand.u32 4294901760, %v3993_v0  ;;  %v4531_v39 = vand.u32 4294901760, %v28513_v21 }
  0xf4   :  { %3064 = vmatpush1.msra.mxu1 %v28190_v53  ;;  %2635 = vmatprep.subr.mxu0 %v2375_v55  ;;  %v28342_v55 = vand.u32 4294901760, %v3364_v47 }
  0xf5   :  { %3149 = vmatprep.subr.mxu1 %v2889_v54  ;;  %2538 = vmatprep.mubr.f32.mxu0 %v34099_v2  ;;  %v28335_v54 = vsub.f32 %v3379_v35, %v28315_v20 }
  0xf6   :  { %3052 = vmatprep.mubr.f32.mxu1 %v34099_v2  ;;  %2541 = vmatmul.mubr.f32.gmra.mrb[2].mxu0 %v28228_v59  ;;  %v28358_v45 = vsub.f32 %v3364_v47, %v28342_v55 }
  0xf7   :  { %3055 = vmatmul.mubr.f32.gmra.mrb[2].mxu1 %v28228_v59  ;;  %2613 = vmatprep.mubr.f32.mxu0 %v34099_v2  ;;  %v3986_v57 = vand.u32 4294901760, %v28335_v54 }
  0xf8   :  { %3127 = vmatprep.mubr.f32.mxu1 %v34099_v2 }
  0xfa   :  { %2617 = vmatmul.mubr.f32.vlgmr.msra.gmra.mrb[0].mxu0 %v28225_v48 }
  0xfb   :  { %2639 = vmatpush1.msra.mxu0 %v2381_v60  ;;  %3131 = vmatmul.mubr.f32.vlgmr.msra.gmra.mrb[0].mxu1 %v28225_v48  ;;  %v28360_v48 = vand.u32 4294901760, %v3367_v46  ;;  %v3987_v60 = vsub.f32 %v28335_v54, %v3986_v57 }
  0xfc   :  { %3153 = vmatpush1.msra.mxu1 %v2895_v61  ;;  %2718 = vmatprep.subr.mxu0 %v28158_v41  ;;  %v28340_v41 = vsub.f32 %v3373_v36, %v28318_v43  ;;  %v28505_v36 = vand.u32 4294901760, %v4424_v32 }
  0xfd   :  { %3232 = vmatprep.subr.mxu1 %v28155_v40  ;;  %2622 = vmatprep.mubr.f32.mxu0 %v34099_v2  ;;  %v28346_v40 = vand.u32 4294901760, %v3370_v50  ;;  %v28386_v61 = vsub.f32 %v3367_v46, %v28360_v48  ;;  %v3988_v5 = vand.u32 4294901760, %v3987_v60  ;;  %v5473_v60 = vpop.permute.xlu1 %5472 }
  0xfe   :  { %3136 = vmatprep.mubr.f32.mxu1 %v34099_v2  ;;  %2626 = vmatmul.mubr.f32.gmra.mrb[2].mxu0 %v28243_v9  ;;  %v3472_v58 = vand.u32 4294901760, %v28340_v41  ;;  %v28529_v47 = vsub.f32 %v4424_v32, %v28505_v36  ;;  %v5517_v32 = vsel %vm129_vm0, %v24899_v24, 0 }
  0xff   :  { %3140 = vmatmul.mubr.f32.gmra.mrb[2].mxu1 %v28243_v9  ;;  %2702 = vmatprep.mubr.f32.mxu0 %v34099_v2  ;;  %v28363_v59 = vsub.f32 %v3370_v50, %v28346_v40  ;;  %v28399_v7 = vand.u32 4294901760, %v28386_v61  ;;  %v5040_v50 = vsub.f32 %v28490_v31, %v5039_v37 }
 0x100   :  { %3216 = vmatprep.mubr.f32.mxu1 %v34099_v2 }
 0x101   :  { %v3478_v62 = vand.u32 4294901760, %v28363_v59  ;;  %v3462_v8 = vsub.f32 %v28386_v61, %v28399_v7  ;;  %v5041_v46 = vand.u32 4294901760, %v5040_v50 }
 0x102   :  { %2704 = vmatmul.mubr.f32.vlgmr.msra.gmra.mrb[0].mxu0 %v28182_v29 }
 0x103   :  { %2720 = vmatpush1.msra.mxu0 %v28186_v38  ;;  %3218 = vmatmul.mubr.f32.vlgmr.msra.gmra.mrb[0].mxu1 %v28182_v29  ;;  %v3473_v38 = vsub.f32 %v28340_v41, %v3472_v58  ;;  %v3479_v44 = vsub.f32 %v28363_v59, %v3478_v62  ;;  %v3463_v11 = vand.u32 4294901760, %v3462_v8 }
 0x104   :  { %3234 = vmatpush1.msra.mxu1 %v28190_v53  ;;  %2709 = vmatprep.mubr.f32.mxu0 %v34099_v2  ;;  %v28383_v53 = vand.u32 4294901760, %v28358_v45 }
 0x105   :  { %3223 = vmatprep.mubr.f32.mxu1 %v34099_v2  ;;  %3896 = vmatprep.subr.mxu1 %v28315_v20  ;;  %v3474_v9 = vand.u32 4294901760, %v3473_v38  ;;  %v3480_v10 = vand.u32 4294901760, %v3479_v44  ;;  %v24897_v38 = vld [vmem:[%s34086_s1 + $0x14] sm:$0xf] }
 0x106   :  { %2711 = vmatmul.mubr.f32.gmra.mrb[2].mxu0 %v28202_v49  ;;  %3382 = vmatprep.subr.mxu0 %v28318_v43  ;;  %v3451_v6 = vsub.f32 %v28358_v45, %v28383_v53  ;;  %v5497_v44 = vrot.slane %v24897_v38, %v27892_v18  ;;  %v5489_v0 = vrot.slane %v24897_v38, %v27886_v15 }
 0x107   :  { %3225 = vmatmul.mubr.f32.gmra.mrb[2].mxu1 %v28202_v49  ;;  %2783 = vmatprep.mubr.f32.mxu0 %v34099_v2 }
 0x108   :  { %3297 = vmatprep.mubr.f32.mxu1 %v34099_v2 }
 0x10a   :  { %2785 = vmatmul.mubr.f32.vlgmr.msra.gmra.mrb[0].mxu0 %v28182_v29 }
 0x10b   :  { %3299 = vmatmul.mubr.f32.vlgmr.msra.gmra.mrb[0].mxu1 %v28182_v29  ;;  %2790 = vmatprep.mubr.f32.mxu0 %v34099_v2  ;;  %v3452_v29 = vand.u32 4294901760, %v3451_v6 }
 0x10c   :  { %3304 = vmatprep.mubr.f32.mxu1 %v34099_v2  ;;  %3898 = vmatpush1.msra.mxu1 %v28350_v56 }
 0x10d   :  { %3384 = vmatpush1.msra.mxu0 %v28346_v40  ;;  %3989 = vmatprep.subr.mxu1 %v3988_v5 }
 0x10e   :  { %2792 = vmatmul.mubr.f32.gmra.mrb[2].mxu0 %v28202_v49  ;;  %3475 = vmatprep.subr.mxu0 %v3474_v9 }
 0x10f   :  { %3306 = vmatmul.mubr.f32.gmra.mrb[2].mxu1 %v28202_v49  ;;  %3447 = vmatprep.mubr.f32.mxu0 %v34099_v2  ;;  %v4428_v49 = vsel %vm136_vm2, %v27845_v4, 0  ;;  %v4421_v4 = vsel %vm129_vm0, %v24895_v19, 0 }
 0x110   :  { %3961 = vmatprep.mubr.f32.mxu1 %v34099_v2  ;;  %v28457_v22 = vand.u32 4294901760, %v4428_v49  ;;  %v28487_v30 = vand.u32 4294901760, %v4421_v4 }
 0x112   :  { %3453 = vmatmul.mubr.f32.vlgmr.msra.gmra.mrb[0].mxu0 %v3452_v29  ;;  %v28479_v26 = vsub.f32 %v4428_v49, %v28457_v22  ;;  %v28503_v35 = vsub.f32 %v4421_v4, %v28487_v30 }
 0x113   :  { %3481 = vmatpush1.msra.mxu0 %v3480_v10  ;;  %3967 = vmatmul.mubr.f32.vlgmr.msra.gmra.mrb[0].mxu1 %v3452_v29 }
 0x114   :  { %3995 = vmatpush1.msra.mxu1 %v3994_v13  ;;  %3561 = vmatprep.subr.mxu0 %v28340_v41  ;;  %v4525_v34 = vand.u32 4294901760, %v28479_v26 }
 0x115   :  { %4075 = vmatprep.subr.mxu1 %v28335_v54  ;;  %3458 = vmatprep.mubr.f32.mxu0 %v34099_v2  ;;  %v5045_v54 = vand.u32 4294901760, %v28518_v42 }
 0x116   :  { %3972 = vmatprep.mubr.f32.mxu1 %v34099_v2  ;;  %3464 = vmatmul.mubr.f32.gmra.mrb[2].mxu0 %v3463_v11 }
 0x117   :  { %3978 = vmatmul.mubr.f32.gmra.mrb[2].mxu1 %v3463_v11  ;;  %3544 = vmatprep.mubr.f32.mxu0 %v34099_v2  ;;  %v24898_v11 = vld [vmem:[%s34085_s3 + $0x50] sm:$0xff] }
 0x118   :  { %4058 = vmatprep.mubr.f32.mxu1 %v34099_v2  ;;  %v5514_v3 = vsel %vm129_vm0, %v24898_v11, 0 }
 0x11a   :  { %3546 = vmatmul.mubr.f32.vlgmr.msra.gmra.mrb[0].mxu0 %v28342_v55 }
 0x11b   :  { %3564 = vmatpush1.msra.mxu0 %v28363_v59  ;;  %4060 = vmatmul.mubr.f32.vlgmr.msra.gmra.mrb[0].mxu1 %v28342_v55 }
 0x11c   :  { %4078 = vmatpush1.msra.mxu1 %v28369_v1  ;;  %3645 = vmatprep.subr.mxu0 %v28318_v43 }
 0x11d   :  { %4159 = vmatprep.subr.mxu1 %v28315_v20  ;;  %3551 = vmatprep.mubr.f32.mxu0 %v34099_v2 }
 0x11e   :  { %4065 = vmatprep.mubr.f32.mxu1 %v34099_v2  ;;  %3553 = vmatmul.mubr.f32.gmra.mrb[2].mxu0 %v28360_v48 }
 0x11f   :  { %4067 = vmatmul.mubr.f32.gmra.mrb[2].mxu1 %v28360_v48  ;;  %3627 = vmatprep.mubr.f32.mxu0 %v34099_v2 }
 0x120   :  { %4141 = vmatprep.mubr.f32.mxu1 %v34099_v2 }
 0x122   :  { %3630 = vmatmul.mubr.f32.vlgmr.msra.gmra.mrb[0].mxu0 %v28358_v45 }
 0x123   :  { %3647 = vmatpush1.msra.mxu0 %v28346_v40  ;;  %4144 = vmatmul.mubr.f32.vlgmr.msra.gmra.mrb[0].mxu1 %v28358_v45 }
 0x124   :  { %4161 = vmatpush1.msra.mxu1 %v28350_v56  ;;  %3732 = vmatprep.subr.mxu0 %v3472_v58 }
 0x125   :  { %4246 = vmatprep.subr.mxu1 %v3986_v57  ;;  %3635 = vmatprep.mubr.f32.mxu0 %v34099_v2  ;;  %v5046_v57 = vsub.f32 %v28518_v42, %v5045_v54 }
 0x126   :  { %4149 = vmatprep.mubr.f32.mxu1 %v34099_v2  ;;  %3638 = vmatmul.mubr.f32.gmra.mrb[2].mxu0 %v28386_v61 }
 0x127   :  { %4152 = vmatmul.mubr.f32.gmra.mrb[2].mxu1 %v28386_v61  ;;  %3710 = vmatprep.mubr.f32.mxu0 %v34099_v2  ;;  %v5047_v59 = vand.u32 4294901760, %v5046_v57  ;;  %v5477_v61 = vpop.permute.xlu1 %5476 }
 0x128   :  { %4224 = vmatprep.mubr.f32.mxu1 %v34099_v2 }
 0x12a   :  { %3714 = vmatmul.mubr.f32.vlgmr.msra.gmra.mrb[0].mxu0 %v28383_v53 }
 0x12b   :  { %3736 = vmatpush1.msra.mxu0 %v3478_v62  ;;  %4228 = vmatmul.mubr.f32.vlgmr.msra.gmra.mrb[0].mxu1 %v28383_v53  ;;  %v5493_v62 = vrot.slane %v24897_v38, %v27890_v17 }
 0x12c   :  { %4250 = vmatpush1.msra.mxu1 %v3992_v63  ;;  %3815 = vmatprep.subr.mxu0 %v28318_v43  ;;  %v28526_v43 = vand.u32 4294901760, %v28503_v35  ;;  %v5501_v63 = vrot.slane %v24897_v38, %v27888_v16 }
 0x12d   :  { %4329 = vmatprep.subr.mxu1 %v28315_v20  ;;  %3719 = vmatprep.mubr.f32.mxu0 %v34099_v2  ;;  %v4526_v20 = vsub.f32 %v28479_v26, %v4525_v34 }
 0x12e   :  { %4233 = vmatprep.mubr.f32.mxu1 %v34099_v2  ;;  %3723 = vmatmul.mubr.f32.gmra.mrb[2].mxu0 %v28399_v7  ;;  %v4504_v41 = vsub.f32 %v28503_v35, %v28526_v43 }
 0x12f   :  { %4237 = vmatmul.mubr.f32.gmra.mrb[2].mxu1 %v28399_v7  ;;  %3799 = vmatprep.mubr.f32.mxu0 %v34099_v2  ;;  %v4527_v51 = vand.u32 4294901760, %v4526_v20 }
 0x130   :  { %4313 = vmatprep.mubr.f32.mxu1 %v34099_v2 }
 0x132   :  { %3801 = vmatmul.mubr.f32.vlgmr.msra.gmra.mrb[0].mxu0 %v28342_v55 }
 0x133   :  { %3817 = vmatpush1.msra.mxu0 %v28346_v40  ;;  %4315 = vmatmul.mubr.f32.vlgmr.msra.gmra.mrb[0].mxu1 %v28342_v55  ;;  %v28543_v40 = vand.u32 4294901760, %v28529_v47 }
 0x134   :  { %4331 = vmatpush1.msra.mxu1 %v28350_v56  ;;  %3806 = vmatprep.mubr.f32.mxu0 %v34099_v2  ;;  %v4532_v56 = vsub.f32 %v28513_v21, %v4531_v39 }
 0x135   :  { %4320 = vmatprep.mubr.f32.mxu1 %v34099_v2  ;;  %4435 = vmatprep.subr.mxu0 %v28457_v22  ;;  %v4515_v58 = vsub.f32 %v28529_v47, %v28543_v40 }
 0x136   :  { %3808 = vmatmul.mubr.f32.gmra.mrb[2].mxu0 %v28360_v48  ;;  %4949 = vmatprep.subr.mxu1 %v28460_v23  ;;  %v4533_v45 = vand.u32 4294901760, %v4532_v56 }
 0x137   :  { %4322 = vmatmul.mubr.f32.gmra.mrb[2].mxu1 %v28360_v48  ;;  %3880 = vmatprep.mubr.f32.mxu0 %v34099_v2  ;;  %v4516_v1 = vand.u32 4294901760, %v4515_v58 }
 0x138   :  { %4394 = vmatprep.mubr.f32.mxu1 %v34099_v2 }
 0x13a   :  { %3882 = vmatmul.mubr.f32.vlgmr.msra.gmra.mrb[0].mxu0 %v28342_v55 }
 0x13b   :  { %4396 = vmatmul.mubr.f32.vlgmr.msra.gmra.mrb[0].mxu1 %v28342_v55  ;;  %3887 = vmatprep.mubr.f32.mxu0 %v34099_v2  ;;  %v4505_v55 = vand.u32 4294901760, %v4504_v41 }
 0x13c   :  { %4401 = vmatprep.mubr.f32.mxu1 %v34099_v2  ;;  %4437 = vmatpush1.msra.mxu0 %v28496_v12 }
 0x13d   :  { %4951 = vmatpush1.msra.mxu1 %v28498_v33  ;;  %4528 = vmatprep.subr.mxu0 %v4527_v51 }
 0x13e   :  { %3889 = vmatmul.mubr.f32.gmra.mrb[2].mxu0 %v28360_v48  ;;  %5042 = vmatprep.subr.mxu1 %v5041_v46 }
 0x13f   :  { %4403 = vmatmul.mubr.f32.gmra.mrb[2].mxu1 %v28360_v48  ;;  %4500 = vmatprep.mubr.f32.mxu0 %v34099_v2  ;;  %v5471_v48 = vpop.permute.xlu0 %5470 }
 0x140   :  { %5014 = vmatprep.mubr.f32.mxu1 %v34099_v2  ;;  %v5482_v9 = vsel %vm5478_vm6, %v5477_v61, %v5471_v48  ;;  %v5481_v10 = vsel %vm5478_vm6, %v5471_v48, %v5473_v60 }
 0x141   :  { %v5509_v7 = vmul.f32 %v5501_v63, %v5482_v9  ;;  %v5506_v19 = vmul.f32 %v5489_v0, %v5481_v10 }
 0x142   :  { %4506 = vmatmul.mubr.f32.vlgmr.msra.gmra.mrb[0].mxu0 %v4505_v55 }
 0x143   :  { %5020 = vmatmul.mubr.f32.vlgmr.msra.gmra.mrb[0].mxu1 %v4505_v55  ;;  %4511 = vmatprep.mubr.f32.mxu0 %v34099_v2  ;;  %v5475_v53 = vpop.permute.xlu0 %5474  ;;  %v5529_v13 = vsel %vm136_vm2, %v5509_v7, 0  ;;  %v5520_v27 = vsel %vm136_vm2, %v5506_v19, 0 }
 0x144   :  { %5025 = vmatprep.mubr.f32.mxu1 %v34099_v2  ;;  %4534 = vmatpush1.msra.mxu0 %v4533_v45  ;;  %v5480_v5 = vsel %vm5478_vm6, %v5473_v60, %v5475_v53  ;;  %v5479_v29 = vsel %vm5478_vm6, %v5475_v53, %v5477_v61  ;;  %v28618_v4 = vand.u32 4294901760, %v5529_v13 }
 0x145   :  { %5048 = vmatpush1.msra.mxu1 %v5047_v59  ;;  %4614 = vmatprep.subr.mxu0 %v28479_v26  ;;  %v5507_v6 = vmul.f32 %v5493_v62, %v5480_v5  ;;  %v5508_v49 = vmul.f32 %v5497_v44, %v5479_v29  ;;  %v6570_v59 = vpop.permute.xlu1 %6569 }
 0x146   :  { %4517 = vmatmul.mubr.f32.gmra.mrb[2].mxu0 %v4516_v1  ;;  %5128 = vmatprep.subr.mxu1 %v28490_v31  ;;  %v28639_v28 = vsub.f32 %v5529_v13, %v28618_v4  ;;  %v28642_v31 = vand.u32 4294901760, %v5514_v3 }
 0x147   :  { %5031 = vmatmul.mubr.f32.gmra.mrb[2].mxu1 %v4516_v1  ;;  %4597 = vmatprep.mubr.f32.mxu0 %v34099_v2  ;;  %v5523_v8 = vsel %vm136_vm2, %v5507_v6, 0  ;;  %v5526_v25 = vsel %vm136_vm2, %v5508_v49, 0  ;;  %v24900_v1 = vld [vmem:[%s34086_s1 + $0x18] sm:$0xf] }
 0x148   :  { %5111 = vmatprep.mubr.f32.mxu1 %v34099_v2  ;;  %v28615_v52 = vand.u32 4294901760, %v5523_v8  ;;  %v6590_v38 = vrot.slane %v24900_v1, %v27890_v17  ;;  %v6598_v53 = vrot.slane %v24900_v1, %v27888_v16  ;;  %v6594_v9 = vrot.slane %v24900_v1, %v27892_v18 }
 0x149   :  { %v6574_v60 = vpop.permute.xlu1 %6573  ;;  %v6586_v6 = vrot.slane %v24900_v1, %v27886_v15 }
 0x14a   :  { %4599 = vmatmul.mubr.f32.vlgmr.msra.gmra.mrb[0].mxu0 %v28487_v30  ;;  %v28633_v26 = vsub.f32 %v5523_v8, %v28615_v52  ;;  %v24901_v8 = vld [vmem:[%s34085_s3 + $0x60] sm:$0xff] }
 0x14b   :  { %5113 = vmatmul.mubr.f32.vlgmr.msra.gmra.mrb[0].mxu1 %v28487_v30  ;;  %4604 = vmatprep.mubr.f32.mxu0 %v34099_v2  ;;  %v6611_v19 = vsel %vm129_vm0, %v24901_v8, 0  ;;  %v24904_v8 = vld [vmem:[%s34085_s3 + $0x70] sm:$0xff] }
 0x14c   :  { %5118 = vmatprep.mubr.f32.mxu1 %v34099_v2  ;;  %4617 = vmatpush1.msra.mxu0 %v28513_v21  ;;  %v28658_v21 = vand.u32 4294901760, %v5517_v32 }
 0x14d   :  { %5131 = vmatpush1.msra.mxu1 %v28518_v42  ;;  %4698 = vmatprep.subr.mxu0 %v28457_v22 }
 0x14e   :  { %4606 = vmatmul.mubr.f32.gmra.mrb[2].mxu0 %v28505_v36  ;;  %5212 = vmatprep.subr.mxu1 %v28460_v23  ;;  %v28684_v50 = vsub.f32 %v5517_v32, %v28658_v21 }
 0x14f   :  { %5120 = vmatmul.mubr.f32.gmra.mrb[2].mxu1 %v28505_v36  ;;  %4680 = vmatprep.mubr.f32.mxu0 %v34099_v2 }
 0x150   :  { %5194 = vmatprep.mubr.f32.mxu1 %v34099_v2 }
 0x152   :  { %4683 = vmatmul.mubr.f32.vlgmr.msra.gmra.mrb[0].mxu0 %v28503_v35 }
 0x153   :  { %5197 = vmatmul.mubr.f32.vlgmr.msra.gmra.mrb[0].mxu1 %v28503_v35  ;;  %4688 = vmatprep.mubr.f32.mxu0 %v34099_v2  ;;  %v5622_v35 = vand.u32 4294901760, %v28633_v26 }
 0x154   :  { %5202 = vmatprep.mubr.f32.mxu1 %v34099_v2  ;;  %4700 = vmatpush1.msra.mxu0 %v28496_v12 }
 0x155   :  { %5214 = vmatpush1.msra.mxu1 %v28498_v33  ;;  %4785 = vmatprep.subr.mxu0 %v4525_v34  ;;  %v28650_v34 = vand.u32 4294901760, %v5520_v27 }
 0x156   :  { %4691 = vmatmul.mubr.f32.gmra.mrb[2].mxu0 %v28529_v47  ;;  %5299 = vmatprep.subr.mxu1 %v5039_v37  ;;  %v28656_v37 = vsub.f32 %v5514_v3, %v28642_v31  ;;  %v24902_v3 = vld [vmem:[%s34085_s3 + $0x68] sm:$0xff] }
 0x157   :  { %5205 = vmatmul.mubr.f32.gmra.mrb[2].mxu1 %v28529_v47  ;;  %4763 = vmatprep.mubr.f32.mxu0 %v34099_v2  ;;  %v28668_v20 = vsub.f32 %v5520_v27, %v28650_v34  ;;  %v28794_v27 = vand.u32 4294901760, %v6611_v19 }
 0x158   :  { %5277 = vmatprep.mubr.f32.mxu1 %v34099_v2 }
 0x159   :  { %v5628_v51 = vand.u32 4294901760, %v28668_v20 }
 0x15a   :  { %4767 = vmatmul.mubr.f32.vlgmr.msra.gmra.mrb[0].mxu0 %v28526_v43 }
 0x15b   :  { %5281 = vmatmul.mubr.f32.vlgmr.msra.gmra.mrb[0].mxu1 %v28526_v43  ;;  %4772 = vmatprep.mubr.f32.mxu0 %v34099_v2  ;;  %v5623_v43 = vsub.f32 %v28633_v26, %v5622_v35  ;;  %v5629_v56 = vsub.f32 %v28668_v20, %v5628_v51 }
 0x15c   :  { %5286 = vmatprep.mubr.f32.mxu1 %v34099_v2  ;;  %4789 = vmatpush1.msra.mxu0 %v4531_v39 }
 0x15d   :  { %5303 = vmatpush1.msra.mxu1 %v5045_v54  ;;  %4868 = vmatprep.subr.mxu0 %v28457_v22  ;;  %v28648_v22 = vand.u32 4294901760, %v5526_v25  ;;  %v5624_v39 = vand.u32 4294901760, %v5623_v43  ;;  %v5630_v58 = vand.u32 4294901760, %v5629_v56 }
 0x15e   :  { %4776 = vmatmul.mubr.f32.gmra.mrb[2].mxu0 %v28543_v40  ;;  %5382 = vmatprep.subr.mxu1 %v28460_v23  ;;  %v6136_v23 = vand.u32 4294901760, %v28639_v28 }
 0x15f   :  { %5290 = vmatmul.mubr.f32.gmra.mrb[2].mxu1 %v28543_v40  ;;  %4852 = vmatprep.mubr.f32.mxu0 %v34099_v2  ;;  %v28663_v42 = vsub.f32 %v5526_v25, %v28648_v22  ;;  %v28695_v40 = vand.u32 4294901760, %v28684_v50 }
 0x160   :  { %5366 = vmatprep.mubr.f32.mxu1 %v34099_v2  ;;  %v6137_v47 = vsub.f32 %v28639_v28, %v6136_v23 }
 0x161   :  { %v5612_v57 = vsub.f32 %v28684_v50, %v28695_v40 }
 0x162   :  { %4854 = vmatmul.mubr.f32.vlgmr.msra.gmra.mrb[0].mxu0 %v28487_v30  ;;  %v6138_v54 = vand.u32 4294901760, %v6137_v47 }
 0x163   :  { %5368 = vmatmul.mubr.f32.vlgmr.msra.gmra.mrb[0].mxu1 %v28487_v30  ;;  %4859 = vmatprep.mubr.f32.mxu0 %v34099_v2  ;;  %v5613_v45 = vand.u32 4294901760, %v5612_v57 }
 0x164   :  { %5373 = vmatprep.mubr.f32.mxu1 %v34099_v2  ;;  %4870 = vmatpush1.msra.mxu0 %v28496_v12  ;;  %v28681_v12 = vand.u32 4294901760, %v28656_v37 }
 0x165   :  { %5384 = vmatpush1.msra.mxu1 %v28498_v33  ;;  %5532 = vmatprep.subr.mxu0 %v28615_v52  ;;  %v6142_v33 = vand.u32 4294901760, %v28663_v42 }
 0x166   :  { %4861 = vmatmul.mubr.f32.gmra.mrb[2].mxu0 %v28505_v36  ;;  %6046 = vmatprep.subr.mxu1 %v28618_v4  ;;  %v5601_v41 = vsub.f32 %v28656_v37, %v28681_v12 }
 0x167   :  { %5375 = vmatmul.mubr.f32.gmra.mrb[2].mxu1 %v28505_v36  ;;  %4933 = vmatprep.mubr.f32.mxu0 %v34099_v2  ;;  %v6143_v46 = vsub.f32 %v28663_v42, %v6142_v33 }
 0x168   :  { %5447 = vmatprep.mubr.f32.mxu1 %v34099_v2 }
 0x169   :  { %v6144_v55 = vand.u32 4294901760, %v6143_v46 }
 0x16a   :  { %4935 = vmatmul.mubr.f32.vlgmr.msra.gmra.mrb[0].mxu0 %v28487_v30 }
 0x16b   :  { %5449 = vmatmul.mubr.f32.vlgmr.msra.gmra.mrb[0].mxu1 %v28487_v30  ;;  %5534 = vmatpush1.msra.mxu0 %v28650_v34  ;;  %v5602_v30 = vand.u32 4294901760, %v5601_v41 }
 0x16c   :  { %4940 = vmatprep.mubr.f32.mxu0 %v34099_v2  ;;  %5454 = vmatprep.mubr.f32.mxu1 %v34099_v2 }
 0x16d   :  { %6048 = vmatpush1.msra.mxu1 %v28648_v22  ;;  %5625 = vmatprep.subr.mxu0 %v5624_v39 }
 0x16e   :  { %4942 = vmatmul.mubr.f32.gmra.mrb[2].mxu0 %v28505_v36  ;;  %6139 = vmatprep.subr.mxu1 %v6138_v54 }
 0x16f   :  { %5456 = vmatmul.mubr.f32.gmra.mrb[2].mxu1 %v28505_v36  ;;  %5597 = vmatprep.mubr.f32.mxu0 %v34099_v2  ;;  %v6568_v36 = vpop.permute.xlu0 %6567 }
 0x170   :  { %6111 = vmatprep.mubr.f32.mxu1 %v34099_v2  ;;  %v6579_v62 = vsel %vm6575_vm7, %v6574_v60, %v6568_v36  ;;  %v6578_v0 = vsel %vm6575_vm7, %v6568_v36, %v6570_v59 }
 0x171   :  { %v6606_v5 = vmul.f32 %v6598_v53, %v6579_v62  ;;  %v6603_v11 = vmul.f32 %v6586_v6, %v6578_v0  ;;  %v27761_v53 = vmov 0   ;;  %v9859_v62 = vld [vmem:[%s34087_s4 + $0x8] sm:$0xff] }
 0x172   :  { %5603 = vmatmul.mubr.f32.vlgmr.msra.gmra.mrb[0].mxu0 %v5602_v30  ;;  %27746 = vset.pattern.permute.xlu0 %v27761_v53 }
 0x173   :  { %5631 = vmatpush1.msra.mxu0 %v5630_v58  ;;  %6117 = vmatmul.mubr.f32.vlgmr.msra.gmra.mrb[0].mxu1 %v5602_v30  ;;  %v6572_v48 = vpop.permute.xlu0 %6571  ;;  %v6626_v29 = vsel %vm136_vm2, %v6606_v5, 0  ;;  %v7667_v58 = vpop.permute.xlu1 %7666 }
 0x174   :  { %6145 = vmatpush1.msra.mxu1 %v6144_v55  ;;  %5711 = vmatprep.subr.mxu0 %v28633_v26  ;;  %v6577_v61 = vsel %vm6575_vm7, %v6570_v59, %v6572_v48  ;;  %v6576_v7 = vsel %vm6575_vm7, %v6572_v48, %v6574_v60  ;;  %v28770_v49 = vand.u32 4294901760, %v6626_v29  ;;  %v6617_v26 = vsel %vm136_vm2, %v6603_v11, 0 }
 0x175   :  { %6225 = vmatprep.subr.mxu1 %v28639_v28  ;;  %5608 = vmatprep.mubr.f32.mxu0 %v34099_v2  ;;  %v6604_v63 = vmul.f32 %v6590_v38, %v6577_v61  ;;  %v6605_v10 = vmul.f32 %v6594_v9, %v6576_v7  ;;  %v28802_v32 = vand.u32 4294901760, %v6617_v26  ;;  %v9858_v61 = vld [vmem:[%s34087_s4] sm:$0xff] }
 0x176   :  { %6122 = vmatprep.mubr.f32.mxu1 %v34099_v2  ;;  %5614 = vmatmul.mubr.f32.gmra.mrb[2].mxu0 %v5613_v45 }
 0x177   :  { %6128 = vmatmul.mubr.f32.gmra.mrb[2].mxu1 %v5613_v45  ;;  %5694 = vmatprep.mubr.f32.mxu0 %v34099_v2  ;;  %v6620_v44 = vsel %vm136_vm2, %v6604_v63, 0  ;;  %v6623_v24 = vsel %vm136_vm2, %v6605_v10, 0  ;;  %v28820_v43 = vsub.f32 %v6617_v26, %v28802_v32  ;;  %v24903_v45 = vld [vmem:[%s34086_s1 + $0x1c] sm:$0xf]  ;;  %v7671_v59 = vpop.permute.xlu1 %7670 }
 0x178   :  { %6208 = vmatprep.mubr.f32.mxu1 %v34099_v2  ;;  %v28767_v13 = vand.u32 4294901760, %v6620_v44  ;;  %v28800_v28 = vand.u32 4294901760, %v6623_v24  ;;  %v7687_v1 = vrot.slane %v24903_v45, %v27890_v17  ;;  %v7695_v48 = vrot.slane %v24903_v45, %v27888_v16  ;;  %9862 = vperm.xlu0 %27746, %v9858_v61  }
 0x179   :  { %v6725_v39 = vand.u32 4294901760, %v28820_v43  ;;  %27747 = vset.pattern.permute.xlu1 %v27761_v53  ;;  %v7691_v9 = vrot.slane %v24903_v45, %v27892_v18  ;;  %v7683_v6 = vrot.slane %v24903_v45, %v27886_v15  ;;  %v24906_v45 = vld [vmem:[%s34086_s1 + $0x20] sm:$0xf] }
 0x17a   :  { %5696 = vmatmul.mubr.f32.vlgmr.msra.gmra.mrb[0].mxu0 %v28642_v31  ;;  %v28786_v25 = vsub.f32 %v6620_v44, %v28767_v13  ;;  %9867 = vperm.xlu1 %27747, %v9859_v62   ;;  %v8788_v62 = vrot.slane %v24906_v45, %v27892_v18 }
 0x17b   :  { %5714 = vmatpush1.msra.mxu0 %v28668_v20  ;;  %6210 = vmatmul.mubr.f32.vlgmr.msra.gmra.mrb[0].mxu1 %v28642_v31  ;;  %v28816_v20 = vsub.f32 %v6623_v24, %v28800_v28  ;;  %v6726_v46 = vsub.f32 %v28820_v43, %v6725_v39  ;;  %v7708_v24 = vsel %vm129_vm0, %v24904_v8, 0 }
 0x17c   :  { %6228 = vmatpush1.msra.mxu1 %v28663_v42  ;;  %5795 = vmatprep.subr.mxu0 %v28615_v52 }
 0x17d   :  { %6309 = vmatprep.subr.mxu1 %v28618_v4  ;;  %5701 = vmatprep.mubr.f32.mxu0 %v34099_v2  ;;  %v6727_v57 = vand.u32 4294901760, %v6726_v46 }
 0x17e   :  { %6215 = vmatprep.mubr.f32.mxu1 %v34099_v2  ;;  %5703 = vmatmul.mubr.f32.gmra.mrb[2].mxu0 %v28658_v21 }
 0x17f   :  { %6217 = vmatmul.mubr.f32.gmra.mrb[2].mxu1 %v28658_v21  ;;  %5777 = vmatprep.mubr.f32.mxu0 %v34099_v2 }
 0x180   :  { %6291 = vmatprep.mubr.f32.mxu1 %v34099_v2 }
 0x182   :  { %5780 = vmatmul.mubr.f32.vlgmr.msra.gmra.mrb[0].mxu0 %v28656_v37 }
 0x183   :  { %5797 = vmatpush1.msra.mxu0 %v28650_v34  ;;  %6294 = vmatmul.mubr.f32.vlgmr.msra.gmra.mrb[0].mxu1 %v28656_v37  ;;  %v28808_v37 = vsub.f32 %v6611_v19, %v28794_v27 }
 0x184   :  { %6311 = vmatpush1.msra.mxu1 %v28648_v22  ;;  %5882 = vmatprep.subr.mxu0 %v5622_v35  ;;  %v6719_v35 = vand.u32 4294901760, %v28786_v25 }
 0x185   :  { %6396 = vmatprep.subr.mxu1 %v6136_v23  ;;  %5785 = vmatprep.mubr.f32.mxu0 %v34099_v2 }
 0x186   :  { %6299 = vmatprep.mubr.f32.mxu1 %v34099_v2  ;;  %5788 = vmatmul.mubr.f32.gmra.mrb[2].mxu0 %v28684_v50  ;;  %v6720_v47 = vsub.f32 %v28786_v25, %v6719_v35 }
 0x187   :  { %6302 = vmatmul.mubr.f32.gmra.mrb[2].mxu1 %v28684_v50  ;;  %5860 = vmatprep.mubr.f32.mxu0 %v34099_v2  ;;  %v7239_v50 = vand.u32 4294901760, %v28816_v20 }
 0x188   :  { %6374 = vmatprep.mubr.f32.mxu1 %v34099_v2 }
 0x18a   :  { %5864 = vmatmul.mubr.f32.vlgmr.msra.gmra.mrb[0].mxu0 %v28681_v12 }
 0x18b   :  { %5886 = vmatpush1.msra.mxu0 %v5628_v51  ;;  %6378 = vmatmul.mubr.f32.vlgmr.msra.gmra.mrb[0].mxu1 %v28681_v12 }
 0x18c   :  { %6400 = vmatpush1.msra.mxu1 %v6142_v33  ;;  %5965 = vmatprep.subr.mxu0 %v28615_v52  ;;  %v28792_v52 = vsub.f32 %v6626_v29, %v28770_v49  ;;  %v6721_v33 = vand.u32 4294901760, %v6720_v47 }
 0x18d   :  { %6479 = vmatprep.subr.mxu1 %v28618_v4  ;;  %5869 = vmatprep.mubr.f32.mxu0 %v34099_v2  ;;  %v6614_v4 = vsel %vm129_vm0, %v24902_v3, 0 }
 0x18e   :  { %6383 = vmatprep.mubr.f32.mxu1 %v34099_v2  ;;  %5873 = vmatmul.mubr.f32.gmra.mrb[2].mxu0 %v28695_v40  ;;  %v7233_v23 = vand.u32 4294901760, %v28792_v52  ;;  %v28810_v42 = vand.u32 4294901760, %v6614_v4 }
 0x18f   :  { %6387 = vmatmul.mubr.f32.gmra.mrb[2].mxu1 %v28695_v40  ;;  %5949 = vmatprep.mubr.f32.mxu0 %v34099_v2  ;;  %v7240_v40 = vsub.f32 %v28816_v20, %v7239_v50 }
 0x190   :  { %6463 = vmatprep.mubr.f32.mxu1 %v34099_v2  ;;  %v28836_v12 = vsub.f32 %v6614_v4, %v28810_v42 }
 0x191   :  { %v7241_v30 = vand.u32 4294901760, %v7240_v40 }
 0x192   :  { %5951 = vmatmul.mubr.f32.vlgmr.msra.gmra.mrb[0].mxu0 %v28642_v31  ;;  %v28847_v41 = vand.u32 4294901760, %v28836_v12 }
 0x193   :  { %6465 = vmatmul.mubr.f32.vlgmr.msra.gmra.mrb[0].mxu1 %v28642_v31  ;;  %5967 = vmatpush1.msra.mxu0 %v28650_v34  ;;  %v28833_v34 = vand.u32 4294901760, %v28808_v37 }
 0x194   :  { %6481 = vmatpush1.msra.mxu1 %v28648_v22  ;;  %5956 = vmatprep.mubr.f32.mxu0 %v34099_v2  ;;  %v7234_v22 = vsub.f32 %v28792_v52, %v7233_v23  ;;  %v6709_v56 = vsub.f32 %v28836_v12, %v28847_v41 }
 0x195   :  { %6470 = vmatprep.mubr.f32.mxu1 %v34099_v2  ;;  %6629 = vmatprep.subr.mxu0 %v28767_v13  ;;  %v6698_v54 = vsub.f32 %v28808_v37, %v28833_v34 }
 0x196   :  { %5958 = vmatmul.mubr.f32.gmra.mrb[2].mxu0 %v28658_v21  ;;  %7143 = vmatprep.subr.mxu1 %v28770_v49  ;;  %v7235_v51 = vand.u32 4294901760, %v7234_v22  ;;  %v6710_v55 = vand.u32 4294901760, %v6709_v56 }
 0x197   :  { %6472 = vmatmul.mubr.f32.gmra.mrb[2].mxu1 %v28658_v21  ;;  %6030 = vmatprep.mubr.f32.mxu0 %v34099_v2 }
 0x198   :  { %6544 = vmatprep.mubr.f32.mxu1 %v34099_v2 }
 0x19a   :  { %6032 = vmatmul.mubr.f32.vlgmr.msra.gmra.mrb[0].mxu0 %v28642_v31 }
 0x19b   :  { %6546 = vmatmul.mubr.f32.vlgmr.msra.gmra.mrb[0].mxu1 %v28642_v31  ;;  %6631 = vmatpush1.msra.mxu0 %v28802_v32  ;;  %v6699_v31 = vand.u32 4294901760, %v6698_v54 }
 0x19c   :  { %6037 = vmatprep.mubr.f32.mxu0 %v34099_v2  ;;  %6551 = vmatprep.mubr.f32.mxu1 %v34099_v2 }
 0x19d   :  { %7145 = vmatpush1.msra.mxu1 %v28800_v28  ;;  %6722 = vmatprep.subr.mxu0 %v6721_v33 }
 0x19e   :  { %6039 = vmatmul.mubr.f32.gmra.mrb[2].mxu0 %v28658_v21  ;;  %7236 = vmatprep.subr.mxu1 %v7235_v51 }
 0x19f   :  { %6553 = vmatmul.mubr.f32.gmra.mrb[2].mxu1 %v28658_v21  ;;  %6694 = vmatprep.mubr.f32.mxu0 %v34099_v2  ;;  %v7665_v21 = vpop.permute.xlu0 %7664 }
 0x1a0   :  { %7208 = vmatprep.mubr.f32.mxu1 %v34099_v2  ;;  %v7676_v38 = vsel %vm7672_vm8, %v7671_v59, %v7665_v21  ;;  %v7675_v0 = vsel %vm7672_vm8, %v7665_v21, %v7667_v58 }
 0x1a1   :  { %v7703_v5 = vmul.f32 %v7695_v48, %v7676_v38  ;;  %v7700_v19 = vmul.f32 %v7683_v6, %v7675_v0  ;;  %v8792_v48 = vrot.slane %v24906_v45, %v27888_v16 }
 0x1a2   :  { %6700 = vmatmul.mubr.f32.vlgmr.msra.gmra.mrb[0].mxu0 %v6699_v31 }
 0x1a3   :  { %6728 = vmatpush1.msra.mxu0 %v6727_v57  ;;  %7214 = vmatmul.mubr.f32.vlgmr.msra.gmra.mrb[0].mxu1 %v6699_v31  ;;  %v7669_v36 = vpop.permute.xlu0 %7668  ;;  %v7723_v29 = vsel %vm136_vm2, %v7703_v5, 0  ;;  %v7714_v4 = vsel %vm136_vm2, %v7700_v19, 0 }
 0x1a4   :  { %7242 = vmatpush1.msra.mxu1 %v7241_v30  ;;  %6808 = vmatprep.subr.mxu0 %v28786_v25  ;;  %v7674_v60 = vsel %vm7672_vm8, %v7667_v58, %v7669_v36  ;;  %v7673_v7 = vsel %vm7672_vm8, %v7669_v36, %v7671_v59  ;;  %v28928_v3 = vand.u32 4294901760, %v7723_v29  ;;  %v24905_v25 = vld [vmem:[%s34085_s3 + $0x78] sm:$0xff]  ;;  %v8764_v58 = vpop.permute.xlu1 %8763 }
 0x1a5   :  { %7322 = vmatprep.subr.mxu1 %v28792_v52  ;;  %6705 = vmatprep.mubr.f32.mxu0 %v34099_v2  ;;  %v7701_v63 = vmul.f32 %v7687_v1, %v7674_v60  ;;  %v7702_v10 = vmul.f32 %v7691_v9, %v7673_v7  ;;  %v8784_v1 = vrot.slane %v24906_v45, %v27890_v17 }
 0x1a6   :  { %7219 = vmatprep.mubr.f32.mxu1 %v34099_v2  ;;  %6711 = vmatmul.mubr.f32.gmra.mrb[2].mxu0 %v6710_v55 }
 0x1a7   :  { %7225 = vmatmul.mubr.f32.gmra.mrb[2].mxu1 %v6710_v55  ;;  %6791 = vmatprep.mubr.f32.mxu0 %v34099_v2  ;;  %v7717_v44 = vsel %vm136_vm2, %v7701_v63, 0  ;;  %v7720_v26 = vsel %vm136_vm2, %v7702_v10, 0  ;;  %v8780_v63 = vrot.slane %v24906_v45, %v27886_v15 }
 0x1a8   :  { %7305 = vmatprep.mubr.f32.mxu1 %v34099_v2  ;;  %v28925_v11 = vand.u32 4294901760, %v7717_v44  ;;  %v8768_v59 = vpop.permute.xlu1 %8767 }
 0x1aa   :  { %6793 = vmatmul.mubr.f32.vlgmr.msra.gmra.mrb[0].mxu0 %v28794_v27  ;;  %v28944_v52 = vsub.f32 %v7717_v44, %v28925_v11  ;;  %v24907_v44 = vld [vmem:[%s34085_s3 + $0x80] sm:$0xff] }
 0x1ab   :  { %6811 = vmatpush1.msra.mxu0 %v28820_v43  ;;  %7307 = vmatmul.mubr.f32.vlgmr.msra.gmra.mrb[0].mxu1 %v28794_v27  ;;  %v8805_v19 = vsel %vm129_vm0, %v24907_v44, 0 }
 0x1ac   :  { %7325 = vmatpush1.msra.mxu1 %v28816_v20  ;;  %6892 = vmatprep.subr.mxu0 %v28767_v13  ;;  %v7816_v20 = vand.u32 4294901760, %v28944_v52 }
 0x1ad   :  { %7406 = vmatprep.subr.mxu1 %v28770_v49  ;;  %6798 = vmatprep.mubr.f32.mxu0 %v34099_v2 }
 0x1ae   :  { %7312 = vmatprep.mubr.f32.mxu1 %v34099_v2  ;;  %6800 = vmatmul.mubr.f32.gmra.mrb[2].mxu0 %v28810_v42 }
 0x1af   :  { %7314 = vmatmul.mubr.f32.gmra.mrb[2].mxu1 %v28810_v42  ;;  %6874 = vmatprep.mubr.f32.mxu0 %v34099_v2 }
 0x1b0   :  { %7388 = vmatprep.mubr.f32.mxu1 %v34099_v2 }
 0x1b2   :  { %6877 = vmatmul.mubr.f32.vlgmr.msra.gmra.mrb[0].mxu0 %v28808_v37 }
 0x1b3   :  { %6894 = vmatpush1.msra.mxu0 %v28802_v32  ;;  %7391 = vmatmul.mubr.f32.vlgmr.msra.gmra.mrb[0].mxu1 %v28808_v37  ;;  %v28960_v37 = vand.u32 4294901760, %v7714_v4 }
 0x1b4   :  { %7408 = vmatpush1.msra.mxu1 %v28800_v28  ;;  %6979 = vmatprep.subr.mxu0 %v6719_v35  ;;  %v28952_v35 = vand.u32 4294901760, %v7708_v24 }
 0x1b5   :  { %7493 = vmatprep.subr.mxu1 %v7233_v23  ;;  %6882 = vmatprep.mubr.f32.mxu0 %v34099_v2  ;;  %v28958_v23 = vand.u32 4294901760, %v7720_v26 }
 0x1b6   :  { %7396 = vmatprep.mubr.f32.mxu1 %v34099_v2  ;;  %6885 = vmatmul.mubr.f32.gmra.mrb[2].mxu0 %v28836_v12  ;;  %v28966_v47 = vsub.f32 %v7708_v24, %v28952_v35  ;;  %v24908_v24 = vld [vmem:[%s34085_s3 + $0x88] sm:$0xff]  ;;  %s27762_s3 = smov 32  }
 0x1b7   :  { %7399 = vmatmul.mubr.f32.gmra.mrb[2].mxu1 %v28836_v12  ;;  %6957 = vmatprep.mubr.f32.mxu0 %v34099_v2  ;;  %v28978_v12 = vsub.f32 %v7714_v4, %v28960_v37  ;;  %v29104_v4 = vand.u32 4294901760, %v8805_v19 }
 0x1b8   :  { %7471 = vmatprep.mubr.f32.mxu1 %v34099_v2 }
 0x1b9   :  { %v7822_v54 = vand.u32 4294901760, %v28978_v12 }
 0x1ba   :  { %6961 = vmatmul.mubr.f32.vlgmr.msra.gmra.mrb[0].mxu0 %v28833_v34 }
 0x1bb   :  { %6983 = vmatpush1.msra.mxu0 %v6725_v39  ;;  %7475 = vmatmul.mubr.f32.vlgmr.msra.gmra.mrb[0].mxu1 %v28833_v34  ;;  %v28974_v34 = vsub.f32 %v7720_v26, %v28958_v23  ;;  %v7823_v56 = vsub.f32 %v28978_v12, %v7822_v54 }
 0x1bc   :  { %7497 = vmatpush1.msra.mxu1 %v7239_v50  ;;  %7062 = vmatprep.subr.mxu0 %v28767_v13  ;;  %v28950_v13 = vsub.f32 %v7723_v29, %v28928_v3  ;;  %v7817_v50 = vsub.f32 %v28944_v52, %v7816_v20 }
 0x1bd   :  { %7576 = vmatprep.subr.mxu1 %v28770_v49  ;;  %6966 = vmatprep.mubr.f32.mxu0 %v34099_v2  ;;  %v7711_v49 = vsel %vm129_vm0, %v24905_v25, 0  ;;  %v8336_v39 = vand.u32 4294901760, %v28974_v34  ;;  %v7824_v55 = vand.u32 4294901760, %v7823_v56 }
 0x1be   :  { %7480 = vmatprep.mubr.f32.mxu1 %v34099_v2  ;;  %6970 = vmatmul.mubr.f32.gmra.mrb[2].mxu0 %v28847_v41  ;;  %v8330_v43 = vand.u32 4294901760, %v28950_v13  ;;  %v28968_v22 = vand.u32 4294901760, %v7711_v49  ;;  %v7818_v51 = vand.u32 4294901760, %v7817_v50 }
 0x1bf   :  { %7484 = vmatmul.mubr.f32.gmra.mrb[2].mxu1 %v28847_v41  ;;  %7046 = vmatprep.mubr.f32.mxu0 %v34099_v2  ;;  %v8337_v31 = vsub.f32 %v28974_v34, %v8336_v39 }
 0x1c0   :  { %7560 = vmatprep.mubr.f32.mxu1 %v34099_v2  ;;  %v28994_v33 = vsub.f32 %v7711_v49, %v28968_v22 }
 0x1c1   :  { %v8338_v57 = vand.u32 4294901760, %v8337_v31 }
 0x1c2   :  { %7048 = vmatmul.mubr.f32.vlgmr.msra.gmra.mrb[0].mxu0 %v28794_v27  ;;  %v29005_v46 = vand.u32 4294901760, %v28994_v33 }
 0x1c3   :  { %7562 = vmatmul.mubr.f32.vlgmr.msra.gmra.mrb[0].mxu1 %v28794_v27  ;;  %7064 = vmatpush1.msra.mxu0 %v28802_v32  ;;  %v28991_v32 = vand.u32 4294901760, %v28966_v47 }
 0x1c4   :  { %7578 = vmatpush1.msra.mxu1 %v28800_v28  ;;  %7053 = vmatprep.mubr.f32.mxu0 %v34099_v2  ;;  %v8331_v28 = vsub.f32 %v28950_v13, %v8330_v43  ;;  %v7806_v30 = vsub.f32 %v28994_v33, %v29005_v46 }
 0x1c5   :  { %7567 = vmatprep.mubr.f32.mxu1 %v34099_v2  ;;  %7726 = vmatprep.subr.mxu0 %v28925_v11  ;;  %v7795_v40 = vsub.f32 %v28966_v47, %v28991_v32 }
 0x1c6   :  { %7055 = vmatmul.mubr.f32.gmra.mrb[2].mxu0 %v28810_v42  ;;  %8240 = vmatprep.subr.mxu1 %v28928_v3  ;;  %v8332_v41 = vand.u32 4294901760, %v8331_v28  ;;  %v7807_v21 = vand.u32 4294901760, %v7806_v30 }
 0x1c7   :  { %7569 = vmatmul.mubr.f32.gmra.mrb[2].mxu1 %v28810_v42  ;;  %7127 = vmatprep.mubr.f32.mxu0 %v34099_v2 }
 0x1c8   :  { %7641 = vmatprep.mubr.f32.mxu1 %v34099_v2 }
 0x1ca   :  { %7129 = vmatmul.mubr.f32.vlgmr.msra.gmra.mrb[0].mxu0 %v28794_v27 }
 0x1cb   :  { %7643 = vmatmul.mubr.f32.vlgmr.msra.gmra.mrb[0].mxu1 %v28794_v27  ;;  %7728 = vmatpush1.msra.mxu0 %v28960_v37  ;;  %v7796_v27 = vand.u32 4294901760, %v7795_v40 }
 0x1cc   :  { %7134 = vmatprep.mubr.f32.mxu0 %v34099_v2  ;;  %7648 = vmatprep.mubr.f32.mxu1 %v34099_v2 }
 0x1cd   :  { %8242 = vmatpush1.msra.mxu1 %v28958_v23  ;;  %7819 = vmatprep.subr.mxu0 %v7818_v51 }
 0x1ce   :  { %7136 = vmatmul.mubr.f32.gmra.mrb[2].mxu0 %v28810_v42  ;;  %8333 = vmatprep.subr.mxu1 %v8332_v41 }
 0x1cf   :  { %7650 = vmatmul.mubr.f32.gmra.mrb[2].mxu1 %v28810_v42  ;;  %7791 = vmatprep.mubr.f32.mxu0 %v34099_v2  ;;  %v8762_v42 = vpop.permute.xlu0 %8761 }
 0x1d0   :  { %8305 = vmatprep.mubr.f32.mxu1 %v34099_v2  ;;  %v8773_v38 = vsel %vm8769_vm9, %v8768_v59, %v8762_v42  ;;  %v8772_v6 = vsel %vm8769_vm9, %v8762_v42, %v8764_v58 }
 0x1d1   :  { %v8800_v61 = vmul.f32 %v8792_v48, %v8773_v38  ;;  %v8797_v8 = vmul.f32 %v8780_v63, %v8772_v6 }
 0x1d2   :  { %7797 = vmatmul.mubr.f32.vlgmr.msra.gmra.mrb[0].mxu0 %v7796_v27 }
 0x1d3   :  { %7825 = vmatpush1.msra.mxu0 %v7824_v55  ;;  %8311 = vmatmul.mubr.f32.vlgmr.msra.gmra.mrb[0].mxu1 %v7796_v27  ;;  %v8766_v36 = vpop.permute.xlu0 %8765  ;;  %v8820_v7 = vsel %vm136_vm2, %v8800_v61, 0 }
 0x1d4   :  { %8339 = vmatpush1.msra.mxu1 %v8338_v57  ;;  %7905 = vmatprep.subr.mxu0 %v28944_v52  ;;  %v8771_v60 = vsel %vm8769_vm9, %v8764_v58, %v8766_v36  ;;  %v8770_v5 = vsel %vm8769_vm9, %v8766_v36, %v8768_v59  ;;  %v29080_v10 = vand.u32 4294901760, %v8820_v7  ;;  %v8811_v52 = vsel %vm136_vm2, %v8797_v8, 0 }
 0x1d5   :  { %8419 = vmatprep.subr.mxu1 %v28950_v13  ;;  %7802 = vmatprep.mubr.f32.mxu0 %v34099_v2  ;;  %v8798_v53 = vmul.f32 %v8784_v1, %v8771_v60  ;;  %v8799_v0 = vmul.f32 %v8788_v62, %v8770_v5  ;;  %v29112_v49 = vand.u32 4294901760, %v8811_v52 }
 0x1d6   :  { %8316 = vmatprep.mubr.f32.mxu1 %v34099_v2  ;;  %7808 = vmatmul.mubr.f32.gmra.mrb[2].mxu0 %v7807_v21 }
 0x1d7   :  { %8322 = vmatmul.mubr.f32.gmra.mrb[2].mxu1 %v7807_v21  ;;  %7888 = vmatprep.mubr.f32.mxu0 %v34099_v2  ;;  %v8814_v9 = vsel %vm136_vm2, %v8798_v53, 0  ;;  %v8817_v25 = vsel %vm136_vm2, %v8799_v0, 0  ;;  %v29130_v50 = vsub.f32 %v8811_v52, %v29112_v49 }
 0x1d8   :  { %8402 = vmatprep.mubr.f32.mxu1 %v34099_v2  ;;  %v29077_v29 = vand.u32 4294901760, %v8814_v9  ;;  %v29110_v13 = vand.u32 4294901760, %v8817_v25 }
 0x1d9   :  { %v8919_v51 = vand.u32 4294901760, %v29130_v50 }
 0x1da   :  { %7890 = vmatmul.mubr.f32.vlgmr.msra.gmra.mrb[0].mxu0 %v28952_v35  ;;  %v29096_v26 = vsub.f32 %v8814_v9, %v29077_v29 }
 0x1db   :  { %7908 = vmatpush1.msra.mxu0 %v28978_v12  ;;  %8404 = vmatmul.mubr.f32.vlgmr.msra.gmra.mrb[0].mxu1 %v28952_v35  ;;  %v29126_v12 = vsub.f32 %v8817_v25, %v29110_v13  ;;  %v8920_v31 = vsub.f32 %v29130_v50, %v8919_v51 }
 0x1dc   :  { %8422 = vmatpush1.msra.mxu1 %v28974_v34  ;;  %7989 = vmatprep.subr.mxu0 %v28925_v11 }
 0x1dd   :  { %8503 = vmatprep.subr.mxu1 %v28928_v3  ;;  %7895 = vmatprep.mubr.f32.mxu0 %v34099_v2  ;;  %v8921_v30 = vand.u32 4294901760, %v8920_v31 }
 0x1de   :  { %8409 = vmatprep.mubr.f32.mxu1 %v34099_v2  ;;  %7897 = vmatmul.mubr.f32.gmra.mrb[2].mxu0 %v28968_v22 }
 0x1df   :  { %8411 = vmatmul.mubr.f32.gmra.mrb[2].mxu1 %v28968_v22  ;;  %7971 = vmatprep.mubr.f32.mxu0 %v34099_v2 }
 0x1e0   :  { %8485 = vmatprep.mubr.f32.mxu1 %v34099_v2 }
 0x1e2   :  { %7974 = vmatmul.mubr.f32.vlgmr.msra.gmra.mrb[0].mxu0 %v28966_v47 }
 0x1e3   :  { %7991 = vmatpush1.msra.mxu0 %v28960_v37  ;;  %8488 = vmatmul.mubr.f32.vlgmr.msra.gmra.mrb[0].mxu1 %v28966_v47  ;;  %v29118_v47 = vsub.f32 %v8805_v19, %v29104_v4 }
 0x1e4   :  { %8505 = vmatpush1.msra.mxu1 %v28958_v23  ;;  %8076 = vmatprep.subr.mxu0 %v7816_v20  ;;  %v8913_v20 = vand.u32 4294901760, %v29096_v26 }
 0x1e5   :  { %8590 = vmatprep.subr.mxu1 %v8330_v43  ;;  %7979 = vmatprep.mubr.f32.mxu0 %v34099_v2 }
 0x1e6   :  { %8493 = vmatprep.mubr.f32.mxu1 %v34099_v2  ;;  %7982 = vmatmul.mubr.f32.gmra.mrb[2].mxu0 %v28994_v33  ;;  %v8914_v28 = vsub.f32 %v29096_v26, %v8913_v20 }
 0x1e7   :  { %8496 = vmatmul.mubr.f32.gmra.mrb[2].mxu1 %v28994_v33  ;;  %8054 = vmatprep.mubr.f32.mxu0 %v34099_v2  ;;  %v9433_v33 = vand.u32 4294901760, %v29126_v12 }
 0x1e8   :  { %8568 = vmatprep.mubr.f32.mxu1 %v34099_v2 }
 0x1ea   :  { %8058 = vmatmul.mubr.f32.vlgmr.msra.gmra.mrb[0].mxu0 %v28991_v32 }
 0x1eb   :  { %8080 = vmatpush1.msra.mxu0 %v7822_v54  ;;  %8572 = vmatmul.mubr.f32.vlgmr.msra.gmra.mrb[0].mxu1 %v28991_v32 }
 0x1ec   :  { %8594 = vmatpush1.msra.mxu1 %v8336_v39  ;;  %8159 = vmatprep.subr.mxu0 %v28925_v11  ;;  %v29102_v11 = vsub.f32 %v8820_v7, %v29080_v10  ;;  %v8915_v39 = vand.u32 4294901760, %v8914_v28 }
 0x1ed   :  { %8673 = vmatprep.subr.mxu1 %v28928_v3  ;;  %8063 = vmatprep.mubr.f32.mxu0 %v34099_v2  ;;  %v8808_v3 = vsel %vm129_vm0, %v24908_v24, 0  ;;  %vm19432_vm0 = vcmp.lt.s32.totalorder %v27880_v14, 96 }
 0x1ee   :  { %8577 = vmatprep.mubr.f32.mxu1 %v34099_v2  ;;  %8067 = vmatmul.mubr.f32.gmra.mrb[2].mxu0 %v29005_v46  ;;  %v9427_v43 = vand.u32 4294901760, %v29102_v11  ;;  %v29120_v34 = vand.u32 4294901760, %v8808_v3 }
 0x1ef   :  { %8581 = vmatmul.mubr.f32.gmra.mrb[2].mxu1 %v29005_v46  ;;  %8143 = vmatprep.mubr.f32.mxu0 %v34099_v2  ;;  %v9434_v46 = vsub.f32 %v29126_v12, %v9433_v33 }
 0x1f0   :  { %8657 = vmatprep.mubr.f32.mxu1 %v34099_v2  ;;  %v8901_v32 = vsub.f32 %v8808_v3, %v29120_v34 }
 0x1f1   :  { %v9435_v27 = vand.u32 4294901760, %v9434_v46 }
 0x1f2   :  { %8145 = vmatmul.mubr.f32.vlgmr.msra.gmra.mrb[0].mxu0 %v28952_v35  ;;  %v29154_v40 = vand.u32 4294901760, %v8901_v32 }
 0x1f3   :  { %8659 = vmatmul.mubr.f32.vlgmr.msra.gmra.mrb[0].mxu1 %v28952_v35  ;;  %8161 = vmatpush1.msra.mxu0 %v28960_v37  ;;  %v29143_v37 = vand.u32 4294901760, %v29118_v47 }
 0x1f4   :  { %8675 = vmatpush1.msra.mxu1 %v28958_v23  ;;  %8150 = vmatprep.mubr.f32.mxu0 %v34099_v2  ;;  %v9428_v23 = vsub.f32 %v29102_v11, %v9427_v43 }
 0x1f5   :  { %8664 = vmatprep.mubr.f32.mxu1 %v34099_v2  ;;  %8823 = vmatprep.subr.mxu0 %v29077_v29  ;;  %v8892_v41 = vsub.f32 %v29118_v47, %v29143_v37 }
 0x1f6   :  { %8152 = vmatmul.mubr.f32.gmra.mrb[2].mxu0 %v28968_v22  ;;  %9337 = vmatprep.subr.mxu1 %v29080_v10  ;;  %v9429_v54 = vand.u32 4294901760, %v9428_v23 }
 0x1f7   :  { %8666 = vmatmul.mubr.f32.gmra.mrb[2].mxu1 %v28968_v22  ;;  %8224 = vmatprep.mubr.f32.mxu0 %v34099_v2  ;;  %v8893_v56 = vand.u32 4294901760, %v8892_v41 }
 0x1f8   :  { %8738 = vmatprep.mubr.f32.mxu1 %v34099_v2 }
 0x1f9   :  { %v9868_v36 = vpop.permute.xlu1 %9867 }
 0x1fa   :  { %8226 = vmatmul.mubr.f32.vlgmr.msra.gmra.mrb[0].mxu0 %v28952_v35 }
 0x1fb   :  { %8740 = vmatmul.mubr.f32.vlgmr.msra.gmra.mrb[0].mxu1 %v28952_v35  ;;  %8825 = vmatpush1.msra.mxu0 %v29112_v49  ;;  %v8903_v35 = vsub.f32 %v8901_v32, %v29154_v40 }
 0x1fc   :  { %8231 = vmatprep.mubr.f32.mxu0 %v34099_v2  ;;  %8745 = vmatprep.mubr.f32.mxu1 %v34099_v2 }
 0x1fd   :  { %9339 = vmatpush1.msra.mxu1 %v29110_v13  ;;  %8916 = vmatprep.subr.mxu0 %v8915_v39  ;;  %v8904_v57 = vand.u32 4294901760, %v8903_v35 }
 0x1fe   :  { %8233 = vmatmul.mubr.f32.gmra.mrb[2].mxu0 %v28968_v22  ;;  %9430 = vmatprep.subr.mxu1 %v9429_v54 }
 0x1ff   :  { %8747 = vmatmul.mubr.f32.gmra.mrb[2].mxu1 %v28968_v22  ;;  %8888 = vmatprep.mubr.f32.mxu0 %v34099_v2  ;;  %v9863_v22 = vpop.permute.xlu0 %9862 }
 0x200   :  { %9402 = vmatprep.mubr.f32.mxu1 %v34099_v2 }
 0x202   :  { %8894 = vmatmul.mubr.f32.vlgmr.msra.gmra.mrb[0].mxu0 %v8893_v56 }
 0x203   :  { %8922 = vmatpush1.msra.mxu0 %v8921_v30  ;;  %9408 = vmatmul.mubr.f32.vlgmr.msra.gmra.mrb[0].mxu1 %v8893_v56 }
 0x204   :  { %9436 = vmatpush1.msra.mxu1 %v9435_v27  ;;  %9002 = vmatprep.subr.mxu0 %v29096_v26 }
 0x205   :  { %9516 = vmatprep.subr.mxu1 %v29102_v11  ;;  %8899 = vmatprep.mubr.f32.mxu0 %v34099_v2 }
 0x206   :  { %9413 = vmatprep.mubr.f32.mxu1 %v34099_v2  ;;  %8905 = vmatmul.mubr.f32.gmra.mrb[2].mxu0 %v8904_v57 }
 0x207   :  { %9419 = vmatmul.mubr.f32.gmra.mrb[2].mxu1 %v8904_v57  ;;  %8985 = vmatprep.mubr.f32.mxu0 %v34099_v2 }
 0x208   :  { %9499 = vmatprep.mubr.f32.mxu1 %v34099_v2 }
 0x20a   :  { %8987 = vmatmul.mubr.f32.vlgmr.msra.gmra.mrb[0].mxu0 %v29104_v4 }
 0x20b   :  { %9005 = vmatpush1.msra.mxu0 %v29130_v50  ;;  %9501 = vmatmul.mubr.f32.vlgmr.msra.gmra.mrb[0].mxu1 %v29104_v4 }
 0x20c   :  { %9519 = vmatpush1.msra.mxu1 %v29126_v12  ;;  %9086 = vmatprep.subr.mxu0 %v29077_v29 }
 0x20d   :  { %9600 = vmatprep.subr.mxu1 %v29080_v10  ;;  %8992 = vmatprep.mubr.f32.mxu0 %v34099_v2 }
 0x20e   :  { %9506 = vmatprep.mubr.f32.mxu1 %v34099_v2  ;;  %8994 = vmatmul.mubr.f32.gmra.mrb[2].mxu0 %v29120_v34 }
 0x20f   :  { %9508 = vmatmul.mubr.f32.gmra.mrb[2].mxu1 %v29120_v34  ;;  %9068 = vmatprep.mubr.f32.mxu0 %v34099_v2 }
 0x210   :  { %9582 = vmatprep.mubr.f32.mxu1 %v34099_v2 }
 0x212   :  { %9071 = vmatmul.mubr.f32.vlgmr.msra.gmra.mrb[0].mxu0 %v29118_v47 }
 0x213   :  { %9088 = vmatpush1.msra.mxu0 %v29112_v49  ;;  %9585 = vmatmul.mubr.f32.vlgmr.msra.gmra.mrb[0].mxu1 %v29118_v47 }
 0x214   :  { %9602 = vmatpush1.msra.mxu1 %v29110_v13  ;;  %9173 = vmatprep.subr.mxu0 %v8913_v20 }
 0x215   :  { %9687 = vmatprep.subr.mxu1 %v9427_v43  ;;  %9076 = vmatprep.mubr.f32.mxu0 %v34099_v2 }
 0x216   :  { %9590 = vmatprep.mubr.f32.mxu1 %v34099_v2  ;;  %9079 = vmatmul.mubr.f32.gmra.mrb[2].mxu0 %v8901_v32 }
 0x217   :  { %9593 = vmatmul.mubr.f32.gmra.mrb[2].mxu1 %v8901_v32  ;;  %9151 = vmatprep.mubr.f32.mxu0 %v34099_v2 }
 0x218   :  { %9665 = vmatprep.mubr.f32.mxu1 %v34099_v2 }
 0x21a   :  { %9155 = vmatmul.mubr.f32.vlgmr.msra.gmra.mrb[0].mxu0 %v29143_v37 }
 0x21b   :  { %9177 = vmatpush1.msra.mxu0 %v8919_v51  ;;  %9669 = vmatmul.mubr.f32.vlgmr.msra.gmra.mrb[0].mxu1 %v29143_v37 }
 0x21c   :  { %9691 = vmatpush1.msra.mxu1 %v9433_v33  ;;  %9256 = vmatprep.subr.mxu0 %v29077_v29 }
 0x21d   :  { %9770 = vmatprep.subr.mxu1 %v29080_v10  ;;  %9160 = vmatprep.mubr.f32.mxu0 %v34099_v2 }
 0x21e   :  { %9674 = vmatprep.mubr.f32.mxu1 %v34099_v2  ;;  %9164 = vmatmul.mubr.f32.gmra.mrb[2].mxu0 %v29154_v40 }
 0x21f   :  { %9678 = vmatmul.mubr.f32.gmra.mrb[2].mxu1 %v29154_v40  ;;  %9240 = vmatprep.mubr.f32.mxu0 %v34099_v2 }
 0x220   :  { %9754 = vmatprep.mubr.f32.mxu1 %v34099_v2 }
 0x222   :  { %9242 = vmatmul.mubr.f32.vlgmr.msra.gmra.mrb[0].mxu0 %v29104_v4 }
 0x223   :  { %9258 = vmatpush1.msra.mxu0 %v29112_v49  ;;  %9756 = vmatmul.mubr.f32.vlgmr.msra.gmra.mrb[0].mxu1 %v29104_v4 }
 0x224   :  { %9772 = vmatpush1.msra.mxu1 %v29110_v13  ;;  %9247 = vmatprep.mubr.f32.mxu0 %v34099_v2 }
 0x225   :  { %9761 = vmatprep.mubr.f32.mxu1 %v34099_v2 }
 0x226   :  { %9249 = vmatmul.mubr.f32.gmra.mrb[2].mxu0 %v29120_v34 }
 0x227   :  { %9763 = vmatmul.mubr.f32.gmra.mrb[2].mxu1 %v29120_v34  ;;  %9321 = vmatprep.mubr.f32.mxu0 %v34099_v2 }
 0x228   :  { %9835 = vmatprep.mubr.f32.mxu1 %v34099_v2 }
 0x22a   :  { %9323 = vmatmul.mubr.f32.vlgmr.msra.gmra.mrb[0].mxu0 %v29104_v4 }
 0x22b   :  { %9837 = vmatmul.mubr.f32.vlgmr.msra.gmra.mrb[0].mxu1 %v29104_v4  ;;  %9328 = vmatprep.mubr.f32.mxu0 %v34099_v2 }
 0x22c   :  { %9842 = vmatprep.mubr.f32.mxu1 %v34099_v2 }
 0x22e   :  { %9330 = vmatmul.mubr.f32.gmra.mrb[2].mxu0 %v29120_v34 }
 0x22f   :  { %9844 = vmatmul.mubr.f32.gmra.mrb[2].mxu1 %v29120_v34  ;;  %10280 = vmatprep.mubr.f32.mxu0 %v34099_v2 }
 0x230   :  { %10151 = vmatprep.mubr.f32.mxu1 %v34099_v2 }
 0x2fd   :  { %v9324_v55 = vpop.f32.mrb[0].mxu0 }
 0x2fe   :  { %v9838_v21 = vpop.f32.mrb[0].mxu1  ;;  %v9870_v42 = vadd.f32 %v9863_v22, %v9324_v55  ;;  %v9326_v58 = vpop.f32.mrb[1].mxu0 }
 0x2ff   :  { %v9840_v45 = vpop.f32.mrb[1].mxu1  ;;  %v9872_v1 = vadd.f32 %v9863_v22, %v9838_v21  ;;  %v9871_v62 = vadd.f32 %v9863_v22, %v9326_v58 }
 0x300   :  { %v9878_v59 = vmax.f32 %v9870_v42, 0.0  ;;  %v9873_v7 = vadd.f32 %v9863_v22, %v9840_v45 }
 0x301   :  { %v9331_v48 = vpop.f32.mrb[2].mxu0  ;;  %v9880_v9 = vmax.f32 %v9872_v1, 0.0  ;;  %v9879_v6 = vmax.f32 %v9871_v62, 0.0 }
 0x302   :  { %v9874_v60 = vadd.f32 %v9868_v36, %v9331_v48  ;;  %v9845_v38 = vpop.f32.mrb[2].mxu1  ;;  %9886 = vrot.lane.b32.xlu1 %v9878_v59, %s27757_s25  ;;  %v9333_v53 = vpop.f32.mrb[3].mxu0  ;;  %v9881_v29 = vmax.f32 %v9873_v7, 0.0 }
 0x303   :  { %v9847_v61 = vpop.f32.mrb[3].mxu1  ;;  %v9876_v5 = vadd.f32 %v9868_v36, %v9845_v38  ;;  %v9875_v0 = vadd.f32 %v9868_v36, %v9333_v53 }
 0x304   :  { %v9882_v63 = vmax.f32 %v9874_v60, 0.0  ;;  %v9877_v8 = vadd.f32 %v9868_v36, %v9847_v61 }
 0x305   :  { %v9884_v44 = vmax.f32 %v9876_v5, 0.0  ;;  %v9883_v10 = vmax.f32 %v9875_v0, 0.0  ;;  %v24910_v5 = vld [vmem:[%s34088_s5 + $0x20] sm:$0xff] }
 0x306   :  { %9894 = vrot.lane.b32.xlu1 %v9880_v9, %s27757_s25  ;;  %9888 = vrot.lane.b32.xlu0 %v9882_v63, %s27757_s25  ;;  %v9885_v19 = vmax.f32 %v9877_v8, 0.0  ;;  %v10072_v7 = vsel %vm10070_vm10, %v24910_v5, 0  ;;  %v22147_v5 = vld [vmem:[%s34090_s6 + $0x8] sm:$0xff] }
 0x30a   :  { %9890 = vrot.lane.b32.xlu1 %v9879_v6, %s27757_s25  ;;  %9896 = vrot.lane.b32.xlu0 %v9884_v44, %s27757_s25 }
 0x30e   :  { %9898 = vrot.lane.b32.xlu1 %v9881_v29, %s27757_s25  ;;  %9892 = vrot.lane.b32.xlu0 %v9883_v10, %s27757_s25 }
 0x312   :  { %9900 = vrot.lane.b32.xlu0 %v9885_v19, %s27757_s25  ;;  %s27763_s25 = smov 34  }
 0x374   :  { %v9887_v24 = vpop.permute.xlu1 %9886 }
 0x378   :  { %v9895_v25 = vpop.permute.xlu1 %9894  ;;  %v9889_v26 = vpop.permute.xlu0 %9888 }
 0x37c   :  { %v9891_v52 = vpop.permute.xlu1 %9890  ;;  %v9897_v11 = vpop.permute.xlu0 %9896 }
 0x37d   :  { %v9906_v4 = vsel %vm5478_vm6, %v9887_v24, %v9891_v52  ;;  %v9904_v13 = vsel %vm5478_vm6, %v9891_v52, %v9895_v25 }
 0x37e   :  { %v9910_v3 = vmax.f32 %v9878_v59, %v9906_v4  ;;  %v9911_v47 = vmax.f32 %v9879_v6, %v9904_v13 }
 0x380   :  { %9918 = vrot.lane.b32.xlu1 %v9910_v3, %s27759_s21  ;;  %v9899_v49 = vpop.permute.xlu1 %9898  ;;  %v9893_v20 = vpop.permute.xlu0 %9892 }
 0x381   :  { %v9907_v43 = vsel %vm5478_vm6, %v9889_v26, %v9893_v20  ;;  %v9902_v12 = vsel %vm5478_vm6, %v9895_v25, %v9899_v49  ;;  %v9905_v50 = vsel %vm5478_vm6, %v9893_v20, %v9897_v11  ;;  %v9908_v32 = vsel %vm5478_vm6, %v9899_v49, %v9887_v24  ;;  %v24912_v25 = vld [vmem:[%s34088_s5 + $0x30] sm:$0xff] }
 0x382   :  { %v9914_v34 = vmax.f32 %v9882_v63, %v9907_v43  ;;  %v9912_v23 = vmax.f32 %v9880_v9, %v9902_v12  ;;  %v9915_v37 = vmax.f32 %v9883_v10, %v9905_v50  ;;  %v9913_v39 = vmax.f32 %v9881_v29, %v9908_v32  ;;  %v29374_v9 = vld [vmem:[%s34089_s2 + $0x4] sm:$0xf]  ;;  %v24913_v43 = vld [vmem:[%s34088_s5 + $0x38] sm:$0xff] }
 0x383   :  { %v10044_v0 = vrot.slane %v29374_v9, %v27890_v17  ;;  %v29387_v29 = vand.u32 4294901760, %v10072_v7  ;;  %v10040_v52 = vrot.slane %v29374_v9, %v27886_v15  ;;  %v10078_v20 = vsel %vm10070_vm10, %v24912_v25, 0 }
 0x384   :  { %9922 = vrot.lane.b32.xlu1 %v9911_v47, %s27759_s21  ;;  %9920 = vrot.lane.b32.xlu0 %v9914_v34, %s27759_s21  ;;  %v9901_v28 = vpop.permute.xlu0 %9900 }
 0x385   :  { %v9903_v33 = vsel %vm5478_vm6, %v9897_v11, %v9901_v28  ;;  %v9909_v54 = vsel %vm5478_vm6, %v9901_v28, %v9889_v26  ;;  %v29405_v11 = vsub.f32 %v10072_v7, %v29387_v29 }
 0x386   :  { %v9916_v51 = vmax.f32 %v9884_v44, %v9903_v33  ;;  %v9917_v41 = vmax.f32 %v9885_v19, %v9909_v54  ;;  %v24911_v44 = vld [vmem:[%s34088_s5 + $0x28] sm:$0xff]  ;;  %v29438_v33 = vand.u32 4294901760, %v10078_v20 }
 0x387   :  { %v10075_v19 = vsel %vm10070_vm10, %v24911_v44, 0 }
 0x388   :  { %9926 = vrot.lane.b32.xlu1 %v9912_v23, %s27759_s21  ;;  %9924 = vrot.lane.b32.xlu0 %v9915_v37, %s27759_s21  ;;  %v29407_v4 = vand.u32 4294901760, %v10075_v19  ;;  %34454 = vst [vmem:[#allocation15_spill] sm:$0xff] %v29438_v33 }
 0x38a   :  { %v29436_v32 = vsub.f32 %v10075_v19, %v29407_v4  ;;  %v24328_v19 = vld [vmem:[%s34091_s9] sm:$0xff] }
 0x38c   :  { %9930 = vrot.lane.b32.xlu1 %v9913_v39, %s27759_s21  ;;  %9928 = vrot.lane.b32.xlu0 %v9916_v51, %s27759_s21 }
 0x390   :  { %9932 = vrot.lane.b32.xlu0 %v9917_v41, %s27759_s21  ;;  %s27764_s21 = smov 30  }
 0x3f2   :  { %v9919_v40 = vpop.permute.xlu1 %9918 }
 0x3f6   :  { %v9923_v46 = vpop.permute.xlu1 %9922  ;;  %v9921_v31 = vpop.permute.xlu0 %9920 }
 0x3f7   :  { %v9938_v56 = vsel %vm7672_vm8, %v9919_v40, %v9923_v46 }
 0x3f8   :  { %v29264_v35 = vmax.f32 %v9910_v3, %v9938_v56 }
 0x3fa   :  { %34446 = vst [vmem:[#allocation7_spill] sm:$0xff] %v29264_v35  ;;  %10009 = vrot.lane.b32.xlu1 %v29264_v35, %s27762_s3  ;;  %v9927_v27 = vpop.permute.xlu1 %9926  ;;  %v9925_v30 = vpop.permute.xlu0 %9924 }
 0x3fb   :  { %v9936_v57 = vsel %vm7672_vm8, %v9923_v46, %v9927_v27  ;;  %v9939_v22 = vsel %vm7672_vm8, %v9921_v31, %v9925_v30 }
 0x3fc   :  { %v29272_v55 = vmax.f32 %v9911_v47, %v9936_v57  ;;  %v29274_v21 = vmax.f32 %v9914_v34, %v9939_v22 }
 0x3fe   :  { %34447 = vst [vmem:[#allocation8_spill] sm:$0xff] %v29272_v55  ;;  %34448 = vst [vmem:[#allocation9_spill] sm:$0xff] %v29274_v21  ;;  %10013 = vrot.lane.b32.xlu1 %v29272_v55, %s27762_s3  ;;  %v9931_v42 = vpop.permute.xlu1 %9930  ;;  %10011 = vrot.lane.b32.xlu0 %v29274_v21, %s27762_s3  ;;  %v9929_v58 = vpop.permute.xlu0 %9928 }
 0x3ff   :  { %v9940_v45 = vsel %vm7672_vm8, %v9931_v42, %v9919_v40  ;;  %v9937_v36 = vsel %vm7672_vm8, %v9925_v30, %v9929_v58  ;;  %v9934_v53 = vsel %vm7672_vm8, %v9927_v27, %v9931_v42  ;;  %v22148_v42 = vld [vmem:[%s34090_s6 + $0x10] sm:$0xff] }
 0x400   :  { %v29284_v59 = vmax.f32 %v9913_v39, %v9940_v45  ;;  %v29286_v1 = vmax.f32 %v9915_v37, %v9937_v36  ;;  %v29305_v61 = vmax.f32 %v9912_v23, %v9934_v53  ;;  %v22146_v23 = vld [vmem:[%s34090_s6] sm:$0xff]  ;;  %v29433_v37 = vand.u32 4294901760, %v29405_v11 }
 0x401   :  { %v10081_v39 = vsel %vm10070_vm10, %v24913_v43, 0  ;;  %v29465_v45 = vand.u32 4294901760, %v29436_v32  ;;  %v29468_v36 = vsub.f32 %v10078_v20, %v29438_v33  ;;  %v29511_v43 = vld [vmem:[%s34089_s2] sm:$0xf] }
 0x402   :  { %34449 = vst [vmem:[#allocation10_spill] sm:$0xff] %v29284_v59  ;;  %34450 = vst [vmem:[#allocation11_spill] sm:$0xff] %v29286_v1  ;;  %10021 = vrot.lane.b32.xlu1 %v29284_v59, %s27762_s3  ;;  %10015 = vrot.lane.b32.xlu0 %v29286_v1, %s27762_s3  ;;  %v9933_v48 = vpop.permute.xlu0 %9932  ;;  %v29455_v57 = vand.u32 4294901760, %v10081_v39 }
 0x403   :  { %v9941_v60 = vsel %vm7672_vm8, %v9933_v48, %v9921_v31  ;;  %34452 = vst [vmem:[#allocation13_spill] sm:$0xff] %v29305_v61  ;;  %v9935_v62 = vsel %vm7672_vm8, %v9929_v58, %v9933_v48  ;;  %v10155_v58 = vsub.f32 %v29405_v11, %v29433_v37  ;;  %34457 = vst [vmem:[#allocation18_spill] sm:$0xff] %v29465_v45 }
 0x404   :  { %v29294_v38 = vmax.f32 %v9917_v41, %v9941_v60  ;;  %v29312_v63 = vmax.f32 %v9916_v51, %v9935_v62 }
 0x406   :  { %34451 = vst [vmem:[#allocation12_spill] sm:$0xff] %v29294_v38  ;;  %9950 = vrot.lane.b32.xlu1 %v29264_v35, %s27763_s25  ;;  %10023 = vrot.lane.b32.xlu0 %v29294_v38, %s27762_s3  ;;  %34453 = vst [vmem:[#allocation14_spill] sm:$0xff] %v29312_v63 }
 0x40a   :  { %9954 = vrot.lane.b32.xlu1 %v29272_v55, %s27763_s25  ;;  %9952 = vrot.lane.b32.xlu0 %v29274_v21, %s27763_s25 }
 0x40e   :  { %9962 = vrot.lane.b32.xlu1 %v29284_v59, %s27763_s25  ;;  %9956 = vrot.lane.b32.xlu0 %v29286_v1, %s27763_s25 }
 0x412   :  { %10017 = vrot.lane.b32.xlu1 %v29305_v61, %s27762_s3  ;;  %9964 = vrot.lane.b32.xlu0 %v29294_v38, %s27763_s25 }
 0x416   :  { %12647 = vrot.lane.b32.xlu1 %v29264_v35, %s27764_s21  ;;  %10019 = vrot.lane.b32.xlu0 %v29312_v63, %s27762_s3 }
 0x41a   :  { %12651 = vrot.lane.b32.xlu1 %v29272_v55, %s27764_s21  ;;  %12649 = vrot.lane.b32.xlu0 %v29274_v21, %s27764_s21 }
 0x41e   :  { %12659 = vrot.lane.b32.xlu1 %v29284_v59, %s27764_s21  ;;  %12653 = vrot.lane.b32.xlu0 %v29286_v1, %s27764_s21 }
 0x422   :  { %9958 = vrot.lane.b32.xlu1 %v29305_v61, %s27763_s25  ;;  %12661 = vrot.lane.b32.xlu0 %v29294_v38, %s27764_s21 }
 0x426   :  { %14012 = vrot.lane.b32.xlu1 %v29264_v35, %s27765_s26  ;;  %9960 = vrot.lane.b32.xlu0 %v29312_v63, %s27763_s25 }
 0x42a   :  { %14016 = vrot.lane.b32.xlu1 %v29272_v55, %s27765_s26  ;;  %14014 = vrot.lane.b32.xlu0 %v29274_v21, %s27765_s26 }
 0x42e   :  { %14024 = vrot.lane.b32.xlu1 %v29284_v59, %s27765_s26  ;;  %14018 = vrot.lane.b32.xlu0 %v29286_v1, %s27765_s26 }
 0x432   :  { %12655 = vrot.lane.b32.xlu1 %v29305_v61, %s27764_s21  ;;  %14026 = vrot.lane.b32.xlu0 %v29294_v38, %s27765_s26 }
 0x436   :  { %14020 = vrot.lane.b32.xlu1 %v29305_v61, %s27765_s26  ;;  %12657 = vrot.lane.b32.xlu0 %v29312_v63, %s27764_s21 }
 0x43a   :  { %16690 = vrot.lane.b32.xlu1 %v29272_v55, %s27766_s27  ;;  %14022 = vrot.lane.b32.xlu0 %v29312_v63, %s27765_s26 }
 0x43e   :  { %16694 = vrot.lane.b32.xlu1 %v29305_v61, %s27766_s27  ;;  %16692 = vrot.lane.b32.xlu0 %v29286_v1, %s27766_s27 }
 0x442   :  { %16686 = vrot.lane.b32.xlu1 %v29264_v35, %s27766_s27  ;;  %16696 = vrot.lane.b32.xlu0 %v29312_v63, %s27766_s27 }
 0x446   :  { %18055 = vrot.lane.b32.xlu1 %v29272_v55, %s27767_s28  ;;  %16688 = vrot.lane.b32.xlu0 %v29274_v21, %s27766_s27 }
 0x44a   :  { %18059 = vrot.lane.b32.xlu1 %v29305_v61, %s27767_s28  ;;  %18057 = vrot.lane.b32.xlu0 %v29286_v1, %s27767_s28 }
 0x44e   :  { %18051 = vrot.lane.b32.xlu1 %v29264_v35, %s27767_s28  ;;  %18061 = vrot.lane.b32.xlu0 %v29312_v63, %s27767_s28 }
 0x452   :  { %16698 = vrot.lane.b32.xlu1 %v29284_v59, %s27766_s27  ;;  %18053 = vrot.lane.b32.xlu0 %v29274_v21, %s27767_s28 }
 0x456   :  { %19420 = vrot.lane.b32.xlu1 %v29272_v55, %s27768_s29  ;;  %16700 = vrot.lane.b32.xlu0 %v29294_v38, %s27766_s27 }
 0x45a   :  { %19424 = vrot.lane.b32.xlu1 %v29305_v61, %s27768_s29  ;;  %19422 = vrot.lane.b32.xlu0 %v29286_v1, %s27768_s29 }
 0x45e   :  { %19416 = vrot.lane.b32.xlu1 %v29264_v35, %s27768_s29  ;;  %19426 = vrot.lane.b32.xlu0 %v29312_v63, %s27768_s29 }
 0x462   :  { %18063 = vrot.lane.b32.xlu1 %v29284_v59, %s27767_s28  ;;  %19418 = vrot.lane.b32.xlu0 %v29274_v21, %s27768_s29 }
 0x466   :  { %20785 = vrot.lane.b32.xlu1 %v29272_v55, %s27769_s30  ;;  %18065 = vrot.lane.b32.xlu0 %v29294_v38, %s27767_s28 }
 0x46a   :  { %20789 = vrot.lane.b32.xlu1 %v29305_v61, %s27769_s30  ;;  %20787 = vrot.lane.b32.xlu0 %v29286_v1, %s27769_s30  ;;  %v34461_v61 = vmov 0.0  }
 0x46c   :  { %v10010_v6 = vpop.permute.xlu1 %10009 }
 0x46e   :  { %20781 = vrot.lane.b32.xlu1 %v29264_v35, %s27769_s30  ;;  %20791 = vrot.lane.b32.xlu0 %v29312_v63, %s27769_s30  ;;  %v9992_v35 = vrot.slane %v29511_v43, %v27888_v16 }
 0x470   :  { %v29389_v8 = vpop.permute.xlu1 %10013  ;;  %v10012_v10 = vpop.permute.xlu0 %10011 }
 0x471   :  { %v10030_v24 = vsel %vm10025_vm11, %v10010_v6, %v29389_v8 }
 0x472   :  { %v10058_v26 = vmul.f32 %v10044_v0, %v10030_v24  ;;  %19428 = vrot.lane.b32.xlu1 %v29284_v59, %s27768_s29  ;;  %20783 = vrot.lane.b32.xlu0 %v29274_v21, %s27769_s30  ;;  %v29493_v24 = vand.u32 4294901760, %v10155_v58 }
 0x474   :  { %v10083_v3 = vand.u32 4294901760, %v10058_v26  ;;  %v29409_v13 = vpop.permute.xlu1 %10021  ;;  %v29411_v49 = vpop.permute.xlu0 %10015 }
 0x475   :  { %v10032_v47 = vsel %vm10025_vm11, %v29409_v13, %v10010_v6  ;;  %v10031_v34 = vsel %vm10025_vm11, %v10012_v10, %v29411_v49 }
 0x476   :  { %v29423_v12 = vsub.f32 %v10058_v26, %v10083_v3  ;;  %v10057_v50 = vmul.f32 %v10040_v52, %v10032_v47  ;;  %v10062_v28 = vmul.f32 %v10044_v0, %v10031_v34  ;;  %20793 = vrot.lane.b32.xlu1 %v29284_v59, %s27769_s30  ;;  %19430 = vrot.lane.b32.xlu0 %v29294_v38, %s27768_s29 }
 0x477   :  { %v10166_v26 = vsub.f32 %v29436_v32, %v29465_v45 }
 0x478   :  { %v10085_v51 = vand.u32 4294901760, %v10057_v50  ;;  %v10087_v54 = vand.u32 4294901760, %v10062_v28  ;;  %v29441_v41 = vpop.permute.xlu1 %9950  ;;  %v29443_v40 = vpop.permute.xlu0 %10023  ;;  %v34098_v31 = vand.u32 4294901760, %v29423_v12 }
 0x479   :  { %34455 = vst [vmem:[#allocation16_spill] sm:$0xff] %v29441_v41  ;;  %v10033_v46 = vsel %vm10025_vm11, %v29443_v40, %v10012_v10  ;;  %v29488_v10 = vsub.f32 %v10081_v39, %v29455_v57 }
 0x47a   :  { %v29449_v56 = vsub.f32 %v10057_v50, %v10085_v51  ;;  %v29451_v27 = vsub.f32 %v10062_v28, %v10087_v54  ;;  %v10061_v30 = vmul.f32 %v10040_v52, %v10033_v46  ;;  %22152 = vperm.xlu1 %27747, %v22146_v23   ;;  %20795 = vrot.lane.b32.xlu0 %v29294_v38, %s27769_s30  ;;  %v29501_v52 = vand.u32 4294901760, %v29468_v36  ;;  %v22149_v50 = vld [vmem:[%s34090_s6 + $0x18] sm:$0xff] }
 0x47b   :  { %v29457_v22 = vpack.c.bf16 %v10087_v54, %v10083_v3  ;;  %v10199_v7 = vsub.f32 %v29423_v12, %v34098_v31  ;;  %v9980_v28 = vrot.slane %v29511_v43, %v27886_v15  ;;  %v10048_v46 = vrot.slane %v29374_v9, %v27892_v18 }
 0x47c   :  { %v34096_v48 = vand.u32 4294901760, %v29449_v56  ;;  %v10089_v60 = vand.u32 4294901760, %v10061_v30  ;;  %v29471_v53 = vpop.permute.xlu1 %9954  ;;  %v29473_v62 = vpop.permute.xlu0 %9952  ;;  %v34097_v6 = vand.u32 4294901760, %v29451_v27  ;;  %34459 = vst [vmem:[#allocation20_spill] sm:$0xff] %v29501_v52 }
 0x47d   :  { %34456 = vst [vmem:[#allocation17_spill] sm:$0xff] %v29457_v22  ;;  %34458 = vst [vmem:[#allocation19_spill] sm:$0xff] %v29471_v53  ;;  %25581 = vmatprep.subr.bf16.mxu1 %v29457_v22  ;;  %v10200_v39 = vand.u32 4294901760, %v10199_v7 }
 0x47e   :  { %v29483_v44 = vpack.c.bf16 %v10089_v60, %v10085_v51  ;;  %v29485_v0 = vsub.f32 %v10061_v30, %v10089_v60  ;;  %22162 = vperm.xlu1 %27747, %v22148_v42   ;;  %22157 = vperm.xlu0 %27746, %v22147_v5   ;;  %v10211_v25 = vsub.f32 %v29451_v27, %v34097_v6  ;;  %v29535_v42 = vand.u32 4294901760, %v29488_v10 }
 0x47f   :  { %v10205_v3 = vsub.f32 %v29449_v56, %v34096_v48  ;;  %v10052_v30 = vrot.slane %v29374_v9, %v27888_v16  ;;  %v29538_v60 = vand.u32 4294901760, %v10166_v26  ;;  %v10177_v5 = vsub.f32 %v29468_v36, %v29501_v52 }
 0x480   :  { %v34095_v20 = vand.u32 4294901760, %v29485_v0  ;;  %v29513_v47 = vpop.permute.xlu1 %9962  ;;  %25583 = vmatpush1.bf16.msra.mxu1 %v29483_v44  ;;  %v29516_v34 = vpop.permute.xlu0 %9956  ;;  %v10212_v51 = vand.u32 4294901760, %v10211_v25  ;;  %34460 = vst [vmem:[#allocation21_spill] sm:$0xff] %v29535_v42  ;;  %v24329_v25 = vld [vmem:[%s34091_s9 + $0x8] sm:$0xff] }
 0x481   :  { %v9973_v23 = vsel %vm9966_vm12, %v29513_v47, %v29441_v41  ;;  %v10206_v9 = vand.u32 4294901760, %v10205_v3  ;;  %v10188_v3 = vsub.f32 %v29488_v10, %v29535_v42 }
 0x482   :  { %v10217_v54 = vsub.f32 %v29485_v0, %v34095_v20  ;;  %24332 = vperm.xlu1 %27747, %v24328_v19   ;;  %22167 = vperm.xlu0 %27746, %v22149_v50   ;;  %v25584_v58 = vpack.c.bf16 %v10212_v51, %v10200_v39  ;;  %v9997_v50 = vmul.f32 %v9980_v28, %v9973_v23 }
 0x483   :  { %10157 = vmatmul.mubr.f32.vlgmr.msra.gmra.mrb[4].mxu1 %v29493_v24 }
 0x484   :  { %v10018_v7 = vpop.permute.xlu1 %10017  ;;  %v29542_v19 = vpop.permute.xlu0 %9964  ;;  %10162 = vmatprep.mubr.f32.mxu1 %v34099_v2  ;;  %v10218_v20 = vand.u32 4294901760, %v10217_v54  ;;  %25585 = vmatprep.subr.bf16.mxu0 %v25584_v58  ;;  %v29561_v54 = vand.u32 4294901760, %v10177_v5  ;;  %v25588_v2 = vpack.c.bf16 %v29451_v27, %v29423_v12 }
 0x485   :  { %v10026_v26 = vsel %vm10025_vm11, %v10018_v7, %v29409_v13  ;;  %v10028_v39 = vsel %vm10025_vm11, %v29389_v8, %v10018_v7  ;;  %v9974_v51 = vsel %vm9966_vm12, %v29542_v19, %v29473_v62 }
 0x486   :  { %v10059_v48 = vmul.f32 %v10048_v46, %v10028_v39  ;;  %v10060_v6 = vmul.f32 %v10052_v30, %v10026_v26  ;;  %v10001_v23 = vmul.f32 %v9980_v28, %v9974_v51  ;;  %24337 = vperm.xlu0 %27746, %v24329_v25   ;;  %v25586_v13 = vpack.c.bf16 %v10218_v20, %v10206_v9 }
 0x487   :  { %10168 = vmatmul.mubr.f32.gmra.mrb[6].mxu1 %v29538_v60  ;;  %v11373_v26 = vand.u32 4294901760, %v9997_v50  ;;  %v29577_v51 = vand.u32 4294901760, %v10188_v3 }
 0x488   :  { %v10721_v31 = vand.u32 4294901760, %v10060_v6  ;;  %v10723_v8 = vand.u32 4294901760, %v10059_v48  ;;  %v12648_v58 = vpop.permute.xlu1 %12647  ;;  %v10020_v7 = vpop.permute.xlu0 %10019  ;;  %10173 = vmatprep.mubr.f32.mxu1 %v34461_v61  ;;  %v11377_v39 = vand.u32 4294901760, %v10001_v23  ;;  %25587 = vmatpush1.bf16.msra.mxu0 %v25586_v13 }
 0x489   :  { %v10027_v20 = vsel %vm10025_vm11, %v10020_v7, %v29443_v40  ;;  %v10029_v28 = vsel %vm10025_vm11, %v29411_v49, %v10020_v7  ;;  %25589 = vmatprep.subr.bf16.mxu0 %v25588_v2  ;;  %v25590_v40 = vpack.c.bf16 %v29485_v0, %v29449_v56 }
 0x48a   :  { %v29573_v5 = vsub.f32 %v10060_v6, %v10721_v31  ;;  %v29575_v25 = vsub.f32 %v10059_v48, %v10723_v8  ;;  %v10063_v9 = vmul.f32 %v10048_v46, %v10029_v28  ;;  %v29579_v63 = vpack.c.bf16 %v11377_v39, %v11373_v26  ;;  %v29611_v46 = vld [vmem:[%s34089_s2 + $0x8] sm:$0xf] }
 0x48b   :  { %v29581_v59 = vsub.f32 %v10001_v23, %v11377_v39  ;;  %v10064_v13 = vmul.f32 %v10052_v30, %v10027_v20  ;;  %10179 = vmatmul.mubr.f32.gmra.mrb[8].mxu1 %v29561_v54  ;;  %10282 = vmatmul.mubr.f32.vlgmr.msra.gmra.mrb[4].mxu0 %v29387_v29  ;;  %v29598_v23 = vsub.f32 %v9997_v50, %v11373_v26 }
 0x48c   :  { %34462 = vst [vmem:[#allocation22_spill] sm:$0xff] %v29579_v63  ;;  %v34107_v49 = vand.u32 4294901760, %v29575_v25  ;;  %v10727_v6 = vand.u32 4294901760, %v10063_v9  ;;  %v29588_v48 = vpop.permute.xlu1 %12651  ;;  %v12650_v2 = vpop.permute.xlu0 %12649  ;;  %10184 = vmatprep.mubr.f32.mxu1 %v34461_v61  ;;  %25591 = vmatpush1.bf16.msra.mxu0 %v25590_v40  ;;  %v12678_v26 = vrot.slane %v29611_v46, %v27886_v15 }
 0x48d   :  { %34463 = vst [vmem:[#allocation23_spill] sm:$0xff] %v29581_v59  ;;  %v10725_v3 = vand.u32 4294901760, %v10064_v13  ;;  %v29595_v30 = vsel %vm12663_vm13, %v12648_v58, %v29588_v48  ;;  %10287 = vmatprep.mubr.f32.mxu0 %v34461_v61  ;;  %34464 = vst [vmem:[#allocation24_spill] sm:$0xff] %v29598_v23  ;;  %25593 = vmatprep.subr.bf16.mxu0 %v29457_v22  ;;  %v34468_v21 = vand.u32 4294901760, %v29581_v59 }
 0x48e   :  { %v29600_v7 = vpack.c.bf16 %v10727_v6, %v10723_v8  ;;  %v29602_v39 = vsub.f32 %v10063_v9, %v10727_v6  ;;  %v10843_v50 = vsub.f32 %v29575_v25, %v34107_v49 }
 0x48f   :  { %v29606_v28 = vsub.f32 %v10064_v13, %v10725_v3  ;;  %10190 = vmatmul.mubr.f32.gmra.mrb[10].mxu1 %v29577_v51  ;;  %v29614_v40 = vpack.c.bf16 %v10725_v3, %v10721_v31  ;;  %10289 = vmatmul.mubr.f32.gmra.mrb[6].mxu0 %v29407_v4  ;;  %v34466_v31 = vand.u32 4294901760, %v29573_v5  ;;  %v11505_v55 = vsub.f32 %v29581_v59, %v34468_v21 }
 0x490   :  { %34465 = vst [vmem:[#allocation25_spill] sm:$0xff] %v29600_v7  ;;  %v29623_v9 = vpop.permute.xlu1 %12659  ;;  %v29625_v13 = vpop.permute.xlu0 %12653  ;;  %10789 = vmatprep.mubr.f32.mxu1 %v34461_v61  ;;  %10294 = vmatprep.mubr.f32.mxu0 %v34461_v61  ;;  %v34467_v38 = vand.u32 4294901760, %v29602_v39 }
 0x491   :  { %v10837_v6 = vsub.f32 %v29573_v5, %v34466_v31  ;;  %v12670_v3 = vsel %vm12663_vm13, %v29623_v9, %v12648_v58  ;;  %25605 = vmatprep.subr.bf16.mxu1 %v29614_v40  ;;  %v29638_v49 = vsel %vm12663_vm13, %v12650_v2, %v29625_v13  ;;  %v34127_v20 = vand.u32 4294901760, %v29606_v28 }
 0x492   :  { %v10855_v31 = vsub.f32 %v29602_v39, %v34467_v38  ;;  %25607 = vmatpush1.bf16.msra.mxu1 %v29600_v7  ;;  %v9988_v58 = vrot.slane %v29511_v43, %v27892_v18  ;;  %v29657_v1 = vmul.f32 %v12678_v26, %v12670_v3  ;;  %v10844_v7 = vand.u32 4294901760, %v10843_v50 }
 0x493   :  { %v10849_v8 = vsub.f32 %v29606_v28, %v34127_v20  ;;  %10296 = vmatmul.mubr.f32.gmra.mrb[8].mxu0 %v29438_v33  ;;  %v10838_v42 = vand.u32 4294901760, %v10837_v6  ;;  %v34469_v50 = vand.u32 4294901760, %v29598_v23  ;;  %v25612_v33 = vpack.c.bf16 %v29606_v28, %v29573_v5 }
 0x494   :  { %v9959_v38 = vpop.permute.xlu1 %9958  ;;  %v29660_v63 = vpop.permute.xlu0 %12661  ;;  %v10856_v52 = vand.u32 4294901760, %v10855_v31  ;;  %10301 = vmatprep.mubr.f32.mxu0 %v34461_v61 }
 0x495   :  { %v9967_v45 = vsel %vm9966_vm12, %v9959_v38, %v29513_v47  ;;  %v9969_v21 = vsel %vm9966_vm12, %v29471_v53, %v9959_v38  ;;  %10795 = vmatmul.mubr.f32.vlgmr.msra.gmra.mrb[12].mxu1 %v29493_v24  ;;  %v12671_v3 = vsel %vm12663_vm13, %v29660_v63, %v12650_v2  ;;  %v10850_v20 = vand.u32 4294901760, %v10849_v8 }
 0x496   :  { %v11493_v6 = vsub.f32 %v29598_v23, %v34469_v50  ;;  %v9999_v31 = vmul.f32 %v9988_v58, %v9969_v21  ;;  %v10000_v41 = vmul.f32 %v9992_v35, %v9967_v45  ;;  %10800 = vmatprep.mubr.f32.mxu1 %v34461_v61  ;;  %v29677_v47 = vmul.f32 %v12678_v26, %v12671_v3 }
 0x497   :  { %v25608_v38 = vpack.c.bf16 %v10850_v20, %v10838_v42  ;;  %v25610_v53 = vpack.c.bf16 %v10856_v52, %v10844_v7  ;;  %10303 = vmatmul.mubr.f32.gmra.mrb[10].mxu0 %v29455_v57  ;;  %v11506_v50 = vand.u32 4294901760, %v11505_v55  ;;  %v34135_v45 = vand.u32 4294901760, %v29657_v1 }
 0x498   :  { %v12009_v24 = vand.u32 4294901760, %v10000_v41  ;;  %v12011_v22 = vand.u32 4294901760, %v9999_v31  ;;  %v14013_v2 = vpop.permute.xlu1 %14012  ;;  %v9961_v8 = vpop.permute.xlu0 %9960  ;;  %v34134_v21 = vand.u32 4294901760, %v29677_v47  ;;  %v11494_v26 = vand.u32 4294901760, %v11493_v6  ;;  %10381 = vmatprep.mubr.f32.mxu0 %v34461_v61 }
 0x499   :  { %10806 = vmatmul.mubr.f32.gmra.mrb[14].mxu1 %v29538_v60  ;;  %25609 = vmatprep.subr.bf16.mxu1 %v25608_v38  ;;  %v9968_v52 = vsel %vm9966_vm12, %v9961_v8, %v29542_v19  ;;  %v9970_v42 = vsel %vm9966_vm12, %v29516_v34, %v9961_v8  ;;  %v34473_v19 = vand.u32 4294901760, %v29423_v12 }
 0x49a   :  { %v29692_v7 = vsub.f32 %v10000_v41, %v12009_v24  ;;  %v29694_v20 = vsub.f32 %v9999_v31, %v12011_v22  ;;  %v10003_v55 = vmul.f32 %v9988_v58, %v9970_v42  ;;  %25611 = vmatpush1.bf16.msra.mxu1 %v25610_v53  ;;  %v29700_v60 = vpack.c.bf16 %v34134_v21, %v34135_v45 }
 0x49b   :  { %v10004_v3 = vmul.f32 %v9992_v35, %v9968_v52  ;;  %25613 = vmatprep.subr.bf16.mxu1 %v25612_v33  ;;  %v34474_v41 = vand.u32 4294901760, %v29451_v27  ;;  %10384 = vmatmul.mubr.f32.vlgmr.msra.gmra.mrb[4].mxu0 %v29405_v11  ;;  %v29712_v8 = vpack.c.bf16 %v11506_v50, %v11494_v26  ;;  %v12682_v52 = vrot.slane %v29611_v46, %v27890_v17 }
 0x49c   :  { %34470 = vst [vmem:[#allocation26_spill] sm:$0xff] %v29692_v7  ;;  %34471 = vst [vmem:[#allocation27_spill] sm:$0xff] %v29694_v20  ;;  %v34133_v31 = vand.u32 4294901760, %v29694_v20  ;;  %v12015_v58 = vand.u32 4294901760, %v10003_v55  ;;  %10811 = vmatprep.mubr.f32.mxu1 %v34461_v61  ;;  %v29710_v53 = vpop.permute.xlu1 %14016  ;;  %v14015_v6 = vpop.permute.xlu0 %14014  ;;  %v34136_v35 = vand.u32 4294901760, %v29692_v7  ;;  %25595 = vmatpush1.bf16.msra.mxu0 %v29483_v44 }
 0x49d   :  { %34472 = vst [vmem:[#allocation28_spill] sm:$0xff] %v29700_v60  ;;  %v25596_v38 = vpack.c.bf16 %v34474_v41, %v34473_v19  ;;  %34475 = vst [vmem:[#allocation29_spill] sm:$0xff] %v29712_v8  ;;  %v12013_v33 = vand.u32 4294901760, %v10004_v3  ;;  %v29719_v12 = vsel %vm14028_vm14, %v14013_v2, %v29710_v53  ;;  %10817 = vmatmul.mubr.f32.gmra.mrb[16].mxu1 %v29561_v54  ;;  %v29735_v19 = vld [vmem:[%s34089_s2 + $0xc] sm:$0xf]  ;;  %10389 = vmatprep.mubr.f32.mxu0 %v34461_v61 }
 0x49e   :  { %v29726_v50 = vpack.c.bf16 %v12015_v58, %v12011_v22  ;;  %v29728_v42 = vsub.f32 %v10003_v55, %v12015_v58  ;;  %10822 = vmatprep.mubr.f32.mxu1 %v34461_v61  ;;  %v12131_v22 = vsub.f32 %v29694_v20, %v34133_v31  ;;  %v29769_v21 = vmul.f32 %v12682_v52, %v29595_v30 }
 0x49f   :  { %25597 = vmatprep.subr.bf16.mxu0 %v25596_v38  ;;  %v29730_v26 = vsub.f32 %v10004_v3, %v12013_v33  ;;  %v29739_v54 = vpack.c.bf16 %v12013_v33, %v12009_v24  ;;  %10392 = vmatmul.mubr.f32.gmra.mrb[6].mxu0 %v29436_v32  ;;  %v14043_v3 = vrot.slane %v29735_v19, %v27886_v15 }
 0x4a0   :  { %34476 = vst [vmem:[#allocation30_spill] sm:$0xff] %v29726_v50  ;;  %34477 = vst [vmem:[#allocation31_spill] sm:$0xff] %v29728_v42  ;;  %v34138_v55 = vand.u32 4294901760, %v29728_v42  ;;  %v29748_v41 = vpop.permute.xlu1 %14024  ;;  %v29750_v38 = vpop.permute.xlu0 %14018  ;;  %v12125_v24 = vsub.f32 %v29692_v7, %v34136_v35  ;;  %10397 = vmatprep.mubr.f32.mxu0 %v34461_v61  ;;  %v29778_v45 = vmul.f32 %v12682_v52, %v29638_v49  ;;  %v12132_v8 = vand.u32 4294901760, %v12131_v22 }
 0x4a1   :  { %34478 = vst [vmem:[#allocation32_spill] sm:$0xff] %v29730_v26  ;;  %34479 = vst [vmem:[#allocation33_spill] sm:$0xff] %v29739_v54  ;;  %v14035_v58 = vsel %vm14028_vm14, %v29748_v41, %v14013_v2  ;;  %10828 = vmatmul.mubr.f32.gmra.mrb[18].mxu1 %v29577_v51  ;;  %v29762_v33 = vsel %vm14028_vm14, %v14015_v6, %v29750_v38  ;;  %v12136_v27 = vand.u32 4294901760, %v29730_v26  ;;  %v34481_v49 = vand.u32 4294901760, %v29598_v23 }
 0x4a2   :  { %34480 = vst [vmem:[#allocation34_spill] sm:$0xff] %v29748_v41  ;;  %v12143_v2 = vsub.f32 %v29728_v42, %v34138_v55  ;;  %10918 = vmatprep.mubr.f32.mxu1 %v34461_v61  ;;  %v12686_v51 = vrot.slane %v29611_v46, %v27892_v18  ;;  %v25614_v35 = vpack.c.bf16 %v29602_v39, %v29575_v25  ;;  %v34482_v52 = vand.u32 4294901760, %v29581_v59 }
 0x4a3   :  { %v12137_v31 = vsub.f32 %v29730_v26, %v12136_v27  ;;  %v29785_v60 = vmul.f32 %v14043_v3, %v14035_v58  ;;  %10400 = vmatmul.mubr.f32.gmra.mrb[8].mxu0 %v29468_v36  ;;  %v12126_v22 = vand.u32 4294901760, %v12125_v24  ;;  %v12690_v30 = vrot.slane %v29611_v46, %v27888_v16 }
 0x4a4   :  { %v12656_v55 = vpop.permute.xlu1 %12655  ;;  %v29788_v50 = vpop.permute.xlu0 %14026  ;;  %v12144_v54 = vand.u32 4294901760, %v12143_v2  ;;  %v29794_v41 = vpack.c.bf16 %v34482_v52, %v34481_v49  ;;  %10405 = vmatprep.mubr.f32.mxu0 %v34461_v61  ;;  %v12724_v24 = vand.u32 4294901760, %v29778_v45 }
 0x4a5   :  { %v12666_v26 = vsel %vm12663_vm13, %v29588_v48, %v12656_v55  ;;  %10920 = vmatmul.mubr.f32.vlgmr.msra.gmra.mrb[12].mxu1 %v29387_v29  ;;  %v14036_v58 = vsel %vm14028_vm14, %v29788_v50, %v14015_v6  ;;  %v12138_v2 = vand.u32 4294901760, %v12137_v31  ;;  %v12664_v46 = vsel %vm12663_vm13, %v12656_v55, %v29623_v9 }
 0x4a6   :  { %34483 = vst [vmem:[#allocation35_spill] sm:$0xff] %v29794_v41  ;;  %v12697_v23 = vmul.f32 %v12686_v51, %v12666_v26  ;;  %25615 = vmatpush1.bf16.msra.mxu1 %v25614_v35  ;;  %v29807_v52 = vmul.f32 %v14043_v3, %v14036_v58  ;;  %10925 = vmatprep.mubr.f32.mxu1 %v34461_v61  ;;  %v34486_v3 = vand.u32 4294901760, %v29692_v7  ;;  %v34488_v55 = vand.u32 4294901760, %v29449_v56 }
 0x4a7   :  { %25617 = vmatprep.subr.bf16.mxu1 %v29614_v40  ;;  %v29811_v48 = vpack.c.bf16 %v12138_v2, %v12126_v22  ;;  %v29813_v6 = vpack.c.bf16 %v12144_v54, %v12132_v8  ;;  %10408 = vmatmul.mubr.f32.gmra.mrb[10].mxu0 %v29488_v10  ;;  %v14051_v31 = vrot.slane %v29735_v19, %v27892_v18  ;;  %v34489_v22 = vand.u32 4294901760, %v29485_v0 }
 0x4a8   :  { %v29822_v35 = vpop.permute.xlu1 %14020  ;;  %v12658_v26 = vpop.permute.xlu0 %12657  ;;  %v29826_v58 = vpack.c.bf16 %v12136_v27, %v34486_v3  ;;  %10482 = vmatprep.mubr.f32.mxu0 %v34461_v61  ;;  %v34490_v27 = vand.u32 4294901760, %v29657_v1  ;;  %v34492_v54 = vand.u32 4294901760, %v29677_v47  ;;  %v13360_v49 = vand.u32 4294901760, %v12697_v23 }
 0x4a9   :  { %34484 = vst [vmem:[#allocation36_spill] sm:$0xff] %v29811_v48  ;;  %34485 = vst [vmem:[#allocation37_spill] sm:$0xff] %v29813_v6  ;;  %10927 = vmatmul.mubr.f32.gmra.mrb[14].mxu1 %v29407_v4  ;;  %v12665_v9 = vsel %vm12663_vm13, %v12658_v26, %v29660_v63  ;;  %v25598_v2 = vpack.c.bf16 %v34489_v22, %v34488_v55  ;;  %v14031_v63 = vsel %vm14028_vm14, %v29710_v53, %v29822_v35 }
 0x4aa   :  { %34487 = vst [vmem:[#allocation38_spill] sm:$0xff] %v29826_v58  ;;  %v29842_v3 = vsub.f32 %v29657_v1, %v34490_v27  ;;  %v29847_v8 = vsub.f32 %v29677_v47, %v34492_v54  ;;  %10932 = vmatprep.mubr.f32.mxu1 %v34461_v61  ;;  %v34494_v56 = vand.u32 4294901760, %v29769_v21  ;;  %v12698_v1 = vmul.f32 %v12690_v30, %v12664_v46 }
 0x4ab   :  { %v34496_v55 = vand.u32 4294901760, %v29785_v60  ;;  %v34497_v22 = vand.u32 4294901760, %v29807_v52  ;;  %v12667_v54 = vsel %vm12663_vm13, %v29625_v13, %v12658_v26  ;;  %v9984_v53 = vrot.slane %v29511_v43, %v27890_v17  ;;  %10486 = vmatmul.mubr.f32.vlgmr.msra.gmra.mrb[4].mxu0 %v29433_v37  ;;  %v34501_v43 = vld [vmem:[#allocation15_spill] sm:$0xff] }
 0x4ac   :  { %34491 = vst [vmem:[#allocation39_spill] sm:$0xff] %v29842_v3  ;;  %34493 = vst [vmem:[#allocation40_spill] sm:$0xff] %v29847_v8  ;;  %v29857_v0 = vsub.f32 %v29769_v21, %v34494_v56  ;;  %v29871_v27 = vsub.f32 %v29778_v45, %v12724_v24  ;;  %v12701_v58 = vmul.f32 %v12686_v51, %v12667_v54  ;;  %v29874_v46 = vpop.permute.xlu1 %16690  ;;  %v29876_v41 = vpop.permute.xlu0 %14022  ;;  %25599 = vmatpush1.bf16.msra.mxu0 %v25598_v2 }
 0x4ad   :  { %v29863_v47 = vpack.c.bf16 %v34497_v22, %v34496_v55  ;;  %v12702_v56 = vmul.f32 %v12690_v30, %v12665_v9  ;;  %34500 = vst [vmem:[#allocation44_spill] sm:$0xff] %v29874_v46  ;;  %v9972_v55 = vsel %vm9966_vm12, %v29473_v62, %v29516_v34  ;;  %v29882_v13 = vmul.f32 %v14051_v31, %v14031_v63  ;;  %v34503_v22 = vld [vmem:[#allocation17_spill] sm:$0xff]  ;;  %v34504_v62 = vld [vmem:[#allocation19_spill] sm:$0xff]  ;;  %v34505_v34 = vld [vmem:[#allocation16_spill] sm:$0xff] }
 0x4ae   :  { %34495 = vst [vmem:[#allocation41_spill] sm:$0xff] %v29857_v0  ;;  %34499 = vst [vmem:[#allocation43_spill] sm:$0xff] %v29871_v27  ;;  %10934 = vmatmul.mubr.f32.gmra.mrb[16].mxu1 %v34501_v43  ;;  %v14032_v45 = vsel %vm14028_vm14, %v29750_v38, %v29876_v41  ;;  %v29891_v26 = vsub.f32 %v12697_v23, %v13360_v49  ;;  %v13364_v9 = vand.u32 4294901760, %v12701_v58  ;;  %25601 = vmatprep.subr.bf16.mxu0 %v34503_v22  ;;  %v34508_v22 = vld [vmem:[#allocation18_spill] sm:$0xff] }
 0x4af   :  { %34498 = vst [vmem:[#allocation42_spill] sm:$0xff] %v29863_v47  ;;  %10491 = vmatprep.mubr.f32.mxu0 %v34461_v61  ;;  %v9971_v2 = vsel %vm9966_vm12, %v34505_v34, %v34504_v62  ;;  %v13358_v63 = vand.u32 4294901760, %v12698_v1  ;;  %v29899_v54 = vmul.f32 %v14051_v31, %v14032_v45  ;;  %10939 = vmatprep.mubr.f32.mxu1 %v34461_v61  ;;  %v13362_v30 = vand.u32 4294901760, %v12702_v56  ;;  %v10005_v45 = vld [vmem:[%s34088_s5] sm:$0xff] }
 0x4b0   :  { %34502 = vst [vmem:[#allocation15_spill] sm:$0xff] %v29891_v26  ;;  %v29903_v23 = vpack.c.bf16 %v13364_v9, %v13360_v49  ;;  %v29905_v51 = vsub.f32 %v12701_v58, %v13364_v9  ;;  %10495 = vmatmul.mubr.f32.gmra.mrb[6].mxu0 %v34508_v22  ;;  %v29908_v46 = vpop.permute.xlu1 %16694  ;;  %v29910_v47 = vpop.permute.xlu0 %16692  ;;  %v10002_v34 = vmul.f32 %v9984_v53, %v9972_v55  ;;  %v34511_v49 = vand.u32 4294901760, %v29769_v21 }
 0x4b1   :  { %34509 = vst [vmem:[#allocation16_spill] sm:$0xff] %v29908_v46  ;;  %34510 = vst [vmem:[#allocation18_spill] sm:$0xff] %v29910_v47  ;;  %10500 = vmatprep.mubr.f32.mxu0 %v34461_v61  ;;  %v34513_v9 = vand.u32 4294901760, %v29842_v3  ;;  %v34514_v46 = vand.u32 4294901760, %v29847_v8  ;;  %v34515_v21 = vand.u32 4294901760, %v29694_v20  ;;  %v29938_v31 = vsub.f32 %v12698_v1, %v13358_v63  ;;  %v34524_v20 = vld [vmem:[#allocation20_spill] sm:$0xff] }
 0x4b2   :  { %34506 = vst [vmem:[#allocation17_spill] sm:$0xff] %v29903_v23  ;;  %34507 = vst [vmem:[#allocation19_spill] sm:$0xff] %v29905_v51  ;;  %10941 = vmatmul.mubr.f32.gmra.mrb[18].mxu1 %v29455_v57  ;;  %v29919_v58 = vpack.c.bf16 %v12724_v24, %v34511_v49  ;;  %v34516_v24 = vand.u32 4294901760, %v29728_v42  ;;  %v34520_v62 = vand.u32 4294901760, %v29899_v54  ;;  %v34522_v23 = vand.u32 4294901760, %v29857_v0 }
 0x4b3   :  { %v12842_v38 = vsub.f32 %v29842_v3, %v34513_v9  ;;  %v12854_v55 = vsub.f32 %v29847_v8, %v34514_v46  ;;  %11019 = vmatprep.mubr.f32.mxu1 %v34461_v61  ;;  %34518 = vst [vmem:[#allocation47_spill] sm:$0xff] %v29938_v31  ;;  %v34519_v46 = vand.u32 4294901760, %v29882_v13  ;;  %v29950_v7 = vsub.f32 %v12702_v56, %v13362_v30 }
 0x4b4   :  { %34512 = vst [vmem:[#allocation45_spill] sm:$0xff] %v29919_v58  ;;  %v29936_v49 = vpack.c.bf16 %v34516_v24, %v34515_v21  ;;  %v12836_v58 = vsub.f32 %v29857_v0, %v34522_v23  ;;  %10504 = vmatmul.mubr.f32.gmra.mrb[8].mxu0 %v34524_v20  ;;  %v29953_v21 = vpop.permute.xlu1 %16686  ;;  %v29955_v1 = vpop.permute.xlu0 %16696  ;;  %v34527_v24 = vand.u32 4294901760, %v29871_v27  ;;  %v34529_v23 = vand.u32 4294901760, %v29573_v5 }
 0x4b5   :  { %v29945_v47 = vpack.c.bf16 %v34520_v62, %v34519_v46  ;;  %34523 = vst [vmem:[#allocation49_spill] sm:$0xff] %v29950_v7  ;;  %34525 = vst [vmem:[#allocation20_spill] sm:$0xff] %v29953_v21  ;;  %v9998_v62 = vmul.f32 %v9984_v53, %v9971_v2  ;;  %v11375_v46 = vand.u32 4294901760, %v10002_v34  ;;  %v34530_v56 = vand.u32 4294901760, %v29606_v28  ;;  %10509 = vmatprep.mubr.f32.mxu0 %v34461_v61 }
 0x4b6   :  { %34517 = vst [vmem:[#allocation46_spill] sm:$0xff] %v29936_v49  ;;  %34526 = vst [vmem:[#allocation50_spill] sm:$0xff] %v29955_v1  ;;  %v12848_v9 = vsub.f32 %v29871_v27, %v34527_v24  ;;  %v29960_v49 = vpack.c.bf16 %v13362_v30, %v13358_v63  ;;  %11022 = vmatmul.mubr.f32.vlgmr.msra.gmra.mrb[12].mxu1 %v29405_v11  ;;  %v11360_v21 = vsel %vm10070_vm10, %v10005_v45, 0  ;;  %v34531_v1 = vand.u32 4294901760, %v29891_v26  ;;  %v34532_v24 = vld [vmem:[#allocation25_spill] sm:$0xff] }
 0x4b7   :  { %34521 = vst [vmem:[#allocation48_spill] sm:$0xff] %v29945_v47  ;;  %v25620_v47 = vpack.c.bf16 %v34530_v56, %v34529_v23  ;;  %25619 = vmatpush1.bf16.msra.mxu1 %v34532_v24  ;;  %11027 = vmatprep.mubr.f32.mxu1 %v34461_v61  ;;  %v12837_v53 = vand.u32 4294901760, %v12836_v58  ;;  %v12843_v11 = vand.u32 4294901760, %v12842_v38  ;;  %v34533_v5 = vand.u32 4294901760, %v29905_v51  ;;  %v34534_v23 = vld [vmem:[#allocation21_spill] sm:$0xff] }
 0x4b8   :  { %34528 = vst [vmem:[#allocation51_spill] sm:$0xff] %v29960_v49  ;;  %v13480_v42 = vsub.f32 %v29891_v26, %v34531_v1  ;;  %v12849_v30 = vand.u32 4294901760, %v12848_v9  ;;  %v12855_v2 = vand.u32 4294901760, %v12854_v55  ;;  %v34157_v45 = vand.u32 4294901760, %v29938_v31  ;;  %10513 = vmatmul.mubr.f32.gmra.mrb[10].mxu0 %v34534_v23  ;;  %v18056_v1 = vpop.permute.xlu1 %18055  ;;  %v29981_v56 = vpop.permute.xlu0 %16688 }
 0x4b9   :  { %v13492_v28 = vsub.f32 %v29905_v51, %v34533_v5  ;;  %25621 = vmatprep.subr.bf16.mxu1 %v25620_v47  ;;  %34535 = vst [vmem:[#allocation25_spill] sm:$0xff] %v29981_v56  ;;  %v34159_v38 = vand.u32 4294901760, %v29950_v7  ;;  %10595 = vmatprep.mubr.f32.mxu0 %v34461_v61  ;;  %v11371_v55 = vand.u32 4294901760, %v9998_v62  ;;  %v29995_v9 = vand.u32 4294901760, %v11360_v21 }
 0x4ba   :  { %v29983_v49 = vpack.c.bf16 %v12849_v30, %v12837_v53  ;;  %11030 = vmatmul.mubr.f32.gmra.mrb[14].mxu1 %v29436_v32  ;;  %v29988_v47 = vpack.c.bf16 %v12855_v2, %v12843_v11  ;;  %v13474_v58 = vsub.f32 %v29938_v31, %v34157_v45  ;;  %v30000_v32 = vsub.f32 %v10002_v34, %v11375_v46  ;;  %v10006_v30 = vld [vmem:[%s34088_s5 + $0x8] sm:$0xff] }
 0x4bb   :  { %11035 = vmatprep.mubr.f32.mxu1 %v34461_v61  ;;  %34538 = vst [vmem:[#allocation53_spill] sm:$0xff] %v29995_v9  ;;  %v13486_v53 = vsub.f32 %v29950_v7, %v34159_v38  ;;  %v13481_v5 = vand.u32 4294901760, %v13480_v42  ;;  %v13493_v2 = vand.u32 4294901760, %v13492_v28  ;;  %v14047_v63 = vrot.slane %v29735_v19, %v27890_v17 }
 0x4bc   :  { %34536 = vst [vmem:[#allocation21_spill] sm:$0xff] %v29983_v49  ;;  %34537 = vst [vmem:[#allocation52_spill] sm:$0xff] %v29988_v47  ;;  %10597 = vmatmul.mubr.f32.vlgmr.msra.gmra.mrb[4].mxu0 %v29387_v29  ;;  %v30010_v45 = vpop.permute.xlu1 %18059  ;;  %v30012_v56 = vpack.c.bf16 %v11375_v46, %v11371_v55  ;;  %v18058_v34 = vpop.permute.xlu0 %18057  ;;  %v24933_v47 = vld [vmem:[%s34089_s2 + $0x18] sm:$0xf]  ;;  %v13475_v28 = vand.u32 4294901760, %v13474_v58  ;;  %v11363_v49 = vsel %vm10070_vm10, %v10006_v30, 0 }
 0x4bd   :  { %v13487_v38 = vand.u32 4294901760, %v13486_v53  ;;  %25603 = vmatpush1.bf16.msra.mxu0 %v29483_v44  ;;  %v30021_v42 = vsel %vm18067_vm15, %v18056_v1, %v30010_v45  ;;  %v30024_v11 = vpack.c.bf16 %v13493_v2, %v13481_v5  ;;  %v30028_v53 = vsub.f32 %v9998_v62, %v11371_v55  ;;  %10602 = vmatprep.mubr.f32.mxu0 %v34461_v61 }
 0x4be   :  { %34539 = vst [vmem:[#allocation54_spill] sm:$0xff] %v30012_v56  ;;  %11038 = vmatmul.mubr.f32.gmra.mrb[16].mxu1 %v29468_v36  ;;  %25629 = vmatprep.subr.bf16.mxu0 %v30012_v56  ;;  %v30032_v44 = vsub.f32 %v11360_v21, %v29995_v9  ;;  %v14065_v6 = vmul.f32 %v14047_v63, %v29762_v33  ;;  %v30041_v36 = vld [vmem:[%s34089_s2 + $0x1c] sm:$0xf]  ;;  %v34543_v21 = vand.u32 4294901760, %v29857_v0  ;;  %v34544_v55 = vand.u32 4294901760, %v29871_v27 }
 0x4bf   :  { %34540 = vst [vmem:[#allocation55_spill] sm:$0xff] %v30024_v11  ;;  %11043 = vmatprep.mubr.f32.mxu1 %v34461_v61  ;;  %v30044_v58 = vpack.c.bf16 %v13487_v38, %v13475_v28  ;;  %v14061_v33 = vmul.f32 %v14047_v63, %v29719_v12  ;;  %v30055_v5 = vrot.slane %v29735_v19, %v27888_v16  ;;  %v10007_v28 = vld [vmem:[%s34088_s5 + $0x10] sm:$0xff]  ;;  %v34550_v11 = vand.u32 4294901760, %v30000_v32 }
 0x4c0   :  { %34541 = vst [vmem:[#allocation56_spill] sm:$0xff] %v30032_v44  ;;  %v30050_v30 = vpack.c.bf16 %v34544_v55, %v34543_v21  ;;  %v30058_v2 = vrot.slane %v24933_v47, %v27890_v17  ;;  %10604 = vmatmul.mubr.f32.gmra.mrb[6].mxu0 %v29407_v4  ;;  %v30061_v46 = vpop.permute.xlu1 %18051  ;;  %v30063_v38 = vpop.permute.xlu0 %18061  ;;  %v18082_v63 = vrot.slane %v24933_v47, %v27886_v15  ;;  %v30081_v55 = vand.u32 4294901760, %v11363_v49 }
 0x4c1   :  { %34542 = vst [vmem:[#allocation57_spill] sm:$0xff] %v30044_v58  ;;  %34546 = vst [vmem:[#allocation59_spill] sm:$0xff] %v30061_v46  ;;  %v18072_v19 = vsel %vm18067_vm15, %v30061_v46, %v18056_v1  ;;  %v30078_v21 = vsel %vm18067_vm15, %v18058_v34, %v30063_v38  ;;  %10609 = vmatprep.mubr.f32.mxu0 %v34461_v61  ;;  %v30086_v12 = vrot.slane %v30041_v36, %v27890_v17 }
 0x4c2   :  { %34545 = vst [vmem:[#allocation58_spill] sm:$0xff] %v30050_v30  ;;  %34547 = vst [vmem:[#allocation60_spill] sm:$0xff] %v30063_v38  ;;  %11046 = vmatmul.mubr.f32.gmra.mrb[18].mxu1 %v29488_v10  ;;  %v30091_v10 = vrot.slane %v30041_v36, %v27886_v15  ;;  %v30094_v1 = vand.u32 4294901760, %v30032_v44  ;;  %v14089_v30 = vand.u32 4294901760, %v14065_v6  ;;  %v11499_v58 = vsub.f32 %v30000_v32, %v34550_v11 }
 0x4c3   :  { %11120 = vmatprep.mubr.f32.mxu1 %v34461_v61  ;;  %34548 = vst [vmem:[#allocation61_spill] sm:$0xff] %v30086_v12  ;;  %v11366_v0 = vsel %vm10070_vm10, %v10007_v28, 0  ;;  %v34551_v27 = vand.u32 4294901760, %v29842_v3  ;;  %v34552_v56 = vand.u32 4294901760, %v29847_v8  ;;  %v14085_v62 = vand.u32 4294901760, %v14061_v33 }
 0x4c4   :  { %34549 = vst [vmem:[#allocation62_spill] sm:$0xff] %v30094_v1  ;;  %10611 = vmatmul.mubr.f32.gmra.mrb[8].mxu0 %v34501_v43  ;;  %v30107_v9 = vpop.permute.xlu1 %16698  ;;  %v34555_v48 = vand.u32 4294901760, %v29575_v25  ;;  %v34556_v46 = vand.u32 4294901760, %v29602_v39  ;;  %v30113_v38 = vpop.permute.xlu0 %18053  ;;  %v30116_v11 = vrot.slane %v24933_v47, %v27892_v18  ;;  %v34558_v28 = vand.u32 4294901760, %v29950_v7 }
 0x4c5   :  { %v30104_v59 = vpack.c.bf16 %v34552_v56, %v34551_v27  ;;  %34554 = vst [vmem:[#allocation64_spill] sm:$0xff] %v30107_v9  ;;  %v10008_v27 = vld [vmem:[%s34088_s5 + $0x18] sm:$0xff]  ;;  %v34557_v56 = vand.u32 4294901760, %v29938_v31  ;;  %v30127_v9 = vmul.f32 %v18082_v63, %v18072_v19  ;;  %v18073_v25 = vsel %vm18067_vm15, %v30113_v38, %v18058_v34  ;;  %10616 = vmatprep.mubr.f32.mxu0 %v34461_v61  ;;  %v34566_v31 = vld [vmem:[#allocation34_spill] sm:$0xff] }
 0x4c6   :  { %v25622_v12 = vpack.c.bf16 %v34556_v46, %v34555_v48  ;;  %11124 = vmatmul.mubr.f32.vlgmr.msra.gmra.mrb[12].mxu1 %v29433_v37  ;;  %v30136_v39 = vsub.f32 %v11363_v49, %v30081_v55  ;;  %v34561_v48 = vand.u32 4294901760, %v30028_v53  ;;  %v30142_v19 = vrot.slane %v24933_v47, %v27888_v16 }
 0x4c7   :  { %34553 = vst [vmem:[#allocation63_spill] sm:$0xff] %v30104_v59  ;;  %v30125_v59 = vpack.c.bf16 %v34558_v28, %v34557_v56  ;;  %v11443_v37 = vsub.f32 %v30032_v44, %v30094_v1  ;;  %v30146_v56 = vand.u32 4294901760, %v11366_v0  ;;  %v30148_v34 = vmul.f32 %v18082_v63, %v18073_v25  ;;  %11129 = vmatprep.mubr.f32.mxu1 %v34461_v61 }
 0x4c8   :  { %34560 = vst [vmem:[#allocation66_spill] sm:$0xff] %v30136_v39  ;;  %25623 = vmatpush1.bf16.msra.mxu1 %v25622_v12  ;;  %v11487_v46 = vsub.f32 %v30028_v53, %v34561_v48  ;;  %v11500_v49 = vand.u32 4294901760, %v11499_v58  ;;  %v11369_v12 = vsel %vm10070_vm10, %v10008_v27, 0  ;;  %v30153_v28 = vpack.c.bf16 %v14089_v30, %v14085_v62  ;;  %10618 = vmatmul.mubr.f32.gmra.mrb[10].mxu0 %v29455_v57  ;;  %v19421_v58 = vpop.permute.xlu1 %19420 }
 0x4c9   :  { %34559 = vst [vmem:[#allocation65_spill] sm:$0xff] %v30125_v59  ;;  %25625 = vmatprep.subr.bf16.mxu1 %v29614_v40  ;;  %v30155_v48 = vsub.f32 %v14061_v33, %v14085_v62  ;;  %v34564_v47 = vand.u32 4294901760, %v29807_v52  ;;  %v14029_v63 = vsel %vm14028_vm14, %v29822_v35, %v34566_v31  ;;  %v14030_v40 = vsel %vm14028_vm14, %v29876_v41, %v29788_v50  ;;  %v30171_v62 = vpop.permute.xlu0 %16700  ;;  %v24943_v35 = vld [vmem:[%s34089_s2 + $0x20] sm:$0xf] }
 0x4ca   :  { %34562 = vst [vmem:[#allocation67_spill] sm:$0xff] %v30153_v28  ;;  %34567 = vst [vmem:[#allocation34_spill] sm:$0xff] %v30171_v62  ;;  %v30173_v33 = vsub.f32 %v14065_v6, %v14089_v30  ;;  %v34174_v27 = vand.u32 4294901760, %v30148_v34  ;;  %11133 = vmatmul.mubr.f32.gmra.mrb[14].mxu1 %v34508_v22  ;;  %10692 = vmatprep.mubr.f32.mxu0 %v34461_v61  ;;  %v30183_v50 = vand.u32 4294901760, %v30136_v39  ;;  %v34570_v41 = vand.u32 4294901760, %v29785_v60 }
 0x4cb   :  { %34563 = vst [vmem:[#allocation68_spill] sm:$0xff] %v30155_v48  ;;  %v30160_v59 = vsub.f32 %v29807_v52, %v34564_v47  ;;  %v34175_v52 = vand.u32 4294901760, %v30127_v9  ;;  %11138 = vmatprep.mubr.f32.mxu1 %v34461_v61  ;;  %v11488_v31 = vand.u32 4294901760, %v11487_v46  ;;  %v30192_v30 = vsub.f32 %v11366_v0, %v30146_v56 }
 0x4cc   :  { %34568 = vst [vmem:[#allocation70_spill] sm:$0xff] %v30173_v33  ;;  %34569 = vst [vmem:[#allocation71_spill] sm:$0xff] %v30183_v50  ;;  %v30188_v6 = vsub.f32 %v29785_v60, %v34570_v41  ;;  %v30194_v22 = vand.u32 4294901760, %v11369_v12  ;;  %v14063_v25 = vmul.f32 %v30055_v5, %v14029_v63  ;;  %v14067_v47 = vmul.f32 %v30055_v5, %v14030_v40  ;;  %v30208_v0 = vpop.permute.xlu1 %19424  ;;  %v34575_v40 = vld [vmem:[#allocation22_spill] sm:$0xff] }
 0x4cd   :  { %34565 = vst [vmem:[#allocation69_spill] sm:$0xff] %v30160_v59  ;;  %34572 = vst [vmem:[#allocation73_spill] sm:$0xff] %v30192_v30  ;;  %v30202_v62 = vpack.c.bf16 %v34174_v27, %v34175_v52  ;;  %v30204_v60 = vand.u32 4294901760, %v11443_v37  ;;  %10694 = vmatmul.mubr.f32.vlgmr.msra.gmra.mrb[4].mxu0 %v29387_v29  ;;  %v25632_v46 = vpack.c.bf16 %v11500_v49, %v11488_v31  ;;  %v19423_v28 = vpop.permute.xlu0 %19422  ;;  %v34576_v49 = vand.u32 4294901760, %v29891_v26 }
 0x4ce   :  { %34571 = vst [vmem:[#allocation72_spill] sm:$0xff] %v30188_v6  ;;  %34573 = vst [vmem:[#allocation74_spill] sm:$0xff] %v30194_v22  ;;  %v30211_v63 = vrot.slane %v24943_v35, %v27890_v17  ;;  %25631 = vmatpush1.bf16.msra.mxu0 %v34575_v40  ;;  %v30218_v37 = vsel %vm19432_vm0, %v19421_v58, %v30208_v0  ;;  %11142 = vmatmul.mubr.f32.gmra.mrb[16].mxu1 %v34524_v20  ;;  %v34577_v31 = vand.u32 4294901760, %v29905_v51 }
 0x4cf   :  { %34574 = vst [vmem:[#allocation75_spill] sm:$0xff] %v30202_v62  ;;  %v11454_v27 = vsub.f32 %v30136_v39, %v30183_v50  ;;  %25633 = vmatprep.subr.bf16.mxu0 %v25632_v46  ;;  %v30232_v62 = vrot.slane %v24943_v35, %v27886_v15  ;;  %v30235_v17 = vand.u32 4294901760, %v30192_v30  ;;  %v30238_v20 = vsub.f32 %v11369_v12, %v30194_v22 }
 0x4d0   :  { %v30227_v52 = vpack.c.bf16 %v34577_v31, %v34576_v49  ;;  %v14723_v7 = vand.u32 4294901760, %v14063_v25  ;;  %v14727_v26 = vand.u32 4294901760, %v14067_v47  ;;  %10699 = vmatprep.mubr.f32.mxu0 %v34461_v61  ;;  %11147 = vmatprep.mubr.f32.mxu1 %v34461_v61  ;;  %v30244_v49 = vrot.slane %v30041_v36, %v27892_v18  ;;  %v30254_v12 = vpop.permute.xlu1 %19416 }
 0x4d1   :  { %34579 = vst [vmem:[#allocation77_spill] sm:$0xff] %v30235_v17  ;;  %34580 = vst [vmem:[#allocation78_spill] sm:$0xff] %v30238_v20  ;;  %v30248_v46 = vrot.slane %v30041_v36, %v27888_v16  ;;  %v34581_v31 = vand.u32 4294901760, %v30160_v59  ;;  %10701 = vmatmul.mubr.f32.gmra.mrb[6].mxu0 %v29407_v4  ;;  %v30256_v5 = vpop.permute.xlu0 %19426  ;;  %v30259_v15 = vrot.slane %v24943_v35, %v27892_v18  ;;  %v34582_v51 = vand.u32 4294901760, %v30155_v48 }
 0x4d2   :  { %34578 = vst [vmem:[#allocation76_spill] sm:$0xff] %v30227_v52  ;;  %v30262_v52 = vrot.slane %v24943_v35, %v27888_v16  ;;  %11151 = vmatmul.mubr.f32.gmra.mrb[18].mxu1 %v34534_v23  ;;  %v30274_v3 = vsel %vm19432_vm0, %v19423_v28, %v30256_v5  ;;  %10706 = vmatprep.mubr.f32.mxu0 %v34461_v61  ;;  %v30277_v18 = vand.u32 4294901760, %v11454_v27  ;;  %v34584_v35 = vand.u32 4294901760, %v30173_v33 }
 0x4d3   :  { %v14219_v41 = vsub.f32 %v30160_v59, %v34581_v31  ;;  %v14201_v36 = vsub.f32 %v30155_v48, %v34582_v51  ;;  %v19437_v31 = vsel %vm19432_vm0, %v30254_v12, %v19421_v58  ;;  %v34585_v51 = vand.u32 4294901760, %v30188_v6  ;;  %11233 = vmatprep.mubr.f32.mxu1 %v34461_v61 }
 0x4d4   :  { %34583 = vst [vmem:[#allocation79_spill] sm:$0xff] %v30277_v18  ;;  %v14213_v16 = vsub.f32 %v30173_v33, %v34584_v35  ;;  %v34586_v58 = vand.u32 4294901760, %v29899_v54  ;;  %v11465_v27 = vsub.f32 %v30192_v30, %v30235_v17  ;;  %v30295_v50 = vand.u32 4294901760, %v30238_v20  ;;  %v30313_v17 = vpop.permute.xlu1 %18063 }
 0x4d5   :  { %v14207_v8 = vsub.f32 %v30188_v6, %v34585_v51  ;;  %v30297_v35 = vsub.f32 %v14063_v25, %v14723_v7  ;;  %v34590_v1 = vand.u32 4294901760, %v29882_v13  ;;  %v30310_v40 = vmul.f32 %v30058_v2, %v30021_v42  ;;  %10708 = vmatmul.mubr.f32.gmra.mrb[8].mxu0 %v34501_v43  ;;  %v30315_v25 = vpop.permute.xlu0 %19418 }
 0x4d6   :  { %v30288_v23 = vsub.f32 %v29899_v54, %v34586_v58  ;;  %34588 = vst [vmem:[#allocation81_spill] sm:$0xff] %v30295_v50  ;;  %v14214_v39 = vand.u32 4294901760, %v14213_v16  ;;  %v30304_v54 = vpack.c.bf16 %v14727_v26, %v14723_v7  ;;  %v30306_v58 = vsub.f32 %v14067_v47, %v14727_v26  ;;  %11235 = vmatmul.mubr.f32.vlgmr.msra.gmra.mrb[12].mxu1 %v29387_v29 }
 0x4d7   :  { %34589 = vst [vmem:[#allocation82_spill] sm:$0xff] %v30297_v35  ;;  %v30302_v51 = vsub.f32 %v29882_v13, %v34590_v1  ;;  %34594 = vst [vmem:[#allocation86_spill] sm:$0xff] %v30310_v40  ;;  %v14220_v30 = vand.u32 4294901760, %v14219_v41  ;;  %v30320_v16 = vmul.f32 %v30091_v10, %v19437_v31  ;;  %v18068_v7 = vsel %vm18067_vm15, %v30010_v45, %v30313_v17 }
 0x4d8   :  { %34587 = vst [vmem:[#allocation80_spill] sm:$0xff] %v30288_v23  ;;  %34592 = vst [vmem:[#allocation84_spill] sm:$0xff] %v30304_v54  ;;  %v19438_v26 = vsel %vm19432_vm0, %v30315_v25, %v19423_v28  ;;  %10713 = vmatprep.mubr.f32.mxu0 %v34461_v61  ;;  %v14202_v42 = vand.u32 4294901760, %v14201_v36  ;;  %25627 = vmatpush1.bf16.msra.mxu1 %v34532_v24  ;;  %v30333_v47 = vand.u32 4294901760, %v11465_v27  ;;  %v14208_v31 = vand.u32 4294901760, %v14207_v8  ;;  %v34595_v28 = vld [vmem:[#allocation33_spill] sm:$0xff]  ;;  %v20786_v8 = vpop.permute.xlu1 %20785 }
 0x4d9   :  { %34591 = vst [vmem:[#allocation83_spill] sm:$0xff] %v30302_v51  ;;  %34593 = vst [vmem:[#allocation85_spill] sm:$0xff] %v30306_v58  ;;  %v11476_v41 = vsub.f32 %v30238_v20, %v30295_v50  ;;  %v30339_v45 = vmul.f32 %v30058_v2, %v30078_v21  ;;  %v30342_v13 = vmul.f32 %v30091_v10, %v19438_v26  ;;  %25653 = vmatprep.subr.bf16.mxu1 %v34595_v28  ;;  %v30354_v2 = vpop.permute.xlu0 %18065  ;;  %v34611_v20 = vld [vmem:[#allocation29_spill] sm:$0xff] }
 0x4da   :  { %11240 = vmatprep.mubr.f32.mxu1 %v34461_v61  ;;  %v30346_v36 = vpack.c.bf16 %v14214_v39, %v14202_v42  ;;  %v30351_v1 = vmul.f32 %v30116_v11, %v18068_v7  ;;  %10715 = vmatmul.mubr.f32.gmra.mrb[10].mxu0 %v29455_v57  ;;  %v30356_v21 = vpack.c.bf16 %v14220_v30, %v14208_v31  ;;  %v19491_v39 = vand.u32 4294901760, %v30320_v16  ;;  %v34598_v7 = vld [vmem:[#allocation60_spill] sm:$0xff] }
 0x4db   :  { %11242 = vmatmul.mubr.f32.gmra.mrb[14].mxu1 %v29407_v4  ;;  %v18069_v27 = vsel %vm18067_vm15, %v34598_v7, %v30354_v2  ;;  %11439 = vmatprep.mubr.f32.mxu0 %v34461_v61  ;;  %v34599_v30 = vand.u32 4294901760, %v30288_v23  ;;  %v25636_v26 = vpack.c.bf16 %v30000_v32, %v30028_v53  ;;  %v34600_v24 = vand.u32 4294901760, %v30028_v53 }
 0x4dc   :  { %34596 = vst [vmem:[#allocation87_spill] sm:$0xff] %v30346_v36  ;;  %34597 = vst [vmem:[#allocation88_spill] sm:$0xff] %v30356_v21  ;;  %v30372_v10 = vmul.f32 %v30116_v11, %v18069_v27  ;;  %11247 = vmatprep.mubr.f32.mxu1 %v34461_v61  ;;  %v34601_v42 = vand.u32 4294901760, %v30000_v32  ;;  %v34603_v7 = vand.u32 4294901760, %v30127_v9  ;;  %v34604_v11 = vand.u32 4294901760, %v30342_v13 }
 0x4dd   :  { %v14857_v31 = vsub.f32 %v30288_v23, %v34599_v30  ;;  %v34606_v36 = vand.u32 4294901760, %v30297_v35  ;;  %v18764_v53 = vand.u32 4294901760, %v30351_v1  ;;  %v34608_v30 = vand.u32 4294901760, %v30302_v51 }
 0x4de   :  { %v30381_v21 = vpack.c.bf16 %v34601_v42, %v34600_v24  ;;  %v30386_v54 = vsub.f32 %v30127_v9, %v34603_v7  ;;  %v30391_v27 = vpack.c.bf16 %v34604_v11, %v19491_v39  ;;  %11445 = vmatmul.mubr.f32.vlgmr.msra.gmra.mrb[4].mxu0 %v30204_v60  ;;  %v30399_v24 = vpop.permute.xlu1 %20789  ;;  %v20788_v9 = vpop.permute.xlu0 %20787  ;;  %v34607_v42 = vand.u32 4294901760, %v30306_v58 }
 0x4df   :  { %v14839_v50 = vsub.f32 %v30297_v35, %v34606_v36  ;;  %v14845_v36 = vsub.f32 %v30302_v51, %v34608_v30  ;;  %25635 = vmatpush1.bf16.msra.mxu0 %v34611_v20  ;;  %v30418_v28 = vsel %vm20797_vm1, %v20786_v8, %v30399_v24  ;;  %11249 = vmatmul.mubr.f32.gmra.mrb[16].mxu1 %v34501_v43  ;;  %v34612_v11 = vand.u32 4294901760, %v30148_v34 }
 0x4e0   :  { %34602 = vst [vmem:[#allocation60_spill] sm:$0xff] %v30381_v21  ;;  %34605 = vst [vmem:[#allocation89_spill] sm:$0xff] %v30391_v27  ;;  %v14851_v7 = vsub.f32 %v30306_v58, %v34607_v42  ;;  %v34609_v27 = vand.u32 4294901760, %v30310_v40  ;;  %v30421_v42 = vand.u32 4294901760, %v11476_v41  ;;  %v34613_v21 = vld [vmem:[#allocation61_spill] sm:$0xff]  ;;  %v34614_v44 = vand.u32 4294901760, %v30372_v10  ;;  %25637 = vmatprep.subr.bf16.mxu0 %v25636_v26  ;;  %11450 = vmatprep.mubr.f32.mxu0 %v34461_v61 }
 0x4e1   :  { %v30426_v30 = vsub.f32 %v30148_v34, %v34612_v11  ;;  %v30434_v20 = vmul.f32 %v34613_v21, %v30274_v3  ;;  %v34616_v41 = vand.u32 4294901760, %v30339_v45  ;;  %v34618_v34 = vld [vmem:[#allocation59_spill] sm:$0xff]  ;;  %11254 = vmatprep.mubr.f32.mxu1 %v34461_v61  ;;  %v14840_v3 = vand.u32 4294901760, %v14839_v50 }
 0x4e2   :  { %v30412_v32 = vsub.f32 %v30310_v40, %v34609_v27  ;;  %v30430_v27 = vmul.f32 %v34613_v21, %v30218_v37  ;;  %v18074_v37 = vsel %vm18067_vm15, %v30313_v17, %v34618_v34  ;;  %v14852_v21 = vand.u32 4294901760, %v14851_v7  ;;  %11456 = vmatmul.mubr.f32.gmra.mrb[6].mxu0 %v30277_v18  ;;  %v30456_v11 = vpop.permute.xlu1 %20781 }
 0x4e3   :  { %v30443_v40 = vsub.f32 %v30339_v45, %v34616_v41  ;;  %v30453_v26 = vsub.f32 %v30320_v16, %v19491_v39  ;;  %v30458_v41 = vpop.permute.xlu0 %20791  ;;  %v20802_v50 = vsel %vm20797_vm1, %v30456_v11, %v20786_v8  ;;  %11256 = vmatmul.mubr.f32.gmra.mrb[18].mxu1 %v29455_v57  ;;  %11461 = vmatprep.mubr.f32.mxu0 %v34461_v61  ;;  %v14846_v7 = vand.u32 4294901760, %v14845_v36 }
 0x4e4   :  { %34610 = vst [vmem:[#allocation90_spill] sm:$0xff] %v30412_v32  ;;  %v30438_v32 = vpack.c.bf16 %v34614_v44, %v18764_v53  ;;  %v20801_v16 = vsel %vm20797_vm1, %v20788_v9, %v30458_v41  ;;  %v30470_v39 = vpack.c.bf16 %v14852_v21, %v14840_v3  ;;  %v30476_v44 = vmul.f32 %v30142_v19, %v18074_v37 }
 0x4e5   :  { %34617 = vst [vmem:[#allocation61_spill] sm:$0xff] %v30443_v40  ;;  %11330 = vmatprep.mubr.f32.mxu1 %v34461_v61  ;;  %v34621_v40 = vand.u32 4294901760, %v30155_v48  ;;  %v34622_v18 = vand.u32 4294901760, %v30173_v33  ;;  %v34624_v21 = vand.u32 4294901760, %v30188_v6  ;;  %v34625_v17 = vand.u32 4294901760, %v30160_v59  ;;  %v34646_v6 = vld [vmem:[#allocation53_spill] sm:$0xff] }
 0x4e6   :  { %34615 = vst [vmem:[#allocation29_spill] sm:$0xff] %v30438_v32  ;;  %v14858_v32 = vand.u32 4294901760, %v14857_v31  ;;  %34619 = vst [vmem:[#allocation59_spill] sm:$0xff] %v30470_v39  ;;  %11467 = vmatmul.mubr.f32.gmra.mrb[8].mxu0 %v30333_v47  ;;  %v34628_v36 = vand.u32 4294901760, %v30306_v58 }
 0x4e7   :  { %v30485_v3 = vpack.c.bf16 %v34622_v18, %v34621_v40  ;;  %v30493_v34 = vpack.c.bf16 %v34625_v17, %v34624_v21  ;;  %v19429_v18 = vpop.permute.xlu1 %19428  ;;  %v20784_v40 = vpop.permute.xlu0 %20783  ;;  %v34630_v17 = vand.u32 4294901760, %v30302_v51  ;;  %v34631_v21 = vand.u32 4294901760, %v30288_v23  ;;  %11332 = vmatmul.mubr.f32.vlgmr.msra.gmra.mrb[12].mxu1 %v29387_v29  ;;  %11472 = vmatprep.mubr.f32.mxu0 %v34461_v61  ;;  %v34635_v29 = vld [vmem:[#allocation30_spill] sm:$0xff] }
 0x4e8   :  { %v30479_v8 = vpack.c.bf16 %v14858_v32, %v14846_v7  ;;  %v18075_v32 = vsel %vm18067_vm15, %v30354_v2, %v30113_v38  ;;  %v34627_v7 = vand.u32 4294901760, %v30297_v35  ;;  %v19433_v38 = vsel %vm19432_vm0, %v30208_v0, %v19429_v18  ;;  %25655 = vmatpush1.bf16.msra.mxu1 %v34635_v29  ;;  %11337 = vmatprep.mubr.f32.mxu1 %v34461_v61 }
 0x4e9   :  { %34623 = vst [vmem:[#allocation92_spill] sm:$0xff] %v30485_v3  ;;  %34626 = vst [vmem:[#allocation93_spill] sm:$0xff] %v30493_v34  ;;  %v30511_v37 = vpack.c.bf16 %v34631_v21, %v34630_v17  ;;  %v20829_v34 = vmul.f32 %v30232_v62, %v20802_v50  ;;  %v20803_v2 = vsel %vm20797_vm1, %v20784_v40, %v20788_v9  ;;  %v34634_v21 = vand.u32 4294901760, %v30342_v13  ;;  %v34637_v17 = vld [vmem:[#allocation36_spill] sm:$0xff] }
 0x4ea   :  { %34620 = vst [vmem:[#allocation91_spill] sm:$0xff] %v30479_v8  ;;  %v30505_v31 = vpack.c.bf16 %v34628_v36, %v34627_v7  ;;  %v34633_v36 = vand.u32 4294901760, %v30386_v54  ;;  %v30528_v50 = vsub.f32 %v30351_v1, %v18764_v53  ;;  %v34636_v9 = vand.u32 4294901760, %v30426_v30  ;;  %25657 = vmatprep.subr.bf16.mxu1 %v34637_v17  ;;  %11478 = vmatmul.mubr.f32.gmra.mrb[10].mxu0 %v30421_v42 }
 0x4eb   :  { %34632 = vst [vmem:[#allocation95_spill] sm:$0xff] %v30511_v37  ;;  %v30533_v0 = vsub.f32 %v30342_v13, %v34634_v21  ;;  %v34638_v1 = vand.u32 4294901760, %v30430_v27  ;;  %v34640_v53 = vand.u32 4294901760, %v30453_v26  ;;  %v19431_v17 = vpop.permute.xlu0 %19430  ;;  %v20856_v51 = vand.u32 4294901760, %v20829_v34  ;;  %11339 = vmatmul.mubr.f32.gmra.mrb[14].mxu1 %v29407_v4  ;;  %11568 = vmatprep.mubr.f32.mxu0 %v34461_v61  ;;  %v34678_v59 = vld [vmem:[#allocation90_spill] sm:$0xff] }
 0x4ec   :  { %34629 = vst [vmem:[#allocation94_spill] sm:$0xff] %v30505_v31  ;;  %v30524_v7 = vsub.f32 %v30386_v54, %v34633_v36  ;;  %v30539_v37 = vsub.f32 %v30426_v30, %v34636_v9  ;;  %v19466_v36 = vmul.f32 %v30244_v49, %v19433_v38  ;;  %v20833_v31 = vmul.f32 %v30232_v62, %v20803_v2  ;;  %v20794_v2 = vpop.permute.xlu1 %20793  ;;  %v34679_v39 = vld [vmem:[#allocation61_spill] sm:$0xff] }
 0x4ed   :  { %v30548_v13 = vsub.f32 %v30430_v27, %v34638_v1  ;;  %v30553_v21 = vsub.f32 %v30453_v26, %v34640_v53  ;;  %v34641_v9 = vand.u32 4294901760, %v30434_v20  ;;  %v30561_v62 = vmul.f32 %v30142_v19, %v18075_v32  ;;  %11344 = vmatprep.mubr.f32.mxu1 %v34461_v61 }
 0x4ee   :  { %v20860_v1 = vand.u32 4294901760, %v20833_v31  ;;  %v20798_v23 = vsel %vm20797_vm1, %v30399_v24, %v20794_v2  ;;  %v19434_v53 = vsel %vm19432_vm0, %v30256_v5, %v19431_v17  ;;  %v34643_v19 = vand.u32 4294901760, %v30476_v44  ;;  %11570 = vmatmul.mubr.f32.vlgmr.msra.gmra.mrb[4].mxu0 %v34646_v6 }
 0x4ef   :  { %34639 = vst [vmem:[#allocation36_spill] sm:$0xff] %v30548_v13  ;;  %v30558_v38 = vsub.f32 %v30434_v20, %v34641_v9  ;;  %v20831_v35 = vmul.f32 %v30259_v15, %v20798_v23  ;;  %v34644_v4 = vand.u32 4294901760, %v30372_v10  ;;  %v19439_v5 = vsel %vm19432_vm0, %v19429_v18, %v30254_v12  ;;  %v34647_v18 = vld [vmem:[#allocation23_spill] sm:$0xff]  ;;  %11346 = vmatmul.mubr.f32.gmra.mrb[16].mxu1 %v34501_v43 }
 0x4f0   :  { %v30575_v32 = vsub.f32 %v30476_v44, %v34643_v19  ;;  %v20129_v58 = vand.u32 4294901760, %v19466_v36  ;;  %v30589_v19 = vpack.c.bf16 %v20860_v1, %v20856_v51  ;;  %v30593_v9 = vmul.f32 %v30211_v63, %v30418_v28  ;;  %11575 = vmatprep.mubr.f32.mxu0 %v34461_v61  ;;  %11351 = vmatprep.mubr.f32.mxu1 %v34461_v61 }
 0x4f1   :  { %34642 = vst [vmem:[#allocation96_spill] sm:$0xff] %v30558_v38  ;;  %v30584_v24 = vsub.f32 %v30372_v10, %v34644_v4  ;;  %v30596_v23 = vmul.f32 %v30211_v63, %v20801_v16  ;;  %v21494_v3 = vand.u32 4294901760, %v20831_v35  ;;  %v19470_v8 = vmul.f32 %v30244_v49, %v19434_v53  ;;  %v20796_v10 = vpop.permute.xlu0 %20795 }
 0x4f2   :  { %34645 = vst [vmem:[#allocation97_spill] sm:$0xff] %v30589_v19  ;;  %v34215_v4 = vand.u32 4294901760, %v30561_v62  ;;  %v20804_v12 = vsel %vm20797_vm1, %v20794_v2, %v30456_v11  ;;  %v19440_v28 = vsel %vm19432_vm0, %v19431_v17, %v30315_v25  ;;  %v34648_v19 = vld [vmem:[#allocation24_spill] sm:$0xff]  ;;  %v20799_v49 = vsel %vm20797_vm1, %v30458_v41, %v20796_v10  ;;  %v34651_v2 = vld [vmem:[#allocation54_spill] sm:$0xff]  ;;  %11577 = vmatmul.mubr.f32.gmra.mrb[6].mxu0 %v30081_v55 }
 0x4f3   :  { %v34649_v63 = vpack.c.bf16 %v34647_v18, %v34648_v19  ;;  %v30614_v16 = vsub.f32 %v20829_v34, %v20856_v51  ;;  %v30617_v53 = vmul.f32 %v30248_v46, %v19439_v5  ;;  %v20133_v11 = vand.u32 4294901760, %v19470_v8  ;;  %11353 = vmatmul.mubr.f32.gmra.mrb[18].mxu1 %v29455_v57  ;;  %11582 = vmatprep.mubr.f32.mxu0 %v34461_v61 }
 0x4f4   :  { %v20805_v25 = vsel %vm20797_vm1, %v20796_v10, %v20784_v40  ;;  %v34652_v17 = vand.u32 4294901760, %v30528_v50  ;;  %v30628_v19 = vsub.f32 %v19466_v36, %v20129_v58  ;;  %v30630_v51 = vsub.f32 %v20833_v31, %v20860_v1  ;;  %12077 = vmatprep.mubr.f32.mxu1 %v34461_v61 }
 0x4f5   :  { %25639 = vmatpush1.bf16.msra.mxu0 %v34649_v63  ;;  %34650 = vst [vmem:[#allocation53_spill] sm:$0xff] %v30614_v16  ;;  %v20835_v41 = vmul.f32 %v30259_v15, %v20799_v49  ;;  %v30635_v34 = vmul.f32 %v30262_v52, %v20804_v12  ;;  %v30637_v5 = vsub.f32 %v20831_v35, %v21494_v3  ;;  %v34216_v36 = vand.u32 4294901760, %v30584_v24 }
 0x4f6   :  { %25641 = vmatprep.subr.bf16.mxu0 %v34651_v2  ;;  %v30626_v43 = vsub.f32 %v30528_v50, %v34652_v17  ;;  %34653 = vst [vmem:[#allocation23_spill] sm:$0xff] %v30628_v19  ;;  %34654 = vst [vmem:[#allocation24_spill] sm:$0xff] %v30630_v51  ;;  %v30640_v40 = vmul.f32 %v30248_v46, %v19440_v28  ;;  %v30642_v10 = vpack.c.bf16 %v20133_v11, %v20129_v58  ;;  %v34687_v2 = vld [vmem:[#allocation60_spill] sm:$0xff] }
 0x4f7   :  { %34655 = vst [vmem:[#allocation98_spill] sm:$0xff] %v30637_v5  ;;  %v30646_v31 = vsub.f32 %v19470_v8, %v20133_v11  ;;  %v30649_v15 = vmul.f32 %v30262_v52, %v20805_v25  ;;  %v21498_v1 = vand.u32 4294901760, %v20835_v41  ;;  %v34217_v35 = vand.u32 4294901760, %v30593_v9  ;;  %11584 = vmatmul.mubr.f32.gmra.mrb[8].mxu0 %v30146_v56  ;;  %12083 = vmatmul.mubr.f32.vlgmr.msra.gmra.mrb[12].mxu1 %v30204_v60 }
 0x4f8   :  { %34656 = vst [vmem:[#allocation99_spill] sm:$0xff] %v30642_v10  ;;  %v34218_v46 = vand.u32 4294901760, %v30614_v16  ;;  %v34219_v58 = vand.u32 4294901760, %v30596_v23  ;;  %v34220_v12 = vand.u32 4294901760, %v30617_v53  ;;  %v34221_v8 = vand.u32 4294901760, %v30628_v19  ;;  %11589 = vmatprep.mubr.f32.mxu0 %v34461_v61  ;;  %12088 = vmatprep.mubr.f32.mxu1 %v34461_v61 }
 0x4f9   :  { %34657 = vst [vmem:[#allocation100_spill] sm:$0xff] %v30646_v31  ;;  %v34223_v52 = vand.u32 4294901760, %v30630_v51  ;;  %v30660_v28 = vpack.c.bf16 %v21498_v1, %v21494_v3  ;;  %v30662_v18 = vsub.f32 %v20835_v41, %v21498_v1  ;;  %v34660_v57 = vand.u32 4294901760, %v30533_v0  ;;  %v34663_v1 = vld [vmem:[#allocation37_spill] sm:$0xff]  ;;  %v34666_v41 = vld [vmem:[#allocation26_spill] sm:$0xff] }
 0x4fa   :  { %v34224_v49 = vand.u32 4294901760, %v30635_v34  ;;  %v34226_v11 = vand.u32 4294901760, %v30637_v5  ;;  %v30676_v3 = vsub.f32 %v30561_v62, %v34215_v4  ;;  %v18896_v17 = vsub.f32 %v30584_v24, %v34216_v36  ;;  %25659 = vmatpush1.bf16.msra.mxu1 %v34663_v1  ;;  %v34665_v1 = vld [vmem:[#allocation32_spill] sm:$0xff] }
 0x4fb   :  { %34658 = vst [vmem:[#allocation101_spill] sm:$0xff] %v30660_v28  ;;  %34659 = vst [vmem:[#allocation102_spill] sm:$0xff] %v30662_v18  ;;  %v30667_v63 = vsub.f32 %v30533_v0, %v34660_v57  ;;  %v30688_v57 = vsub.f32 %v30593_v9, %v34217_v35  ;;  %v30693_v4 = vsub.f32 %v30614_v16, %v34218_v46  ;;  %v34669_v28 = vand.u32 4294901760, %v30640_v40 }
 0x4fc   :  { %v30698_v36 = vsub.f32 %v30596_v23, %v34219_v58  ;;  %v30705_v60 = vsub.f32 %v30617_v53, %v34220_v12  ;;  %v30710_v35 = vsub.f32 %v30628_v19, %v34221_v8  ;;  %v30715_v46 = vsub.f32 %v30630_v51, %v34223_v52  ;;  %11591 = vmatmul.mubr.f32.gmra.mrb[10].mxu0 %v30194_v22  ;;  %v34670_v58 = vld [vmem:[#allocation86_spill] sm:$0xff] }
 0x4fd   :  { %34661 = vst [vmem:[#allocation103_spill] sm:$0xff] %v30688_v57  ;;  %v34667_v25 = vpack.c.bf16 %v34665_v1, %v34666_v41  ;;  %v30724_v12 = vsub.f32 %v30635_v34, %v34224_v49  ;;  %v30729_v8 = vsub.f32 %v30637_v5, %v34226_v11  ;;  %v30734_v52 = vsub.f32 %v30640_v40, %v34669_v28  ;;  %v34677_v28 = vld [vmem:[#allocation79_spill] sm:$0xff] }
 0x4fe   :  { %34662 = vst [vmem:[#allocation104_spill] sm:$0xff] %v30698_v36  ;;  %34664 = vst [vmem:[#allocation37_spill] sm:$0xff] %v30705_v60  ;;  %v34671_v41 = vand.u32 4294901760, %v34670_v58  ;;  %v34674_v49 = vand.u32 4294901760, %v30646_v31  ;;  %v34675_v11 = vand.u32 4294901760, %v30649_v15  ;;  %12094 = vmatmul.mubr.f32.gmra.mrb[14].mxu1 %v34677_v28  ;;  %11669 = vmatprep.mubr.f32.mxu0 %v34461_v61  ;;  %v18239_v58 = vand.u32 4294901760, %v34678_v59 }
 0x4ff   :  { %25661 = vmatprep.subr.bf16.mxu1 %v34667_v25  ;;  %34668 = vst [vmem:[#allocation32_spill] sm:$0xff] %v30724_v12  ;;  %v34672_v25 = vand.u32 4294901760, %v30339_v45  ;;  %v18251_v45 = vand.u32 4294901760, %v34679_v39  ;;  %12099 = vmatprep.mubr.f32.mxu1 %v34461_v61  ;;  %v34683_v48 = vand.u32 4294901760, %v30662_v18  ;;  %v18885_v28 = vand.u32 4294901760, %v30626_v43 }
 0x500   :  { %v30746_v10 = vsub.f32 %v30646_v31, %v34674_v49  ;;  %v30751_v14 = vsub.f32 %v30649_v15, %v34675_v11  ;;  %v34681_v49 = vand.u32 4294901760, %v30561_v62  ;;  %v18259_v11 = vand.u32 4294901760, %v30539_v37 }
 0x501   :  { %v30741_v1 = vpack.c.bf16 %v34672_v25, %v34671_v41  ;;  %v34680_v41 = vand.u32 4294901760, %v30476_v44  ;;  %v30771_v33 = vsub.f32 %v30662_v18, %v34683_v48  ;;  %v18240_v29 = vsub.f32 %v34678_v59, %v18239_v58 }
 0x502   :  { %34676 = vst [vmem:[#allocation86_spill] sm:$0xff] %v30751_v14  ;;  %v18252_v44 = vsub.f32 %v34679_v39, %v18251_v45  ;;  %v18877_v62 = vand.u32 4294901760, %v30575_v32  ;;  %v18889_v37 = vand.u32 4294901760, %v30676_v3  ;;  %12105 = vmatmul.mubr.f32.gmra.mrb[16].mxu1 %v30333_v47  ;;  %v18897_v22 = vand.u32 4294901760, %v18896_v17  ;;  %v34688_v17 = vld [vmem:[#allocation66_spill] sm:$0xff] }
 0x503   :  { %34673 = vst [vmem:[#allocation26_spill] sm:$0xff] %v30741_v1  ;;  %v30762_v25 = vpack.c.bf16 %v34681_v49, %v34680_v41  ;;  %v18247_v1 = vand.u32 4294901760, %v30524_v7  ;;  %v34684_v41 = vld [vmem:[#allocation56_spill] sm:$0xff]  ;;  %v18241_v48 = vand.u32 4294901760, %v18240_v29  ;;  %v30791_v7 = vpack.c.bf16 %v18251_v45, %v18239_v58  ;;  %12110 = vmatprep.mubr.f32.mxu1 %v34461_v61 }
 0x504   :  { %11672 = vmatmul.mubr.f32.vlgmr.msra.gmra.mrb[4].mxu0 %v34684_v41  ;;  %v18253_v59 = vand.u32 4294901760, %v18252_v44  ;;  %v18878_v39 = vsub.f32 %v30575_v32, %v18877_v62  ;;  %v19604_v43 = vand.u32 4294901760, %v30548_v13  ;;  %v30797_v44 = vpack.c.bf16 %v18897_v22, %v18885_v28 }
 0x505   :  { %34682 = vst [vmem:[#allocation79_spill] sm:$0xff] %v30762_v25  ;;  %v30777_v49 = vpack.c.bf16 %v18259_v11, %v18247_v1  ;;  %v34686_v25 = vld [vmem:[#allocation22_spill] sm:$0xff]  ;;  %11677 = vmatprep.mubr.f32.mxu0 %v34461_v61  ;;  %v18890_v1 = vsub.f32 %v30676_v3, %v18889_v37  ;;  %v34690_v58 = vand.u32 4294901760, %v30426_v30  ;;  %v30808_v11 = vpack.c.bf16 %v18889_v37, %v18877_v62 }
 0x506   :  { %25643 = vmatpush1.bf16.msra.mxu0 %v34686_v25  ;;  %v30795_v47 = vpack.c.bf16 %v18253_v59, %v18241_v48  ;;  %v18879_v29 = vand.u32 4294901760, %v18878_v39  ;;  %v34689_v25 = vand.u32 4294901760, %v30386_v54  ;;  %v34691_v59 = vand.u32 4294901760, %v30430_v27  ;;  %12116 = vmatmul.mubr.f32.gmra.mrb[18].mxu1 %v30421_v42 }
 0x507   :  { %34685 = vst [vmem:[#allocation56_spill] sm:$0xff] %v30777_v49  ;;  %25645 = vmatprep.subr.bf16.mxu0 %v34687_v2  ;;  %v18891_v49 = vand.u32 4294901760, %v18890_v1  ;;  %v34692_v39 = vand.u32 4294901760, %v30434_v20  ;;  %v34693_v28 = vand.u32 4294901760, %v30528_v50  ;;  %v34694_v48 = vand.u32 4294901760, %v30584_v24  ;;  %12206 = vmatprep.mubr.f32.mxu1 %v34461_v61  ;;  %v34700_v2 = vld [vmem:[#allocation27_spill] sm:$0xff] }
 0x508   :  { %11680 = vmatmul.mubr.f32.gmra.mrb[6].mxu0 %v34688_v17  ;;  %v30806_v45 = vpack.c.bf16 %v34690_v58, %v34689_v25  ;;  %v19605_v25 = vsub.f32 %v30548_v13, %v19604_v43  ;;  %v19616_v62 = vand.u32 4294901760, %v30558_v38  ;;  %v34695_v27 = vand.u32 4294901760, %v30617_v53 }
 0x509   :  { %v30814_v22 = vpack.c.bf16 %v34692_v39, %v34691_v59  ;;  %11685 = vmatprep.mubr.f32.mxu0 %v34461_v61  ;;  %v30822_v1 = vpack.c.bf16 %v34694_v48, %v34693_v28  ;;  %v34696_v20 = vand.u32 4294901760, %v30640_v40  ;;  %v30833_v42 = vpack.c.bf16 %v18891_v49, %v18879_v29 }
 0x50a   :  { %v19612_v58 = vand.u32 4294901760, %v30553_v21  ;;  %v19624_v59 = vand.u32 4294901760, %v30667_v63  ;;  %v19606_v28 = vand.u32 4294901760, %v19605_v25  ;;  %v19617_v48 = vsub.f32 %v30558_v38, %v19616_v62  ;;  %12208 = vmatmul.mubr.f32.vlgmr.msra.gmra.mrb[12].mxu1 %v34646_v6  ;;  %v34703_v38 = vld [vmem:[#allocation33_spill] sm:$0xff] }
 0x50b   :  { %v30830_v37 = vpack.c.bf16 %v34696_v20, %v34695_v27  ;;  %v20242_v53 = vand.u32 4294901760, %v30705_v60  ;;  %v20254_v40 = vand.u32 4294901760, %v30734_v52  ;;  %v34697_v27 = vld [vmem:[#allocation73_spill] sm:$0xff]  ;;  %v20250_v21 = vand.u32 4294901760, %v30710_v35  ;;  %12213 = vmatprep.mubr.f32.mxu1 %v34461_v61 }
 0x50c   :  { %11688 = vmatmul.mubr.f32.gmra.mrb[8].mxu0 %v34697_v27  ;;  %v30843_v20 = vpack.c.bf16 %v19624_v59, %v19612_v58  ;;  %v20262_v63 = vand.u32 4294901760, %v30746_v10  ;;  %v19618_v29 = vand.u32 4294901760, %v19617_v48  ;;  %v34699_v59 = vld [vmem:[#allocation31_spill] sm:$0xff]  ;;  %v30861_v10 = vpack.c.bf16 %v19616_v62, %v19604_v43 }
 0x50d   :  { %11693 = vmatprep.mubr.f32.mxu0 %v34461_v61  ;;  %v20243_v25 = vsub.f32 %v30705_v60, %v20242_v53  ;;  %v20255_v39 = vsub.f32 %v30734_v52, %v20254_v40  ;;  %v34701_v13 = vpack.c.bf16 %v34699_v59, %v34700_v2  ;;  %v20969_v49 = vand.u32 4294901760, %v30688_v57 }
 0x50e   :  { %34698 = vst [vmem:[#allocation60_spill] sm:$0xff] %v30843_v20  ;;  %v30859_v35 = vpack.c.bf16 %v20262_v63, %v20250_v21  ;;  %34702 = vst [vmem:[#allocation66_spill] sm:$0xff] %v30861_v10  ;;  %v30867_v20 = vpack.c.bf16 %v19618_v29, %v19606_v28  ;;  %v34704_v2 = vand.u32 4294901760, %v30453_v26  ;;  %v34707_v21 = vld [vmem:[#allocation78_spill] sm:$0xff]  ;;  %v30876_v43 = vpack.c.bf16 %v20254_v40, %v20242_v53 }
 0x50f   :  { %25663 = vmatpush1.bf16.msra.mxu1 %v34701_v13  ;;  %v20244_v58 = vand.u32 4294901760, %v20243_v25  ;;  %v20256_v60 = vand.u32 4294901760, %v20255_v39  ;;  %v34705_v13 = vand.u32 4294901760, %v30533_v0  ;;  %v34709_v62 = vand.u32 4294901760, %v30593_v9 }
 0x510   :  { %25665 = vmatprep.subr.bf16.mxu1 %v34703_v38  ;;  %11696 = vmatmul.mubr.f32.gmra.mrb[10].mxu0 %v34707_v21  ;;  %34708 = vst [vmem:[#allocation31_spill] sm:$0xff] %v30876_v43  ;;  %v34710_v63 = vand.u32 4294901760, %v30596_v23  ;;  %v34712_v28 = vand.u32 4294901760, %v30628_v19  ;;  %v34713_v39 = vand.u32 4294901760, %v30646_v31  ;;  %v20970_v25 = vsub.f32 %v30688_v57, %v20969_v49 }
 0x511   :  { %v30873_v59 = vpack.c.bf16 %v34705_v13, %v34704_v2  ;;  %12215 = vmatmul.mubr.f32.gmra.mrb[14].mxu1 %v30081_v55  ;;  %11770 = vmatprep.mubr.f32.mxu0 %v34461_v61  ;;  %v30893_v53 = vpack.c.bf16 %v20256_v60, %v20244_v58  ;;  %v20981_v9 = vand.u32 4294901760, %v30698_v36  ;;  %v34715_v23 = vand.u32 4294901760, %v30635_v34 }
 0x512   :  { %v30882_v48 = vpack.c.bf16 %v34710_v63, %v34709_v62  ;;  %v30888_v29 = vpack.c.bf16 %v34713_v39, %v34712_v28  ;;  %v34716_v40 = vand.u32 4294901760, %v30649_v15  ;;  %v20977_v13 = vand.u32 4294901760, %v30693_v4  ;;  %12220 = vmatprep.mubr.f32.mxu1 %v34461_v61  ;;  %v34718_v4 = vld [vmem:[#allocation62_spill] sm:$0xff]  ;;  %v34720_v28 = vld [vmem:[#allocation35_spill] sm:$0xff] }
 0x513   :  { %34706 = vst [vmem:[#allocation73_spill] sm:$0xff] %v30873_v59  ;;  %v20971_v62 = vand.u32 4294901760, %v20970_v25  ;;  %v20989_v63 = vand.u32 4294901760, %v30715_v46  ;;  %v21607_v60 = vand.u32 4294901760, %v30724_v12  ;;  %v20982_v58 = vsub.f32 %v30698_v36, %v20981_v9 }
 0x514   :  { %34711 = vst [vmem:[#allocation27_spill] sm:$0xff] %v30882_v48  ;;  %34714 = vst [vmem:[#allocation33_spill] sm:$0xff] %v30888_v29  ;;  %v30900_v2 = vpack.c.bf16 %v34716_v40, %v34715_v23  ;;  %v21619_v34 = vand.u32 4294901760, %v30751_v14  ;;  %v21615_v39 = vand.u32 4294901760, %v30729_v8  ;;  %11774 = vmatmul.mubr.f32.vlgmr.msra.gmra.mrb[4].mxu0 %v34718_v4  ;;  %v21627_v25 = vand.u32 4294901760, %v30771_v33 }
 0x515   :  { %v30914_v23 = vpack.c.bf16 %v20989_v63, %v20977_v13  ;;  %v21608_v46 = vsub.f32 %v30724_v12, %v21607_v60  ;;  %25647 = vmatpush1.bf16.msra.mxu0 %v34720_v28  ;;  %12222 = vmatmul.mubr.f32.gmra.mrb[16].mxu1 %v30146_v56  ;;  %v20983_v57 = vand.u32 4294901760, %v20982_v58  ;;  %v30923_v36 = vpack.c.bf16 %v20981_v9, %v20969_v49  ;;  %v34722_v13 = vld [vmem:[#allocation54_spill] sm:$0xff] }
 0x516   :  { %34717 = vst [vmem:[#allocation78_spill] sm:$0xff] %v30900_v2  ;;  %v21620_v15 = vsub.f32 %v30751_v14, %v21619_v34  ;;  %25649 = vmatprep.subr.bf16.mxu0 %v34722_v13  ;;  %11779 = vmatprep.mubr.f32.mxu0 %v34461_v61  ;;  %v30929_v33 = vpack.c.bf16 %v21627_v25, %v21615_v39  ;;  %v34724_v63 = vand.u32 4294901760, %v30614_v16  ;;  %v34725_v28 = vand.u32 4294901760, %v30630_v51  ;;  %v34732_v25 = vld [vmem:[#allocation71_spill] sm:$0xff]  ;;  %v34733_v12 = vld [vmem:[#allocation74_spill] sm:$0xff] }
 0x517   :  { %34719 = vst [vmem:[#allocation62_spill] sm:$0xff] %v30914_v23  ;;  %34721 = vst [vmem:[#allocation35_spill] sm:$0xff] %v30923_v36  ;;  %v30937_v58 = vpack.c.bf16 %v21619_v34, %v21607_v60  ;;  %12227 = vmatprep.mubr.f32.mxu1 %v34461_v61  ;;  %v30940_v49 = vpack.c.bf16 %v20983_v57, %v20971_v62  ;;  %v21609_v9 = vand.u32 4294901760, %v21608_v46  ;;  %v34729_v13 = vand.u32 4294901760, %v30637_v5  ;;  %v34735_v57 = vld [vmem:[#allocation77_spill] sm:$0xff]  ;;  %v34736_v62 = vld [vmem:[#allocation30_spill] sm:$0xff] }
 0x518   :  { %34723 = vst [vmem:[#allocation54_spill] sm:$0xff] %v30929_v33  ;;  %v30935_v40 = vpack.c.bf16 %v34725_v28, %v34724_v63  ;;  %v21621_v8 = vand.u32 4294901760, %v21620_v15  ;;  %v34730_v36 = vand.u32 4294901760, %v30662_v18  ;;  %11783 = vmatmul.mubr.f32.gmra.mrb[6].mxu0 %v34732_v25  ;;  %v34738_v34 = vld [vmem:[#allocation81_spill] sm:$0xff]  ;;  %v34739_v15 = vld [vmem:[#allocation22_spill] sm:$0xff]  ;;  %v24917_v63 = vld [vmem:[%s34088_s5 + $0x50] sm:$0xff] }
 0x519   :  { %34727 = vst [vmem:[#allocation106_spill] sm:$0xff] %v30937_v58  ;;  %34728 = vst [vmem:[#allocation107_spill] sm:$0xff] %v30940_v49  ;;  %12229 = vmatmul.mubr.f32.gmra.mrb[18].mxu1 %v34733_v12  ;;  %11788 = vmatprep.mubr.f32.mxu0 %v34461_v61  ;;  %v34741_v46 = vld [vmem:[#allocation46_spill] sm:$0xff]  ;;  %v34747_v5 = vld [vmem:[#allocation41_spill] sm:$0xff] }
 0x51a   :  { %34726 = vst [vmem:[#allocation105_spill] sm:$0xff] %v30935_v40  ;;  %v30946_v39 = vpack.c.bf16 %v34730_v36, %v34729_v13  ;;  %v30951_v60 = vpack.c.bf16 %v21621_v8, %v21609_v9  ;;  %12307 = vmatprep.mubr.f32.mxu1 %v34461_v61  ;;  %v34737_v36 = vld [vmem:[#allocation38_spill] sm:$0xff]  ;;  %v34742_v9 = vld [vmem:[#allocation28_spill] sm:$0xff]  ;;  %v12715_v13 = vsel %vm10070_vm10, %v24917_v63, 0 }
 0x51b   :  { %v34745_v40 = vld [vmem:[#allocation52_spill] sm:$0xff] }
 0x51c   :  { %34731 = vst [vmem:[#allocation108_spill] sm:$0xff] %v30946_v39  ;;  %34734 = vst [vmem:[#allocation71_spill] sm:$0xff] %v30951_v60  ;;  %11792 = vmatmul.mubr.f32.gmra.mrb[8].mxu0 %v34735_v57 }
 0x51d   :  { %12310 = vmatmul.mubr.f32.vlgmr.msra.gmra.mrb[12].mxu1 %v34684_v41  ;;  %11797 = vmatprep.mubr.f32.mxu0 %v34461_v61  ;;  %v34740_v41 = vld [vmem:[#allocation45_spill] sm:$0xff] }
 0x51e   :  { %25667 = vmatpush1.bf16.msra.mxu1 %v34736_v62  ;;  %12315 = vmatprep.mubr.f32.mxu1 %v34461_v61 }
 0x51f   :  { %25669 = vmatprep.subr.bf16.mxu1 %v34737_v36  ;;  %v24918_v36 = vld [vmem:[%s34088_s5 + $0x58] sm:$0xff] }
 0x520   :  { %11801 = vmatmul.mubr.f32.gmra.mrb[10].mxu0 %v34738_v34 }
 0x521   :  { %12318 = vmatmul.mubr.f32.gmra.mrb[14].mxu1 %v34688_v17  ;;  %11883 = vmatprep.mubr.f32.mxu0 %v34461_v61  ;;  %v24915_v17 = vld [vmem:[%s34088_s5 + $0x40] sm:$0xff] }
 0x522   :  { %12323 = vmatprep.mubr.f32.mxu1 %v34461_v61 }
 0x524   :  { %11885 = vmatmul.mubr.f32.vlgmr.msra.gmra.mrb[4].mxu0 %v34646_v6 }
 0x525   :  { %25651 = vmatpush1.bf16.msra.mxu0 %v34739_v15  ;;  %12326 = vmatmul.mubr.f32.gmra.mrb[16].mxu1 %v34697_v27  ;;  %v12709_v27 = vsel %vm10070_vm10, %v24915_v17, 0 }
 0x526   :  { %25677 = vmatprep.subr.bf16.mxu0 %v34740_v41  ;;  %11890 = vmatprep.mubr.f32.mxu0 %v34461_v61  ;;  %v30988_v8 = vand.u32 4294901760, %v12709_v27 }
 0x527   :  { %12331 = vmatprep.mubr.f32.mxu1 %v34461_v61 }
 0x528   :  { %11892 = vmatmul.mubr.f32.gmra.mrb[6].mxu0 %v30081_v55 }
 0x529   :  { %12334 = vmatmul.mubr.f32.gmra.mrb[18].mxu1 %v34707_v21  ;;  %11897 = vmatprep.mubr.f32.mxu0 %v34461_v61  ;;  %v24916_v21 = vld [vmem:[%s34088_s5 + $0x48] sm:$0xff] }
 0x52a   :  { %12408 = vmatprep.mubr.f32.mxu1 %v34461_v61 }
 0x52c   :  { %11899 = vmatmul.mubr.f32.gmra.mrb[8].mxu0 %v30146_v56 }
 0x52d   :  { %12412 = vmatmul.mubr.f32.vlgmr.msra.gmra.mrb[12].mxu1 %v34718_v4  ;;  %11904 = vmatprep.mubr.f32.mxu0 %v34461_v61  ;;  %v12712_v4 = vsel %vm10070_vm10, %v24916_v21, 0 }
 0x52e   :  { %25671 = vmatpush1.bf16.msra.mxu1 %v34741_v46  ;;  %12417 = vmatprep.mubr.f32.mxu1 %v34461_v61  ;;  %v31001_v28 = vand.u32 4294901760, %v12712_v4 }
 0x52f   :  { %25673 = vmatprep.subr.bf16.mxu1 %v34703_v38  ;;  %v30999_v38 = vsub.f32 %v12709_v27, %v30988_v8  ;;  %v12718_v27 = vsel %vm10070_vm10, %v24918_v36, 0 }
 0x530   :  { %11906 = vmatmul.mubr.f32.gmra.mrb[10].mxu0 %v34733_v12  ;;  %v31017_v17 = vsub.f32 %v12712_v4, %v31001_v28  ;;  %v31034_v63 = vand.u32 4294901760, %v12718_v27 }
 0x531   :  { %12421 = vmatmul.mubr.f32.gmra.mrb[14].mxu1 %v34732_v25  ;;  %11980 = vmatprep.mubr.f32.mxu0 %v34461_v61  ;;  %v34743_v25 = vld [vmem:[#allocation21_spill] sm:$0xff]  ;;  %v31014_v15 = vand.u32 4294901760, %v30999_v38 }
 0x532   :  { %12426 = vmatprep.mubr.f32.mxu1 %v34461_v61  ;;  %v31029_v21 = vand.u32 4294901760, %v31017_v17  ;;  %v31048_v39 = vsub.f32 %v12718_v27, %v31034_v63  ;;  %v34746_v27 = vld [vmem:[#allocation43_spill] sm:$0xff] }
 0x533   :  { %v12792_v46 = vsub.f32 %v30999_v38, %v31014_v15  ;;  %v34748_v18 = vpack.c.bf16 %v34746_v27, %v34747_v5  ;;  %v34749_v5 = vld [vmem:[#allocation17_spill] sm:$0xff] }
 0x534   :  { %11982 = vmatmul.mubr.f32.vlgmr.msra.gmra.mrb[4].mxu0 %v34646_v6  ;;  %v12803_v36 = vsub.f32 %v31017_v17, %v31029_v21  ;;  %v31056_v58 = vand.u32 4294901760, %v31048_v39  ;;  %v34756_v27 = vld [vmem:[#allocation49_spill] sm:$0xff] }
 0x535   :  { %25679 = vmatpush1.bf16.msra.mxu0 %v34742_v9  ;;  %12430 = vmatmul.mubr.f32.gmra.mrb[16].mxu1 %v34735_v57  ;;  %v31019_v57 = vand.u32 4294901760, %v12715_v13 }
 0x536   :  { %25681 = vmatprep.subr.bf16.mxu0 %v34743_v25  ;;  %11987 = vmatprep.mubr.f32.mxu0 %v34461_v61  ;;  %v12793_v25 = vand.u32 4294901760, %v12792_v46  ;;  %v12825_v14 = vsub.f32 %v31048_v39, %v31056_v58 }
 0x537   :  { %12435 = vmatprep.mubr.f32.mxu1 %v34461_v61  ;;  %v31032_v4 = vsub.f32 %v12715_v13, %v31019_v57 }
 0x538   :  { %11989 = vmatmul.mubr.f32.gmra.mrb[6].mxu0 %v30081_v55 }
 0x539   :  { %12439 = vmatmul.mubr.f32.gmra.mrb[18].mxu1 %v34738_v34  ;;  %11994 = vmatprep.mubr.f32.mxu0 %v34461_v61  ;;  %v34744_v34 = vld [vmem:[#allocation51_spill] sm:$0xff]  ;;  %v31045_v13 = vand.u32 4294901760, %v31032_v4 }
 0x53a   :  { %12521 = vmatprep.mubr.f32.mxu1 %v34461_v61 }
 0x53b   :  { %v12814_v46 = vsub.f32 %v31032_v4, %v31045_v13 }
 0x53c   :  { %11996 = vmatmul.mubr.f32.gmra.mrb[8].mxu0 %v30146_v56 }
 0x53d   :  { %12523 = vmatmul.mubr.f32.vlgmr.msra.gmra.mrb[12].mxu1 %v34646_v6  ;;  %12001 = vmatprep.mubr.f32.mxu0 %v34461_v61 }
 0x53e   :  { %25675 = vmatpush1.bf16.msra.mxu1 %v34736_v62  ;;  %12528 = vmatprep.mubr.f32.mxu1 %v34461_v61  ;;  %v12804_v62 = vand.u32 4294901760, %v12803_v36  ;;  %v12815_v36 = vand.u32 4294901760, %v12814_v46  ;;  %v34752_v46 = vld [vmem:[#allocation39_spill] sm:$0xff] }
 0x53f   :  { %25701 = vmatprep.subr.bf16.mxu1 %v34744_v34 }
 0x540   :  { %12003 = vmatmul.mubr.f32.gmra.mrb[10].mxu0 %v34733_v12 }
 0x541   :  { %12530 = vmatmul.mubr.f32.gmra.mrb[14].mxu1 %v30081_v55  ;;  %12788 = vmatprep.mubr.f32.mxu0 %v34461_v61 }
 0x542   :  { %12535 = vmatprep.mubr.f32.mxu1 %v34461_v61 }
 0x544   :  { %12794 = vmatmul.mubr.f32.vlgmr.msra.gmra.mrb[4].mxu0 %v12793_v25 }
 0x545   :  { %25683 = vmatpush1.bf16.msra.mxu0 %v34745_v40  ;;  %12537 = vmatmul.mubr.f32.gmra.mrb[16].mxu1 %v30146_v56  ;;  %v12826_v40 = vand.u32 4294901760, %v12825_v14  ;;  %v34751_v14 = vld [vmem:[#allocation40_spill] sm:$0xff] }
 0x546   :  { %25685 = vmatprep.subr.bf16.mxu0 %v34748_v18  ;;  %12799 = vmatprep.mubr.f32.mxu0 %v34461_v61  ;;  %v34750_v18 = vld [vmem:[#allocation57_spill] sm:$0xff] }
 0x547   :  { %12542 = vmatprep.mubr.f32.mxu1 %v34461_v61 }
 0x548   :  { %12805 = vmatmul.mubr.f32.gmra.mrb[6].mxu0 %v12804_v62 }
 0x549   :  { %12544 = vmatmul.mubr.f32.gmra.mrb[18].mxu1 %v34733_v12  ;;  %12810 = vmatprep.mubr.f32.mxu0 %v34461_v61 }
 0x54a   :  { %12618 = vmatprep.mubr.f32.mxu1 %v34461_v61 }
 0x54c   :  { %12816 = vmatmul.mubr.f32.gmra.mrb[8].mxu0 %v12815_v36 }
 0x54d   :  { %12620 = vmatmul.mubr.f32.vlgmr.msra.gmra.mrb[12].mxu1 %v34646_v6  ;;  %12821 = vmatprep.mubr.f32.mxu0 %v34461_v61  ;;  %v34753_v6 = vpack.c.bf16 %v34751_v14, %v34752_v46 }
 0x54e   :  { %25703 = vmatpush1.bf16.msra.mxu1 %v34749_v5  ;;  %12625 = vmatprep.mubr.f32.mxu1 %v34461_v61 }
 0x54f   :  { %25705 = vmatprep.subr.bf16.mxu1 %v34750_v18  ;;  %v34757_v18 = vld [vmem:[#allocation47_spill] sm:$0xff] }
 0x550   :  { %12827 = vmatmul.mubr.f32.gmra.mrb[10].mxu0 %v12826_v40  ;;  %v34758_v14 = vpack.c.bf16 %v34756_v27, %v34757_v18  ;;  %v34767_v18 = vld [vmem:[#allocation19_spill] sm:$0xff] }
 0x551   :  { %12627 = vmatmul.mubr.f32.gmra.mrb[14].mxu1 %v30081_v55  ;;  %12917 = vmatprep.mubr.f32.mxu0 %v34461_v61  ;;  %v34754_v55 = vld [vmem:[#allocation55_spill] sm:$0xff] }
 0x552   :  { %12632 = vmatprep.mubr.f32.mxu1 %v34461_v61 }
 0x554   :  { %12919 = vmatmul.mubr.f32.vlgmr.msra.gmra.mrb[4].mxu0 %v30988_v8 }
 0x555   :  { %25687 = vmatpush1.bf16.msra.mxu0 %v34753_v6  ;;  %12634 = vmatmul.mubr.f32.gmra.mrb[16].mxu1 %v30146_v56  ;;  %v34762_v6 = vld [vmem:[#allocation58_spill] sm:$0xff] }
 0x556   :  { %25689 = vmatprep.subr.bf16.mxu0 %v34740_v41  ;;  %12924 = vmatprep.mubr.f32.mxu0 %v34461_v61  ;;  %v31094_v56 = vpop.f32.mrb[4].mxu1 }
 0x557   :  { %12639 = vmatprep.mubr.f32.mxu1 %v34461_v61  ;;  %34755 = vst [vmem:[#allocation74_spill] sm:$0xff] %v31094_v56 }
 0x558   :  { %12926 = vmatmul.mubr.f32.gmra.mrb[6].mxu0 %v31001_v28 }
 0x559   :  { %12641 = vmatmul.mubr.f32.gmra.mrb[18].mxu1 %v34733_v12  ;;  %12931 = vmatprep.mubr.f32.mxu0 %v34461_v61  ;;  %v31099_v12 = vpop.f32.mrb[5].mxu1 }
 0x55a   :  { %13426 = vmatprep.mubr.f32.mxu1 %v34461_v61  ;;  %34759 = vst [vmem:[#allocation77_spill] sm:$0xff] %v31099_v12 }
 0x55c   :  { %12933 = vmatmul.mubr.f32.gmra.mrb[8].mxu0 %v31019_v57 }
 0x55d   :  { %13432 = vmatmul.mubr.f32.vlgmr.msra.gmra.mrb[12].mxu1 %v12793_v25  ;;  %12938 = vmatprep.mubr.f32.mxu0 %v34461_v61  ;;  %v31104_v25 = vpop.f32.mrb[6].mxu1 }
 0x55e   :  { %25707 = vmatpush1.bf16.msra.mxu1 %v34754_v55  ;;  %13437 = vmatprep.mubr.f32.mxu1 %v34461_v61  ;;  %34760 = vst [vmem:[#allocation30_spill] sm:$0xff] %v31104_v25  ;;  %v31106_v46 = vpop.f32.mrb[7].mxu1  ;;  %v34779_v25 = vld [vmem:[#allocation68_spill] sm:$0xff] }
 0x55f   :  { %25709 = vmatprep.subr.bf16.mxu1 %v34758_v14  ;;  %34761 = vst [vmem:[#allocation38_spill] sm:$0xff] %v31106_v46  ;;  %v31112_v55 = vpop.f32.mrb[8].mxu1  ;;  %v34768_v14 = vld [vmem:[#allocation15_spill] sm:$0xff]  ;;  %v34777_v46 = vld [vmem:[#allocation88_spill] sm:$0xff] }
 0x560   :  { %12940 = vmatmul.mubr.f32.gmra.mrb[10].mxu0 %v31034_v63  ;;  %34763 = vst [vmem:[#allocation81_spill] sm:$0xff] %v31112_v55 }
 0x561   :  { %13443 = vmatmul.mubr.f32.gmra.mrb[14].mxu1 %v12804_v62  ;;  %13018 = vmatprep.mubr.f32.mxu0 %v34461_v61  ;;  %v31115_v62 = vpop.f32.mrb[9].mxu1 }
 0x562   :  { %13448 = vmatprep.mubr.f32.mxu1 %v34461_v61  ;;  %34764 = vst [vmem:[#allocation22_spill] sm:$0xff] %v31115_v62  ;;  %v31120_v27 = vpop.f32.mrb[10].mxu1 }
 0x563   :  { %34765 = vst [vmem:[#allocation45_spill] sm:$0xff] %v31120_v27 }
 0x564   :  { %13021 = vmatmul.mubr.f32.vlgmr.msra.gmra.mrb[4].mxu0 %v30999_v38 }
 0x565   :  { %25691 = vmatpush1.bf16.msra.mxu0 %v34742_v9  ;;  %13454 = vmatmul.mubr.f32.gmra.mrb[16].mxu1 %v12815_v36  ;;  %v31122_v36 = vpop.f32.mrb[11].mxu1 }
 0x566   :  { %25693 = vmatprep.subr.bf16.mxu0 %v34762_v6  ;;  %13026 = vmatprep.mubr.f32.mxu0 %v34461_v61  ;;  %34766 = vst [vmem:[#allocation46_spill] sm:$0xff] %v31122_v36  ;;  %v34769_v6 = vpack.c.bf16 %v34767_v18, %v34768_v14  ;;  %v24922_v14 = vld [vmem:[%s34088_s5 + $0x70] sm:$0xff] }
 0x567   :  { %13459 = vmatprep.mubr.f32.mxu1 %v34461_v61 }
 0x568   :  { %13029 = vmatmul.mubr.f32.gmra.mrb[6].mxu0 %v31017_v17 }
 0x569   :  { %13465 = vmatmul.mubr.f32.gmra.mrb[18].mxu1 %v12826_v40  ;;  %13034 = vmatprep.mubr.f32.mxu0 %v34461_v61  ;;  %v34770_v40 = vld [vmem:[#allocation63_spill] sm:$0xff] }
 0x56a   :  { %13555 = vmatprep.mubr.f32.mxu1 %v34461_v61 }
 0x56c   :  { %13037 = vmatmul.mubr.f32.gmra.mrb[8].mxu0 %v31032_v4 }
 0x56d   :  { %13557 = vmatmul.mubr.f32.vlgmr.msra.gmra.mrb[12].mxu1 %v30988_v8  ;;  %13042 = vmatprep.mubr.f32.mxu0 %v34461_v61 }
 0x56e   :  { %25711 = vmatpush1.bf16.msra.mxu1 %v34769_v6  ;;  %13562 = vmatprep.mubr.f32.mxu1 %v34461_v61 }
 0x56f   :  { %25713 = vmatprep.subr.bf16.mxu1 %v34744_v34 }
 0x570   :  { %13045 = vmatmul.mubr.f32.gmra.mrb[10].mxu0 %v31048_v39 }
 0x571   :  { %13564 = vmatmul.mubr.f32.gmra.mrb[14].mxu1 %v31001_v28  ;;  %13119 = vmatprep.mubr.f32.mxu0 %v34461_v61 }
 0x572   :  { %13569 = vmatprep.mubr.f32.mxu1 %v34461_v61 }
 0x574   :  { %13123 = vmatmul.mubr.f32.vlgmr.msra.gmra.mrb[4].mxu0 %v31014_v15 }
 0x575   :  { %25695 = vmatpush1.bf16.msra.mxu0 %v34770_v40  ;;  %13571 = vmatmul.mubr.f32.gmra.mrb[16].mxu1 %v31019_v57  ;;  %v34774_v40 = vld [vmem:[#allocation42_spill] sm:$0xff] }
 0x576   :  { %25697 = vmatprep.subr.bf16.mxu0 %v34740_v41  ;;  %13128 = vmatprep.mubr.f32.mxu0 %v34461_v61  ;;  %v34771_v41 = vld [vmem:[#allocation65_spill] sm:$0xff] }
 0x577   :  { %13576 = vmatprep.mubr.f32.mxu1 %v34461_v61 }
 0x578   :  { %13132 = vmatmul.mubr.f32.gmra.mrb[6].mxu0 %v31029_v21 }
 0x579   :  { %13578 = vmatmul.mubr.f32.gmra.mrb[18].mxu1 %v31034_v63  ;;  %13137 = vmatprep.mubr.f32.mxu0 %v34461_v61 }
 0x57a   :  { %13656 = vmatprep.mubr.f32.mxu1 %v34461_v61 }
 0x57c   :  { %13141 = vmatmul.mubr.f32.gmra.mrb[8].mxu0 %v31045_v13 }
 0x57d   :  { %13659 = vmatmul.mubr.f32.vlgmr.msra.gmra.mrb[12].mxu1 %v30999_v38  ;;  %13146 = vmatprep.mubr.f32.mxu0 %v34461_v61  ;;  %v34772_v38 = vld [vmem:[#allocation67_spill] sm:$0xff] }
 0x57e   :  { %25715 = vmatpush1.bf16.msra.mxu1 %v34749_v5  ;;  %13664 = vmatprep.mubr.f32.mxu1 %v34461_v61 }
 0x57f   :  { %25717 = vmatprep.subr.bf16.mxu1 %v34771_v41  ;;  %v34775_v41 = vld [vmem:[#allocation87_spill] sm:$0xff] }
 0x580   :  { %13150 = vmatmul.mubr.f32.gmra.mrb[10].mxu0 %v31056_v58 }
 0x581   :  { %13667 = vmatmul.mubr.f32.gmra.mrb[14].mxu1 %v31017_v17  ;;  %13232 = vmatprep.mubr.f32.mxu0 %v34461_v61 }
 0x582   :  { %13672 = vmatprep.mubr.f32.mxu1 %v34461_v61 }
 0x584   :  { %13234 = vmatmul.mubr.f32.vlgmr.msra.gmra.mrb[4].mxu0 %v30988_v8 }
 0x585   :  { %25699 = vmatpush1.bf16.msra.mxu0 %v34742_v9  ;;  %13675 = vmatmul.mubr.f32.gmra.mrb[16].mxu1 %v31032_v4  ;;  %v24920_v9 = vld [vmem:[%s34088_s5 + $0x60] sm:$0xff]  ;;  %v34773_v4 = vld [vmem:[#allocation76_spill] sm:$0xff] }
 0x586   :  { %25725 = vmatprep.subr.bf16.mxu0 %v34772_v38  ;;  %13239 = vmatprep.mubr.f32.mxu0 %v34461_v61  ;;  %v14074_v17 = vsel %vm10070_vm10, %v24920_v9, 0  ;;  %v24923_v9 = vld [vmem:[%s34088_s5 + $0x78] sm:$0xff] }
 0x587   :  { %13680 = vmatprep.mubr.f32.mxu1 %v34461_v61  ;;  %v31180_v18 = vand.u32 4294901760, %v14074_v17 }
 0x588   :  { %13241 = vmatmul.mubr.f32.gmra.mrb[6].mxu0 %v31001_v28 }
 0x589   :  { %13683 = vmatmul.mubr.f32.gmra.mrb[18].mxu1 %v31048_v39  ;;  %13246 = vmatprep.mubr.f32.mxu0 %v34461_v61  ;;  %v24921_v39 = vld [vmem:[%s34088_s5 + $0x68] sm:$0xff] }
 0x58a   :  { %13757 = vmatprep.mubr.f32.mxu1 %v34461_v61 }
 0x58c   :  { %13248 = vmatmul.mubr.f32.gmra.mrb[8].mxu0 %v31019_v57 }
 0x58d   :  { %13761 = vmatmul.mubr.f32.vlgmr.msra.gmra.mrb[12].mxu1 %v31014_v15  ;;  %13253 = vmatprep.mubr.f32.mxu0 %v34461_v61  ;;  %v14077_v15 = vsel %vm10070_vm10, %v24921_v39, 0  ;;  %v14083_v39 = vsel %vm10070_vm10, %v24923_v9, 0 }
 0x58e   :  { %25719 = vmatpush1.bf16.msra.mxu1 %v34773_v4  ;;  %13766 = vmatprep.mubr.f32.mxu1 %v34461_v61  ;;  %v31193_v6 = vand.u32 4294901760, %v14077_v15  ;;  %v31226_v36 = vand.u32 4294901760, %v14083_v39 }
 0x58f   :  { %25721 = vmatprep.subr.bf16.mxu1 %v34744_v34  ;;  %v31191_v34 = vsub.f32 %v14074_v17, %v31180_v18 }
 0x590   :  { %13255 = vmatmul.mubr.f32.gmra.mrb[10].mxu0 %v31034_v63  ;;  %v31209_v4 = vsub.f32 %v14077_v15, %v31193_v6  ;;  %v31240_v62 = vsub.f32 %v14083_v39, %v31226_v36  ;;  %v34778_v39 = vld [vmem:[#allocation70_spill] sm:$0xff] }
 0x591   :  { %13770 = vmatmul.mubr.f32.gmra.mrb[14].mxu1 %v31029_v21  ;;  %13329 = vmatprep.mubr.f32.mxu0 %v34461_v61  ;;  %v14080_v21 = vsel %vm10070_vm10, %v24922_v14, 0  ;;  %v31206_v17 = vand.u32 4294901760, %v31191_v34  ;;  %v34780_v12 = vpack.c.bf16 %v34778_v39, %v34779_v25  ;;  %v34782_v25 = vld [vmem:[#allocation59_spill] sm:$0xff]  ;;  %v34788_v39 = vld [vmem:[#allocation82_spill] sm:$0xff] }
 0x592   :  { %13775 = vmatprep.mubr.f32.mxu1 %v34461_v61  ;;  %v31248_v55 = vand.u32 4294901760, %v31240_v62 }
 0x593   :  { %v14157_v14 = vsub.f32 %v31191_v34, %v31206_v17 }
 0x594   :  { %13331 = vmatmul.mubr.f32.vlgmr.msra.gmra.mrb[4].mxu0 %v30988_v8  ;;  %v14190_v56 = vsub.f32 %v31240_v62, %v31248_v55 }
 0x595   :  { %25727 = vmatpush1.bf16.msra.mxu0 %v34774_v40  ;;  %13779 = vmatmul.mubr.f32.gmra.mrb[16].mxu1 %v31045_v13  ;;  %v31211_v13 = vand.u32 4294901760, %v14080_v21  ;;  %v14158_v9 = vand.u32 4294901760, %v14157_v14 }
 0x596   :  { %25729 = vmatprep.subr.bf16.mxu0 %v34775_v41  ;;  %13336 = vmatprep.mubr.f32.mxu0 %v34461_v61  ;;  %v31221_v41 = vand.u32 4294901760, %v31209_v4 }
 0x597   :  { %13784 = vmatprep.mubr.f32.mxu1 %v34461_v61  ;;  %v31224_v15 = vsub.f32 %v14080_v21, %v31211_v13 }
 0x598   :  { %13338 = vmatmul.mubr.f32.gmra.mrb[6].mxu0 %v31001_v28  ;;  %v14168_v27 = vsub.f32 %v31209_v4, %v31221_v41 }
 0x599   :  { %13788 = vmatmul.mubr.f32.gmra.mrb[18].mxu1 %v31056_v58  ;;  %13343 = vmatprep.mubr.f32.mxu0 %v34461_v61  ;;  %v34776_v58 = vld [vmem:[#allocation84_spill] sm:$0xff]  ;;  %v31237_v21 = vand.u32 4294901760, %v31224_v15 }
 0x59a   :  { %13870 = vmatprep.mubr.f32.mxu1 %v34461_v61 }
 0x59b   :  { %v14179_v14 = vsub.f32 %v31224_v15, %v31237_v21 }
 0x59c   :  { %13345 = vmatmul.mubr.f32.gmra.mrb[8].mxu0 %v31019_v57 }
 0x59d   :  { %13872 = vmatmul.mubr.f32.vlgmr.msra.gmra.mrb[12].mxu1 %v30988_v8  ;;  %13350 = vmatprep.mubr.f32.mxu0 %v34461_v61 }
 0x59e   :  { %25723 = vmatpush1.bf16.msra.mxu1 %v34749_v5  ;;  %13877 = vmatprep.mubr.f32.mxu1 %v34461_v61  ;;  %v14169_v5 = vand.u32 4294901760, %v14168_v27  ;;  %v14180_v27 = vand.u32 4294901760, %v14179_v14  ;;  %v34784_v14 = vld [vmem:[#allocation72_spill] sm:$0xff] }
 0x59f   :  { %25749 = vmatprep.subr.bf16.mxu1 %v34776_v58 }
 0x5a0   :  { %13352 = vmatmul.mubr.f32.gmra.mrb[10].mxu0 %v31034_v63 }
 0x5a1   :  { %13879 = vmatmul.mubr.f32.gmra.mrb[14].mxu1 %v31001_v28  ;;  %14153 = vmatprep.mubr.f32.mxu0 %v34461_v61 }
 0x5a2   :  { %13884 = vmatprep.mubr.f32.mxu1 %v34461_v61 }
 0x5a4   :  { %14159 = vmatmul.mubr.f32.vlgmr.msra.gmra.mrb[4].mxu0 %v14158_v9 }
 0x5a5   :  { %25731 = vmatpush1.bf16.msra.mxu0 %v34777_v46  ;;  %13886 = vmatmul.mubr.f32.gmra.mrb[16].mxu1 %v31019_v57  ;;  %v14191_v46 = vand.u32 4294901760, %v14190_v56  ;;  %v34783_v56 = vld [vmem:[#allocation69_spill] sm:$0xff] }
 0x5a6   :  { %25733 = vmatprep.subr.bf16.mxu0 %v34780_v12  ;;  %14164 = vmatprep.mubr.f32.mxu0 %v34461_v61  ;;  %v34781_v12 = vld [vmem:[#allocation48_spill] sm:$0xff] }
 0x5a7   :  { %13891 = vmatprep.mubr.f32.mxu1 %v34461_v61 }
 0x5a8   :  { %14170 = vmatmul.mubr.f32.gmra.mrb[6].mxu0 %v14169_v5 }
 0x5a9   :  { %13893 = vmatmul.mubr.f32.gmra.mrb[18].mxu1 %v31034_v63  ;;  %14175 = vmatprep.mubr.f32.mxu0 %v34461_v61 }
 0x5aa   :  { %13967 = vmatprep.mubr.f32.mxu1 %v34461_v61 }
 0x5ac   :  { %14181 = vmatmul.mubr.f32.gmra.mrb[8].mxu0 %v14180_v27 }
 0x5ad   :  { %13969 = vmatmul.mubr.f32.vlgmr.msra.gmra.mrb[12].mxu1 %v30988_v8  ;;  %14186 = vmatprep.mubr.f32.mxu0 %v34461_v61  ;;  %v34785_v8 = vpack.c.bf16 %v34783_v56, %v34784_v14  ;;  %v34796_v56 = vld [vmem:[#allocation11_spill] sm:$0xff] }
 0x5ae   :  { %25751 = vmatpush1.bf16.msra.mxu1 %v34781_v12  ;;  %13974 = vmatprep.mubr.f32.mxu1 %v34461_v61  ;;  %v15398_v14 = vand.u32 4294901760, %v34796_v56 }
 0x5af   :  { %25753 = vmatprep.subr.bf16.mxu1 %v34782_v25 }
 0x5b0   :  { %14192 = vmatmul.mubr.f32.gmra.mrb[10].mxu0 %v14191_v46 }
 0x5b1   :  { %13976 = vmatmul.mubr.f32.gmra.mrb[14].mxu1 %v31001_v28  ;;  %14282 = vmatprep.mubr.f32.mxu0 %v34461_v61  ;;  %v34786_v28 = vld [vmem:[#allocation91_spill] sm:$0xff] }
 0x5b2   :  { %13981 = vmatprep.mubr.f32.mxu1 %v34461_v61 }
 0x5b4   :  { %14284 = vmatmul.mubr.f32.vlgmr.msra.gmra.mrb[4].mxu0 %v31180_v18 }
 0x5b5   :  { %25735 = vmatpush1.bf16.msra.mxu0 %v34785_v8  ;;  %13983 = vmatmul.mubr.f32.gmra.mrb[16].mxu1 %v31019_v57  ;;  %v34787_v57 = vld [vmem:[#allocation85_spill] sm:$0xff]  ;;  %v34797_v8 = vld [vmem:[#allocation8_spill] sm:$0xff] }
 0x5b6   :  { %25737 = vmatprep.subr.bf16.mxu0 %v34772_v38  ;;  %14289 = vmatprep.mubr.f32.mxu0 %v34461_v61  ;;  %v34789_v25 = vpack.c.bf16 %v34787_v57, %v34788_v39  ;;  %v31338_v57 = vsub.f32 %v34796_v56, %v15398_v14  ;;  %v34800_v56 = vld [vmem:[#allocation7_spill] sm:$0xff] }
 0x5b7   :  { %13988 = vmatprep.mubr.f32.mxu1 %v34461_v61 }
 0x5b8   :  { %14291 = vmatmul.mubr.f32.gmra.mrb[6].mxu0 %v31193_v6  ;;  %v34247_v39 = vand.u32 4294901760, %v31338_v57 }
 0x5b9   :  { %13990 = vmatmul.mubr.f32.gmra.mrb[18].mxu1 %v31034_v63  ;;  %14296 = vmatprep.mubr.f32.mxu0 %v34461_v61  ;;  %v34790_v63 = vld [vmem:[#allocation92_spill] sm:$0xff] }
 0x5ba   :  { %14791 = vmatprep.mubr.f32.mxu1 %v34461_v61 }
 0x5bc   :  { %14298 = vmatmul.mubr.f32.gmra.mrb[8].mxu0 %v31211_v13 }
 0x5bd   :  { %14797 = vmatmul.mubr.f32.vlgmr.msra.gmra.mrb[12].mxu1 %v14158_v9  ;;  %14303 = vmatprep.mubr.f32.mxu0 %v34461_v61  ;;  %v34791_v9 = vld [vmem:[#allocation80_spill] sm:$0xff] }
 0x5be   :  { %25755 = vmatpush1.bf16.msra.mxu1 %v34786_v28  ;;  %14802 = vmatprep.mubr.f32.mxu1 %v34461_v61 }
 0x5bf   :  { %25757 = vmatprep.subr.bf16.mxu1 %v34789_v25  ;;  %v15522_v25 = vsub.f32 %v31338_v57, %v34247_v39 }
 0x5c0   :  { %14305 = vmatmul.mubr.f32.gmra.mrb[10].mxu0 %v31226_v36 }
 0x5c1   :  { %14808 = vmatmul.mubr.f32.gmra.mrb[14].mxu1 %v14169_v5  ;;  %14383 = vmatprep.mubr.f32.mxu0 %v34461_v61  ;;  %v34792_v5 = vld [vmem:[#allocation83_spill] sm:$0xff] }
 0x5c2   :  { %14813 = vmatprep.mubr.f32.mxu1 %v34461_v61 }
 0x5c4   :  { %14386 = vmatmul.mubr.f32.vlgmr.msra.gmra.mrb[4].mxu0 %v31191_v34 }
 0x5c5   :  { %25739 = vmatpush1.bf16.msra.mxu0 %v34774_v40  ;;  %14819 = vmatmul.mubr.f32.gmra.mrb[16].mxu1 %v14180_v27  ;;  %v34793_v27 = vpack.c.bf16 %v34791_v9, %v34792_v5  ;;  %v24925_v5 = vld [vmem:[%s34088_s5 + $0x88] sm:$0xff] }
 0x5c6   :  { %25741 = vmatprep.subr.bf16.mxu0 %v34790_v63  ;;  %14391 = vmatprep.mubr.f32.mxu0 %v34461_v61  ;;  %v34798_v63 = vld [vmem:[#allocation95_spill] sm:$0xff] }
 0x5c7   :  { %14824 = vmatprep.mubr.f32.mxu1 %v34461_v61 }
 0x5c8   :  { %14394 = vmatmul.mubr.f32.gmra.mrb[6].mxu0 %v31209_v4 }
 0x5c9   :  { %14830 = vmatmul.mubr.f32.gmra.mrb[18].mxu1 %v14191_v46  ;;  %14399 = vmatprep.mubr.f32.mxu0 %v34461_v61  ;;  %v34794_v46 = vld [vmem:[#allocation93_spill] sm:$0xff] }
 0x5ca   :  { %14920 = vmatprep.mubr.f32.mxu1 %v34461_v61 }
 0x5cc   :  { %14402 = vmatmul.mubr.f32.gmra.mrb[8].mxu0 %v31224_v15 }
 0x5cd   :  { %14922 = vmatmul.mubr.f32.vlgmr.msra.gmra.mrb[12].mxu1 %v31180_v18  ;;  %14407 = vmatprep.mubr.f32.mxu0 %v34461_v61 }
 0x5ce   :  { %25759 = vmatpush1.bf16.msra.mxu1 %v34793_v27  ;;  %14927 = vmatprep.mubr.f32.mxu1 %v34461_v61  ;;  %v34799_v27 = vld [vmem:[#allocation9_spill] sm:$0xff] }
 0x5cf   :  { %25761 = vmatprep.subr.bf16.mxu1 %v34776_v58 }
 0x5d0   :  { %14410 = vmatmul.mubr.f32.gmra.mrb[10].mxu0 %v31240_v62 }
 0x5d1   :  { %14929 = vmatmul.mubr.f32.gmra.mrb[14].mxu1 %v31193_v6  ;;  %14484 = vmatprep.mubr.f32.mxu0 %v34461_v61 }
 0x5d2   :  { %14934 = vmatprep.mubr.f32.mxu1 %v34461_v61 }
 0x5d4   :  { %14488 = vmatmul.mubr.f32.vlgmr.msra.gmra.mrb[4].mxu0 %v31206_v17 }
 0x5d5   :  { %25743 = vmatpush1.bf16.msra.mxu0 %v34794_v46  ;;  %14936 = vmatmul.mubr.f32.gmra.mrb[16].mxu1 %v31211_v13  ;;  %v15523_v46 = vand.u32 4294901760, %v15522_v25 }
 0x5d6   :  { %25745 = vmatprep.subr.bf16.mxu0 %v34772_v38  ;;  %14493 = vmatprep.mubr.f32.mxu0 %v34461_v61  ;;  %v34795_v38 = vld [vmem:[#allocation94_spill] sm:$0xff] }
 0x5d7   :  { %14941 = vmatprep.mubr.f32.mxu1 %v34461_v61 }
 0x5d8   :  { %14497 = vmatmul.mubr.f32.gmra.mrb[6].mxu0 %v31221_v41 }
 0x5d9   :  { %14943 = vmatmul.mubr.f32.gmra.mrb[18].mxu1 %v31226_v36  ;;  %14502 = vmatprep.mubr.f32.mxu0 %v34461_v61 }
 0x5da   :  { %15021 = vmatprep.mubr.f32.mxu1 %v34461_v61 }
 0x5dc   :  { %14506 = vmatmul.mubr.f32.gmra.mrb[8].mxu0 %v31237_v21 }
 0x5dd   :  { %15024 = vmatmul.mubr.f32.vlgmr.msra.gmra.mrb[12].mxu1 %v31191_v34  ;;  %14511 = vmatprep.mubr.f32.mxu0 %v34461_v61  ;;  %v15394_v34 = vand.u32 4294901760, %v34797_v8 }
 0x5de   :  { %25763 = vmatpush1.bf16.msra.mxu1 %v34781_v12  ;;  %15029 = vmatprep.mubr.f32.mxu1 %v34461_v61 }
 0x5df   :  { %25765 = vmatprep.subr.bf16.mxu1 %v34795_v38  ;;  %v31335_v28 = vpack.c.bf16 %v15398_v14, %v15394_v34  ;;  %v15396_v14 = vand.u32 4294901760, %v34800_v56 }
 0x5e0   :  { %14515 = vmatmul.mubr.f32.gmra.mrb[10].mxu0 %v31248_v55 }
 0x5e1   :  { %15032 = vmatmul.mubr.f32.gmra.mrb[14].mxu1 %v31209_v4  ;;  %14597 = vmatprep.mubr.f32.mxu0 %v34461_v61  ;;  %v31344_v4 = vsub.f32 %v34797_v8, %v15394_v34  ;;  %v15386_v8 = vsel %vm10070_vm10, %v24925_v5, 0 }
 0x5e2   :  { %15037 = vmatprep.mubr.f32.mxu1 %v34461_v61  ;;  %v31394_v39 = vand.u32 4294901760, %v15386_v8 }
 0x5e4   :  { %14599 = vmatmul.mubr.f32.vlgmr.msra.gmra.mrb[4].mxu0 %v31180_v18 }
 0x5e5   :  { %25747 = vmatpush1.bf16.msra.mxu0 %v34774_v40  ;;  %15040 = vmatmul.mubr.f32.gmra.mrb[16].mxu1 %v31224_v15  ;;  %v34248_v40 = vand.u32 4294901760, %v31344_v4  ;;  %v24924_v15 = vld [vmem:[%s34088_s5 + $0x80] sm:$0xff] }
 0x5e6   :  { %25773 = vmatprep.subr.bf16.mxu0 %v31335_v28  ;;  %14604 = vmatprep.mubr.f32.mxu0 %v34461_v61 }
 0x5e7   :  { %15045 = vmatprep.mubr.f32.mxu1 %v34461_v61  ;;  %v15510_v9 = vsub.f32 %v31344_v4, %v34248_v40 }
 0x5e8   :  { %14606 = vmatmul.mubr.f32.gmra.mrb[6].mxu0 %v31193_v6 }
 0x5e9   :  { %15048 = vmatmul.mubr.f32.gmra.mrb[18].mxu1 %v31240_v62  ;;  %14611 = vmatprep.mubr.f32.mxu0 %v34461_v61  ;;  %v15383_v62 = vsel %vm10070_vm10, %v24924_v15, 0  ;;  %v15511_v34 = vand.u32 4294901760, %v15510_v9  ;;  %v31398_v9 = vsub.f32 %v34800_v56, %v15396_v14  ;;  %v34801_v56 = vld [vmem:[#allocation12_spill] sm:$0xff] }
 0x5ea   :  { %15122 = vmatprep.mubr.f32.mxu1 %v34461_v61  ;;  %v31375_v38 = vand.u32 4294901760, %v15383_v62 }
 0x5ec   :  { %14613 = vmatmul.mubr.f32.gmra.mrb[8].mxu0 %v31211_v13 }
 0x5ed   :  { %15126 = vmatmul.mubr.f32.vlgmr.msra.gmra.mrb[12].mxu1 %v31206_v17  ;;  %14618 = vmatprep.mubr.f32.mxu0 %v34461_v61  ;;  %v15400_v17 = vand.u32 4294901760, %v34799_v27 }
 0x5ee   :  { %25767 = vmatpush1.bf16.msra.mxu1 %v34798_v63  ;;  %15131 = vmatprep.mubr.f32.mxu1 %v34461_v61  ;;  %v31392_v63 = vsub.f32 %v15383_v62, %v31375_v38 }
 0x5ef   :  { %25769 = vmatprep.subr.bf16.mxu1 %v34776_v58  ;;  %v24926_v58 = vld [vmem:[%s34088_s5 + $0x90] sm:$0xff]  ;;  %v31385_v15 = vpack.c.bf16 %v15400_v17, %v15396_v14  ;;  %v31388_v25 = vsub.f32 %v34799_v27, %v15400_v17  ;;  %v24927_v27 = vld [vmem:[%s34088_s5 + $0x98] sm:$0xff]  ;;  %v16036_v14 = vand.u32 4294901760, %v34801_v56 }
 0x5f0   :  { %14620 = vmatmul.mubr.f32.gmra.mrb[10].mxu0 %v31226_v36  ;;  %v15389_v5 = vsel %vm10070_vm10, %v24926_v58, 0  ;;  %v31410_v17 = vand.u32 4294901760, %v31392_v63  ;;  %v15392_v58 = vsel %vm10070_vm10, %v24927_v27, 0 }
 0x5f1   :  { %15135 = vmatmul.mubr.f32.gmra.mrb[14].mxu1 %v31221_v41  ;;  %14694 = vmatprep.mubr.f32.mxu0 %v34461_v61  ;;  %v25776_v41 = vpack.c.bf16 %v15523_v46, %v15511_v34  ;;  %v34251_v62 = vand.u32 4294901760, %v31388_v25  ;;  %v31415_v46 = vand.u32 4294901760, %v15389_v5  ;;  %v31436_v27 = vand.u32 4294901760, %v15392_v58 }
 0x5f2   :  { %15140 = vmatprep.mubr.f32.mxu1 %v34461_v61  ;;  %v31442_v51 = vsub.f32 %v34801_v56, %v16036_v14 }
 0x5f3   :  { %v31434_v34 = vsub.f32 %v15389_v5, %v31415_v46 }
 0x5f4   :  { %14696 = vmatmul.mubr.f32.vlgmr.msra.gmra.mrb[4].mxu0 %v31180_v18 }
 0x5f5   :  { %25775 = vmatpush1.bf16.msra.mxu0 %v31385_v15  ;;  %15144 = vmatmul.mubr.f32.gmra.mrb[16].mxu1 %v31237_v21  ;;  %v31413_v21 = vsub.f32 %v15386_v8, %v31394_v39  ;;  %v15528_v8 = vsub.f32 %v31388_v25, %v34251_v62  ;;  %v34803_v62 = vand.u32 4294901760, %v31398_v9  ;;  %v31460_v2 = vand.u32 4294901760, %v31434_v34 }
 0x5f6   :  { %25777 = vmatprep.subr.bf16.mxu0 %v25776_v41  ;;  %14701 = vmatprep.mubr.f32.mxu0 %v34461_v61  ;;  %v34802_v41 = vld [vmem:[#allocation10_spill] sm:$0xff] }
 0x5f7   :  { %15149 = vmatprep.mubr.f32.mxu1 %v34461_v61  ;;  %v16032_v40 = vand.u32 4294901760, %v34802_v41  ;;  %v31431_v33 = vand.u32 4294901760, %v31413_v21  ;;  %v15516_v60 = vsub.f32 %v31398_v9, %v34803_v62  ;;  %v15529_v23 = vand.u32 4294901760, %v15528_v8 }
 0x5f8   :  { %14703 = vmatmul.mubr.f32.gmra.mrb[6].mxu0 %v31193_v6  ;;  %v34254_v62 = vand.u32 4294901760, %v31442_v51 }
 0x5f9   :  { %15153 = vmatmul.mubr.f32.gmra.mrb[18].mxu1 %v31248_v55  ;;  %14708 = vmatprep.mubr.f32.mxu0 %v34461_v61  ;;  %v15466_v55 = vsub.f32 %v31392_v63, %v31410_v17  ;;  %v31439_v16 = vpack.c.bf16 %v16036_v14, %v16032_v40  ;;  %v31452_v5 = vsub.f32 %v34802_v41, %v16032_v40  ;;  %v15517_v40 = vand.u32 4294901760, %v15516_v60 }
 0x5fa   :  { %15235 = vmatprep.mubr.f32.mxu1 %v34461_v61  ;;  %v15477_v14 = vsub.f32 %v31413_v21, %v31431_v33 }
 0x5fb   :  { %v31455_v56 = vand.u32 4294901760, %v15466_v55  ;;  %v25778_v41 = vpack.c.bf16 %v15529_v23, %v15517_v40  ;;  %v34256_v8 = vand.u32 4294901760, %v31452_v5  ;;  %v25780_v55 = vpack.c.bf16 %v31338_v57, %v31344_v4  ;;  %v34804_v40 = vld [vmem:[#allocation14_spill] sm:$0xff] }
 0x5fc   :  { %14710 = vmatmul.mubr.f32.gmra.mrb[8].mxu0 %v31211_v13  ;;  %v15478_v49 = vand.u32 4294901760, %v15477_v14  ;;  %v16160_v23 = vsub.f32 %v31442_v51, %v34254_v62  ;;  %v16038_v48 = vand.u32 4294901760, %v34804_v40  ;;  %v34805_v62 = vld [vmem:[#allocation13_spill] sm:$0xff] }
 0x5fd   :  { %15237 = vmatmul.mubr.f32.vlgmr.msra.gmra.mrb[12].mxu1 %v31180_v18  ;;  %14715 = vmatprep.mubr.f32.mxu0 %v34461_v61  ;;  %v16148_v60 = vsub.f32 %v31452_v5, %v34256_v8  ;;  %v16034_v43 = vand.u32 4294901760, %v34805_v62 }
 0x5fe   :  { %25771 = vmatpush1.bf16.msra.mxu1 %v34781_v12  ;;  %15242 = vmatprep.mubr.f32.mxu1 %v34461_v61  ;;  %v31463_v12 = vsub.f32 %v15392_v58, %v31436_v27  ;;  %v15488_v58 = vsub.f32 %v31434_v34, %v31460_v2 }
 0x5ff   :  { %25797 = vmatprep.subr.bf16.mxu1 %v31439_v16  ;;  %v16149_v59 = vand.u32 4294901760, %v16148_v60  ;;  %v31494_v19 = vpack.c.bf16 %v16038_v48, %v16034_v43 }
 0x600   :  { %14717 = vmatmul.mubr.f32.gmra.mrb[10].mxu0 %v31226_v36  ;;  %v31476_v29 = vand.u32 4294901760, %v31463_v12  ;;  %v15489_v14 = vand.u32 4294901760, %v15488_v58  ;;  %v31497_v58 = vsub.f32 %v34804_v40, %v16038_v48 }
 0x601   :  { %15244 = vmatmul.mubr.f32.gmra.mrb[14].mxu1 %v31193_v6  ;;  %15462 = vmatprep.mubr.f32.mxu0 %v34461_v61 }
 0x602   :  { %15249 = vmatprep.mubr.f32.mxu1 %v34461_v61  ;;  %v16165_v60 = vand.u32 4294901760, %v31497_v58 }
 0x604   :  { %15468 = vmatmul.mubr.f32.vlgmr.msra.gmra.mrb[4].mxu0 %v31455_v56 }
 0x605   :  { %25779 = vmatpush1.bf16.msra.mxu0 %v25778_v41  ;;  %15251 = vmatmul.mubr.f32.gmra.mrb[16].mxu1 %v31211_v13  ;;  %v15499_v41 = vsub.f32 %v31463_v12, %v31476_v29 }
 0x606   :  { %25781 = vmatprep.subr.bf16.mxu0 %v25780_v55  ;;  %15473 = vmatprep.mubr.f32.mxu0 %v34461_v61  ;;  %v16161_v55 = vand.u32 4294901760, %v16160_v23  ;;  %v31503_v23 = vsub.f32 %v34805_v62, %v16034_v43  ;;  %v25804_v62 = vpack.c.bf16 %v31442_v51, %v31452_v5 }
 0x607   :  { %15256 = vmatprep.mubr.f32.mxu1 %v34461_v61  ;;  %v15500_v8 = vand.u32 4294901760, %v15499_v41  ;;  %v34812_v41 = vld [vmem:[#allocation18_spill] sm:$0xff] }
 0x608   :  { %15479 = vmatmul.mubr.f32.gmra.mrb[6].mxu0 %v15478_v49  ;;  %v25800_v31 = vpack.c.bf16 %v16161_v55, %v16149_v59  ;;  %v16153_v48 = vand.u32 4294901760, %v31503_v23  ;;  %v25782_v59 = vpack.c.bf16 %v31388_v25, %v31398_v9 }
 0x609   :  { %15258 = vmatmul.mubr.f32.gmra.mrb[18].mxu1 %v31226_v36  ;;  %15484 = vmatprep.mubr.f32.mxu0 %v34461_v61 }
 0x60a   :  { %15332 = vmatprep.mubr.f32.mxu1 %v34461_v61  ;;  %v16154_v43 = vsub.f32 %v31503_v23, %v16153_v48 }
 0x60c   :  { %15490 = vmatmul.mubr.f32.gmra.mrb[8].mxu0 %v15489_v14 }
 0x60d   :  { %15334 = vmatmul.mubr.f32.vlgmr.msra.gmra.mrb[12].mxu1 %v31180_v18  ;;  %15495 = vmatprep.mubr.f32.mxu0 %v34461_v61 }
 0x60e   :  { %25799 = vmatpush1.bf16.msra.mxu1 %v31494_v19  ;;  %15339 = vmatprep.mubr.f32.mxu1 %v34461_v61 }
 0x60f   :  { %25801 = vmatprep.subr.bf16.mxu1 %v25800_v31  ;;  %v16166_v31 = vsub.f32 %v31497_v58, %v16165_v60 }
 0x610   :  { %15501 = vmatmul.mubr.f32.gmra.mrb[10].mxu0 %v15500_v8 }
 0x611   :  { %15341 = vmatmul.mubr.f32.gmra.mrb[14].mxu1 %v31193_v6  ;;  %15591 = vmatprep.mubr.f32.mxu0 %v34461_v61  ;;  %v16167_v18 = vand.u32 4294901760, %v16166_v31  ;;  %v16155_v6 = vand.u32 4294901760, %v16154_v43  ;;  %v34814_v31 = vld [vmem:[#allocation16_spill] sm:$0xff] }
 0x612   :  { %15346 = vmatprep.mubr.f32.mxu1 %v34461_v61  ;;  %v34815_v43 = vld [vmem:[#allocation44_spill] sm:$0xff] }
 0x614   :  { %15593 = vmatmul.mubr.f32.vlgmr.msra.gmra.mrb[4].mxu0 %v31375_v38 }
 0x615   :  { %25783 = vmatpush1.bf16.msra.mxu0 %v25782_v59  ;;  %15348 = vmatmul.mubr.f32.gmra.mrb[16].mxu1 %v31211_v13  ;;  %v25802_v13 = vpack.c.bf16 %v16167_v18, %v16155_v6 }
 0x616   :  { %25785 = vmatprep.subr.bf16.mxu0 %v31335_v28  ;;  %15598 = vmatprep.mubr.f32.mxu0 %v34461_v61 }
 0x617   :  { %15353 = vmatprep.mubr.f32.mxu1 %v34461_v61 }
 0x618   :  { %15600 = vmatmul.mubr.f32.gmra.mrb[6].mxu0 %v31394_v39 }
 0x619   :  { %15355 = vmatmul.mubr.f32.gmra.mrb[18].mxu1 %v31226_v36  ;;  %15605 = vmatprep.mubr.f32.mxu0 %v34461_v61  ;;  %v34806_v36 = vand.u32 4294901760, %v31344_v4  ;;  %v34809_v4 = vand.u32 4294901760, %v31388_v25  ;;  %v34811_v25 = vld [vmem:[#allocation50_spill] sm:$0xff] }
 0x61a   :  { %16100 = vmatprep.mubr.f32.mxu1 %v34461_v61 }
 0x61c   :  { %15607 = vmatmul.mubr.f32.gmra.mrb[8].mxu0 %v31415_v46 }
 0x61d   :  { %16106 = vmatmul.mubr.f32.vlgmr.msra.gmra.mrb[12].mxu1 %v31455_v56  ;;  %15612 = vmatprep.mubr.f32.mxu0 %v34461_v61  ;;  %v34807_v56 = vand.u32 4294901760, %v31338_v57  ;;  %v34808_v57 = vand.u32 4294901760, %v31398_v9  ;;  %v34810_v9 = vld [vmem:[#allocation2_spill] sm:$0xff] }
 0x61e   :  { %25803 = vmatpush1.bf16.msra.mxu1 %v25802_v13  ;;  %16111 = vmatprep.mubr.f32.mxu1 %v34461_v61  ;;  %vm16702_vm2 = vcmp.lt.s32.totalorder %v34810_v9, 126  ;;  %v34816_v13 = vand.u32 4294901760, %v31452_v5 }
 0x61f   :  { %25805 = vmatprep.subr.bf16.mxu1 %v25804_v62  ;;  %v25788_v40 = vpack.c.bf16 %v34807_v56, %v34806_v36  ;;  %v16706_v55 = vsel %vm16702_vm2, %v34812_v41, %v34811_v25  ;;  %v16705_v18 = vsel %vm16702_vm2, %v34815_v43, %v34814_v31  ;;  %v34817_v62 = vand.u32 4294901760, %v31442_v51 }
 0x620   :  { %15614 = vmatmul.mubr.f32.gmra.mrb[10].mxu0 %v31436_v27 }
 0x621   :  { %16117 = vmatmul.mubr.f32.gmra.mrb[14].mxu1 %v15478_v49  ;;  %15692 = vmatprep.mubr.f32.mxu0 %v34461_v61  ;;  %v25806_v49 = vpack.c.bf16 %v31497_v58, %v31503_v23  ;;  %v25812_v36 = vpack.c.bf16 %v34817_v62, %v34816_v13  ;;  %v24930_v58 = vld [vmem:[%s34088_s5 + $0xa8] sm:$0xff] }
 0x622   :  { %16122 = vmatprep.mubr.f32.mxu1 %v34461_v61  ;;  %v16751_v62 = vsel %vm10070_vm10, %v24930_v58, 0 }
 0x624   :  { %15695 = vmatmul.mubr.f32.vlgmr.msra.gmra.mrb[4].mxu0 %v31392_v63 }
 0x625   :  { %25787 = vmatpush1.bf16.msra.mxu0 %v31385_v15  ;;  %16128 = vmatmul.mubr.f32.gmra.mrb[16].mxu1 %v15489_v14  ;;  %v31570_v14 = vld [vmem:[%s34089_s2 + $0x14] sm:$0xf] }
 0x626   :  { %25789 = vmatprep.subr.bf16.mxu0 %v25788_v40  ;;  %15700 = vmatprep.mubr.f32.mxu0 %v34461_v61 }
 0x627   :  { %16133 = vmatprep.mubr.f32.mxu1 %v34461_v61 }
 0x628   :  { %15703 = vmatmul.mubr.f32.gmra.mrb[6].mxu0 %v31413_v21 }
 0x629   :  { %16139 = vmatmul.mubr.f32.gmra.mrb[18].mxu1 %v15500_v8  ;;  %15708 = vmatprep.mubr.f32.mxu0 %v34461_v61  ;;  %v25790_v8 = vpack.c.bf16 %v34809_v4, %v34808_v57 }
 0x62a   :  { %16229 = vmatprep.mubr.f32.mxu1 %v34461_v61 }
 0x62c   :  { %15711 = vmatmul.mubr.f32.gmra.mrb[8].mxu0 %v31434_v34 }
 0x62d   :  { %16231 = vmatmul.mubr.f32.vlgmr.msra.gmra.mrb[12].mxu1 %v31375_v38  ;;  %15716 = vmatprep.mubr.f32.mxu0 %v34461_v61 }
 0x62e   :  { %25807 = vmatpush1.bf16.msra.mxu1 %v25806_v49  ;;  %16236 = vmatprep.mubr.f32.mxu1 %v34461_v61 }
 0x62f   :  { %25809 = vmatprep.subr.bf16.mxu1 %v31439_v16 }
 0x630   :  { %15719 = vmatmul.mubr.f32.gmra.mrb[10].mxu0 %v31463_v12 }
 0x631   :  { %16238 = vmatmul.mubr.f32.gmra.mrb[14].mxu1 %v31394_v39  ;;  %15793 = vmatprep.mubr.f32.mxu0 %v34461_v61 }
 0x632   :  { %16243 = vmatprep.mubr.f32.mxu1 %v34461_v61 }
 0x634   :  { %15797 = vmatmul.mubr.f32.vlgmr.msra.gmra.mrb[4].mxu0 %v31410_v17 }
 0x635   :  { %25791 = vmatpush1.bf16.msra.mxu0 %v25790_v8  ;;  %16245 = vmatmul.mubr.f32.gmra.mrb[16].mxu1 %v31415_v46  ;;  %v34820_v8 = vld [vmem:[#allocation20_spill] sm:$0xff] }
 0x636   :  { %25793 = vmatprep.subr.bf16.mxu0 %v31335_v28  ;;  %15802 = vmatprep.mubr.f32.mxu0 %v34461_v61  ;;  %v34813_v28 = vld [vmem:[#allocation5_spill] sm:$0xff] }
 0x637   :  { %16250 = vmatprep.mubr.f32.mxu1 %v34461_v61  ;;  %v16721_v59 = vrot.slane %v31570_v14, %v34813_v28  ;;  %v24929_v28 = vld [vmem:[%s34088_s5 + $0xa0] sm:$0xff] }
 0x638   :  { %15806 = vmatmul.mubr.f32.gmra.mrb[6].mxu0 %v31431_v33 }
 0x639   :  { %16252 = vmatmul.mubr.f32.gmra.mrb[18].mxu1 %v31436_v27  ;;  %15811 = vmatprep.mubr.f32.mxu0 %v34461_v61  ;;  %v16739_v6 = vmul.f32 %v16721_v59, %v16706_v55  ;;  %v16735_v56 = vmul.f32 %v16721_v59, %v16705_v18  ;;  %v16707_v55 = vsel %vm16702_vm2, %v34820_v8, %v34815_v43 }
 0x63a   :  { %16330 = vmatprep.mubr.f32.mxu1 %v34461_v61 }
 0x63b   :  { %v16763_v40 = vand.u32 4294901760, %v16739_v6 }
 0x63c   :  { %15815 = vmatmul.mubr.f32.gmra.mrb[8].mxu0 %v31460_v2 }
 0x63d   :  { %16333 = vmatmul.mubr.f32.vlgmr.msra.gmra.mrb[12].mxu1 %v31392_v63  ;;  %15820 = vmatprep.mubr.f32.mxu0 %v34461_v61  ;;  %v16759_v63 = vand.u32 4294901760, %v16735_v56  ;;  %v31601_v51 = vsub.f32 %v16739_v6, %v16763_v40  ;;  %v16748_v6 = vsel %vm10070_vm10, %v24929_v28, 0 }
 0x63e   :  { %25811 = vmatpush1.bf16.msra.mxu1 %v31494_v19  ;;  %16338 = vmatprep.mubr.f32.mxu1 %v34461_v61 }
 0x63f   :  { %25813 = vmatprep.subr.bf16.mxu1 %v25812_v36  ;;  %v31604_v5 = vpack.c.bf16 %v16763_v40, %v16759_v63  ;;  %v31608_v49 = vsub.f32 %v16735_v56, %v16759_v63  ;;  %v34260_v4 = vand.u32 4294901760, %v31601_v51  ;;  %v34821_v36 = vld [vmem:[#allocation34_spill] sm:$0xff]  ;;  %v24931_v40 = vld [vmem:[%s34088_s5 + $0xb0] sm:$0xff] }
 0x640   :  { %15824 = vmatmul.mubr.f32.gmra.mrb[10].mxu0 %v31476_v29 }
 0x641   :  { %16341 = vmatmul.mubr.f32.gmra.mrb[14].mxu1 %v31413_v21  ;;  %15906 = vmatprep.mubr.f32.mxu0 %v34461_v61  ;;  %v34818_v21 = vld [vmem:[#allocation25_spill] sm:$0xff]  ;;  %v16887_v43 = vsub.f32 %v31601_v51, %v34260_v4 }
 0x642   :  { %16346 = vmatprep.mubr.f32.mxu1 %v34461_v61  ;;  %v16708_v57 = vsel %vm16702_vm2, %v34818_v21, %v34812_v41  ;;  %v34261_v41 = vand.u32 4294901760, %v31608_v49  ;;  %v16710_v56 = vsel %vm16702_vm2, %v34821_v36, %v34818_v21 }
 0x644   :  { %15908 = vmatmul.mubr.f32.vlgmr.msra.gmra.mrb[4].mxu0 %v31375_v38  ;;  %v16875_v23 = vsub.f32 %v31608_v49, %v34261_v41 }
 0x645   :  { %25795 = vmatpush1.bf16.msra.mxu0 %v31385_v15  ;;  %16349 = vmatmul.mubr.f32.gmra.mrb[16].mxu1 %v31434_v34  ;;  %v34819_v15 = vld [vmem:[#allocation3_spill] sm:$0xff] }
 0x646   :  { %25821 = vmatprep.subr.bf16.mxu0 %v31604_v5  ;;  %15913 = vmatprep.mubr.f32.mxu0 %v34461_v61  ;;  %v16717_v34 = vrot.slane %v31570_v14, %v34819_v15 }
 0x647   :  { %16354 = vmatprep.mubr.f32.mxu1 %v34461_v61 }
 0x648   :  { %15915 = vmatmul.mubr.f32.gmra.mrb[6].mxu0 %v31394_v39  ;;  %v16738_v59 = vmul.f32 %v16717_v34, %v16708_v57  ;;  %v16734_v18 = vmul.f32 %v16717_v34, %v16707_v55  ;;  %v34823_v34 = vld [vmem:[#allocation64_spill] sm:$0xff] }
 0x649   :  { %16357 = vmatmul.mubr.f32.gmra.mrb[18].mxu1 %v31463_v12  ;;  %15920 = vmatprep.mubr.f32.mxu0 %v34461_v61  ;;  %v25814_v12 = vpack.c.bf16 %v16165_v60, %v16153_v48  ;;  %v31652_v48 = vand.u32 4294901760, %v16748_v6  ;;  %v16709_v55 = vsel %vm16702_vm2, %v34823_v34, %v34820_v8  ;;  %v24932_v8 = vld [vmem:[%s34088_s5 + $0xb8] sm:$0xff] }
 0x64a   :  { %16431 = vmatprep.mubr.f32.mxu1 %v34461_v61  ;;  %v16765_v60 = vand.u32 4294901760, %v16738_v59  ;;  %v16761_v13 = vand.u32 4294901760, %v16734_v18 }
 0x64b   :  { %v31677_v28 = vsub.f32 %v16748_v6, %v31652_v48 }
 0x64c   :  { %15922 = vmatmul.mubr.f32.gmra.mrb[8].mxu0 %v31415_v46  ;;  %v31665_v63 = vpack.c.bf16 %v16765_v60, %v16761_v13  ;;  %v31667_v57 = vsub.f32 %v16738_v59, %v16765_v60 }
 0x64d   :  { %16435 = vmatmul.mubr.f32.vlgmr.msra.gmra.mrb[12].mxu1 %v31410_v17  ;;  %15927 = vmatprep.mubr.f32.mxu0 %v34461_v61  ;;  %v16888_v17 = vand.u32 4294901760, %v16887_v43  ;;  %v31681_v43 = vsub.f32 %v16734_v18, %v16761_v13  ;;  %v31694_v18 = vand.u32 4294901760, %v31677_v28 }
 0x64e   :  { %25815 = vmatpush1.bf16.msra.mxu1 %v25814_v12  ;;  %16440 = vmatprep.mubr.f32.mxu1 %v34461_v61  ;;  %v31679_v12 = vand.u32 4294901760, %v16751_v62  ;;  %v34258_v6 = vand.u32 4294901760, %v31667_v57 }
 0x64f   :  { %25817 = vmatprep.subr.bf16.mxu1 %v31439_v16  ;;  %v16876_v16 = vand.u32 4294901760, %v16875_v23  ;;  %v16754_v23 = vsel %vm10070_vm10, %v24931_v40, 0 }
 0x650   :  { %15929 = vmatmul.mubr.f32.gmra.mrb[10].mxu0 %v31436_v27  ;;  %v31699_v60 = vand.u32 4294901760, %v16754_v23 }
 0x651   :  { %16444 = vmatmul.mubr.f32.gmra.mrb[14].mxu1 %v31431_v33  ;;  %16003 = vmatprep.mubr.f32.mxu0 %v34461_v61  ;;  %v34822_v33 = vld [vmem:[#allocation4_spill] sm:$0xff]  ;;  %v25824_v21 = vpack.c.bf16 %v16888_v17, %v16876_v16  ;;  %v34259_v17 = vand.u32 4294901760, %v31681_v43  ;;  %v16893_v16 = vsub.f32 %v31667_v57, %v34258_v6  ;;  %v16704_v6 = vsel %vm16702_vm2, %v34811_v25, %v34821_v36 }
 0x652   :  { %16449 = vmatprep.mubr.f32.mxu1 %v34461_v61  ;;  %v16729_v15 = vrot.slane %v31570_v14, %v34822_v33 }
 0x654   :  { %16005 = vmatmul.mubr.f32.vlgmr.msra.gmra.mrb[4].mxu0 %v31375_v38  ;;  %v16741_v59 = vmul.f32 %v16729_v15, %v16710_v56  ;;  %v16737_v58 = vmul.f32 %v16729_v15, %v16709_v55  ;;  %v16757_v56 = vsel %vm10070_vm10, %v24932_v8, 0  ;;  %v16881_v55 = vsub.f32 %v31681_v43, %v34259_v17 }
 0x655   :  { %25823 = vmatpush1.bf16.msra.mxu0 %v31665_v63  ;;  %16453 = vmatmul.mubr.f32.gmra.mrb[16].mxu1 %v31460_v2  ;;  %v31697_v2 = vsub.f32 %v16751_v62, %v31679_v12  ;;  %v16831_v62 = vsub.f32 %v31677_v28, %v31694_v18  ;;  %v31718_v15 = vand.u32 4294901760, %v16757_v56 }
 0x656   :  { %25825 = vmatprep.subr.bf16.mxu0 %v25824_v21  ;;  %16010 = vmatprep.mubr.f32.mxu0 %v34461_v61  ;;  %v17401_v13 = vand.u32 4294901760, %v16741_v59  ;;  %v17397_v40 = vand.u32 4294901760, %v16737_v58  ;;  %v16882_v25 = vand.u32 4294901760, %v16881_v55 }
 0x657   :  { %16458 = vmatprep.mubr.f32.mxu1 %v34461_v61  ;;  %v31713_v33 = vand.u32 4294901760, %v31697_v2 }
 0x658   :  { %16012 = vmatmul.mubr.f32.gmra.mrb[6].mxu0 %v31394_v39  ;;  %v31723_v21 = vsub.f32 %v16741_v59, %v17401_v13  ;;  %v31726_v8 = vpack.c.bf16 %v17401_v13, %v17397_v40  ;;  %v16894_v59 = vand.u32 4294901760, %v16893_v16  ;;  %v31739_v13 = vand.u32 4294901760, %v16831_v62 }
 0x659   :  { %16462 = vmatmul.mubr.f32.gmra.mrb[18].mxu1 %v31476_v29  ;;  %16017 = vmatprep.mubr.f32.mxu0 %v34461_v61  ;;  %v31716_v29 = vsub.f32 %v16754_v23, %v31699_v60  ;;  %v31731_v23 = vsub.f32 %v16737_v58, %v17397_v40  ;;  %v16842_v17 = vsub.f32 %v31697_v2, %v31713_v33  ;;  %v34824_v40 = vld [vmem:[#allocation6_spill] sm:$0xff] }
 0x65a   :  { %16544 = vmatprep.mubr.f32.mxu1 %v34461_v61  ;;  %v31747_v58 = vsub.f32 %v16757_v56, %v31718_v15  ;;  %v16725_v4 = vrot.slane %v31570_v14, %v34824_v40  ;;  %v16703_v16 = vsel %vm16702_vm2, %v34814_v31, %v34823_v34  ;;  %v25826_v56 = vpack.c.bf16 %v16894_v59, %v16882_v25 }
 0x65b   :  { %v34262_v41 = vand.u32 4294901760, %v31731_v23  ;;  %v25828_v14 = vpack.c.bf16 %v31601_v51, %v31608_v49  ;;  %v16843_v40 = vand.u32 4294901760, %v16842_v17  ;;  %v34825_v9 = vand.u32 4294901760, %v31723_v21 }
 0x65c   :  { %16019 = vmatmul.mubr.f32.gmra.mrb[8].mxu0 %v31415_v46  ;;  %v16740_v62 = vmul.f32 %v16725_v4, %v16704_v6  ;;  %v31766_v36 = vand.u32 4294901760, %v31747_v58  ;;  %v16736_v34 = vmul.f32 %v16725_v4, %v16703_v16 }
 0x65d   :  { %16546 = vmatmul.mubr.f32.vlgmr.msra.gmra.mrb[12].mxu1 %v31375_v38  ;;  %16024 = vmatprep.mubr.f32.mxu0 %v34461_v61  ;;  %v17525_v31 = vsub.f32 %v31723_v21, %v34825_v9  ;;  %v17513_v6 = vsub.f32 %v31731_v23, %v34262_v41 }
 0x65e   :  { %25819 = vmatpush1.bf16.msra.mxu1 %v31494_v19  ;;  %16551 = vmatprep.mubr.f32.mxu1 %v34461_v61  ;;  %v31744_v19 = vand.u32 4294901760, %v31716_v29  ;;  %v17403_v17 = vand.u32 4294901760, %v16740_v62  ;;  %v16864_v25 = vsub.f32 %v31747_v58, %v31766_v36  ;;  %v17399_v16 = vand.u32 4294901760, %v16736_v34 }
 0x65f   :  { %25845 = vmatprep.subr.bf16.mxu1 %v31726_v8  ;;  %v17526_v4 = vand.u32 4294901760, %v17525_v31 }
 0x660   :  { %16026 = vmatmul.mubr.f32.gmra.mrb[10].mxu0 %v31436_v27  ;;  %v16853_v55 = vsub.f32 %v31716_v29, %v31744_v19  ;;  %v31784_v9 = vsub.f32 %v16740_v62, %v17403_v17  ;;  %v16865_v41 = vand.u32 4294901760, %v16864_v25  ;;  %v31788_v10 = vsub.f32 %v16736_v34, %v17399_v16 }
 0x661   :  { %16553 = vmatmul.mubr.f32.gmra.mrb[14].mxu1 %v31394_v39  ;;  %16827 = vmatprep.mubr.f32.mxu0 %v34461_v61  ;;  %v25852_v25 = vpack.c.bf16 %v31723_v21, %v31731_v23 }
 0x662   :  { %16558 = vmatprep.mubr.f32.mxu1 %v34461_v61  ;;  %v16854_v59 = vand.u32 4294901760, %v16853_v55  ;;  %v17530_v31 = vand.u32 4294901760, %v31784_v9  ;;  %v17518_v62 = vand.u32 4294901760, %v31788_v10 }
 0x664   :  { %16833 = vmatmul.mubr.f32.vlgmr.msra.gmra.mrb[4].mxu0 %v31739_v13  ;;  %v17531_v34 = vsub.f32 %v31784_v9, %v17530_v31 }
 0x665   :  { %25827 = vmatpush1.bf16.msra.mxu0 %v25826_v56  ;;  %16560 = vmatmul.mubr.f32.gmra.mrb[16].mxu1 %v31415_v46  ;;  %v17514_v56 = vand.u32 4294901760, %v17513_v6 }
 0x666   :  { %25829 = vmatprep.subr.bf16.mxu0 %v25828_v14  ;;  %16838 = vmatprep.mubr.f32.mxu0 %v34461_v61  ;;  %v31782_v14 = vpack.c.bf16 %v17403_v17, %v17399_v16  ;;  %v17532_v6 = vand.u32 4294901760, %v17531_v34  ;;  %v24937_v16 = vld [vmem:[%s34088_s5 + $0xd8] sm:$0xff] }
 0x667   :  { %16565 = vmatprep.mubr.f32.mxu1 %v34461_v61  ;;  %v25848_v55 = vpack.c.bf16 %v17526_v4, %v17514_v56 }
 0x668   :  { %16844 = vmatmul.mubr.f32.gmra.mrb[6].mxu0 %v16843_v40 }
 0x669   :  { %16567 = vmatmul.mubr.f32.gmra.mrb[18].mxu1 %v31436_v27  ;;  %16849 = vmatprep.mubr.f32.mxu0 %v34461_v61 }
 0x66a   :  { %16641 = vmatprep.mubr.f32.mxu1 %v34461_v61 }
 0x66c   :  { %16855 = vmatmul.mubr.f32.gmra.mrb[8].mxu0 %v16854_v59 }
 0x66d   :  { %16643 = vmatmul.mubr.f32.vlgmr.msra.gmra.mrb[12].mxu1 %v31375_v38  ;;  %16860 = vmatprep.mubr.f32.mxu0 %v34461_v61  ;;  %v25830_v38 = vpack.c.bf16 %v31667_v57, %v31681_v43 }
 0x66e   :  { %25847 = vmatpush1.bf16.msra.mxu1 %v31782_v14  ;;  %16648 = vmatprep.mubr.f32.mxu1 %v34461_v61 }
 0x66f   :  { %25849 = vmatprep.subr.bf16.mxu1 %v25848_v55 }
 0x670   :  { %16866 = vmatmul.mubr.f32.gmra.mrb[10].mxu0 %v16865_v41 }
 0x671   :  { %16650 = vmatmul.mubr.f32.gmra.mrb[14].mxu1 %v31394_v39  ;;  %16956 = vmatprep.mubr.f32.mxu0 %v34461_v61  ;;  %v17519_v39 = vsub.f32 %v31788_v10, %v17518_v62 }
 0x672   :  { %16655 = vmatprep.mubr.f32.mxu1 %v34461_v61 }
 0x674   :  { %16958 = vmatmul.mubr.f32.vlgmr.msra.gmra.mrb[4].mxu0 %v31652_v48 }
 0x675   :  { %25831 = vmatpush1.bf16.msra.mxu0 %v25830_v38  ;;  %16657 = vmatmul.mubr.f32.gmra.mrb[16].mxu1 %v31415_v46  ;;  %v17520_v46 = vand.u32 4294901760, %v17519_v39 }
 0x676   :  { %25833 = vmatprep.subr.bf16.mxu0 %v31604_v5  ;;  %16963 = vmatprep.mubr.f32.mxu0 %v34461_v61 }
 0x677   :  { %16662 = vmatprep.mubr.f32.mxu1 %v34461_v61  ;;  %v25850_v17 = vpack.c.bf16 %v17532_v6, %v17520_v46 }
 0x678   :  { %16965 = vmatmul.mubr.f32.gmra.mrb[6].mxu0 %v31679_v12 }
 0x679   :  { %16664 = vmatmul.mubr.f32.gmra.mrb[18].mxu1 %v31436_v27  ;;  %16970 = vmatprep.mubr.f32.mxu0 %v34461_v61  ;;  %v34826_v27 = vand.u32 4294901760, %v31608_v49  ;;  %v34828_v49 = vand.u32 4294901760, %v31681_v43 }
 0x67a   :  { %17465 = vmatprep.mubr.f32.mxu1 %v34461_v61 }
 0x67c   :  { %16972 = vmatmul.mubr.f32.gmra.mrb[8].mxu0 %v31699_v60 }
 0x67d   :  { %17471 = vmatmul.mubr.f32.vlgmr.msra.gmra.mrb[12].mxu1 %v31739_v13  ;;  %16977 = vmatprep.mubr.f32.mxu0 %v34461_v61  ;;  %v34827_v13 = vand.u32 4294901760, %v31601_v51  ;;  %v25854_v51 = vpack.c.bf16 %v31784_v9, %v31788_v10 }
 0x67e   :  { %25851 = vmatpush1.bf16.msra.mxu1 %v25850_v17  ;;  %17476 = vmatprep.mubr.f32.mxu1 %v34461_v61 }
 0x67f   :  { %25853 = vmatprep.subr.bf16.mxu1 %v25852_v25  ;;  %v25836_v4 = vpack.c.bf16 %v34827_v13, %v34826_v27  ;;  %v34835_v27 = vld [vmem:[#allocation56_spill] sm:$0xff]  ;;  %v34836_v13 = vld [vmem:[#allocation61_spill] sm:$0xff] }
 0x680   :  { %16979 = vmatmul.mubr.f32.gmra.mrb[10].mxu0 %v31718_v15 }
 0x681   :  { %17482 = vmatmul.mubr.f32.gmra.mrb[14].mxu1 %v16843_v40  ;;  %17057 = vmatprep.mubr.f32.mxu0 %v34461_v61 }
 0x682   :  { %17487 = vmatprep.mubr.f32.mxu1 %v34461_v61 }
 0x684   :  { %17060 = vmatmul.mubr.f32.vlgmr.msra.gmra.mrb[4].mxu0 %v31677_v28 }
 0x685   :  { %25835 = vmatpush1.bf16.msra.mxu0 %v31665_v63  ;;  %17493 = vmatmul.mubr.f32.gmra.mrb[16].mxu1 %v16854_v59  ;;  %v34833_v59 = vld [vmem:[#allocation75_spill] sm:$0xff] }
 0x686   :  { %25837 = vmatprep.subr.bf16.mxu0 %v25836_v4  ;;  %17065 = vmatprep.mubr.f32.mxu0 %v34461_v61  ;;  %v34837_v4 = vld [vmem:[#allocation90_spill] sm:$0xff] }
 0x687   :  { %17498 = vmatprep.mubr.f32.mxu1 %v34461_v61 }
 0x688   :  { %17068 = vmatmul.mubr.f32.gmra.mrb[6].mxu0 %v31697_v2 }
 0x689   :  { %17504 = vmatmul.mubr.f32.gmra.mrb[18].mxu1 %v16865_v41  ;;  %17073 = vmatprep.mubr.f32.mxu0 %v34461_v61  ;;  %v34829_v41 = vand.u32 4294901760, %v31667_v57  ;;  %v34830_v57 = vand.u32 4294901760, %v31731_v23  ;;  %v24936_v23 = vld [vmem:[%s34088_s5 + $0xd0] sm:$0xff] }
 0x68a   :  { %17594 = vmatprep.mubr.f32.mxu1 %v34461_v61 }
 0x68b   :  { %v25838_v40 = vpack.c.bf16 %v34829_v41, %v34828_v49 }
 0x68c   :  { %17076 = vmatmul.mubr.f32.gmra.mrb[8].mxu0 %v31716_v29 }
 0x68d   :  { %17596 = vmatmul.mubr.f32.vlgmr.msra.gmra.mrb[12].mxu1 %v31652_v48  ;;  %17081 = vmatprep.mubr.f32.mxu0 %v34461_v61 }
 0x68e   :  { %25855 = vmatpush1.bf16.msra.mxu1 %v25854_v51  ;;  %17601 = vmatprep.mubr.f32.mxu1 %v34461_v61  ;;  %v34838_v51 = vpack.c.bf16 %v34836_v13, %v34837_v4  ;;  %v34860_v13 = vld [vmem:[#allocation97_spill] sm:$0xff] }
 0x68f   :  { %25857 = vmatprep.subr.bf16.mxu1 %v31726_v8 }
 0x690   :  { %17084 = vmatmul.mubr.f32.gmra.mrb[10].mxu0 %v31747_v58 }
 0x691   :  { %17603 = vmatmul.mubr.f32.gmra.mrb[14].mxu1 %v31679_v12  ;;  %17158 = vmatprep.mubr.f32.mxu0 %v34461_v61 }
 0x692   :  { %17608 = vmatprep.mubr.f32.mxu1 %v34461_v61 }
 0x694   :  { %17162 = vmatmul.mubr.f32.vlgmr.msra.gmra.mrb[4].mxu0 %v31694_v18 }
 0x695   :  { %25839 = vmatpush1.bf16.msra.mxu0 %v25838_v40  ;;  %17610 = vmatmul.mubr.f32.gmra.mrb[16].mxu1 %v31699_v60 }
 0x696   :  { %25841 = vmatprep.subr.bf16.mxu0 %v31604_v5  ;;  %17167 = vmatprep.mubr.f32.mxu0 %v34461_v61  ;;  %v34831_v5 = vand.u32 4294901760, %v31723_v21  ;;  %v24935_v21 = vld [vmem:[%s34088_s5 + $0xc8] sm:$0xff] }
 0x697   :  { %17615 = vmatprep.mubr.f32.mxu1 %v34461_v61 }
 0x698   :  { %17171 = vmatmul.mubr.f32.gmra.mrb[6].mxu0 %v31713_v33  ;;  %v25860_v43 = vpack.c.bf16 %v34831_v5, %v34830_v57  ;;  %v34839_v57 = vld [vmem:[#allocation29_spill] sm:$0xff] }
 0x699   :  { %17617 = vmatmul.mubr.f32.gmra.mrb[18].mxu1 %v31718_v15  ;;  %17176 = vmatprep.mubr.f32.mxu0 %v34461_v61 }
 0x69a   :  { %17695 = vmatprep.mubr.f32.mxu1 %v34461_v61 }
 0x69c   :  { %17180 = vmatmul.mubr.f32.gmra.mrb[8].mxu0 %v31744_v19 }
 0x69d   :  { %17698 = vmatmul.mubr.f32.vlgmr.msra.gmra.mrb[12].mxu1 %v31677_v28  ;;  %17185 = vmatprep.mubr.f32.mxu0 %v34461_v61  ;;  %v34832_v28 = vld [vmem:[#allocation26_spill] sm:$0xff] }
 0x69e   :  { %25859 = vmatpush1.bf16.msra.mxu1 %v31782_v14  ;;  %17703 = vmatprep.mubr.f32.mxu1 %v34461_v61 }
 0x69f   :  { %25861 = vmatprep.subr.bf16.mxu1 %v25860_v43 }
 0x6a0   :  { %17189 = vmatmul.mubr.f32.gmra.mrb[10].mxu0 %v31766_v36 }
 0x6a1   :  { %17706 = vmatmul.mubr.f32.gmra.mrb[14].mxu1 %v31697_v2  ;;  %17271 = vmatprep.mubr.f32.mxu0 %v34461_v61  ;;  %v25862_v2 = vpack.c.bf16 %v17530_v31, %v17518_v62 }
 0x6a2   :  { %17711 = vmatprep.mubr.f32.mxu1 %v34461_v61 }
 0x6a4   :  { %17273 = vmatmul.mubr.f32.vlgmr.msra.gmra.mrb[4].mxu0 %v31652_v48 }
 0x6a5   :  { %25843 = vmatpush1.bf16.msra.mxu0 %v31665_v63  ;;  %17714 = vmatmul.mubr.f32.gmra.mrb[16].mxu1 %v31716_v29  ;;  %v24934_v63 = vld [vmem:[%s34088_s5 + $0xc0] sm:$0xff] }
 0x6a6   :  { %25869 = vmatprep.subr.bf16.mxu0 %v34832_v28  ;;  %17278 = vmatprep.mubr.f32.mxu0 %v34461_v61  ;;  %v18113_v29 = vsel %vm10070_vm10, %v24934_v63, 0 }
 0x6a7   :  { %17719 = vmatprep.mubr.f32.mxu1 %v34461_v61  ;;  %v31898_v10 = vand.u32 4294901760, %v18113_v29 }
 0x6a8   :  { %17280 = vmatmul.mubr.f32.gmra.mrb[6].mxu0 %v31679_v12 }
 0x6a9   :  { %17722 = vmatmul.mubr.f32.gmra.mrb[18].mxu1 %v31747_v58  ;;  %17285 = vmatprep.mubr.f32.mxu0 %v34461_v61 }
 0x6aa   :  { %17796 = vmatprep.mubr.f32.mxu1 %v34461_v61 }
 0x6ac   :  { %17287 = vmatmul.mubr.f32.gmra.mrb[8].mxu0 %v31699_v60 }
 0x6ad   :  { %17800 = vmatmul.mubr.f32.vlgmr.msra.gmra.mrb[12].mxu1 %v31694_v18  ;;  %17292 = vmatprep.mubr.f32.mxu0 %v34461_v61  ;;  %v18116_v18 = vsel %vm10070_vm10, %v24935_v21, 0 }
 0x6ae   :  { %25863 = vmatpush1.bf16.msra.mxu1 %v25862_v2  ;;  %17805 = vmatprep.mubr.f32.mxu1 %v34461_v61  ;;  %v31911_v58 = vand.u32 4294901760, %v18116_v18 }
 0x6af   :  { %25865 = vmatprep.subr.bf16.mxu1 %v31726_v8  ;;  %v31909_v8 = vsub.f32 %v18113_v29, %v31898_v10 }
 0x6b0   :  { %17294 = vmatmul.mubr.f32.gmra.mrb[10].mxu0 %v31718_v15  ;;  %v31927_v9 = vsub.f32 %v18116_v18, %v31911_v58 }
 0x6b1   :  { %17809 = vmatmul.mubr.f32.gmra.mrb[14].mxu1 %v31713_v33  ;;  %17368 = vmatprep.mubr.f32.mxu0 %v34461_v61  ;;  %v18119_v33 = vsel %vm10070_vm10, %v24936_v23, 0  ;;  %v31924_v56 = vand.u32 4294901760, %v31909_v8 }
 0x6b2   :  { %17814 = vmatprep.mubr.f32.mxu1 %v34461_v61  ;;  %v31939_v31 = vand.u32 4294901760, %v31927_v9 }
 0x6b3   :  { %v18196_v55 = vsub.f32 %v31909_v8, %v31924_v56 }
 0x6b4   :  { %17370 = vmatmul.mubr.f32.vlgmr.msra.gmra.mrb[4].mxu0 %v31652_v48  ;;  %v18207_v39 = vsub.f32 %v31927_v9, %v31939_v31 }
 0x6b5   :  { %25871 = vmatpush1.bf16.msra.mxu0 %v34833_v59  ;;  %17818 = vmatmul.mubr.f32.gmra.mrb[16].mxu1 %v31744_v19  ;;  %v31929_v19 = vand.u32 4294901760, %v18119_v33  ;;  %v18197_v34 = vand.u32 4294901760, %v18196_v55 }
 0x6b6   :  { %25873 = vmatprep.subr.bf16.mxu0 %v30795_v47  ;;  %17375 = vmatprep.mubr.f32.mxu0 %v34461_v61  ;;  %v18122_v47 = vsel %vm10070_vm10, %v24937_v16, 0  ;;  %v34844_v16 = vld [vmem:[#allocation60_spill] sm:$0xff] }
 0x6b7   :  { %17823 = vmatprep.mubr.f32.mxu1 %v34461_v61  ;;  %v31942_v62 = vsub.f32 %v18119_v33, %v31929_v19  ;;  %v31944_v38 = vand.u32 4294901760, %v18122_v47 }
 0x6b8   :  { %17377 = vmatmul.mubr.f32.gmra.mrb[6].mxu0 %v31679_v12 }
 0x6b9   :  { %17827 = vmatmul.mubr.f32.gmra.mrb[18].mxu1 %v31766_v36  ;;  %17382 = vmatprep.mubr.f32.mxu0 %v34461_v61  ;;  %v34834_v36 = vld [vmem:[#allocation79_spill] sm:$0xff]  ;;  %v31955_v6 = vand.u32 4294901760, %v31942_v62  ;;  %v31958_v46 = vsub.f32 %v18122_v47, %v31944_v38 }
 0x6ba   :  { %17909 = vmatprep.mubr.f32.mxu1 %v34461_v61 }
 0x6bb   :  { %v18218_v17 = vsub.f32 %v31942_v62, %v31955_v6  ;;  %v31966_v25 = vand.u32 4294901760, %v31958_v46 }
 0x6bc   :  { %17384 = vmatmul.mubr.f32.gmra.mrb[8].mxu0 %v31699_v60 }
 0x6bd   :  { %17911 = vmatmul.mubr.f32.vlgmr.msra.gmra.mrb[12].mxu1 %v31652_v48  ;;  %17389 = vmatprep.mubr.f32.mxu0 %v34461_v61  ;;  %v18219_v49 = vand.u32 4294901760, %v18218_v17  ;;  %v18229_v41 = vsub.f32 %v31958_v46, %v31966_v25 }
 0x6be   :  { %25867 = vmatpush1.bf16.msra.mxu1 %v31782_v14  ;;  %17916 = vmatprep.mubr.f32.mxu1 %v34461_v61  ;;  %v18208_v14 = vand.u32 4294901760, %v18207_v39 }
 0x6bf   :  { %25893 = vmatprep.subr.bf16.mxu1 %v34834_v36  ;;  %v18230_v40 = vand.u32 4294901760, %v18229_v41 }
 0x6c0   :  { %17391 = vmatmul.mubr.f32.gmra.mrb[10].mxu0 %v31718_v15 }
 0x6c1   :  { %17918 = vmatmul.mubr.f32.gmra.mrb[14].mxu1 %v31679_v12  ;;  %18192 = vmatprep.mubr.f32.mxu0 %v34461_v61 }
 0x6c2   :  { %17923 = vmatprep.mubr.f32.mxu1 %v34461_v61 }
 0x6c4   :  { %18198 = vmatmul.mubr.f32.vlgmr.msra.gmra.mrb[4].mxu0 %v18197_v34 }
 0x6c5   :  { %25875 = vmatpush1.bf16.msra.mxu0 %v34835_v27  ;;  %17925 = vmatmul.mubr.f32.gmra.mrb[16].mxu1 %v31699_v60 }
 0x6c6   :  { %25877 = vmatprep.subr.bf16.mxu0 %v34838_v51  ;;  %18203 = vmatprep.mubr.f32.mxu0 %v34461_v61  ;;  %v34861_v51 = vld [vmem:[#allocation107_spill] sm:$0xff] }
 0x6c7   :  { %17930 = vmatprep.mubr.f32.mxu1 %v34461_v61 }
 0x6c8   :  { %18209 = vmatmul.mubr.f32.gmra.mrb[6].mxu0 %v18208_v14 }
 0x6c9   :  { %17932 = vmatmul.mubr.f32.gmra.mrb[18].mxu1 %v31718_v15  ;;  %18214 = vmatprep.mubr.f32.mxu0 %v34461_v61 }
 0x6ca   :  { %18006 = vmatprep.mubr.f32.mxu1 %v34461_v61 }
 0x6cc   :  { %18220 = vmatmul.mubr.f32.gmra.mrb[8].mxu0 %v18219_v49 }
 0x6cd   :  { %18008 = vmatmul.mubr.f32.vlgmr.msra.gmra.mrb[12].mxu1 %v31652_v48  ;;  %18225 = vmatprep.mubr.f32.mxu0 %v34461_v61  ;;  %v34840_v48 = vpack.c.bf16 %v30426_v30, %v30386_v54  ;;  %v34841_v54 = vpack.c.bf16 %v30676_v3, %v30575_v32  ;;  %v34842_v30 = vpack.c.bf16 %v30584_v24, %v30528_v50  ;;  %v24939_v50 = vld [vmem:[%s34088_s5 + $0xe0] sm:$0xff]  ;;  %v24940_v24 = vld [vmem:[%s34088_s5 + $0xe8] sm:$0xff] }
 0x6ce   :  { %25895 = vmatpush1.bf16.msra.mxu1 %v34839_v57  ;;  %18013 = vmatprep.mubr.f32.mxu1 %v34461_v61  ;;  %v19478_v32 = vsel %vm10070_vm10, %v24939_v50, 0 }
 0x6cf   :  { %25897 = vmatprep.subr.bf16.mxu1 %v30833_v42  ;;  %v32074_v3 = vand.u32 4294901760, %v19478_v32 }
 0x6d0   :  { %18231 = vmatmul.mubr.f32.gmra.mrb[10].mxu0 %v18230_v40 }
 0x6d1   :  { %18015 = vmatmul.mubr.f32.gmra.mrb[14].mxu1 %v31679_v12  ;;  %18321 = vmatprep.mubr.f32.mxu0 %v34461_v61  ;;  %v24942_v12 = vld [vmem:[%s34088_s5 + $0xf8] sm:$0xff] }
 0x6d2   :  { %18020 = vmatprep.mubr.f32.mxu1 %v34461_v61 }
 0x6d4   :  { %18323 = vmatmul.mubr.f32.vlgmr.msra.gmra.mrb[4].mxu0 %v31898_v10 }
 0x6d5   :  { %25879 = vmatpush1.bf16.msra.mxu0 %v34840_v48  ;;  %18022 = vmatmul.mubr.f32.gmra.mrb[16].mxu1 %v31699_v60 }
 0x6d6   :  { %25881 = vmatprep.subr.bf16.mxu0 %v34832_v28  ;;  %18328 = vmatprep.mubr.f32.mxu0 %v34461_v61 }
 0x6d7   :  { %18027 = vmatprep.mubr.f32.mxu1 %v34461_v61 }
 0x6d8   :  { %18330 = vmatmul.mubr.f32.gmra.mrb[6].mxu0 %v31911_v58 }
 0x6d9   :  { %18029 = vmatmul.mubr.f32.gmra.mrb[18].mxu1 %v31718_v15  ;;  %18335 = vmatprep.mubr.f32.mxu0 %v34461_v61 }
 0x6da   :  { %18830 = vmatprep.mubr.f32.mxu1 %v34461_v61 }
 0x6dc   :  { %18337 = vmatmul.mubr.f32.gmra.mrb[8].mxu0 %v31929_v19 }
 0x6dd   :  { %18836 = vmatmul.mubr.f32.vlgmr.msra.gmra.mrb[12].mxu1 %v18197_v34  ;;  %18342 = vmatprep.mubr.f32.mxu0 %v34461_v61  ;;  %v24944_v34 = vld [vmem:[%s34088_s5 + $0x100] sm:$0xff] }
 0x6de   :  { %25899 = vmatpush1.bf16.msra.mxu1 %v30797_v44  ;;  %18841 = vmatprep.mubr.f32.mxu1 %v34461_v61  ;;  %v32085_v44 = vsub.f32 %v19478_v32, %v32074_v3  ;;  %v20843_v39 = vsel %vm10070_vm10, %v24944_v34, 0  ;;  %v22221_v34 = vld [vmem:[%s34092_s7 + $0x98] sm:$0xff] }
 0x6df   :  { %25901 = vmatprep.subr.bf16.mxu1 %v34841_v54 }
 0x6e0   :  { %18344 = vmatmul.mubr.f32.gmra.mrb[10].mxu0 %v31944_v38  ;;  %v32100_v60 = vand.u32 4294901760, %v32085_v44 }
 0x6e1   :  { %18847 = vmatmul.mubr.f32.gmra.mrb[14].mxu1 %v18208_v14  ;;  %18422 = vmatprep.mubr.f32.mxu0 %v34461_v61  ;;  %v32250_v14 = vand.u32 4294901760, %v20843_v39 }
 0x6e2   :  { %18852 = vmatprep.mubr.f32.mxu1 %v34461_v61  ;;  %v19561_v43 = vsub.f32 %v32085_v44, %v32100_v60 }
 0x6e4   :  { %18425 = vmatmul.mubr.f32.vlgmr.msra.gmra.mrb[4].mxu0 %v31909_v8  ;;  %v19562_v29 = vand.u32 4294901760, %v19561_v43  ;;  %v34865_v43 = vld [vmem:[#allocation103_spill] sm:$0xff] }
 0x6e5   :  { %25883 = vmatpush1.bf16.msra.mxu0 %v34833_v59  ;;  %18858 = vmatmul.mubr.f32.gmra.mrb[16].mxu1 %v18219_v49  ;;  %v24947_v49 = vld [vmem:[%s34088_s5 + $0x118] sm:$0xff] }
 0x6e6   :  { %25885 = vmatprep.subr.bf16.mxu0 %v30791_v7  ;;  %18430 = vmatprep.mubr.f32.mxu0 %v34461_v61  ;;  %v19481_v7 = vsel %vm10070_vm10, %v24940_v24, 0  ;;  %v20852_v48 = vsel %vm10070_vm10, %v24947_v49, 0  ;;  %v34862_v24 = vld [vmem:[#allocation78_spill] sm:$0xff] }
 0x6e7   :  { %18863 = vmatprep.mubr.f32.mxu1 %v34461_v61  ;;  %v32296_v32 = vand.u32 4294901760, %v20852_v48  ;;  %v22222_v49 = vld [vmem:[%s34092_s7 + $0xa0] sm:$0xff] }
 0x6e8   :  { %18433 = vmatmul.mubr.f32.gmra.mrb[6].mxu0 %v31927_v9 }
 0x6e9   :  { %18869 = vmatmul.mubr.f32.gmra.mrb[18].mxu1 %v18230_v40  ;;  %18438 = vmatprep.mubr.f32.mxu0 %v34461_v61 }
 0x6ea   :  { %18959 = vmatprep.mubr.f32.mxu1 %v34461_v61 }
 0x6ec   :  { %18441 = vmatmul.mubr.f32.gmra.mrb[8].mxu0 %v31942_v62 }
 0x6ed   :  { %18961 = vmatmul.mubr.f32.vlgmr.msra.gmra.mrb[12].mxu1 %v31898_v10  ;;  %18446 = vmatprep.mubr.f32.mxu0 %v34461_v61 }
 0x6ee   :  { %25903 = vmatpush1.bf16.msra.mxu1 %v34842_v30  ;;  %18966 = vmatprep.mubr.f32.mxu1 %v34461_v61 }
 0x6ef   :  { %25905 = vmatprep.subr.bf16.mxu1 %v34834_v36 }
 0x6f0   :  { %18449 = vmatmul.mubr.f32.gmra.mrb[10].mxu0 %v31958_v46 }
 0x6f1   :  { %18968 = vmatmul.mubr.f32.gmra.mrb[14].mxu1 %v31911_v58  ;;  %18523 = vmatprep.mubr.f32.mxu0 %v34461_v61 }
 0x6f2   :  { %18973 = vmatprep.mubr.f32.mxu1 %v34461_v61 }
 0x6f4   :  { %18527 = vmatmul.mubr.f32.vlgmr.msra.gmra.mrb[4].mxu0 %v31924_v56 }
 0x6f5   :  { %25887 = vmatpush1.bf16.msra.mxu0 %v30806_v45  ;;  %18975 = vmatmul.mubr.f32.gmra.mrb[16].mxu1 %v31929_v19  ;;  %v32087_v45 = vand.u32 4294901760, %v19481_v7 }
 0x6f6   :  { %25889 = vmatprep.subr.bf16.mxu0 %v34832_v28  ;;  %18532 = vmatprep.mubr.f32.mxu0 %v34461_v61 }
 0x6f7   :  { %18980 = vmatprep.mubr.f32.mxu1 %v34461_v61  ;;  %v32103_v15 = vsub.f32 %v19481_v7, %v32087_v45 }
 0x6f8   :  { %18536 = vmatmul.mubr.f32.gmra.mrb[6].mxu0 %v31939_v31 }
 0x6f9   :  { %18982 = vmatmul.mubr.f32.gmra.mrb[18].mxu1 %v31944_v38  ;;  %18541 = vmatprep.mubr.f32.mxu0 %v34461_v61  ;;  %v32115_v28 = vand.u32 4294901760, %v32103_v15 }
 0x6fa   :  { %19060 = vmatprep.mubr.f32.mxu1 %v34461_v61 }
 0x6fb   :  { %v19572_v21 = vsub.f32 %v32103_v15, %v32115_v28 }
 0x6fc   :  { %18545 = vmatmul.mubr.f32.gmra.mrb[8].mxu0 %v31955_v6 }
 0x6fd   :  { %19063 = vmatmul.mubr.f32.vlgmr.msra.gmra.mrb[12].mxu1 %v31909_v8  ;;  %18550 = vmatprep.mubr.f32.mxu0 %v34461_v61  ;;  %v19573_v8 = vand.u32 4294901760, %v19572_v21 }
 0x6fe   :  { %25907 = vmatpush1.bf16.msra.mxu1 %v34839_v57  ;;  %19068 = vmatprep.mubr.f32.mxu1 %v34461_v61 }
 0x6ff   :  { %25909 = vmatprep.subr.bf16.mxu1 %v30808_v11  ;;  %v24941_v11 = vld [vmem:[%s34088_s5 + $0xf0] sm:$0xff] }
 0x700   :  { %18554 = vmatmul.mubr.f32.gmra.mrb[10].mxu0 %v31966_v25  ;;  %v19484_v42 = vsel %vm10070_vm10, %v24941_v11, 0 }
 0x701   :  { %19071 = vmatmul.mubr.f32.gmra.mrb[14].mxu1 %v31927_v9  ;;  %18636 = vmatprep.mubr.f32.mxu0 %v34461_v61  ;;  %v32105_v5 = vand.u32 4294901760, %v19484_v42  ;;  %v34846_v9 = vld [vmem:[#allocation36_spill] sm:$0xff] }
 0x702   :  { %19076 = vmatprep.mubr.f32.mxu1 %v34461_v61 }
 0x703   :  { %v32118_v63 = vsub.f32 %v19484_v42, %v32105_v5 }
 0x704   :  { %18638 = vmatmul.mubr.f32.vlgmr.msra.gmra.mrb[4].mxu0 %v31898_v10 }
 0x705   :  { %25891 = vmatpush1.bf16.msra.mxu0 %v34833_v59  ;;  %19079 = vmatmul.mubr.f32.gmra.mrb[16].mxu1 %v31942_v62  ;;  %v32131_v18 = vand.u32 4294901760, %v32118_v63 }
 0x706   :  { %25917 = vmatprep.subr.bf16.mxu0 %v30814_v22  ;;  %18643 = vmatprep.mubr.f32.mxu0 %v34461_v61 }
 0x707   :  { %19084 = vmatprep.mubr.f32.mxu1 %v34461_v61  ;;  %v19583_v59 = vsub.f32 %v32118_v63, %v32131_v18 }
 0x708   :  { %18645 = vmatmul.mubr.f32.gmra.mrb[6].mxu0 %v31911_v58 }
 0x709   :  { %19087 = vmatmul.mubr.f32.gmra.mrb[18].mxu1 %v31958_v46  ;;  %18650 = vmatprep.mubr.f32.mxu0 %v34461_v61  ;;  %v19584_v55 = vand.u32 4294901760, %v19583_v59  ;;  %v24945_v46 = vld [vmem:[%s34088_s5 + $0x108] sm:$0xff]  ;;  %v34870_v59 = vld [vmem:[#allocation53_spill] sm:$0xff] }
 0x70a   :  { %19161 = vmatprep.mubr.f32.mxu1 %v34461_v61  ;;  %v20846_v17 = vsel %vm10070_vm10, %v24945_v46, 0 }
 0x70b   :  { %v32263_v27 = vand.u32 4294901760, %v20846_v17 }
 0x70c   :  { %18652 = vmatmul.mubr.f32.gmra.mrb[8].mxu0 %v31929_v19 }
 0x70d   :  { %19165 = vmatmul.mubr.f32.vlgmr.msra.gmra.mrb[12].mxu1 %v31924_v56  ;;  %18657 = vmatprep.mubr.f32.mxu0 %v34461_v61  ;;  %v34845_v56 = vld [vmem:[#allocation96_spill] sm:$0xff]  ;;  %v32279_v40 = vsub.f32 %v20846_v17, %v32263_v27 }
 0x70e   :  { %25911 = vmatpush1.bf16.msra.mxu1 %v30822_v1  ;;  %19170 = vmatprep.mubr.f32.mxu1 %v34461_v61  ;;  %v34843_v1 = vld [vmem:[#allocation89_spill] sm:$0xff]  ;;  %v34847_v47 = vpack.c.bf16 %v34845_v56, %v34846_v9  ;;  %v34877_v56 = vld [vmem:[#allocation102_spill] sm:$0xff]  ;;  %v22204_v17 = vld [vmem:[%s34092_s7 + $0x10] sm:$0xff] }
 0x70f   :  { %25913 = vmatprep.subr.bf16.mxu1 %v34834_v36  ;;  %v34848_v36 = vld [vmem:[#allocation99_spill] sm:$0xff]  ;;  %v32291_v30 = vand.u32 4294901760, %v32279_v40  ;;  %v34878_v9 = vld [vmem:[#allocation98_spill] sm:$0xff] }
 0x710   :  { %18659 = vmatmul.mubr.f32.gmra.mrb[10].mxu0 %v31944_v38 }
 0x711   :  { %19174 = vmatmul.mubr.f32.gmra.mrb[14].mxu1 %v31939_v31  ;;  %18733 = vmatprep.mubr.f32.mxu0 %v34461_v61  ;;  %v20937_v11 = vsub.f32 %v32279_v40, %v32291_v30 }
 0x712   :  { %19179 = vmatprep.mubr.f32.mxu1 %v34461_v61 }
 0x713   :  { %v20938_v42 = vand.u32 4294901760, %v20937_v11 }
 0x714   :  { %18735 = vmatmul.mubr.f32.vlgmr.msra.gmra.mrb[4].mxu0 %v31898_v10 }
 0x715   :  { %25919 = vmatpush1.bf16.msra.mxu0 %v34843_v1  ;;  %19183 = vmatmul.mubr.f32.gmra.mrb[16].mxu1 %v31955_v6  ;;  %v34859_v6 = vld [vmem:[#allocation33_spill] sm:$0xff] }
 0x716   :  { %25921 = vmatprep.subr.bf16.mxu0 %v30867_v20  ;;  %18740 = vmatprep.mubr.f32.mxu0 %v34461_v61  ;;  %v19487_v20 = vsel %vm10070_vm10, %v24942_v12, 0 }
 0x717   :  { %19188 = vmatprep.mubr.f32.mxu1 %v34461_v61  ;;  %v32120_v2 = vand.u32 4294901760, %v19487_v20 }
 0x718   :  { %18742 = vmatmul.mubr.f32.gmra.mrb[6].mxu0 %v31911_v58 }
 0x719   :  { %19192 = vmatmul.mubr.f32.gmra.mrb[18].mxu1 %v31966_v25  ;;  %18747 = vmatprep.mubr.f32.mxu0 %v34461_v61  ;;  %v32134_v23 = vsub.f32 %v19487_v20, %v32120_v2  ;;  %v24946_v25 = vld [vmem:[%s34088_s5 + $0x110] sm:$0xff] }
 0x71a   :  { %19274 = vmatprep.mubr.f32.mxu1 %v34461_v61  ;;  %v20849_v4 = vsel %vm10070_vm10, %v24946_v25, 0  ;;  %v34864_v20 = vld [vmem:[#allocation104_spill] sm:$0xff] }
 0x71b   :  { %v32142_v33 = vand.u32 4294901760, %v32134_v23 }
 0x71c   :  { %18749 = vmatmul.mubr.f32.gmra.mrb[8].mxu0 %v31929_v19 }
 0x71d   :  { %19276 = vmatmul.mubr.f32.vlgmr.msra.gmra.mrb[12].mxu1 %v31898_v10  ;;  %18754 = vmatprep.mubr.f32.mxu0 %v34461_v61  ;;  %v19594_v31 = vsub.f32 %v32134_v23, %v32142_v33 }
 0x71e   :  { %25915 = vmatpush1.bf16.msra.mxu1 %v34839_v57  ;;  %19281 = vmatprep.mubr.f32.mxu1 %v34461_v61  ;;  %v32281_v57 = vand.u32 4294901760, %v20849_v4 }
 0x71f   :  { %25941 = vmatprep.subr.bf16.mxu1 %v30830_v37  ;;  %v19595_v62 = vand.u32 4294901760, %v19594_v31  ;;  %v22218_v31 = vld [vmem:[%s34092_s7 + $0x80] sm:$0xff] }
 0x720   :  { %18756 = vmatmul.mubr.f32.gmra.mrb[10].mxu0 %v31944_v38  ;;  %v32294_v50 = vsub.f32 %v20849_v4, %v32281_v57 }
 0x721   :  { %19283 = vmatmul.mubr.f32.gmra.mrb[14].mxu1 %v31911_v58  ;;  %19557 = vmatprep.mubr.f32.mxu0 %v34461_v61 }
 0x722   :  { %19288 = vmatprep.mubr.f32.mxu1 %v34461_v61 }
 0x724   :  { %19563 = vmatmul.mubr.f32.vlgmr.msra.gmra.mrb[4].mxu0 %v19562_v29 }
 0x725   :  { %25923 = vmatpush1.bf16.msra.mxu0 %v34844_v16  ;;  %19290 = vmatmul.mubr.f32.gmra.mrb[16].mxu1 %v31929_v19 }
 0x726   :  { %25925 = vmatprep.subr.bf16.mxu0 %v34847_v47  ;;  %19568 = vmatprep.mubr.f32.mxu0 %v34461_v61  ;;  %v34879_v47 = vpack.c.bf16 %v34877_v56, %v34878_v9  ;;  %v22209_v9 = vld [vmem:[%s34092_s7 + $0x38] sm:$0xff] }
 0x727   :  { %19295 = vmatprep.mubr.f32.mxu1 %v34461_v61 }
 0x728   :  { %19574 = vmatmul.mubr.f32.gmra.mrb[6].mxu0 %v19573_v8 }
 0x729   :  { %19297 = vmatmul.mubr.f32.gmra.mrb[18].mxu1 %v31944_v38  ;;  %19579 = vmatprep.mubr.f32.mxu0 %v34461_v61 }
 0x72a   :  { %19371 = vmatprep.mubr.f32.mxu1 %v34461_v61 }
 0x72c   :  { %19585 = vmatmul.mubr.f32.gmra.mrb[8].mxu0 %v19584_v55 }
 0x72d   :  { %19373 = vmatmul.mubr.f32.vlgmr.msra.gmra.mrb[12].mxu1 %v31898_v10  ;;  %19590 = vmatprep.mubr.f32.mxu0 %v34461_v61  ;;  %v34849_v10 = vpack.c.bf16 %v30533_v0, %v30453_v26  ;;  %v34850_v26 = vld [vmem:[#allocation37_spill] sm:$0xff] }
 0x72e   :  { %25943 = vmatpush1.bf16.msra.mxu1 %v34848_v36  ;;  %19378 = vmatprep.mubr.f32.mxu1 %v34461_v61  ;;  %v34851_v0 = vpack.c.bf16 %v30734_v52, %v34850_v26  ;;  %v34853_v52 = vld [vmem:[#allocation100_spill] sm:$0xff] }
 0x72f   :  { %25945 = vmatprep.subr.bf16.mxu1 %v30893_v53  ;;  %v34852_v53 = vld [vmem:[#allocation66_spill] sm:$0xff] }
 0x730   :  { %19596 = vmatmul.mubr.f32.gmra.mrb[10].mxu0 %v19595_v62 }
 0x731   :  { %19380 = vmatmul.mubr.f32.gmra.mrb[14].mxu1 %v31911_v58  ;;  %19686 = vmatprep.mubr.f32.mxu0 %v34461_v61 }
 0x732   :  { %19385 = vmatprep.mubr.f32.mxu1 %v34461_v61 }
 0x734   :  { %19688 = vmatmul.mubr.f32.vlgmr.msra.gmra.mrb[4].mxu0 %v32074_v3 }
 0x735   :  { %25927 = vmatpush1.bf16.msra.mxu0 %v34849_v10  ;;  %19387 = vmatmul.mubr.f32.gmra.mrb[16].mxu1 %v31929_v19  ;;  %v34856_v19 = vld [vmem:[#allocation73_spill] sm:$0xff]  ;;  %v22315_v10 = vand.u32 4294901760, %v22218_v31 }
 0x736   :  { %25929 = vmatprep.subr.bf16.mxu0 %v30814_v22  ;;  %19693 = vmatprep.mubr.f32.mxu0 %v34461_v61 }
 0x737   :  { %19392 = vmatprep.mubr.f32.mxu1 %v34461_v61 }
 0x738   :  { %19695 = vmatmul.mubr.f32.gmra.mrb[6].mxu0 %v32087_v45 }
 0x739   :  { %19394 = vmatmul.mubr.f32.gmra.mrb[18].mxu1 %v31944_v38  ;;  %19700 = vmatprep.mubr.f32.mxu0 %v34461_v61  ;;  %v34858_v38 = vld [vmem:[#allocation27_spill] sm:$0xff] }
 0x73a   :  { %20195 = vmatprep.mubr.f32.mxu1 %v34461_v61 }
 0x73c   :  { %19702 = vmatmul.mubr.f32.gmra.mrb[8].mxu0 %v32105_v5 }
 0x73d   :  { %20201 = vmatmul.mubr.f32.vlgmr.msra.gmra.mrb[12].mxu1 %v19562_v29  ;;  %19707 = vmatprep.mubr.f32.mxu0 %v34461_v61 }
 0x73e   :  { %25947 = vmatpush1.bf16.msra.mxu1 %v30859_v35  ;;  %20206 = vmatprep.mubr.f32.mxu1 %v34461_v61  ;;  %v34854_v35 = vld [vmem:[#allocation23_spill] sm:$0xff] }
 0x73f   :  { %25949 = vmatprep.subr.bf16.mxu1 %v34851_v0  ;;  %v34855_v58 = vpack.c.bf16 %v34853_v52, %v34854_v35  ;;  %v22202_v35 = vld [vmem:[%s34092_s7] sm:$0xff] }
 0x740   :  { %19709 = vmatmul.mubr.f32.gmra.mrb[10].mxu0 %v32120_v2 }
 0x741   :  { %20212 = vmatmul.mubr.f32.gmra.mrb[14].mxu1 %v19573_v8  ;;  %19787 = vmatprep.mubr.f32.mxu0 %v34461_v61  ;;  %v34869_v8 = vld [vmem:[#allocation24_spill] sm:$0xff] }
 0x742   :  { %20217 = vmatprep.mubr.f32.mxu1 %v34461_v61 }
 0x744   :  { %19790 = vmatmul.mubr.f32.vlgmr.msra.gmra.mrb[4].mxu0 %v32085_v44 }
 0x745   :  { %25931 = vmatpush1.bf16.msra.mxu0 %v34843_v1  ;;  %20223 = vmatmul.mubr.f32.gmra.mrb[16].mxu1 %v19584_v55  ;;  %v34880_v55 = vld [vmem:[#allocation105_spill] sm:$0xff] }
 0x746   :  { %25933 = vmatprep.subr.bf16.mxu0 %v34852_v53  ;;  %19795 = vmatprep.mubr.f32.mxu0 %v34461_v61  ;;  %v32420_v53 = vsub.f32 %v22218_v31, %v22315_v10 }
 0x747   :  { %20228 = vmatprep.mubr.f32.mxu1 %v34461_v61 }
 0x748   :  { %19798 = vmatmul.mubr.f32.gmra.mrb[6].mxu0 %v32103_v15 }
 0x749   :  { %20234 = vmatmul.mubr.f32.gmra.mrb[18].mxu1 %v19595_v62  ;;  %19803 = vmatprep.mubr.f32.mxu0 %v34461_v61  ;;  %v22219_v62 = vld [vmem:[%s34092_s7 + $0x88] sm:$0xff] }
 0x74a   :  { %20324 = vmatprep.mubr.f32.mxu1 %v34461_v61  ;;  %v22318_v26 = vand.u32 4294901760, %v22219_v62 }
 0x74c   :  { %19806 = vmatmul.mubr.f32.gmra.mrb[8].mxu0 %v32118_v63  ;;  %v32408_v0 = vpack.c.bf16 %v22318_v26, %v22315_v10  ;;  %v32422_v52 = vsub.f32 %v22219_v62, %v22318_v26 }
 0x74d   :  { %20326 = vmatmul.mubr.f32.vlgmr.msra.gmra.mrb[12].mxu1 %v32074_v3  ;;  %19811 = vmatprep.mubr.f32.mxu0 %v34461_v61 }
 0x74e   :  { %25951 = vmatpush1.bf16.msra.mxu1 %v34855_v58  ;;  %20331 = vmatprep.mubr.f32.mxu1 %v34461_v61  ;;  %v22203_v58 = vld [vmem:[%s34092_s7 + $0x8] sm:$0xff] }
 0x74f   :  { %25953 = vmatprep.subr.bf16.mxu1 %v30830_v37  ;;  %v22270_v46 = vand.u32 4294901760, %v22203_v58 }
 0x750   :  { %19814 = vmatmul.mubr.f32.gmra.mrb[10].mxu0 %v32134_v23 }
 0x751   :  { %20333 = vmatmul.mubr.f32.gmra.mrb[14].mxu1 %v32087_v45  ;;  %19888 = vmatprep.mubr.f32.mxu0 %v34461_v61 }
 0x752   :  { %20338 = vmatprep.mubr.f32.mxu1 %v34461_v61 }
 0x754   :  { %19892 = vmatmul.mubr.f32.vlgmr.msra.gmra.mrb[4].mxu0 %v32100_v60 }
 0x755   :  { %25935 = vmatpush1.bf16.msra.mxu0 %v34856_v19  ;;  %20340 = vmatmul.mubr.f32.gmra.mrb[16].mxu1 %v32105_v5  ;;  %v34882_v19 = vld [vmem:[#allocation108_spill] sm:$0xff] }
 0x756   :  { %25937 = vmatprep.subr.bf16.mxu0 %v30814_v22  ;;  %19897 = vmatprep.mubr.f32.mxu0 %v34461_v61  ;;  %v34857_v22 = vld [vmem:[#allocation31_spill] sm:$0xff] }
 0x757   :  { %20345 = vmatprep.mubr.f32.mxu1 %v34461_v61 }
 0x758   :  { %19901 = vmatmul.mubr.f32.gmra.mrb[6].mxu0 %v32115_v28 }
 0x759   :  { %20347 = vmatmul.mubr.f32.gmra.mrb[18].mxu1 %v32120_v2  ;;  %19906 = vmatprep.mubr.f32.mxu0 %v34461_v61 }
 0x75a   :  { %20425 = vmatprep.mubr.f32.mxu1 %v34461_v61 }
 0x75c   :  { %19910 = vmatmul.mubr.f32.gmra.mrb[8].mxu0 %v32131_v18 }
 0x75d   :  { %20428 = vmatmul.mubr.f32.vlgmr.msra.gmra.mrb[12].mxu1 %v32085_v44  ;;  %19915 = vmatprep.mubr.f32.mxu0 %v34461_v61  ;;  %v32307_v44 = vand.u32 4294901760, %v32294_v50 }
 0x75e   :  { %25955 = vmatpush1.bf16.msra.mxu1 %v34848_v36  ;;  %20433 = vmatprep.mubr.f32.mxu1 %v34461_v61 }
 0x75f   :  { %25957 = vmatprep.subr.bf16.mxu1 %v34857_v22  ;;  %v20948_v12 = vsub.f32 %v32294_v50, %v32307_v44  ;;  %v22267_v22 = vand.u32 4294901760, %v22202_v35 }
 0x760   :  { %19919 = vmatmul.mubr.f32.gmra.mrb[10].mxu0 %v32142_v33 }
 0x761   :  { %20436 = vmatmul.mubr.f32.gmra.mrb[14].mxu1 %v32103_v15  ;;  %20001 = vmatprep.mubr.f32.mxu0 %v34461_v61  ;;  %v34863_v15 = vld [vmem:[#allocation62_spill] sm:$0xff]  ;;  %v32454_v4 = vsub.f32 %v22202_v35, %v22267_v22 }
 0x762   :  { %20441 = vmatprep.mubr.f32.mxu1 %v34461_v61 }
 0x764   :  { %20003 = vmatmul.mubr.f32.vlgmr.msra.gmra.mrb[4].mxu0 %v32074_v3 }
 0x765   :  { %25939 = vmatpush1.bf16.msra.mxu0 %v34843_v1  ;;  %20444 = vmatmul.mubr.f32.gmra.mrb[16].mxu1 %v32118_v63  ;;  %v32310_v1 = vsub.f32 %v20852_v48, %v32296_v32  ;;  %v20949_v63 = vand.u32 4294901760, %v20948_v12  ;;  %v34274_v12 = vand.u32 4294901760, %v32454_v4 }
 0x766   :  { %25965 = vmatprep.subr.bf16.mxu0 %v34858_v38  ;;  %20008 = vmatprep.mubr.f32.mxu0 %v34461_v61 }
 0x767   :  { %20449 = vmatprep.mubr.f32.mxu1 %v34461_v61 }
 0x768   :  { %20010 = vmatmul.mubr.f32.gmra.mrb[6].mxu0 %v32087_v45 }
 0x769   :  { %20452 = vmatmul.mubr.f32.gmra.mrb[18].mxu1 %v32134_v23  ;;  %20015 = vmatprep.mubr.f32.mxu0 %v34461_v61  ;;  %v34868_v23 = vld [vmem:[#allocation71_spill] sm:$0xff] }
 0x76a   :  { %20526 = vmatprep.mubr.f32.mxu1 %v34461_v61 }
 0x76c   :  { %20017 = vmatmul.mubr.f32.gmra.mrb[8].mxu0 %v32105_v5 }
 0x76d   :  { %20530 = vmatmul.mubr.f32.vlgmr.msra.gmra.mrb[12].mxu1 %v32100_v60  ;;  %20022 = vmatprep.mubr.f32.mxu0 %v34461_v61  ;;  %v32318_v60 = vand.u32 4294901760, %v32310_v1 }
 0x76e   :  { %25959 = vmatpush1.bf16.msra.mxu1 %v34859_v6  ;;  %20535 = vmatprep.mubr.f32.mxu1 %v34461_v61  ;;  %v34275_v6 = vand.u32 4294901760, %v32422_v52 }
 0x76f   :  { %25961 = vmatprep.subr.bf16.mxu1 %v30830_v37  ;;  %v32261_v37 = vsub.f32 %v20843_v39, %v32250_v14  ;;  %v20959_v29 = vsub.f32 %v32310_v1, %v32318_v60  ;;  %v34276_v39 = vand.u32 4294901760, %v32420_v53 }
 0x770   :  { %20024 = vmatmul.mubr.f32.gmra.mrb[10].mxu0 %v32120_v2 }
 0x771   :  { %20539 = vmatmul.mubr.f32.gmra.mrb[14].mxu1 %v32115_v28  ;;  %20098 = vmatprep.mubr.f32.mxu0 %v34461_v61  ;;  %v32276_v41 = vand.u32 4294901760, %v32261_v37  ;;  %v34866_v28 = vpack.c.bf16 %v34864_v20, %v34865_v43  ;;  %v20960_v21 = vand.u32 4294901760, %v20959_v29  ;;  %v22539_v48 = vsub.f32 %v32420_v53, %v34276_v39  ;;  %v22207_v20 = vld [vmem:[%s34092_s7 + $0x28] sm:$0xff] }
 0x772   :  { %20544 = vmatprep.mubr.f32.mxu1 %v34461_v61 }
 0x773   :  { %v20926_v54 = vsub.f32 %v32261_v37, %v32276_v41 }
 0x774   :  { %20100 = vmatmul.mubr.f32.vlgmr.msra.gmra.mrb[4].mxu0 %v32074_v3 }
 0x775   :  { %25967 = vmatpush1.bf16.msra.mxu0 %v34860_v13  ;;  %20548 = vmatmul.mubr.f32.gmra.mrb[16].mxu1 %v32131_v18  ;;  %v20927_v7 = vand.u32 4294901760, %v20926_v54  ;;  %v34867_v18 = vld [vmem:[#allocation101_spill] sm:$0xff]  ;;  %v22546_v54 = vsub.f32 %v32422_v52, %v34275_v6 }
 0x776   :  { %25969 = vmatprep.subr.bf16.mxu0 %v34861_v51  ;;  %20105 = vmatprep.mubr.f32.mxu0 %v34461_v61  ;;  %v22273_v51 = vand.u32 4294901760, %v22204_v17 }
 0x777   :  { %20553 = vmatprep.mubr.f32.mxu1 %v34461_v61 }
 0x778   :  { %20107 = vmatmul.mubr.f32.gmra.mrb[6].mxu0 %v32087_v45 }
 0x779   :  { %20557 = vmatmul.mubr.f32.gmra.mrb[18].mxu1 %v32142_v33  ;;  %20112 = vmatprep.mubr.f32.mxu0 %v34461_v61  ;;  %v34874_v33 = vld [vmem:[#allocation32_spill] sm:$0xff] }
 0x77a   :  { %20639 = vmatprep.mubr.f32.mxu1 %v34461_v61 }
 0x77c   :  { %20114 = vmatmul.mubr.f32.gmra.mrb[8].mxu0 %v32105_v5 }
 0x77d   :  { %20641 = vmatmul.mubr.f32.vlgmr.msra.gmra.mrb[12].mxu1 %v32074_v3  ;;  %20119 = vmatprep.mubr.f32.mxu0 %v34461_v61 }
 0x77e   :  { %25963 = vmatpush1.bf16.msra.mxu1 %v34848_v36  ;;  %20646 = vmatprep.mubr.f32.mxu1 %v34461_v61  ;;  %v34881_v36 = vld [vmem:[#allocation106_spill] sm:$0xff] }
 0x77f   :  { %25989 = vmatprep.subr.bf16.mxu1 %v34862_v24 }
 0x780   :  { %20121 = vmatmul.mubr.f32.gmra.mrb[10].mxu0 %v32120_v2 }
 0x781   :  { %20648 = vmatmul.mubr.f32.gmra.mrb[14].mxu1 %v32087_v45  ;;  %20922 = vmatprep.mubr.f32.mxu0 %v34461_v61 }
 0x782   :  { %20653 = vmatprep.mubr.f32.mxu1 %v34461_v61 }
 0x784   :  { %20928 = vmatmul.mubr.f32.vlgmr.msra.gmra.mrb[4].mxu0 %v20927_v7 }
 0x785   :  { %25971 = vmatpush1.bf16.msra.mxu0 %v34863_v15  ;;  %20655 = vmatmul.mubr.f32.gmra.mrb[16].mxu1 %v32105_v5  ;;  %v32483_v15 = vsub.f32 %v22204_v17, %v22273_v51 }
 0x786   :  { %25973 = vmatprep.subr.bf16.mxu0 %v34866_v28  ;;  %20933 = vmatprep.mubr.f32.mxu0 %v34461_v61  ;;  %v22540_v28 = vand.u32 4294901760, %v22539_v48 }
 0x787   :  { %20660 = vmatprep.mubr.f32.mxu1 %v34461_v61  ;;  %34884 = vst [vmem:[#allocation21_spill] sm:$0xff] %v32483_v15  ;;  %v34266_v31 = vand.u32 4294901760, %v32483_v15 }
 0x788   :  { %20939 = vmatmul.mubr.f32.gmra.mrb[6].mxu0 %v20938_v42 }
 0x789   :  { %20662 = vmatmul.mubr.f32.gmra.mrb[18].mxu1 %v32120_v2  ;;  %20944 = vmatprep.mubr.f32.mxu0 %v34461_v61  ;;  %v32550_v17 = vsub.f32 %v32483_v15, %v34266_v31 }
 0x78a   :  { %20736 = vmatprep.mubr.f32.mxu1 %v34461_v61 }
 0x78c   :  { %20950 = vmatmul.mubr.f32.gmra.mrb[8].mxu0 %v20949_v63 }
 0x78d   :  { %20738 = vmatmul.mubr.f32.vlgmr.msra.gmra.mrb[12].mxu1 %v32074_v3  ;;  %20955 = vmatprep.mubr.f32.mxu0 %v34461_v61  ;;  %v34871_v3 = vpack.c.bf16 %v34869_v8, %v34870_v59 }
 0x78e   :  { %25991 = vmatpush1.bf16.msra.mxu1 %v34867_v18  ;;  %20743 = vmatprep.mubr.f32.mxu1 %v34461_v61 }
 0x78f   :  { %25993 = vmatprep.subr.bf16.mxu1 %v34868_v23  ;;  %v22225_v23 = vld [vmem:[%s34092_s7 + $0xb8] sm:$0xff] }
 0x790   :  { %20961 = vmatmul.mubr.f32.gmra.mrb[10].mxu0 %v20960_v21  ;;  %v22336_v56 = vand.u32 4294901760, %v22225_v23 }
 0x791   :  { %20745 = vmatmul.mubr.f32.gmra.mrb[14].mxu1 %v32087_v45  ;;  %21051 = vmatprep.mubr.f32.mxu0 %v34461_v61  ;;  %v34872_v45 = vld [vmem:[#allocation54_spill] sm:$0xff] }
 0x792   :  { %20750 = vmatprep.mubr.f32.mxu1 %v34461_v61 }
 0x794   :  { %21053 = vmatmul.mubr.f32.vlgmr.msra.gmra.mrb[4].mxu0 %v32250_v14 }
 0x795   :  { %25975 = vmatpush1.bf16.msra.mxu0 %v34871_v3  ;;  %20752 = vmatmul.mubr.f32.gmra.mrb[16].mxu1 %v32105_v5  ;;  %v34873_v5 = vld [vmem:[#allocation86_spill] sm:$0xff] }
 0x796   :  { %25977 = vmatprep.subr.bf16.mxu0 %v34858_v38  ;;  %21058 = vmatprep.mubr.f32.mxu0 %v34461_v61  ;;  %v34875_v16 = vpack.c.bf16 %v34873_v5, %v34874_v33  ;;  %v22282_v5 = vand.u32 4294901760, %v22207_v20  ;;  %v22427_v33 = vsub.f32 %v32454_v4, %v34274_v12 }
 0x797   :  { %20757 = vmatprep.mubr.f32.mxu1 %v34461_v61 }
 0x798   :  { %21060 = vmatmul.mubr.f32.gmra.mrb[6].mxu0 %v32263_v27 }
 0x799   :  { %20759 = vmatmul.mubr.f32.gmra.mrb[18].mxu1 %v32120_v2  ;;  %21065 = vmatprep.mubr.f32.mxu0 %v34461_v61  ;;  %v34876_v2 = vld [vmem:[#allocation35_spill] sm:$0xff] }
 0x79a   :  { %21560 = vmatprep.mubr.f32.mxu1 %v34461_v61 }
 0x79c   :  { %21067 = vmatmul.mubr.f32.gmra.mrb[8].mxu0 %v32281_v57 }
 0x79d   :  { %21566 = vmatmul.mubr.f32.vlgmr.msra.gmra.mrb[12].mxu1 %v20927_v7  ;;  %21072 = vmatprep.mubr.f32.mxu0 %v34461_v61 }
 0x79e   :  { %25995 = vmatpush1.bf16.msra.mxu1 %v34872_v45  ;;  %21571 = vmatprep.mubr.f32.mxu1 %v34461_v61 }
 0x79f   :  { %25997 = vmatprep.subr.bf16.mxu1 %v34875_v16 }
 0x7a0   :  { %21074 = vmatmul.mubr.f32.gmra.mrb[10].mxu0 %v32296_v32 }
 0x7a1   :  { %21577 = vmatmul.mubr.f32.gmra.mrb[14].mxu1 %v20938_v42  ;;  %21152 = vmatprep.mubr.f32.mxu0 %v34461_v61 }
 0x7a2   :  { %21582 = vmatprep.mubr.f32.mxu1 %v34461_v61 }
 0x7a4   :  { %21155 = vmatmul.mubr.f32.vlgmr.msra.gmra.mrb[4].mxu0 %v32261_v37 }
 0x7a5   :  { %25979 = vmatpush1.bf16.msra.mxu0 %v34860_v13  ;;  %21588 = vmatmul.mubr.f32.gmra.mrb[16].mxu1 %v20949_v63  ;;  %v22547_v63 = vand.u32 4294901760, %v22546_v54  ;;  %v32576_v54 = vsub.f32 %v22225_v23, %v22336_v56  ;;  %v32593_v23 = vld [vmem:[%s34092_s7 + $0x48] sm:$0xff] }
 0x7a6   :  { %25981 = vmatprep.subr.bf16.mxu0 %v34876_v2  ;;  %21160 = vmatprep.mubr.f32.mxu0 %v34461_v61 }
 0x7a7   :  { %21593 = vmatprep.mubr.f32.mxu1 %v34461_v61  ;;  %34896 = vst [vmem:[#allocation58_spill] sm:$0xff] %v32576_v54 }
 0x7a8   :  { %21163 = vmatmul.mubr.f32.gmra.mrb[6].mxu0 %v32279_v40 }
 0x7a9   :  { %21599 = vmatmul.mubr.f32.gmra.mrb[18].mxu1 %v20960_v21  ;;  %21168 = vmatprep.mubr.f32.mxu0 %v34461_v61  ;;  %v22224_v21 = vld [vmem:[%s34092_s7 + $0xb0] sm:$0xff] }
 0x7aa   :  { %21689 = vmatprep.mubr.f32.mxu1 %v34461_v61  ;;  %v22333_v2 = vand.u32 4294901760, %v22224_v21 }
 0x7ac   :  { %21171 = vmatmul.mubr.f32.gmra.mrb[8].mxu0 %v32294_v50  ;;  %v32534_v26 = vpack.c.bf16 %v22336_v56, %v22333_v2  ;;  %v32574_v48 = vsub.f32 %v22224_v21, %v22333_v2  ;;  %v32588_v21 = vld [vmem:[%s34092_s7 + $0x40] sm:$0xff]  ;;  %v32607_v56 = vld [vmem:[%s34092_s7 + $0xd0] sm:$0xff] }
 0x7ad   :  { %21691 = vmatmul.mubr.f32.vlgmr.msra.gmra.mrb[12].mxu1 %v32250_v14  ;;  %21176 = vmatprep.mubr.f32.mxu0 %v34461_v61 }
 0x7ae   :  { %25999 = vmatpush1.bf16.msra.mxu1 %v34879_v47  ;;  %21696 = vmatprep.mubr.f32.mxu1 %v34461_v61  ;;  %v26044_v47 = vpack.c.bf16 %v22547_v63, %v22540_v28  ;;  %34891 = vst [vmem:[#allocation40_spill] sm:$0xff] %v32534_v26  ;;  %34895 = vst [vmem:[#allocation47_spill] sm:$0xff] %v32574_v48 }
 0x7af   :  { %26001 = vmatprep.subr.bf16.mxu1 %v34862_v24 }
 0x7b0   :  { %21179 = vmatmul.mubr.f32.gmra.mrb[10].mxu0 %v32310_v1 }
 0x7b1   :  { %21698 = vmatmul.mubr.f32.gmra.mrb[14].mxu1 %v32263_v27  ;;  %21253 = vmatprep.mubr.f32.mxu0 %v34461_v61 }
 0x7b2   :  { %21703 = vmatprep.mubr.f32.mxu1 %v34461_v61 }
 0x7b4   :  { %21257 = vmatmul.mubr.f32.vlgmr.msra.gmra.mrb[4].mxu0 %v32276_v41 }
 0x7b5   :  { %25983 = vmatpush1.bf16.msra.mxu0 %v34880_v55  ;;  %21705 = vmatmul.mubr.f32.gmra.mrb[16].mxu1 %v32281_v57 }
 0x7b6   :  { %25985 = vmatprep.subr.bf16.mxu0 %v34858_v38  ;;  %21262 = vmatprep.mubr.f32.mxu0 %v34461_v61  ;;  %v22220_v38 = vld [vmem:[%s34092_s7 + $0x90] sm:$0xff] }
 0x7b7   :  { %21710 = vmatprep.mubr.f32.mxu1 %v34461_v61  ;;  %v22321_v25 = vand.u32 4294901760, %v22220_v38 }
 0x7b8   :  { %21266 = vmatmul.mubr.f32.gmra.mrb[6].mxu0 %v32291_v30 }
 0x7b9   :  { %21712 = vmatmul.mubr.f32.gmra.mrb[18].mxu1 %v32296_v32  ;;  %21271 = vmatprep.mubr.f32.mxu0 %v34461_v61  ;;  %v32477_v7 = vsub.f32 %v22220_v38, %v22321_v25 }
 0x7ba   :  { %21790 = vmatprep.mubr.f32.mxu1 %v34461_v61 }
 0x7bb   :  { %v34268_v59 = vand.u32 4294901760, %v32477_v7 }
 0x7bc   :  { %21275 = vmatmul.mubr.f32.gmra.mrb[8].mxu0 %v32307_v44 }
 0x7bd   :  { %21793 = vmatmul.mubr.f32.vlgmr.msra.gmra.mrb[12].mxu1 %v32261_v37  ;;  %21280 = vmatprep.mubr.f32.mxu0 %v34461_v61  ;;  %v22324_v37 = vand.u32 4294901760, %v22221_v34 }
 0x7be   :  { %26003 = vmatpush1.bf16.msra.mxu1 %v34867_v18  ;;  %21798 = vmatprep.mubr.f32.mxu1 %v34461_v61 }
 0x7bf   :  { %26005 = vmatprep.subr.bf16.mxu1 %v34881_v36  ;;  %v32479_v11 = vsub.f32 %v22221_v34, %v22324_v37  ;;  %v22428_v34 = vand.u32 4294901760, %v22427_v33 }
 0x7c0   :  { %21284 = vmatmul.mubr.f32.gmra.mrb[10].mxu0 %v32318_v60 }
 0x7c1   :  { %21801 = vmatmul.mubr.f32.gmra.mrb[14].mxu1 %v32279_v40  ;;  %21366 = vmatprep.mubr.f32.mxu0 %v34461_v61  ;;  %v32462_v40 = vpack.c.bf16 %v22270_v46, %v22267_v22  ;;  %v34267_v3 = vand.u32 4294901760, %v32479_v11 }
 0x7c2   :  { %21806 = vmatprep.mubr.f32.mxu1 %v34461_v61 }
 0x7c3   :  { %v22560_v22 = vsub.f32 %v32479_v11, %v34267_v3 }
 0x7c4   :  { %21368 = vmatmul.mubr.f32.vlgmr.msra.gmra.mrb[4].mxu0 %v32250_v14 }
 0x7c5   :  { %25987 = vmatpush1.bf16.msra.mxu0 %v34860_v13  ;;  %21809 = vmatmul.mubr.f32.gmra.mrb[16].mxu1 %v32294_v50  ;;  %v22205_v13 = vld [vmem:[%s34092_s7 + $0x18] sm:$0xff]  ;;  %v32472_v50 = vpack.c.bf16 %v22324_v37, %v22321_v25 }
 0x7c6   :  { %21373 = vmatprep.mubr.f32.mxu0 %v34461_v61  ;;  %21814 = vmatprep.mubr.f32.mxu1 %v34461_v61 }
 0x7c7   :  { %26013 = vmatprep.subr.bf16.mxu0 %v32408_v0  ;;  %34883 = vst [vmem:[#allocation28_spill] sm:$0xff] %v32472_v50 }
 0x7c8   :  { %21375 = vmatmul.mubr.f32.gmra.mrb[6].mxu0 %v32263_v27 }
 0x7c9   :  { %21817 = vmatmul.mubr.f32.gmra.mrb[18].mxu1 %v32310_v1  ;;  %21380 = vmatprep.mubr.f32.mxu0 %v34461_v61  ;;  %v22327_v1 = vand.u32 4294901760, %v22222_v49 }
 0x7ca   :  { %21891 = vmatprep.mubr.f32.mxu1 %v34461_v61 }
 0x7cb   :  { %v32530_v36 = vsub.f32 %v22222_v49, %v22327_v1  ;;  %v32565_v49 = vld [vmem:[%s34092_s7 + $0xc0] sm:$0xff] }
 0x7cc   :  { %21382 = vmatmul.mubr.f32.gmra.mrb[8].mxu0 %v32281_v57  ;;  %v34280_v28 = vand.u32 4294901760, %v32565_v49 }
 0x7cd   :  { %21895 = vmatmul.mubr.f32.vlgmr.msra.gmra.mrb[12].mxu1 %v32276_v41  ;;  %21387 = vmatprep.mubr.f32.mxu0 %v34461_v61  ;;  %v22223_v41 = vld [vmem:[%s34092_s7 + $0xa8] sm:$0xff]  ;;  %34889 = vst [vmem:[#allocation17_spill] sm:$0xff] %v32530_v36  ;;  %v34264_v25 = vand.u32 4294901760, %v32530_v36 }
 0x7ce   :  { %26007 = vmatpush1.bf16.msra.mxu1 %v34882_v19  ;;  %21900 = vmatprep.mubr.f32.mxu1 %v34461_v61  ;;  %v22330_v42 = vand.u32 4294901760, %v22223_v41  ;;  %v22553_v19 = vsub.f32 %v32477_v7, %v34268_v59 }
 0x7cf   :  { %26009 = vmatprep.subr.bf16.mxu1 %v34862_v24  ;;  %v22276_v24 = vand.u32 4294901760, %v22205_v13 }
 0x7d0   :  { %21389 = vmatmul.mubr.f32.gmra.mrb[10].mxu0 %v32296_v32  ;;  %v32502_v8 = vpack.c.bf16 %v22330_v42, %v22327_v1  ;;  %v32532_v10 = vsub.f32 %v22223_v41, %v22330_v42  ;;  %v32570_v41 = vld [vmem:[%s34092_s7 + $0xc8] sm:$0xff]  ;;  %v22561_v1 = vand.u32 4294901760, %v22560_v22 }
 0x7d1   :  { %21904 = vmatmul.mubr.f32.gmra.mrb[14].mxu1 %v32291_v30  ;;  %21463 = vmatprep.mubr.f32.mxu0 %v34461_v61  ;;  %v32470_v30 = vsub.f32 %v22203_v58, %v22270_v46  ;;  %v32492_v43 = vpack.c.bf16 %v22276_v24, %v22273_v51  ;;  %v32513_v16 = vsub.f32 %v22205_v13, %v22276_v24  ;;  %v22288_v58 = vand.u32 4294901760, %v22209_v9 }
 0x7d2   :  { %21909 = vmatprep.mubr.f32.mxu1 %v34461_v61  ;;  %34886 = vst [vmem:[#allocation52_spill] sm:$0xff] %v32502_v8  ;;  %34890 = vst [vmem:[#allocation57_spill] sm:$0xff] %v32532_v10  ;;  %v34263_v37 = vand.u32 4294901760, %v32532_v10  ;;  %v32560_v51 = vsub.f32 %v22207_v20, %v22282_v5  ;;  %v22554_v24 = vand.u32 4294901760, %v22553_v19  ;;  %v22442_v20 = vand.u32 4294901760, %v32550_v17 }
 0x7d3   :  { %34885 = vst [vmem:[#allocation51_spill] sm:$0xff] %v32492_v43  ;;  %v34269_v29 = vand.u32 4294901760, %v32470_v30  ;;  %34887 = vst [vmem:[#allocation43_spill] sm:$0xff] %v32513_v16  ;;  %v34265_v38 = vand.u32 4294901760, %v32513_v16  ;;  %v34279_v63 = vand.u32 4294901760, %v32570_v41  ;;  %v34273_v19 = vand.u32 4294901760, %v32576_v54 }
 0x7d4   :  { %21465 = vmatmul.mubr.f32.vlgmr.msra.gmra.mrb[4].mxu0 %v32250_v14  ;;  %34894 = vst [vmem:[#allocation49_spill] sm:$0xff] %v32560_v51  ;;  %v34270_v2 = vand.u32 4294901760, %v32560_v51 }
 0x7d5   :  { %21913 = vmatmul.mubr.f32.gmra.mrb[16].mxu1 %v32307_v44  ;;  %21470 = vmatprep.mubr.f32.mxu0 %v34461_v61  ;;  %v22206_v44 = vld [vmem:[%s34092_s7 + $0x20] sm:$0xff]  ;;  %v22434_v55 = vsub.f32 %v32470_v30, %v34269_v29  ;;  %v22448_v42 = vsub.f32 %v32513_v16, %v34265_v38  ;;  %v32627_v38 = vsub.f32 %v32565_v49, %v34280_v28 }
 0x7d6   :  { %21918 = vmatprep.mubr.f32.mxu1 %v34461_v61  ;;  %26015 = vmatpush3.bf16.msra.mxu0 %v32462_v40  ;;  %v22279_v45 = vand.u32 4294901760, %v22206_v44  ;;  %v22462_v3 = vsub.f32 %v32560_v51, %v34270_v2  ;;  %v22588_v29 = vsub.f32 %v32576_v54, %v34273_v19 }
 0x7d7   :  { %26017 = vmatprep.subr.bf16.mxu0 %v32472_v50  ;;  %v22435_v46 = vand.u32 4294901760, %v22434_v55  ;;  %v34272_v55 = vand.u32 4294901760, %v32574_v48  ;;  %v22449_v17 = vand.u32 4294901760, %v22448_v42  ;;  %34897 = vst [vmem:[#allocation19_spill] sm:$0xff] %v32627_v38 }
 0x7d8   :  { %21472 = vmatmul.mubr.f32.gmra.mrb[6].mxu0 %v32263_v27  ;;  %v32527_v62 = vpack.c.bf16 %v22282_v5, %v22279_v45  ;;  %v32558_v13 = vsub.f32 %v22206_v44, %v22279_v45  ;;  %v22567_v45 = vsub.f32 %v32530_v36, %v34264_v25  ;;  %v22574_v5 = vsub.f32 %v32532_v10, %v34263_v37 }
 0x7d9   :  { %21922 = vmatmul.mubr.f32.gmra.mrb[18].mxu1 %v32318_v60  ;;  %21477 = vmatprep.mubr.f32.mxu0 %v34461_v61  ;;  %v22208_v60 = vld [vmem:[%s34092_s7 + $0x30] sm:$0xff]  ;;  %v26046_v44 = vpack.c.bf16 %v22435_v46, %v22428_v34  ;;  %v32619_v34 = vsub.f32 %v22209_v9, %v22288_v58  ;;  %v26048_v46 = vpack.c.bf16 %v22561_v1, %v22554_v24  ;;  %v34277_v37 = vand.u32 4294901760, %v32588_v21  ;;  %v32644_v24 = vld [vmem:[%s34092_s7 + $0x58] sm:$0xff] }
 0x7da   :  { %22004 = vmatprep.mubr.f32.mxu1 %v34461_v61  ;;  %26019 = vmatpush3.bf16.msra.mxu0 %v32492_v43  ;;  %34888 = vst [vmem:[#allocation41_spill] sm:$0xff] %v32527_v62  ;;  %v22285_v35 = vand.u32 4294901760, %v22208_v60  ;;  %34893 = vst [vmem:[#allocation55_spill] sm:$0xff] %v32558_v13  ;;  %v34271_v33 = vand.u32 4294901760, %v32558_v13  ;;  %v34278_v25 = vand.u32 4294901760, %v32593_v23  ;;  %v34281_v9 = vand.u32 4294901760, %v32607_v56 }
 0x7db   :  { %26021 = vmatprep.subr.bf16.mxu0 %v32502_v8  ;;  %v22568_v1 = vand.u32 4294901760, %v22567_v45  ;;  %v22575_v42 = vand.u32 4294901760, %v22574_v5  ;;  %v22581_v59 = vsub.f32 %v32574_v48, %v34272_v55  ;;  %v34282_v5 = vand.u32 4294901760, %v32619_v34 }
 0x7dc   :  { %21479 = vmatmul.mubr.f32.gmra.mrb[8].mxu0 %v32281_v57  ;;  %v32617_v22 = vsub.f32 %v22208_v60, %v22285_v35  ;;  %v32632_v60 = vsub.f32 %v32570_v41, %v34279_v63  ;;  %v22455_v31 = vsub.f32 %v32558_v13, %v34271_v33  ;;  %v32665_v2 = vsub.f32 %v32588_v21, %v34277_v37 }
 0x7dd   :  { %22006 = vmatmul.mubr.f32.vlgmr.msra.gmra.mrb[12].mxu1 %v32250_v14  ;;  %21484 = vmatprep.mubr.f32.mxu0 %v34461_v61  ;;  %v32670_v33 = vsub.f32 %v32593_v23, %v34278_v25  ;;  %v32679_v39 = vsub.f32 %v32607_v56, %v34281_v9  ;;  %v26050_v25 = vpack.c.bf16 %v22449_v17, %v22442_v20  ;;  %v22463_v55 = vand.u32 4294901760, %v22462_v3 }
 0x7de   :  { %26011 = vmatpush1.bf16.msra.mxu1 %v34867_v18  ;;  %22011 = vmatprep.mubr.f32.mxu1 %v34461_v61  ;;  %v32553_v18 = vpack.c.bf16 %v22288_v58, %v22285_v35  ;;  %34898 = vst [vmem:[#allocation15_spill] sm:$0xff] %v32632_v60  ;;  %v32639_v58 = vld [vmem:[%s34092_s7 + $0x50] sm:$0xff]  ;;  %v34283_v45 = vand.u32 4294901760, %v32617_v22  ;;  %34899 = vst [vmem:[#allocation63_spill] sm:$0xff] %v32665_v2  ;;  %v26052_v63 = vpack.c.bf16 %v22575_v42, %v22568_v1 }
 0x7df   :  { %26045 = vmatprep.subr.bf16.mxu1 %v26044_v47  ;;  %26023 = vmatpush3.bf16.msra.mxu0 %v32527_v62  ;;  %v32612_v47 = vld [vmem:[%s34092_s7 + $0xd8] sm:$0xff]  ;;  %34900 = vst [vmem:[#allocation65_spill] sm:$0xff] %v32670_v33  ;;  %34901 = vst [vmem:[#allocation67_spill] sm:$0xff] %v32679_v39  ;;  %v22456_v28 = vand.u32 4294901760, %v22455_v31  ;;  %v22582_v19 = vand.u32 4294901760, %v22581_v59  ;;  %v22589_v12 = vand.u32 4294901760, %v22588_v29  ;;  %v22476_v9 = vsub.f32 %v32619_v34, %v34282_v5 }
 0x7e0   :  { %34892 = vst [vmem:[#allocation39_spill] sm:$0xff] %v32553_v18  ;;  %21486 = vmatmul.mubr.f32.gmra.mrb[10].mxu0 %v32296_v32  ;;  %26025 = vmatprep.subr.bf16.mxu0 %v32534_v26  ;;  %v34284_v35 = vand.u32 4294901760, %v32612_v47  ;;  %v22469_v6 = vsub.f32 %v32617_v22, %v34283_v45  ;;  %v34287_v20 = vand.u32 4294901760, %v32665_v2  ;;  %v34903_v3 = vand.u32 4294901760, %v32639_v58 }
 0x7e1   :  { %22013 = vmatmul.mubr.f32.gmra.mrb[14].mxu1 %v32263_v27  ;;  %v34905_v29 = vand.u32 4294901760, %v32644_v24  ;;  %v34907_v17 = vand.u32 4294901760, %v32627_v38 }
 0x7e2   :  { %22018 = vmatprep.mubr.f32.mxu1 %v34461_v61  ;;  %v32684_v37 = vsub.f32 %v32612_v47, %v34284_v35  ;;  %v26056_v35 = vpack.c.bf16 %v22589_v12, %v22582_v19  ;;  %v22470_v31 = vand.u32 4294901760, %v22469_v6  ;;  %v34910_v6 = vand.u32 4294901760, %v32679_v39 }
 0x7e3   :  { %26027 = vmatpush3.bf16.msra.mxu0 %v32553_v18  ;;  %v32704_v59 = vsub.f32 %v32644_v24, %v34905_v29  ;;  %v22595_v1 = vsub.f32 %v32627_v38, %v34907_v17  ;;  %v22477_v29 = vand.u32 4294901760, %v22476_v9  ;;  %v34909_v17 = vand.u32 4294901760, %v32670_v33 }
 0x7e4   :  { %34902 = vst [vmem:[#allocation76_spill] sm:$0xff] %v32684_v37 }
 0x7e5   :  { %22020 = vmatmul.mubr.f32.gmra.mrb[16].mxu1 %v32281_v57  ;;  %34906 = vst [vmem:[#allocation87_spill] sm:$0xff] %v32704_v59  ;;  %v34285_v45 = vand.u32 4294901760, %v32704_v59  ;;  %v26058_v19 = vpack.c.bf16 %v22477_v29, %v22470_v31 }
 0x7e6   :  { %22025 = vmatprep.mubr.f32.mxu1 %v34461_v61 }
 0x7e9   :  { %22027 = vmatmul.mubr.f32.gmra.mrb[18].mxu1 %v32296_v32 }
 0x7ea   :  { %22101 = vmatprep.mubr.f32.mxu1 %v34461_v61 }
 0x7ed   :  { %22103 = vmatmul.mubr.f32.vlgmr.msra.gmra.mrb[12].mxu1 %v32250_v14  ;;  %v32699_v14 = vsub.f32 %v32639_v58, %v34903_v3  ;;  %v26054_v3 = vpack.c.bf16 %v22463_v55, %v22456_v28  ;;  %v22609_v28 = vsub.f32 %v32679_v39, %v34910_v6 }
 0x7ee   :  { %22108 = vmatprep.mubr.f32.mxu1 %v34461_v61  ;;  %26047 = vmatpush3.bf16.msra.mxu1 %v26046_v44  ;;  %v34908_v44 = vand.u32 4294901760, %v32632_v60 }
 0x7ef   :  { %34904 = vst [vmem:[#allocation42_spill] sm:$0xff] %v32699_v14  ;;  %26049 = vmatprep.subr.bf16.mxu1 %v26048_v46  ;;  %v22483_v46 = vsub.f32 %v32665_v2, %v34287_v20  ;;  %v34286_v5 = vand.u32 4294901760, %v32699_v14  ;;  %v22610_v6 = vand.u32 4294901760, %v22609_v28  ;;  %v34916_v28 = vand.u32 4294901760, %v32593_v23  ;;  %v22232_v23 = vld [vmem:[%s34092_s7 + $0xf0] sm:$0xff] }
 0x7f0   :  { %v22602_v42 = vsub.f32 %v32632_v60, %v34908_v44  ;;  %v22490_v44 = vsub.f32 %v32670_v33, %v34909_v17 }
 0x7f1   :  { %22110 = vmatmul.mubr.f32.gmra.mrb[14].mxu1 %v32263_v27  ;;  %v22596_v27 = vand.u32 4294901760, %v22595_v1  ;;  %v22484_v9 = vand.u32 4294901760, %v22483_v46  ;;  %v22504_v1 = vsub.f32 %v32704_v59, %v34285_v45  ;;  %v34912_v46 = vand.u32 4294901760, %v32565_v49  ;;  %v22214_v49 = vld [vmem:[%s34092_s7 + $0x60] sm:$0xff] }
 0x7f2   :  { %22115 = vmatprep.mubr.f32.mxu1 %v34461_v61  ;;  %26051 = vmatpush3.bf16.msra.mxu1 %v26050_v25  ;;  %v22603_v12 = vand.u32 4294901760, %v22602_v42  ;;  %v34911_v25 = vand.u32 4294901760, %v32684_v37  ;;  %v22491_v17 = vand.u32 4294901760, %v22490_v44  ;;  %v34913_v44 = vand.u32 4294901760, %v32570_v41 }
 0x7f3   :  { %26053 = vmatprep.subr.bf16.mxu1 %v26052_v63  ;;  %v22497_v63 = vsub.f32 %v32699_v14, %v34286_v5  ;;  %v22505_v31 = vand.u32 4294901760, %v22504_v1  ;;  %v34918_v41 = vand.u32 4294901760, %v32607_v56  ;;  %v22303_v1 = vand.u32 4294901760, %v22214_v49 }
 0x7f4   :  { %v22616_v55 = vsub.f32 %v32684_v37, %v34911_v25  ;;  %v26060_v42 = vpack.c.bf16 %v22603_v12, %v22596_v27  ;;  %v22231_v27 = vld [vmem:[%s34092_s7 + $0xe8] sm:$0xff]  ;;  %v34915_v12 = vand.u32 4294901760, %v32588_v21 }
 0x7f5   :  { %22117 = vmatmul.mubr.f32.gmra.mrb[16].mxu1 %v32281_v57  ;;  %v26062_v57 = vpack.c.bf16 %v22491_v17, %v22484_v9  ;;  %v22215_v21 = vld [vmem:[%s34092_s7 + $0x68] sm:$0xff] }
 0x7f6   :  { %22122 = vmatprep.mubr.f32.mxu1 %v34461_v61  ;;  %26055 = vmatpush3.bf16.msra.mxu1 %v26054_v3  ;;  %v22617_v25 = vand.u32 4294901760, %v22616_v55  ;;  %v22498_v61 = vand.u32 4294901760, %v22497_v63  ;;  %v32755_v55 = vpack.c.bf16 %v34916_v28, %v34915_v12  ;;  %v22354_v63 = vand.u32 4294901760, %v22231_v27 }
 0x7f7   :  { %26057 = vmatprep.subr.bf16.mxu1 %v26056_v35  ;;  %v32743_v35 = vpack.c.bf16 %v34913_v44, %v34912_v46  ;;  %v22306_v56 = vand.u32 4294901760, %v22215_v21  ;;  %v32793_v44 = vsub.f32 %v22214_v49, %v22303_v1 }
 0x7f8   :  { %v26064_v3 = vpack.c.bf16 %v22617_v25, %v22610_v6  ;;  %v26066_v29 = vpack.c.bf16 %v22505_v31, %v22498_v61  ;;  %34917 = vst [vmem:[#allocation88_spill] sm:$0xff] %v32755_v55  ;;  %v34921_v25 = vand.u32 4294901760, %v32639_v58  ;;  %v22216_v31 = vld [vmem:[%s34092_s7 + $0x70] sm:$0xff]  ;;  %v32790_v46 = vsub.f32 %v22231_v27, %v22354_v63 }
 0x7f9   :  { %22124 = vmatmul.mubr.f32.gmra.mrb[18].mxu1 %v32296_v32  ;;  %34914 = vst [vmem:[#allocation84_spill] sm:$0xff] %v32743_v35  ;;  %v22230_v32 = vld [vmem:[%s34092_s7 + $0xe0] sm:$0xff]  ;;  %26029 = vmatprep.subr.bf16.mxu0 %v32743_v35  ;;  %v22309_v58 = vand.u32 4294901760, %v22216_v31  ;;  %v22510_v27 = vand.u32 4294901760, %v32793_v44  ;;  %v32825_v60 = vpack.c.bf16 %v22306_v56, %v22303_v1  ;;  %v34930_v1 = vld [vmem:[#allocation77_spill] sm:$0xff] }
 0x7fa   :  { %26059 = vmatpush3.bf16.msra.mxu1 %v26058_v19  ;;  %v34919_v19 = vand.u32 4294901760, %v32612_v47  ;;  %v22351_v17 = vand.u32 4294901760, %v22230_v32  ;;  %v22357_v47 = vand.u32 4294901760, %v22232_v23  ;;  %26031 = vmatpush3.bf16.msra.mxu0 %v32755_v55 }
 0x7fb   :  { %26061 = vmatprep.subr.bf16.mxu1 %v26060_v42  ;;  %v22233_v42 = vld [vmem:[%s34092_s7 + $0xf8] sm:$0xff]  ;;  %v22511_v5 = vsub.f32 %v32793_v44, %v22510_v27 }
 0x7fc   :  { %v32764_v9 = vpack.c.bf16 %v34919_v19, %v34918_v41  ;;  %v22360_v6 = vand.u32 4294901760, %v22233_v42  ;;  %v32798_v12 = vsub.f32 %v22232_v23, %v22357_v47  ;;  %v32823_v62 = vpack.c.bf16 %v22354_v63, %v22351_v17  ;;  %v32855_v63 = vpop.permute.xlu1 %22152 }
 0x7fd   :  { %v22512_v33 = vand.u32 4294901760, %v22511_v5  ;;  %34929 = vst [vmem:[#allocation91_spill] sm:$0xff] %v32855_v63 }
 0x7fe   :  { %26063 = vmatpush3.bf16.msra.mxu1 %v26062_v57  ;;  %34920 = vst [vmem:[#allocation70_spill] sm:$0xff] %v32764_v9  ;;  %v34922_v57 = vand.u32 4294901760, %v32644_v24  ;;  %v32795_v24 = vsub.f32 %v22215_v21, %v22306_v56  ;;  %26033 = vmatprep.subr.bf16.mxu0 %v32764_v9  ;;  %v32800_v28 = vsub.f32 %v22233_v42, %v22360_v6  ;;  %v22636_v21 = vand.u32 4294901760, %v32798_v12 }
 0x7ff   :  { %26065 = vmatprep.subr.bf16.mxu1 %v26064_v3  ;;  %v22217_v3 = vld [vmem:[%s34092_s7 + $0x78] sm:$0xff]  ;;  %v32827_v50 = vpack.c.bf16 %v22360_v6, %v22357_v47 }
 0x800   :  { %v32780_v61 = vpack.c.bf16 %v34922_v57, %v34921_v25  ;;  %v22312_v41 = vand.u32 4294901760, %v22217_v3  ;;  %v32805_v25 = vsub.f32 %v22216_v31, %v22309_v58  ;;  %v22517_v49 = vand.u32 4294901760, %v32795_v24 }
 0x801   :  { %v22643_v57 = vand.u32 4294901760, %v32800_v28  ;;  %v22637_v59 = vsub.f32 %v32798_v12, %v22636_v21 }
 0x802   :  { %26067 = vmatpush3.bf16.msra.mxu1 %v26066_v29  ;;  %34923 = vst [vmem:[#allocation68_spill] sm:$0xff] %v32780_v61  ;;  %v32788_v29 = vsub.f32 %v22230_v32, %v22351_v17  ;;  %v22629_v32 = vand.u32 4294901760, %v32790_v46  ;;  %v32810_v45 = vsub.f32 %v22217_v3, %v22312_v41  ;;  %26035 = vmatpush3.bf16.msra.mxu0 %v32780_v61  ;;  %v22524_v20 = vand.u32 4294901760, %v32805_v25 }
 0x803   :  { %v22518_v31 = vsub.f32 %v32795_v24, %v22517_v49  ;;  %v22644_v14 = vsub.f32 %v32800_v28, %v22643_v57  ;;  %v22638_v55 = vand.u32 4294901760, %v22637_v59  ;;  %26037 = vmatprep.subr.bf16.mxu0 %v32823_v62 }
 0x804   :  { %v22622_v19 = vand.u32 4294901760, %v32788_v29  ;;  %v22630_v42 = vsub.f32 %v32790_v46, %v22629_v32  ;;  %v22531_v37 = vand.u32 4294901760, %v32810_v45  ;;  %v22525_v2 = vsub.f32 %v32805_v25, %v22524_v20 }
 0x805   :  { %v22519_v9 = vand.u32 4294901760, %v22518_v31  ;;  %v22645_v35 = vand.u32 4294901760, %v22644_v14  ;;  %v32831_v14 = vpack.c.bf16 %v22312_v41, %v22309_v58  ;;  %v34931_v41 = vld [vmem:[#allocation30_spill] sm:$0xff] }
 0x806   :  { %v22623_v23 = vsub.f32 %v32788_v29, %v22622_v19  ;;  %v22631_v39 = vand.u32 4294901760, %v22630_v42  ;;  %v22532_v61 = vsub.f32 %v32810_v45, %v22531_v37  ;;  %v22526_v26 = vand.u32 4294901760, %v22525_v2  ;;  %26039 = vmatpush3.bf16.msra.mxu0 %v32825_v60 }
 0x807   :  { %v26070_v38 = vpack.c.bf16 %v22519_v9, %v22512_v33  ;;  %v26072_v8 = vpack.c.bf16 %v22645_v35, %v22638_v55  ;;  %26041 = vmatprep.subr.bf16.mxu0 %v32827_v50  ;;  %v32848_v33 = vpack.c.bf16 %v22517_v49, %v22510_v27  ;;  %v32850_v2 = vpack.c.bf16 %v22643_v57, %v22636_v21  ;;  %v34928_v55 = vld [vmem:[#allocation74_spill] sm:$0xff]  ;;  %v32861_v27 = vpop.permute.xlu0 %22157 }
 0x808   :  { %v22624_v3 = vand.u32 4294901760, %v22623_v23  ;;  %v22533_v43 = vand.u32 4294901760, %v22532_v61  ;;  %v32852_v59 = vpack.c.bf16 %v22531_v37, %v22524_v20  ;;  %34932 = vst [vmem:[#allocation85_spill] sm:$0xff] %v32861_v27  ;;  %v34933_v20 = vld [vmem:[#allocation38_spill] sm:$0xff] }
 0x809   :  { %34925 = vst [vmem:[#allocation59_spill] sm:$0xff] %v32848_v33  ;;  %34926 = vst [vmem:[#allocation69_spill] sm:$0xff] %v32850_v2  ;;  %v34957_v2 = vld [vmem:[#allocation19_spill] sm:$0xff]  ;;  %v33002_v33 = vld [vmem:[%s34092_s7 + $0x130] sm:$0xff] }
 0x80a   :  { %v26068_v18 = vpack.c.bf16 %v22631_v39, %v22624_v3  ;;  %v26074_v5 = vpack.c.bf16 %v22533_v43, %v22526_v26  ;;  %v26076_v39 = vpack.c.bf16 %v32422_v52, %v32420_v53  ;;  %26043 = vmatpush3.bf16.msra.mxu0 %v32831_v14  ;;  %34927 = vst [vmem:[#allocation72_spill] sm:$0xff] %v32852_v59  ;;  %v32913_v26 = vld [vmem:[%s34092_s7 + $0x1a8] sm:$0xff]  ;;  %v34953_v59 = vld [vmem:[#allocation52_spill] sm:$0xff]  ;;  %34966 = vst [vmem:[#allocation5_spill] sm:$0xff] %v33002_v33 }
 0x80b   :  { %34942 = vst [vmem:[#allocation11_spill] sm:$0xff] %v32913_v26 }
 0x80c   :  { %26069 = vmatprep.subr.bf16.mxu1 %v26068_v18  ;;  %26077 = vmatprep.subr.bf16.mxu0 %v26076_v39  ;;  %v32846_v18 = vpack.c.bf16 %v22629_v32, %v22622_v19 }
 0x80d   :  { %26071 = vmatpush3.bf16.msra.mxu1 %v26070_v38  ;;  %v34943_v38 = vld [vmem:[#allocation45_spill] sm:$0xff] }
 0x80e   :  { %26073 = vmatprep.subr.bf16.mxu1 %v26072_v8  ;;  %34924 = vst [vmem:[#allocation48_spill] sm:$0xff] %v32846_v18  ;;  %v34971_v18 = vand.u32 4294901760, %v32913_v26 }
 0x811   :  { %26075 = vmatpush3.bf16.msra.mxu1 %v26074_v5 }
 0x812   :  { %26109 = vmatprep.subr.bf16.mxu1 %v32408_v0 }
 0x8a7   :  { %v21466_v35 = vpop.f32.mrb[4].mxu0 }
 0x8a8   :  { %v26444_v9 = vadd.f32 %v21466_v35, %v34928_v55  ;;  %v21468_v17 = vpop.f32.mrb[5].mxu0  ;;  %v32924_v35 = vpop.permute.xlu0 %22167 }
 0x8a9   :  { %v26445_v56 = vadd.f32 %v21468_v17, %v34930_v1  ;;  %v34936_v17 = vld [vmem:[#allocation81_spill] sm:$0xff]  ;;  %34945 = vst [vmem:[#allocation8_spill] sm:$0xff] %v32924_v35 }
 0x8aa   :  { %v22170_v47 = vadd.f32 %v26444_v9, %v32855_v63 }
 0x8ab   :  { %v22171_v6 = vadd.f32 %v26445_v56, %v32855_v63  ;;  %v21473_v61 = vpop.f32.mrb[6].mxu0  ;;  %v33017_v63 = vsub.f32 %v32913_v26, %v34971_v18 }
 0x8ac   :  { %v22186_v58 = vmax.f32 %v22170_v47, 0.0  ;;  %v26446_v19 = vadd.f32 %v21473_v61, %v34931_v41  ;;  %v21475_v32 = vpop.f32.mrb[7].mxu0  ;;  %v32889_v61 = vpop.permute.xlu1 %22162  ;;  %v34944_v47 = vld [vmem:[#allocation28_spill] sm:$0xff] }
 0x8ad   :  { %v22187_v37 = vmax.f32 %v22171_v6, 0.0  ;;  %v26447_v49 = vadd.f32 %v21475_v32, %v34933_v20  ;;  %v32887_v6 = vld [vmem:[%s34092_s7 + $0x1a0] sm:$0xff]  ;;  %34938 = vst [vmem:[#allocation83_spill] sm:$0xff] %v32889_v61  ;;  %34972 = vst [vmem:[#allocation44_spill] sm:$0xff] %v33017_v63 }
 0x8ae   :  { %v32864_v21 = vand.u32 4294901760, %v22186_v58  ;;  %v22174_v57 = vadd.f32 %v26446_v19, %v32861_v27  ;;  %34937 = vst [vmem:[#allocation80_spill] sm:$0xff] %v32887_v6 }
 0x8af   :  { %v32871_v31 = vand.u32 4294901760, %v22187_v37  ;;  %v22175_v3 = vadd.f32 %v26447_v49, %v32861_v27  ;;  %v21480_v5 = vpop.f32.mrb[8].mxu0 }
 0x8b0   :  { %34934 = vst [vmem:[#allocation82_spill] sm:$0xff] %v32864_v21  ;;  %v32879_v55 = vsub.f32 %v22186_v58, %v32864_v21  ;;  %v22190_v9 = vmax.f32 %v22174_v57, 0.0  ;;  %v26448_v1 = vadd.f32 %v21480_v5, %v34936_v17  ;;  %v21482_v56 = vpop.f32.mrb[9].mxu0  ;;  %v34939_v58 = vld [vmem:[#allocation22_spill] sm:$0xff] }
 0x8b1   :  { %34935 = vst [vmem:[#allocation92_spill] sm:$0xff] %v32871_v31  ;;  %v32892_v41 = vsub.f32 %v22187_v37, %v32871_v31  ;;  %v22191_v19 = vmax.f32 %v22175_v3, 0.0  ;;  %v26449_v32 = vadd.f32 %v21482_v56, %v34939_v58  ;;  %22648 = vmatprep.mubr.f32.mxu1 %v32871_v31 }
 0x8b2   :  { %v34324_v49 = vand.u32 4294901760, %v32879_v55  ;;  %v32899_v57 = vand.u32 4294901760, %v22190_v9  ;;  %v22178_v5 = vadd.f32 %v26448_v1, %v32889_v61  ;;  %22650 = vmatmul.mubr.f32.vlgmr.msra.gmra.mrb[20].mxu1 %v32864_v21  ;;  %v34946_v1 = vld [vmem:[#allocation46_spill] sm:$0xff] }
 0x8b3   :  { %v32905_v17 = vand.u32 4294901760, %v22191_v19  ;;  %v22179_v3 = vadd.f32 %v26449_v32, %v32889_v61  ;;  %26111 = vmatpush3.bf16.msra.mxu1 %v32462_v40  ;;  %v21487_v56 = vpop.f32.mrb[10].mxu0  ;;  %v34325_v58 = vand.u32 4294901760, %v32892_v41 }
 0x8b4   :  { %34940 = vst [vmem:[#allocation93_spill] sm:$0xff] %v32899_v57  ;;  %v22371_v8 = vsub.f32 %v32879_v55, %v34324_v49  ;;  %v32920_v43 = vsub.f32 %v22190_v9, %v32899_v57  ;;  %v22194_v32 = vmax.f32 %v22178_v5, 0.0  ;;  %v26450_v37 = vadd.f32 %v21487_v56, %v34943_v38  ;;  %v21489_v20 = vpop.f32.mrb[11].mxu0  ;;  %26113 = vmatprep.subr.bf16.mxu1 %v34944_v47  ;;  %v34950_v49 = vld [vmem:[#allocation51_spill] sm:$0xff] }
 0x8b5   :  { %34941 = vst [vmem:[#allocation94_spill] sm:$0xff] %v32905_v17  ;;  %v32927_v39 = vsub.f32 %v22191_v19, %v32905_v17  ;;  %v22195_v42 = vmax.f32 %v22179_v3, 0.0  ;;  %v26451_v23 = vadd.f32 %v21489_v20, %v34946_v1  ;;  %22655 = vmatprep.mubr.f32.mxu1 %v32905_v17  ;;  %v22365_v9 = vsub.f32 %v32892_v41, %v34325_v58  ;;  %v32943_v20 = vld [vmem:[%s34092_s7 + $0x120] sm:$0xff]  ;;  %v32953_v56 = vld [vmem:[%s34092_s7 + $0x128] sm:$0xff] }
 0x8b6   :  { %v32934_v5 = vand.u32 4294901760, %v22194_v32  ;;  %v22182_v38 = vadd.f32 %v26450_v37, %v32924_v35  ;;  %22657 = vmatmul.mubr.f32.gmra.mrb[22].mxu1 %v32899_v57  ;;  %34948 = vst [vmem:[#allocation9_spill] sm:$0xff] %v32943_v20  ;;  %34951 = vst [vmem:[#allocation12_spill] sm:$0xff] %v32953_v56  ;;  %v22372_v19 = vand.u32 4294901760, %v22371_v8  ;;  %v34954_v57 = vand.u32 4294901760, %v32920_v43 }
 0x8b7   :  { %v32945_v3 = vand.u32 4294901760, %v22195_v42  ;;  %v22183_v1 = vadd.f32 %v26451_v23, %v32924_v35  ;;  %26115 = vmatpush3.bf16.msra.mxu1 %v34950_v49  ;;  %v22366_v58 = vand.u32 4294901760, %v22365_v9  ;;  %v34955_v35 = vand.u32 4294901760, %v32927_v39 }
 0x8b8   :  { %34947 = vst [vmem:[#allocation95_spill] sm:$0xff] %v32934_v5  ;;  %v32956_v61 = vsub.f32 %v22194_v32, %v32934_v5  ;;  %v22198_v27 = vmax.f32 %v22182_v38, 0.0  ;;  %26117 = vmatprep.subr.bf16.mxu1 %v34953_v59  ;;  %v22386_v23 = vsub.f32 %v32920_v43, %v34954_v57  ;;  %v34961_v32 = vpack.c.bf16 %v32470_v30, %v32454_v4  ;;  %v34969_v57 = vld [vmem:[#allocation40_spill] sm:$0xff] }
 0x8b9   :  { %34949 = vst [vmem:[#allocation7_spill] sm:$0xff] %v32945_v3  ;;  %v32963_v9 = vsub.f32 %v22195_v42, %v32945_v3  ;;  %v22199_v37 = vmax.f32 %v22183_v1, 0.0  ;;  %22367 = vmatprep.mubr.f32.mxu0 %v22366_v58  ;;  %22662 = vmatprep.mubr.f32.mxu1 %v32945_v3  ;;  %v22380_v8 = vsub.f32 %v32927_v39, %v34955_v35  ;;  %v34958_v42 = vld [vmem:[#allocation15_spill] sm:$0xff]  ;;  %v32980_v1 = vld [vmem:[%s34092_s7 + $0x1b0] sm:$0xff]  ;;  %v34963_v17 = vand.u32 4294901760, %v32887_v6  ;;  %v32997_v3 = vld [vmem:[%s34092_s7 + $0x1b8] sm:$0xff] }
 0x8ba   :  { %34952 = vst [vmem:[#allocation10_spill] sm:$0xff] %v32956_v61  ;;  %v32970_v38 = vand.u32 4294901760, %v22198_v27  ;;  %22373 = vmatmul.mubr.f32.vlgmr.msra.gmra.mrb[12].mxu0 %v22372_v19  ;;  %22664 = vmatmul.mubr.f32.gmra.mrb[24].mxu1 %v32934_v5  ;;  %34959 = vst [vmem:[#allocation13_spill] sm:$0xff] %v32980_v1  ;;  %v34962_v19 = vld [vmem:[#allocation41_spill] sm:$0xff]  ;;  %v34976_v26 = vand.u32 4294901760, %v32943_v20 }
 0x8bb   :  { %v32982_v35 = vand.u32 4294901760, %v22199_v37  ;;  %26079 = vmatpush3.bf16.msra.mxu0 %v34961_v32  ;;  %26119 = vmatpush3.bf16.msra.mxu1 %v34962_v19  ;;  %v22381_v5 = vand.u32 4294901760, %v22380_v8  ;;  %v32992_v58 = vsub.f32 %v32887_v6, %v34963_v17  ;;  %34965 = vst [vmem:[#allocation18_spill] sm:$0xff] %v32997_v3  ;;  %v34968_v8 = vpack.c.bf16 %v32479_v11, %v32477_v7  ;;  %v33045_v19 = vld [vmem:[%s34092_s7 + $0x1c8] sm:$0xff] }
 0x8bc   :  { %34956 = vst [vmem:[#allocation14_spill] sm:$0xff] %v32970_v38  ;;  %v33005_v32 = vsub.f32 %v22198_v27, %v32970_v38  ;;  %26121 = vmatprep.subr.bf16.mxu1 %v34969_v57  ;;  %v22387_v17 = vand.u32 4294901760, %v22386_v23  ;;  %v34970_v6 = vand.u32 4294901760, %v32956_v61  ;;  %v33022_v27 = vld [vmem:[%s34092_s7 + $0x138] sm:$0xff]  ;;  %v33039_v31 = vsub.f32 %v32943_v20, %v34976_v26  ;;  %34978 = vst [vmem:[#allocation34_spill] sm:$0xff] %v33045_v19  ;;  %v33059_v57 = vld [vmem:[%s34092_s7 + $0x140] sm:$0xff] }
 0x8bd   :  { %34960 = vst [vmem:[#allocation2_spill] sm:$0xff] %v32982_v35  ;;  %34964 = vst [vmem:[#allocation50_spill] sm:$0xff] %v32992_v58  ;;  %26081 = vmatprep.subr.bf16.mxu0 %v34968_v8  ;;  %v33027_v8 = vld [vmem:[%s34092_s7 + $0x1c0] sm:$0xff]  ;;  %v33030_v23 = vsub.f32 %v22199_v37, %v32982_v35  ;;  %22382 = vmatprep.mubr.f32.mxu0 %v22381_v5  ;;  %v34979_v37 = vand.u32 4294901760, %v32953_v56  ;;  %v33071_v20 = vld [vmem:[%s34092_s7 + $0x148] sm:$0xff]  ;;  %v35000_v26 = vand.u32 4294901760, %v33002_v33 }
 0x8be   :  { %34967 = vst [vmem:[#allocation16_spill] sm:$0xff] %v33005_v32  ;;  %v22401_v21 = vsub.f32 %v32956_v61, %v34970_v6  ;;  %34973 = vst [vmem:[#allocation25_spill] sm:$0xff] %v33022_v27  ;;  %22669 = vmatprep.mubr.f32.mxu1 %v32982_v35  ;;  %v34975_v6 = vand.u32 4294901760, %v32963_v9  ;;  %22388 = vmatmul.mubr.f32.gmra.mrb[14].mxu0 %v22387_v17  ;;  %v34982_v17 = vpack.c.bf16 %v32513_v16, %v32483_v15  ;;  %v34990_v15 = vld [vmem:[#allocation84_spill] sm:$0xff] }
 0x8bf   :  { %34974 = vst [vmem:[#allocation3_spill] sm:$0xff] %v33027_v8  ;;  %34977 = vst [vmem:[#allocation20_spill] sm:$0xff] %v33039_v31  ;;  %22671 = vmatmul.mubr.f32.gmra.mrb[26].mxu1 %v32970_v38  ;;  %v34983_v38 = vld [vmem:[#allocation39_spill] sm:$0xff]  ;;  %v34988_v35 = vand.u32 4294901760, %v33005_v32 }
 0x8c0   :  { %v22395_v18 = vsub.f32 %v32963_v9, %v34975_v6  ;;  %v33052_v6 = vsub.f32 %v32953_v56, %v34979_v37  ;;  %34981 = vst [vmem:[#allocation64_spill] sm:$0xff] %v33059_v57  ;;  %26083 = vmatpush3.bf16.msra.mxu0 %v34982_v17  ;;  %26123 = vmatpush3.bf16.msra.mxu1 %v34983_v38  ;;  %34984 = vst [vmem:[#allocation6_spill] sm:$0xff] %v33071_v20  ;;  %v34985_v56 = vand.u32 4294901760, %v32892_v41  ;;  %v33075_v61 = vpop.f32.mrb[12].mxu1 }
 0x8c1   :  { %34986 = vst [vmem:[#allocation26_spill] sm:$0xff] %v33075_v61  ;;  %v34987_v17 = vpack.c.bf16 %v32532_v10, %v32530_v36  ;;  %v22416_v37 = vsub.f32 %v33005_v32, %v34988_v35  ;;  %v33085_v16 = vpop.f32.mrb[13].mxu1  ;;  %26125 = vmatprep.subr.bf16.mxu1 %v34990_v15  ;;  %v33097_v35 = vld [vmem:[%s34092_s7 + $0x1d0] sm:$0xff]  ;;  %v33123_v32 = vsub.f32 %v33002_v33, %v35000_v26 }
 0x8c2   :  { %34980 = vst [vmem:[#allocation4_spill] sm:$0xff] %v33052_v6  ;;  %v22396_v5 = vand.u32 4294901760, %v22395_v18  ;;  %22940 = vmatprep.mubr.f32.mxu1 %v34985_v56  ;;  %v22402_v18 = vand.u32 4294901760, %v22401_v21  ;;  %34989 = vst [vmem:[#allocation75_spill] sm:$0xff] %v33085_v16  ;;  %v34991_v56 = vand.u32 4294901760, %v33030_v23  ;;  %v34996_v21 = vand.u32 4294901760, %v32997_v3 }
 0x8c3   :  { %26085 = vmatprep.subr.bf16.mxu0 %v34987_v17  ;;  %34992 = vst [vmem:[#allocation79_spill] sm:$0xff] %v33097_v35  ;;  %v34998_v16 = vpack.c.bf16 %v32560_v51, %v32558_v13  ;;  %v34999_v15 = vld [vmem:[#allocation88_spill] sm:$0xff]  ;;  %v35014_v13 = vld [vmem:[#allocation65_spill] sm:$0xff] }
 0x8c4   :  { %22397 = vmatprep.mubr.f32.mxu0 %v22396_v5  ;;  %v22410_v61 = vsub.f32 %v33030_v23, %v34991_v56  ;;  %v33102_v5 = vld [vmem:[%s34092_s7 + $0x1d8] sm:$0xff]  ;;  %v34994_v56 = vand.u32 4294901760, %v32980_v1  ;;  %v33113_v10 = vsub.f32 %v32997_v3, %v34996_v21  ;;  %26127 = vmatpush3.bf16.msra.mxu1 %v34999_v15  ;;  %v35003_v21 = vand.u32 4294901760, %v33027_v8  ;;  %v33145_v26 = vpop.f32.mrb[14].mxu1 }
 0x8c5   :  { %34993 = vst [vmem:[#allocation56_spill] sm:$0xff] %v33102_v5  ;;  %22403 = vmatmul.mubr.f32.gmra.mrb[16].mxu0 %v22402_v18  ;;  %35007 = vst [vmem:[#allocation36_spill] sm:$0xff] %v33145_v26  ;;  %v33158_v51 = vpop.f32.mrb[15].mxu1  ;;  %v35013_v26 = vld [vmem:[#allocation63_spill] sm:$0xff]  ;;  %v35019_v3 = vand.u32 4294901760, %v33017_v63 }
 0x8c6   :  { %v33108_v17 = vsub.f32 %v32980_v1, %v34994_v56  ;;  %34997 = vst [vmem:[#allocation90_spill] sm:$0xff] %v33113_v10  ;;  %26087 = vmatpush3.bf16.msra.mxu0 %v34998_v16  ;;  %v22411_v18 = vand.u32 4294901760, %v22410_v61  ;;  %v35001_v56 = vand.u32 4294901760, %v33022_v27  ;;  %v33133_v38 = vsub.f32 %v33027_v8, %v35003_v21  ;;  %v33138_v16 = vld [vmem:[%s34092_s7 + $0x150] sm:$0xff]  ;;  %v33143_v61 = vld [vmem:[%s34092_s7 + $0x158] sm:$0xff]  ;;  %35012 = vst [vmem:[#allocation37_spill] sm:$0xff] %v33158_v51 }
 0x8c7   :  { %35005 = vst [vmem:[#allocation60_spill] sm:$0xff] %v33138_v16  ;;  %35006 = vst [vmem:[#allocation96_spill] sm:$0xff] %v33143_v61  ;;  %v22417_v21 = vand.u32 4294901760, %v22416_v37  ;;  %v35010_v8 = vand.u32 4294901760, %v33045_v19  ;;  %v26094_v36 = vpack.c.bf16 %v35014_v13, %v35013_v26  ;;  %v35017_v37 = vand.u32 4294901760, %v33059_v57 }
 0x8c8   :  { %34995 = vst [vmem:[#allocation61_spill] sm:$0xff] %v33108_v17  ;;  %v33128_v1 = vsub.f32 %v33022_v27, %v35001_v56  ;;  %35004 = vst [vmem:[#allocation89_spill] sm:$0xff] %v33133_v38  ;;  %v35008_v56 = vpack.c.bf16 %v32576_v54, %v32574_v48  ;;  %v35009_v27 = vld [vmem:[#allocation70_spill] sm:$0xff]  ;;  %22412 = vmatprep.mubr.f32.mxu0 %v22411_v18  ;;  %v35015_v54 = vld [vmem:[#allocation67_spill] sm:$0xff]  ;;  %v35021_v18 = vand.u32 4294901760, %v33071_v20 }
 0x8c9   :  { %26129 = vmatprep.subr.bf16.mxu1 %v35009_v27  ;;  %v33154_v33 = vsub.f32 %v33045_v19, %v35010_v8  ;;  %v33167_v27 = vsub.f32 %v33059_v57, %v35017_v37  ;;  %v35018_v8 = vand.u32 4294901760, %v32992_v58  ;;  %22418 = vmatmul.mubr.f32.gmra.mrb[18].mxu0 %v22417_v21  ;;  %v33185_v37 = vld [vmem:[%s34092_s7 + $0x1e0] sm:$0xff]  ;;  %v35024_v21 = vand.u32 4294901760, %v33039_v31  ;;  %v33207_v31 = vpop.f32.mrb[16].mxu1 }
 0x8ca   :  { %35002 = vst [vmem:[#allocation29_spill] sm:$0xff] %v33128_v1  ;;  %26089 = vmatprep.subr.bf16.mxu0 %v35008_v56  ;;  %v35016_v56 = vld [vmem:[#allocation76_spill] sm:$0xff]  ;;  %v33178_v15 = vsub.f32 %v33071_v20, %v35021_v18  ;;  %v35027_v51 = vpack.c.bf16 %v32619_v34, %v32617_v22  ;;  %22806 = vmatprep.mubr.f32.mxu0 %v32892_v41  ;;  %35029 = vst [vmem:[#allocation31_spill] sm:$0xff] %v33207_v31  ;;  %v35032_v57 = vand.u32 4294901760, %v33102_v5  ;;  %v33227_v41 = vld [vmem:[%s34092_s7 + $0x160] sm:$0xff] }
 0x8cb   :  { %35011 = vst [vmem:[#allocation99_spill] sm:$0xff] %v33154_v33  ;;  %v26096_v48 = vpack.c.bf16 %v35016_v56, %v35015_v54  ;;  %v33173_v19 = vpack.c.bf16 %v35019_v3, %v35018_v8  ;;  %v33190_v3 = vld [vmem:[%s34092_s7 + $0x1e8] sm:$0xff]  ;;  %v35025_v8 = vand.u32 4294901760, %v33052_v6  ;;  %v35028_v56 = vld [vmem:[#allocation68_spill] sm:$0xff]  ;;  %35033 = vst [vmem:[#allocation27_spill] sm:$0xff] %v33227_v41  ;;  %v35036_v31 = vand.u32 4294901760, %v33113_v10 }
 0x8cc   :  { %35022 = vst [vmem:[#allocation100_spill] sm:$0xff] %v33178_v15  ;;  %35023 = vst [vmem:[#allocation23_spill] sm:$0xff] %v33190_v3  ;;  %26091 = vmatpush3.bf16.msra.mxu0 %v35027_v51  ;;  %26131 = vmatpush3.bf16.msra.mxu1 %v35028_v56  ;;  %v33222_v63 = vsub.f32 %v33102_v5, %v35032_v57  ;;  %v33238_v57 = vld [vmem:[%s34092_s7 + $0x168] sm:$0xff]  ;;  %v35045_v10 = vand.u32 4294901760, %v33133_v38  ;;  %v35046_v6 = vand.u32 4294901760, %v33154_v33 }
 0x8cd   :  { %35020 = vst [vmem:[#allocation66_spill] sm:$0xff] %v33173_v19  ;;  %v33196_v18 = vpack.c.bf16 %v35025_v8, %v35024_v21  ;;  %v35030_v21 = vpack.c.bf16 %v34958_v42, %v34957_v2  ;;  %v35031_v19 = vand.u32 4294901760, %v33097_v35  ;;  %26133 = vmatprep.subr.bf16.mxu1 %v32823_v62 }
 0x8ce   :  { %v33281_v58 = vpack.c.bf16 %v35046_v6, %v35045_v10  ;;  %v35052_v10 = vand.u32 4294901760, %v33185_v37  ;;  %v35054_v6 = vand.u32 4294901760, %v33190_v3 }
 0x8cf   :  { %35026 = vst [vmem:[#allocation73_spill] sm:$0xff] %v33196_v18  ;;  %26093 = vmatprep.subr.bf16.mxu0 %v35030_v21  ;;  %v33217_v20 = vsub.f32 %v33097_v35, %v35031_v19  ;;  %v33229_v21 = vpop.f32.mrb[17].mxu1  ;;  %v35035_v18 = vand.u32 4294901760, %v33108_v17  ;;  %v35039_v19 = vand.u32 4294901760, %v33143_v61  ;;  %v33260_v17 = vld [vmem:[%s34092_s7 + $0x1f0] sm:$0xff] }
 0x8d0   :  { %35034 = vst [vmem:[#allocation33_spill] sm:$0xff] %v33229_v21  ;;  %v35038_v21 = vand.u32 4294901760, %v33138_v16  ;;  %26095 = vmatpush3.bf16.msra.mxu0 %v26094_v36  ;;  %26135 = vmatpush3.bf16.msra.mxu1 %v32825_v60  ;;  %35047 = vst [vmem:[#allocation78_spill] sm:$0xff] %v33281_v58  ;;  %v33283_v54 = vpop.f32.mrb[18].mxu1  ;;  %v33305_v36 = vsub.f32 %v33190_v3, %v35054_v6  ;;  %v35057_v6 = vand.u32 4294901760, %v33227_v41  ;;  %v35059_v58 = vand.u32 4294901760, %v33222_v63 }
 0x8d1   :  { %v33244_v5 = vpack.c.bf16 %v35036_v31, %v35035_v18  ;;  %v33255_v51 = vsub.f32 %v33143_v61, %v35039_v19  ;;  %v33265_v31 = vld [vmem:[%s34092_s7 + $0x1f8] sm:$0xff]  ;;  %v35040_v18 = vand.u32 4294901760, %v33123_v32  ;;  %v35043_v19 = vld [vmem:[#allocation42_spill] sm:$0xff]  ;;  %35048 = vst [vmem:[#allocation62_spill] sm:$0xff] %v33283_v54  ;;  %26097 = vmatprep.subr.bf16.mxu0 %v26096_v48  ;;  %26137 = vmatprep.subr.bf16.mxu1 %v32827_v50  ;;  %v33295_v33 = vpop.f32.mrb[19].mxu1 }
 0x8d2   :  { %v33250_v8 = vsub.f32 %v33138_v16, %v35038_v21  ;;  %v35041_v21 = vand.u32 4294901760, %v33128_v1  ;;  %v35050_v16 = vand.u32 4294901760, %v33178_v15  ;;  %v33300_v48 = vsub.f32 %v33185_v37, %v35052_v10  ;;  %35055 = vst [vmem:[#allocation101_spill] sm:$0xff] %v33305_v36 }
 0x8d3   :  { %35037 = vst [vmem:[#allocation97_spill] sm:$0xff] %v33244_v5  ;;  %v35044_v5 = vld [vmem:[#allocation87_spill] sm:$0xff]  ;;  %v35061_v3 = vpack.c.bf16 %v32790_v46, %v32788_v29  ;;  %v35069_v10 = vand.u32 4294901760, %v32879_v55  ;;  %v35072_v46 = vand.u32 4294901760, %v32420_v53 }
 0x8d4   :  { %v33271_v35 = vpack.c.bf16 %v35041_v21, %v35040_v18  ;;  %v26098_v61 = vpack.c.bf16 %v35044_v5, %v35043_v19  ;;  %35053 = vst [vmem:[#allocation103_spill] sm:$0xff] %v33300_v48  ;;  %26139 = vmatpush3.bf16.msra.mxu1 %v32831_v14  ;;  %v33325_v18 = vsub.f32 %v33227_v41, %v35057_v6  ;;  %v35058_v21 = vand.u32 4294901760, %v33217_v20 }
 0x8d5   :  { %26173 = vmatprep.subr.bf16.mxu1 %v32408_v0  ;;  %v35063_v41 = vand.u32 4294901760, %v33250_v8  ;;  %v35066_v0 = vand.u32 4294901760, %v33260_v17 }
 0x8d6   :  { %35042 = vst [vmem:[#allocation107_spill] sm:$0xff] %v33271_v35  ;;  %v35049_v35 = vand.u32 4294901760, %v33167_v27  ;;  %26099 = vmatpush3.bf16.msra.mxu0 %v26098_v61  ;;  %v33331_v54 = vpack.c.bf16 %v35059_v58, %v35058_v21  ;;  %v35062_v61 = vand.u32 4294901760, %v33238_v57  ;;  %v35064_v58 = vand.u32 4294901760, %v33255_v51 }
 0x8d7   :  { %26101 = vmatprep.subr.bf16.mxu0 %v35061_v3  ;;  %v33355_v3 = vsub.f32 %v33260_v17, %v35066_v0  ;;  %22944 = vmatmul.mubr.f32.vlgmr.msra.gmra.mrb[28].mxu1 %v35069_v10  ;;  %v35073_v0 = vand.u32 4294901760, %v32422_v52 }
 0x8d8   :  { %v33293_v38 = vpack.c.bf16 %v35050_v16, %v35049_v35  ;;  %v33312_v35 = vld [vmem:[%s34092_s7 + $0x170] sm:$0xff]  ;;  %v33317_v16 = vld [vmem:[%s34092_s7 + $0x178] sm:$0xff]  ;;  %35060 = vst [vmem:[#allocation24_spill] sm:$0xff] %v33331_v54  ;;  %v33348_v21 = vpack.c.bf16 %v35064_v58, %v35063_v41  ;;  %v35070_v41 = vpack.c.bf16 %v32795_v24, %v32793_v44  ;;  %v35071_v58 = vand.u32 4294901760, %v32927_v39  ;;  %26175 = vmatpush3.bf16.msra.mxu1 %v32462_v40 }
 0x8d9   :  { %35056 = vst [vmem:[#allocation71_spill] sm:$0xff] %v33317_v16  ;;  %v26140_v29 = vpack.c.bf16 %v35073_v0, %v35072_v46  ;;  %v35077_v44 = vpack.c.bf16 %v32800_v28, %v32798_v12  ;;  %v34401_v24 = vand.u32 4294901760, %v33325_v18  ;;  %v35078_v53 = vand.u32 4294901760, %v33312_v35  ;;  %26177 = vmatprep.subr.bf16.mxu1 %v34944_v47 }
 0x8da   :  { %35051 = vst [vmem:[#allocation104_spill] sm:$0xff] %v33293_v38  ;;  %v33340_v38 = vsub.f32 %v33238_v57, %v35062_v61  ;;  %35065 = vst [vmem:[#allocation53_spill] sm:$0xff] %v33348_v21  ;;  %v35067_v61 = vand.u32 4294901760, %v33265_v31  ;;  %26103 = vmatpush3.bf16.msra.mxu0 %v35070_v41  ;;  %22951 = vmatprep.mubr.f32.mxu1 %v35071_v58  ;;  %v35074_v21 = vand.u32 4294901760, %v33300_v48  ;;  %v35079_v46 = vand.u32 4294901760, %v33317_v16  ;;  %v33403_v41 = vld [vmem:[%s34092_s7 + $0x180] sm:$0xff] }
 0x8db   :  { %26105 = vmatprep.subr.bf16.mxu0 %v35077_v44  ;;  %v33388_v52 = vsub.f32 %v33312_v35, %v35078_v53  ;;  %v34397_v40 = vand.u32 4294901760, %v33355_v3  ;;  %v35080_v28 = vand.u32 4294901760, %v32920_v43  ;;  %v33408_v58 = vld [vmem:[%s34092_s7 + $0x188] sm:$0xff]  ;;  %v35082_v0 = vpack.c.bf16 %v32810_v45, %v32805_v25 }
 0x8dc   :  { %v33360_v6 = vsub.f32 %v33265_v31, %v35067_v61  ;;  %v35075_v61 = vand.u32 4294901760, %v33305_v36  ;;  %v34400_v10 = vand.u32 4294901760, %v33340_v38  ;;  %26179 = vmatpush3.bf16.msra.mxu1 %v34950_v49  ;;  %v35085_v53 = vand.u32 4294901760, %v32454_v4  ;;  %v33444_v4 = vld [vmem:[%s34092_s7 + $0x100] sm:$0xff]  ;;  %v35101_v49 = vld [vmem:[#allocation57_spill] sm:$0xff] }
 0x8dd   :  { %22955 = vmatmul.mubr.f32.gmra.mrb[30].mxu1 %v35080_v28  ;;  %v34399_v45 = vand.u32 4294901760, %v33388_v52  ;;  %26181 = vmatprep.subr.bf16.mxu1 %v34953_v59  ;;  %v35092_v59 = vand.u32 4294901760, %v33030_v23 }
 0x8de   :  { %35068 = vst [vmem:[#allocation54_spill] sm:$0xff] %v33360_v6  ;;  %v33377_v54 = vpack.c.bf16 %v35075_v61, %v35074_v21  ;;  %v33393_v21 = vsub.f32 %v33317_v16, %v35079_v46  ;;  %v34396_v12 = vand.u32 4294901760, %v33360_v6  ;;  %v33414_v47 = vpack.c.bf16 %v34400_v10, %v34401_v24  ;;  %26107 = vmatpush3.bf16.msra.mxu0 %v35082_v0  ;;  %v35099_v10 = vld [vmem:[#allocation17_spill] sm:$0xff] }
 0x8df   :  { %v35083_v61 = vand.u32 4294901760, %v32963_v9  ;;  %26141 = vmatprep.subr.bf16.mxu0 %v26140_v29  ;;  %v35086_v46 = vand.u32 4294901760, %v32470_v30  ;;  %v35087_v0 = vand.u32 4294901760, %v32477_v7  ;;  %v35089_v30 = vld [vmem:[#allocation10_spill] sm:$0xff]  ;;  %v33452_v7 = vld [vmem:[%s34092_s7 + $0x108] sm:$0xff]  ;;  %v35100_v24 = vand.u32 4294901760, %v35099_v10 }
 0x8e0   :  { %35076 = vst [vmem:[#allocation86_spill] sm:$0xff] %v33377_v54  ;;  %35081 = vst [vmem:[#allocation32_spill] sm:$0xff] %v33414_v47  ;;  %v33425_v44 = vpack.c.bf16 %v34396_v12, %v34397_v40  ;;  %v34398_v25 = vand.u32 4294901760, %v33393_v21  ;;  %v35090_v29 = vand.u32 4294901760, %v35089_v30  ;;  %v35102_v40 = vand.u32 4294901760, %v35101_v49  ;;  %v35105_v10 = vld [vmem:[#allocation16_spill] sm:$0xff] }
 0x8e1   :  { %22962 = vmatprep.mubr.f32.mxu1 %v35083_v61  ;;  %v26142_v28 = vpack.c.bf16 %v35086_v46, %v35085_v53  ;;  %v35088_v61 = vand.u32 4294901760, %v32479_v11  ;;  %22809 = vmatmul.mubr.f32.vlgmr.msra.gmra.mrb[20].mxu0 %v32879_v55  ;;  %v33466_v55 = vld [vmem:[%s34092_s7 + $0x190] sm:$0xff]  ;;  %v33471_v53 = vld [vmem:[%s34092_s7 + $0x198] sm:$0xff] }
 0x8e2   :  { %35084 = vst [vmem:[#allocation35_spill] sm:$0xff] %v33425_v44  ;;  %22966 = vmatmul.mubr.f32.gmra.mrb[32].mxu1 %v35090_v29  ;;  %v33458_v11 = vpack.c.bf16 %v34398_v25, %v34399_v45  ;;  %22815 = vmatprep.mubr.f32.mxu0 %v32927_v39  ;;  %v35093_v46 = vld [vmem:[#allocation41_spill] sm:$0xff]  ;;  %v35096_v29 = vld [vmem:[#allocation43_spill] sm:$0xff]  ;;  %v35098_v45 = vld [vmem:[#allocation40_spill] sm:$0xff]  ;;  %v35103_v44 = vand.u32 4294901760, %v33403_v41 }
 0x8e3   :  { %v26144_v12 = vpack.c.bf16 %v35088_v61, %v35087_v0  ;;  %22973 = vmatprep.mubr.f32.mxu1 %v35092_v59  ;;  %26143 = vmatpush3.bf16.msra.mxu0 %v26142_v28  ;;  %v35094_v0 = vld [vmem:[#allocation21_spill] sm:$0xff]  ;;  %v35097_v39 = vand.u32 4294901760, %v35096_v29  ;;  %v35107_v49 = vld [vmem:[#allocation92_spill] sm:$0xff]  ;;  %v35108_v29 = vld [vmem:[#allocation39_spill] sm:$0xff] }
 0x8e4   :  { %35091 = vst [vmem:[#allocation102_spill] sm:$0xff] %v33458_v11  ;;  %26183 = vmatpush3.bf16.msra.mxu1 %v35093_v46  ;;  %v35095_v61 = vand.u32 4294901760, %v35094_v0  ;;  %v26148_v11 = vpack.c.bf16 %v35102_v40, %v35100_v24  ;;  %v33487_v28 = vsub.f32 %v33403_v41, %v35103_v44  ;;  %v35104_v46 = vand.u32 4294901760, %v33408_v58  ;;  %v33503_v24 = vld [vmem:[%s34092_s7 + $0x118] sm:$0xff] }
 0x8e5   :  { %26145 = vmatprep.subr.bf16.mxu0 %v26144_v12  ;;  %26185 = vmatprep.subr.bf16.mxu1 %v35098_v45  ;;  %v33498_v12 = vld [vmem:[%s34092_s7 + $0x110] sm:$0xff]  ;;  %v35106_v40 = vand.u32 4294901760, %v35105_v10  ;;  %v34405_v45 = vand.u32 4294901760, %v33503_v24 }
 0x8e6   :  { %v26146_v25 = vpack.c.bf16 %v35097_v39, %v35095_v61  ;;  %v33492_v0 = vsub.f32 %v33408_v58, %v35104_v46  ;;  %22818 = vmatmul.mubr.f32.gmra.mrb[22].mxu0 %v32920_v43  ;;  %v35109_v39 = vld [vmem:[#allocation55_spill] sm:$0xff]  ;;  %v35111_v61 = vld [vmem:[#allocation49_spill] sm:$0xff]  ;;  %v35113_v43 = vand.u32 4294901760, %v33444_v4  ;;  %v34403_v44 = vand.u32 4294901760, %v33498_v12 }
 0x8e7   :  { %22977 = vmatmul.mubr.f32.gmra.mrb[34].mxu1 %v35106_v40  ;;  %22824 = vmatprep.mubr.f32.mxu0 %v32963_v9  ;;  %v35110_v46 = vand.u32 4294901760, %v35109_v39  ;;  %v35112_v59 = vand.u32 4294901760, %v35111_v61  ;;  %v35114_v9 = vld [vmem:[#allocation84_spill] sm:$0xff]  ;;  %v34404_v61 = vand.u32 4294901760, %v33487_v28 }
 0x8e8   :  { %23268 = vmatprep.mubr.f32.mxu1 %v35107_v49  ;;  %26147 = vmatpush3.bf16.msra.mxu0 %v26146_v25  ;;  %v33520_v40 = vsub.f32 %v33444_v4, %v35113_v43  ;;  %v35115_v25 = vld [vmem:[#allocation47_spill] sm:$0xff] }
 0x8e9   :  { %26187 = vmatpush3.bf16.msra.mxu1 %v35108_v29  ;;  %v26150_v47 = vpack.c.bf16 %v35112_v59, %v35110_v46  ;;  %26149 = vmatprep.subr.bf16.mxu0 %v26148_v11  ;;  %v35116_v54 = vand.u32 4294901760, %v35115_v25  ;;  %v35117_v29 = vld [vmem:[#allocation58_spill] sm:$0xff]  ;;  %v35119_v46 = vand.u32 4294901760, %v33452_v7  ;;  %v35120_v11 = vand.u32 4294901760, %v33466_v55 }
 0x8ea   :  { %26189 = vmatprep.subr.bf16.mxu1 %v35114_v9  ;;  %v35118_v16 = vand.u32 4294901760, %v35117_v29  ;;  %22827 = vmatmul.mubr.f32.gmra.mrb[24].mxu0 %v35089_v30  ;;  %v35121_v25 = vand.u32 4294901760, %v33471_v53  ;;  %v35124_v29 = vand.u32 4294901760, %v32617_v22  ;;  %v34409_v59 = vand.u32 4294901760, %v33520_v40 }
 0x8eb   :  { %v33534_v43 = vsub.f32 %v33452_v7, %v35119_v46  ;;  %v33540_v9 = vsub.f32 %v33466_v55, %v35120_v11  ;;  %22833 = vmatprep.mubr.f32.mxu0 %v33030_v23  ;;  %v35125_v46 = vand.u32 4294901760, %v32619_v34  ;;  %v33557_v11 = vsub.f32 %v33498_v12, %v34403_v44  ;;  %v35128_v23 = vld [vmem:[#allocation70_spill] sm:$0xff] }
 0x8ec   :  { %v26152_v39 = vpack.c.bf16 %v35118_v16, %v35116_v54  ;;  %v33545_v54 = vsub.f32 %v33471_v53, %v35121_v25  ;;  %26151 = vmatpush3.bf16.msra.mxu0 %v26150_v47  ;;  %v35123_v16 = vld [vmem:[#allocation88_spill] sm:$0xff]  ;;  %v33562_v25 = vsub.f32 %v33503_v24, %v34405_v45  ;;  %v35129_v22 = vand.u32 4294901760, %v34957_v2 }
 0x8ed   :  { %26191 = vmatpush3.bf16.msra.mxu1 %v35123_v16  ;;  %v26154_v30 = vpack.c.bf16 %v35125_v46, %v35124_v29  ;;  %35126 = vst [vmem:[#allocation105_spill] sm:$0xff] %v33557_v11  ;;  %v35130_v34 = vand.u32 4294901760, %v34958_v42  ;;  %v23569_v16 = vsub.f32 %v33487_v28, %v34404_v61  ;;  %v35131_v29 = vand.u32 4294901760, %v33492_v0  ;;  %v35136_v61 = vld [vmem:[#allocation76_spill] sm:$0xff] }
 0x8ee   :  { %35122 = vst [vmem:[#allocation98_spill] sm:$0xff] %v33545_v54  ;;  %35127 = vst [vmem:[#allocation106_spill] sm:$0xff] %v33562_v25  ;;  %26153 = vmatprep.subr.bf16.mxu0 %v26152_v39  ;;  %26193 = vmatprep.subr.bf16.mxu1 %v35128_v23  ;;  %v34408_v44 = vand.u32 4294901760, %v33534_v43  ;;  %v34406_v39 = vand.u32 4294901760, %v33540_v9  ;;  %v35132_v2 = vand.u32 4294901760, %v35013_v26  ;;  %v35133_v42 = vand.u32 4294901760, %v35014_v13 }
 0x8ef   :  { %v26156_v47 = vpack.c.bf16 %v35130_v34, %v35129_v22  ;;  %v23576_v46 = vsub.f32 %v33492_v0, %v35131_v29  ;;  %22836 = vmatmul.mubr.f32.gmra.mrb[26].mxu0 %v35105_v10  ;;  %v23457_v34 = vsub.f32 %v33520_v40, %v34409_v59  ;;  %v34407_v10 = vand.u32 4294901760, %v33557_v11 }
 0x8f0   :  { %23143 = vmatprep.mubr.f32.mxu0 %v35107_v49  ;;  %26155 = vmatpush3.bf16.msra.mxu0 %v26154_v30  ;;  %v26158_v22 = vpack.c.bf16 %v35133_v42, %v35132_v2  ;;  %v34410_v29 = vand.u32 4294901760, %v33562_v25  ;;  %v35134_v49 = vld [vmem:[#allocation67_spill] sm:$0xff]  ;;  %v23570_v26 = vand.u32 4294901760, %v23569_v16  ;;  %v23464_v13 = vsub.f32 %v33534_v43, %v34408_v44 }
 0x8f1   :  { %26195 = vmatpush3.bf16.msra.mxu1 %v35028_v56  ;;  %26157 = vmatprep.subr.bf16.mxu0 %v26156_v47  ;;  %v35135_v30 = vand.u32 4294901760, %v35134_v49  ;;  %v35137_v56 = vand.u32 4294901760, %v35136_v61  ;;  %v23577_v23 = vand.u32 4294901760, %v23576_v46  ;;  %v23583_v2 = vsub.f32 %v33540_v9, %v34406_v39  ;;  %v35146_v39 = vld [vmem:[#allocation91_spill] sm:$0xff] }
 0x8f2   :  { %26197 = vmatprep.subr.bf16.mxu1 %v32823_v62  ;;  %v35138_v42 = vand.u32 4294901760, %v33545_v54  ;;  %v35139_v62 = vand.u32 4294901760, %v35043_v19  ;;  %v35140_v61 = vand.u32 4294901760, %v35044_v5  ;;  %v23458_v46 = vand.u32 4294901760, %v23457_v34  ;;  %v35143_v5 = vld [vmem:[#allocation44_spill] sm:$0xff] }
 0x8f3   :  { %v26160_v45 = vpack.c.bf16 %v35137_v56, %v35135_v30  ;;  %v23471_v49 = vsub.f32 %v33557_v11, %v34407_v10  ;;  %v23478_v30 = vsub.f32 %v33562_v25, %v34410_v29  ;;  %v23465_v56 = vand.u32 4294901760, %v23464_v13  ;;  %v35149_v29 = vld [vmem:[#allocation4_spill] sm:$0xff] }
 0x8f4   :  { %v23590_v47 = vsub.f32 %v33545_v54, %v35138_v42  ;;  %26159 = vmatpush3.bf16.msra.mxu0 %v26158_v22  ;;  %v26162_v16 = vpack.c.bf16 %v35140_v61, %v35139_v62  ;;  %v26236_v22 = vpack.c.bf16 %v23577_v23, %v23570_v26  ;;  %v35144_v62 = vand.u32 4294901760, %v35143_v5  ;;  %v35145_v61 = vld [vmem:[#allocation75_spill] sm:$0xff]  ;;  %v35147_v23 = vld [vmem:[#allocation20_spill] sm:$0xff] }
 0x8f5   :  { %26199 = vmatpush3.bf16.msra.mxu1 %v32825_v60  ;;  %26161 = vmatprep.subr.bf16.mxu0 %v26160_v45  ;;  %v35141_v60 = vld [vmem:[#allocation50_spill] sm:$0xff]  ;;  %v22173_v10 = vadd.f32 %v35146_v39, %v35145_v61  ;;  %v23584_v44 = vand.u32 4294901760, %v23583_v2  ;;  %v23472_v45 = vand.u32 4294901760, %v23471_v49  ;;  %v35148_v26 = vand.u32 4294901760, %v35147_v23  ;;  %v35151_v25 = vld [vmem:[#allocation48_spill] sm:$0xff]  ;;  %v35157_v54 = vld [vmem:[#allocation59_spill] sm:$0xff] }
 0x8f6   :  { %26201 = vmatprep.subr.bf16.mxu1 %v32827_v50  ;;  %v35142_v42 = vand.u32 4294901760, %v35141_v60  ;;  %v23604_v34 = vsub.f32 %v35143_v5, %v35144_v62  ;;  %v23591_v59 = vand.u32 4294901760, %v23590_v47  ;;  %v23479_v50 = vand.u32 4294901760, %v23478_v30  ;;  %v35152_v47 = vld [vmem:[#allocation61_spill] sm:$0xff]  ;;  %v35154_v5 = vld [vmem:[#allocation90_spill] sm:$0xff] }
 0x8f7   :  { %v23485_v13 = vsub.f32 %v35147_v23, %v35148_v26  ;;  %v26238_v62 = vpack.c.bf16 %v23465_v56, %v23458_v46  ;;  %v22189_v49 = vmax.f32 %v22173_v10, 0.0  ;;  %v35155_v11 = vand.u32 4294901760, %v35154_v5  ;;  %v35156_v23 = vld [vmem:[#allocation82_spill] sm:$0xff] }
 0x8f8   :  { %v23597_v19 = vsub.f32 %v35141_v60, %v35142_v42  ;;  %26163 = vmatpush3.bf16.msra.mxu0 %v26162_v16  ;;  %v35150_v42 = vand.u32 4294901760, %v35149_v29  ;;  %v23605_v2 = vand.u32 4294901760, %v23604_v34  ;;  %v35153_v16 = vand.u32 4294901760, %v35152_v47 }
 0x8f9   :  { %26203 = vmatpush3.bf16.msra.mxu1 %v32831_v14  ;;  %26165 = vmatprep.subr.bf16.mxu0 %v35151_v25  ;;  %v26240_v30 = vpack.c.bf16 %v23591_v59, %v23584_v44  ;;  %v23618_v26 = vsub.f32 %v35154_v5, %v35155_v11  ;;  %v26242_v25 = vpack.c.bf16 %v23479_v50, %v23472_v45  ;;  %v35159_v46 = vand.u32 4294901760, %v33403_v41  ;;  %v35161_v44 = vld [vmem:[#allocation69_spill] sm:$0xff] }
 0x8fa   :  { %v23492_v60 = vsub.f32 %v35149_v29, %v35150_v42  ;;  %26237 = vmatprep.subr.bf16.mxu1 %v26236_v22  ;;  %v23598_v61 = vand.u32 4294901760, %v23597_v19  ;;  %v23611_v14 = vsub.f32 %v35152_v47, %v35153_v16  ;;  %v35158_v42 = vld [vmem:[#allocation94_spill] sm:$0xff]  ;;  %v35160_v22 = vand.u32 4294901760, %v33408_v58  ;;  %v35165_v50 = vld [vmem:[#allocation89_spill] sm:$0xff] }
 0x8fb   :  { %v23486_v19 = vand.u32 4294901760, %v23485_v13  ;;  %v35162_v34 = vand.u32 4294901760, %v33123_v32  ;;  %v35163_v16 = vand.u32 4294901760, %v33128_v1  ;;  %v33654_v41 = vand.u32 4294901760, %v22189_v49 }
 0x8fc   :  { %23270 = vmatmul.mubr.f32.vlgmr.msra.gmra.mrb[36].mxu1 %v35156_v23  ;;  %26167 = vmatpush3.bf16.msra.mxu0 %v35157_v54  ;;  %v33645_v56 = vpack.c.bf16 %v35160_v22, %v35159_v46  ;;  %v23493_v10 = vand.u32 4294901760, %v23492_v60  ;;  %v26244_v59 = vpack.c.bf16 %v23605_v2, %v23598_v61  ;;  %v23612_v11 = vand.u32 4294901760, %v23611_v14  ;;  %v35169_v2 = vld [vmem:[#allocation93_spill] sm:$0xff] }
 0x8fd   :  { %23275 = vmatprep.mubr.f32.mxu1 %v35158_v42  ;;  %26239 = vmatpush3.bf16.msra.mxu1 %v26238_v62  ;;  %v23499_v54 = vsub.f32 %v33123_v32, %v35162_v34  ;;  %v23506_v45 = vsub.f32 %v33128_v1, %v35163_v16  ;;  %35164 = vst [vmem:[#allocation108_spill] sm:$0xff] %v33654_v41  ;;  %v23619_v58 = vand.u32 4294901760, %v23618_v26  ;;  %v35166_v13 = vand.u32 4294901760, %v35165_v50  ;;  %v35167_v62 = vld [vmem:[#allocation99_spill] sm:$0xff] }
 0x8fe   :  { %26169 = vmatprep.subr.bf16.mxu0 %v35161_v44  ;;  %26241 = vmatprep.subr.bf16.mxu1 %v26240_v30  ;;  %v35168_v46 = vand.u32 4294901760, %v35167_v62  ;;  %v35170_v14 = vand.u32 4294901760, %v33167_v27  ;;  %v35171_v44 = vand.u32 4294901760, %v33178_v15  ;;  %v35172_v30 = vld [vmem:[#allocation72_spill] sm:$0xff]  ;;  %v35173_v26 = vld [vmem:[#allocation7_spill] sm:$0xff]  ;;  %v35174_v16 = vand.u32 4294901760, %v33444_v4 }
 0x8ff   :  { %v23625_v60 = vsub.f32 %v35165_v50, %v35166_v13  ;;  %v35175_v13 = vand.u32 4294901760, %v33452_v7  ;;  %v35177_v1 = vand.u32 4294901760, %v33471_v53  ;;  %v35179_v7 = vand.u32 4294901760, %v33222_v63 }
 0x900   :  { %v23632_v61 = vsub.f32 %v35167_v62, %v35168_v46  ;;  %23277 = vmatmul.mubr.f32.gmra.mrb[38].mxu1 %v35169_v2  ;;  %v23513_v22 = vsub.f32 %v33167_v27, %v35170_v14  ;;  %v23520_v34 = vsub.f32 %v33178_v15, %v35171_v44  ;;  %26171 = vmatpush3.bf16.msra.mxu0 %v35172_v30  ;;  %v35176_v62 = vand.u32 4294901760, %v33466_v55 }
 0x901   :  { %23282 = vmatprep.mubr.f32.mxu1 %v35173_v26  ;;  %v33675_v50 = vpack.c.bf16 %v35175_v13, %v35174_v16  ;;  %v26246_v46 = vpack.c.bf16 %v23493_v10, %v23486_v19  ;;  %26243 = vmatpush3.bf16.msra.mxu1 %v26242_v25  ;;  %v23500_v44 = vand.u32 4294901760, %v23499_v54  ;;  %v23507_v30 = vand.u32 4294901760, %v23506_v45  ;;  %v35180_v25 = vld [vmem:[#allocation95_spill] sm:$0xff] }
 0x902   :  { %v33681_v14 = vpack.c.bf16 %v35177_v1, %v35176_v62  ;;  %26205 = vmatprep.subr.bf16.mxu0 %v33645_v56  ;;  %v35178_v15 = vand.u32 4294901760, %v33217_v20  ;;  %v23646_v16 = vsub.f32 %v33222_v63, %v35179_v7  ;;  %v33691_v19 = vsub.f32 %v22189_v49, %v33654_v41  ;;  %26245 = vmatprep.subr.bf16.mxu1 %v26244_v59  ;;  %v35182_v62 = vld [vmem:[#allocation2_spill] sm:$0xff] }
 0x903   :  { %v26248_v55 = vpack.c.bf16 %v23619_v58, %v23612_v11  ;;  %v23626_v1 = vand.u32 4294901760, %v23625_v60  ;;  %v23633_v53 = vand.u32 4294901760, %v23632_v61  ;;  %23145 = vmatmul.mubr.f32.vlgmr.msra.gmra.mrb[28].mxu0 %v35156_v23  ;;  %v23514_v10 = vand.u32 4294901760, %v23513_v22 }
 0x904   :  { %v23639_v4 = vsub.f32 %v33217_v20, %v35178_v15  ;;  %23284 = vmatmul.mubr.f32.gmra.mrb[40].mxu1 %v35180_v25  ;;  %v23521_v54 = vand.u32 4294901760, %v23520_v34  ;;  %v35181_v45 = vand.u32 4294901760, %v33250_v8  ;;  %23150 = vmatprep.mubr.f32.mxu0 %v35158_v42  ;;  %v35183_v49 = vand.u32 4294901760, %v33255_v51 }
 0x905   :  { %23289 = vmatprep.mubr.f32.mxu1 %v35182_v62  ;;  %v35184_v11 = vand.u32 4294901760, %v33300_v48  ;;  %v35185_v58 = vand.u32 4294901760, %v33305_v36  ;;  %26207 = vmatpush3.bf16.msra.mxu0 %v33675_v50  ;;  %v35186_v61 = vand.u32 4294901760, %v33498_v12  ;;  %v35187_v42 = vand.u32 4294901760, %v33503_v24  ;;  %v35192_v12 = vld [vmem:[#allocation14_spill] sm:$0xff]  ;;  %v35193_v24 = vld [vmem:[#allocation9_spill] sm:$0xff] }
 0x906   :  { %v23527_v15 = vsub.f32 %v33250_v8, %v35181_v45  ;;  %v23534_v59 = vsub.f32 %v33255_v51, %v35183_v49  ;;  %26247 = vmatpush3.bf16.msra.mxu1 %v26246_v46  ;;  %v26250_v34 = vpack.c.bf16 %v23507_v30, %v23500_v44  ;;  %v23640_v13 = vand.u32 4294901760, %v23639_v4  ;;  %26209 = vmatprep.subr.bf16.mxu0 %v33681_v14  ;;  %v35188_v45 = vld [vmem:[#allocation80_spill] sm:$0xff] }
 0x907   :  { %v23653_v23 = vsub.f32 %v33300_v48, %v35184_v11  ;;  %v23660_v60 = vsub.f32 %v33305_v36, %v35185_v58  ;;  %v33714_v22 = vpack.c.bf16 %v35187_v42, %v35186_v61  ;;  %v23647_v7 = vand.u32 4294901760, %v23646_v16  ;;  %26249 = vmatprep.subr.bf16.mxu1 %v26248_v55  ;;  %v35190_v11 = vld [vmem:[#allocation11_spill] sm:$0xff]  ;;  %23152 = vmatmul.mubr.f32.gmra.mrb[30].mxu0 %v35169_v2  ;;  %v35195_v30 = vld [vmem:[#allocation12_spill] sm:$0xff]  ;;  %v35197_v61 = vld [vmem:[#allocation13_spill] sm:$0xff] }
 0x908   :  { %v35189_v49 = vand.u32 4294901760, %v35188_v45  ;;  %v35191_v48 = vand.u32 4294901760, %v35190_v11  ;;  %v26252_v36 = vpack.c.bf16 %v23633_v53, %v23626_v1  ;;  %v34426_v46 = vand.u32 4294901760, %v33691_v19  ;;  %23291 = vmatmul.mubr.f32.gmra.mrb[42].mxu1 %v35192_v12  ;;  %v35199_v45 = vld [vmem:[#allocation18_spill] sm:$0xff]  ;;  %23157 = vmatprep.mubr.f32.mxu0 %v35173_v26 }
 0x909   :  { %v35194_v44 = vand.u32 4294901760, %v35193_v24  ;;  %v35196_v4 = vand.u32 4294901760, %v35195_v30  ;;  %v26254_v55 = vpack.c.bf16 %v23521_v54, %v23514_v10  ;;  %v35198_v42 = vand.u32 4294901760, %v35197_v61  ;;  %23678 = vmatprep.mubr.f32.mxu1 %v33654_v41  ;;  %26211 = vmatpush3.bf16.msra.mxu0 %v33714_v22 }
 0x90a   :  { %v33721_v58 = vpack.c.bf16 %v35191_v48, %v35189_v49  ;;  %v35200_v11 = vand.u32 4294901760, %v35199_v45  ;;  %v23528_v1 = vand.u32 4294901760, %v23527_v15  ;;  %v23535_v2 = vand.u32 4294901760, %v23534_v59  ;;  %26251 = vmatpush3.bf16.msra.mxu1 %v26250_v34 }
 0x90b   :  { %v33730_v16 = vpack.c.bf16 %v35196_v4, %v35194_v44  ;;  %v23654_v53 = vand.u32 4294901760, %v23653_v23  ;;  %v23661_v49 = vand.u32 4294901760, %v23660_v60  ;;  %v35201_v24 = vand.u32 4294901760, %v33325_v18  ;;  %v35204_v4 = vld [vmem:[#allocation26_spill] sm:$0xff]  ;;  %26253 = vmatprep.subr.bf16.mxu1 %v26252_v36  ;;  %23159 = vmatmul.mubr.f32.gmra.mrb[32].mxu0 %v35180_v25 }
 0x90c   :  { %v33736_v48 = vpack.c.bf16 %v35200_v11, %v35198_v42  ;;  %v26256_v10 = vpack.c.bf16 %v23647_v7, %v23640_v13  ;;  %v35202_v54 = vand.u32 4294901760, %v33340_v38  ;;  %v35203_v15 = vand.u32 4294901760, %v33355_v3  ;;  %26213 = vmatprep.subr.bf16.mxu0 %v33721_v58  ;;  %v35206_v13 = vld [vmem:[#allocation37_spill] sm:$0xff]  ;;  %23164 = vmatprep.mubr.f32.mxu0 %v35182_v62 }
 0x90d   :  { %v23541_v44 = vsub.f32 %v33325_v18, %v35201_v24  ;;  %v22172_v59 = vadd.f32 %v35146_v39, %v35204_v4  ;;  %v23395_v23 = vsub.f32 %v33691_v19, %v34426_v46  ;;  %v35205_v60 = vand.u32 4294901760, %v33360_v6  ;;  %v35207_v7 = vld [vmem:[#allocation85_spill] sm:$0xff]  ;;  %v35214_v4 = vld [vmem:[#allocation34_spill] sm:$0xff]  ;;  %26215 = vmatpush3.bf16.msra.mxu0 %v33730_v16 }
 0x90e   :  { %v23548_v30 = vsub.f32 %v33340_v38, %v35202_v54  ;;  %v23667_v26 = vsub.f32 %v33355_v3, %v35203_v15  ;;  %v22177_v61 = vadd.f32 %v35207_v7, %v35206_v13  ;;  %v35208_v42 = vld [vmem:[#allocation5_spill] sm:$0xff]  ;;  %v26258_v36 = vpack.c.bf16 %v23535_v2, %v23528_v1  ;;  %v35212_v54 = vld [vmem:[#allocation3_spill] sm:$0xff]  ;;  %26255 = vmatpush3.bf16.msra.mxu1 %v26254_v55 }
 0x90f   :  { %v23674_v34 = vsub.f32 %v33360_v6, %v35205_v60  ;;  %v35209_v45 = vand.u32 4294901760, %v35208_v42  ;;  %v35210_v11 = vld [vmem:[#allocation25_spill] sm:$0xff]  ;;  %v35213_v15 = vand.u32 4294901760, %v35212_v54  ;;  %v35215_v46 = vand.u32 4294901760, %v35214_v4  ;;  %26217 = vmatprep.subr.bf16.mxu0 %v33736_v48  ;;  %26257 = vmatprep.subr.bf16.mxu1 %v26256_v10  ;;  %v35225_v10 = vld [vmem:[#allocation79_spill] sm:$0xff] }
 0x910   :  { %v35211_v39 = vand.u32 4294901760, %v35210_v11  ;;  %v26260_v60 = vpack.c.bf16 %v23661_v49, %v23654_v53  ;;  %v23542_v6 = vand.u32 4294901760, %v23541_v44  ;;  %v23549_v25 = vand.u32 4294901760, %v23548_v30  ;;  %v35218_v11 = vld [vmem:[#allocation36_spill] sm:$0xff]  ;;  %v35219_v44 = vld [vmem:[#allocation33_spill] sm:$0xff]  ;;  %v35220_v30 = vld [vmem:[#allocation83_spill] sm:$0xff]  ;;  %23166 = vmatmul.mubr.f32.gmra.mrb[34].mxu0 %v35192_v12 }
 0x911   :  { %v33773_v41 = vpack.c.bf16 %v35215_v46, %v35213_v15  ;;  %v23668_v13 = vand.u32 4294901760, %v23667_v26  ;;  %v35216_v42 = vand.u32 4294901760, %v33388_v52  ;;  %v35217_v62 = vand.u32 4294901760, %v33393_v21  ;;  %v35223_v15 = vld [vmem:[#allocation6_spill] sm:$0xff] }
 0x912   :  { %v33766_v24 = vpack.c.bf16 %v35211_v39, %v35209_v45  ;;  %v22188_v2 = vmax.f32 %v22172_v59, 0.0  ;;  %v22176_v46 = vadd.f32 %v35207_v7, %v35218_v11  ;;  %v23396_v53 = vand.u32 4294901760, %v23395_v23  ;;  %v35221_v39 = vld [vmem:[#allocation64_spill] sm:$0xff]  ;;  %26259 = vmatpush3.bf16.msra.mxu1 %v26258_v36 }
 0x913   :  { %v23555_v45 = vsub.f32 %v33388_v52, %v35216_v42  ;;  %v23562_v1 = vsub.f32 %v33393_v21, %v35217_v62  ;;  %v23675_v49 = vand.u32 4294901760, %v23674_v34  ;;  %v22193_v55 = vmax.f32 %v22177_v61, 0.0  ;;  %v35227_v34 = vld [vmem:[#allocation56_spill] sm:$0xff]  ;;  %26261 = vmatprep.subr.bf16.mxu1 %v26260_v60  ;;  %v35236_v60 = vld [vmem:[#allocation23_spill] sm:$0xff] }
 0x914   :  { %v22181_v26 = vadd.f32 %v35220_v30, %v35219_v44  ;;  %23397 = vmatprep.mubr.f32.mxu0 %v23396_v53  ;;  %v35222_v54 = vand.u32 4294901760, %v35221_v39  ;;  %v35224_v4 = vand.u32 4294901760, %v35223_v15  ;;  %26219 = vmatpush3.bf16.msra.mxu0 %v33766_v24  ;;  %v26262_v7 = vpack.c.bf16 %v23549_v25, %v23542_v6  ;;  %v35229_v44 = vld [vmem:[#allocation31_spill] sm:$0xff]  ;;  %v35230_v25 = vld [vmem:[#allocation8_spill] sm:$0xff] }
 0x915   :  { %v35226_v23 = vand.u32 4294901760, %v35225_v10  ;;  %v35228_v61 = vand.u32 4294901760, %v35227_v34  ;;  %v23556_v62 = vand.u32 4294901760, %v23555_v45  ;;  %v23563_v11 = vand.u32 4294901760, %v23562_v1  ;;  %26221 = vmatprep.subr.bf16.mxu0 %v33773_v41  ;;  %v35231_v45 = vld [vmem:[#allocation60_spill] sm:$0xff] }
 0x916   :  { %v33792_v59 = vpack.c.bf16 %v35224_v4, %v35222_v54  ;;  %v33801_v12 = vand.u32 4294901760, %v22188_v2  ;;  %v22192_v53 = vmax.f32 %v22176_v46, 0.0  ;;  %v22180_v39 = vadd.f32 %v35220_v30, %v35229_v44  ;;  %26263 = vmatpush3.bf16.msra.mxu1 %v26262_v7  ;;  %v35233_v4 = vld [vmem:[#allocation96_spill] sm:$0xff]  ;;  %v35238_v7 = vld [vmem:[#allocation62_spill] sm:$0xff] }
 0x917   :  { %v33799_v42 = vpack.c.bf16 %v35228_v61, %v35226_v23  ;;  %v26264_v54 = vpack.c.bf16 %v23675_v49, %v23668_v13  ;;  %v33806_v36 = vand.u32 4294901760, %v22193_v55  ;;  %v22197_v6 = vmax.f32 %v22181_v26, 0.0 }
 0x918   :  { %v22185_v15 = vadd.f32 %v35230_v25, %v33295_v33  ;;  %26223 = vmatpush3.bf16.msra.mxu0 %v33792_v59  ;;  %v35232_v1 = vand.u32 4294901760, %v35231_v45  ;;  %v35234_v46 = vand.u32 4294901760, %v35233_v4  ;;  %v26266_v30 = vpack.c.bf16 %v23563_v11, %v23556_v62 }
 0x919   :  { %v35235_v23 = vand.u32 4294901760, %v33185_v37  ;;  %v35237_v13 = vand.u32 4294901760, %v35236_v60  ;;  %v33824_v26 = vsub.f32 %v22188_v2, %v33801_v12  ;;  %v33826_v33 = vand.u32 4294901760, %v22192_v53  ;;  %26225 = vmatprep.subr.bf16.mxu0 %v33799_v42  ;;  %26265 = vmatprep.subr.bf16.mxu1 %v26264_v54  ;;  %v35240_v2 = vld [vmem:[#allocation27_spill] sm:$0xff] }
 0x91a   :  { %v33815_v10 = vpack.c.bf16 %v35234_v46, %v35232_v1  ;;  %v22196_v34 = vmax.f32 %v22180_v39, 0.0  ;;  %v22184_v61 = vadd.f32 %v35230_v25, %v35238_v7  ;;  %v33832_v62 = vsub.f32 %v22193_v55, %v33806_v36  ;;  %26267 = vmatpush3.bf16.msra.mxu1 %v26266_v30  ;;  %v35248_v30 = vld [vmem:[#allocation71_spill] sm:$0xff] }
 0x91b   :  { %v33821_v49 = vpack.c.bf16 %v35237_v13, %v35235_v23  ;;  %v33834_v37 = vand.u32 4294901760, %v22197_v6  ;;  %v22201_v11 = vmax.f32 %v22185_v15, 0.0  ;;  %v35241_v44 = vand.u32 4294901760, %v35240_v2  ;;  %26301 = vmatprep.subr.bf16.mxu1 %v33645_v56 }
 0x91c   :  { %26227 = vmatpush3.bf16.msra.mxu0 %v33815_v10  ;;  %v35242_v45 = vand.u32 4294901760, %v33238_v57  ;;  %v35243_v25 = vand.u32 4294901760, %v33260_v17  ;;  %v35244_v1 = vand.u32 4294901760, %v33265_v31  ;;  %v34432_v55 = vand.u32 4294901760, %v33824_v26 }
 0x91d   :  { %35239 = vst [vmem:[#allocation74_spill] sm:$0xff] %v33834_v37  ;;  %v33851_v4 = vsub.f32 %v22192_v53, %v33826_v33  ;;  %v33853_v15 = vand.u32 4294901760, %v22196_v34  ;;  %v22200_v46 = vmax.f32 %v22184_v61, 0.0  ;;  %26229 = vmatprep.subr.bf16.mxu0 %v33821_v49  ;;  %v33858_v57 = vsub.f32 %v22197_v6, %v33834_v37  ;;  %23680 = vmatmul.mubr.f32.vlgmr.msra.gmra.mrb[44].mxu1 %v33801_v12 }
 0x91e   :  { %v33841_v39 = vpack.c.bf16 %v35242_v45, %v35241_v44  ;;  %v33847_v54 = vpack.c.bf16 %v35244_v1, %v35243_v25  ;;  %v33860_v17 = vand.u32 4294901760, %v22201_v11  ;;  %v34430_v31 = vand.u32 4294901760, %v33832_v62  ;;  %23685 = vmatprep.mubr.f32.mxu1 %v33806_v36  ;;  %26303 = vmatpush3.bf16.msra.mxu1 %v33675_v50 }
 0x91f   :  { %35245 = vst [vmem:[#allocation77_spill] sm:$0xff] %v33853_v15  ;;  %v35247_v53 = vand.u32 4294901760, %v33312_v35  ;;  %v35249_v23 = vand.u32 4294901760, %v35248_v30  ;;  %v26268_v6 = vpack.c.bf16 %v33492_v0, %v33487_v28  ;;  %v23401_v13 = vsub.f32 %v33824_v26, %v34432_v55  ;;  %26305 = vmatprep.subr.bf16.mxu1 %v33681_v14 }
 0x920   :  { %35246 = vst [vmem:[#allocation30_spill] sm:$0xff] %v33860_v17  ;;  %26231 = vmatpush3.bf16.msra.mxu0 %v33841_v39  ;;  %v33878_v7 = vsub.f32 %v22196_v34, %v33853_v15  ;;  %v33880_v61 = vand.u32 4294901760, %v22200_v46  ;;  %v34431_v35 = vand.u32 4294901760, %v33851_v4  ;;  %v33886_v2 = vsub.f32 %v22201_v11, %v33860_v17 }
 0x921   :  { %v33870_v60 = vpack.c.bf16 %v35249_v23, %v35247_v53  ;;  %26233 = vmatprep.subr.bf16.mxu0 %v33847_v54  ;;  %v23410_v44 = vsub.f32 %v33832_v62, %v34430_v31  ;;  %v34435_v34 = vand.u32 4294901760, %v33858_v57  ;;  %23687 = vmatmul.mubr.f32.gmra.mrb[46].mxu1 %v33826_v33  ;;  %v26270_v45 = vpack.c.bf16 %v33534_v43, %v33520_v40  ;;  %v35250_v23 = vld [vmem:[#allocation98_spill] sm:$0xff] }
 0x922   :  { %23692 = vmatprep.mubr.f32.mxu1 %v33834_v37  ;;  %v23402_v25 = vand.u32 4294901760, %v23401_v13  ;;  %v33899_v11 = vsub.f32 %v22200_v46, %v33880_v61  ;;  %26307 = vmatpush3.bf16.msra.mxu1 %v33714_v22  ;;  %v23416_v1 = vsub.f32 %v33851_v4, %v34431_v35  ;;  %v34440_v53 = vand.u32 4294901760, %v33878_v7  ;;  %v35252_v35 = vld [vmem:[#allocation106_spill] sm:$0xff]  ;;  %v35254_v13 = vld [vmem:[#allocation44_spill] sm:$0xff] }
 0x923   :  { %26309 = vmatprep.subr.bf16.mxu1 %v33721_v58  ;;  %v23411_v30 = vand.u32 4294901760, %v23410_v44  ;;  %v26272_v31 = vpack.c.bf16 %v35250_v23, %v33540_v9  ;;  %v23425_v46 = vsub.f32 %v33858_v57, %v34435_v34  ;;  %v35251_v44 = vld [vmem:[#allocation105_spill] sm:$0xff] }
 0x924   :  { %26235 = vmatpush3.bf16.msra.mxu0 %v33870_v60  ;;  %v26274_v55 = vpack.c.bf16 %v35252_v35, %v35251_v44  ;;  %v23431_v37 = vsub.f32 %v33878_v7, %v34440_v53  ;;  %v23445_v34 = vand.u32 4294901760, %v33899_v11  ;;  %v35257_v53 = vld [vmem:[#allocation20_spill] sm:$0xff] }
 0x925   :  { %26269 = vmatprep.subr.bf16.mxu0 %v26268_v6  ;;  %23694 = vmatmul.mubr.f32.gmra.mrb[48].mxu1 %v33853_v15  ;;  %v23417_v6 = vand.u32 4294901760, %v23416_v1  ;;  %v35256_v15 = vand.u32 4294901760, %v33691_v19 }
 0x926   :  { %23699 = vmatprep.mubr.f32.mxu1 %v33860_v17  ;;  %26311 = vmatpush3.bf16.msra.mxu1 %v33730_v16 }
 0x927   :  { %23403 = vmatmul.mubr.f32.vlgmr.msra.gmra.mrb[36].mxu0 %v23402_v25  ;;  %26313 = vmatprep.subr.bf16.mxu1 %v33736_v48  ;;  %v23426_v25 = vand.u32 4294901760, %v23425_v46  ;;  %v26278_v46 = vpack.c.bf16 %v35149_v29, %v35257_v53 }
 0x928   :  { %23412 = vmatprep.mubr.f32.mxu0 %v23411_v30  ;;  %26271 = vmatpush3.bf16.msra.mxu0 %v26270_v45  ;;  %v35253_v30 = vld [vmem:[#allocation50_spill] sm:$0xff]  ;;  %v35255_v45 = vand.u32 4294901760, %v33886_v2 }
 0x929   :  { %26273 = vmatprep.subr.bf16.mxu0 %v26272_v31  ;;  %v26276_v17 = vpack.c.bf16 %v35254_v13, %v35253_v30  ;;  %23701 = vmatmul.mubr.f32.gmra.mrb[50].mxu1 %v33880_v61  ;;  %v23432_v31 = vand.u32 4294901760, %v23431_v37  ;;  %v23446_v13 = vsub.f32 %v33899_v11, %v23445_v34  ;;  %v26290_v30 = vpack.c.bf16 %v33255_v51, %v33250_v8 }
 0x92a   :  { %v23440_v1 = vsub.f32 %v33886_v2, %v35255_v45  ;;  %23970 = vmatprep.mubr.f32.mxu1 %v35256_v15  ;;  %26315 = vmatpush3.bf16.msra.mxu1 %v33766_v24  ;;  %v35259_v15 = vld [vmem:[#allocation89_spill] sm:$0xff]  ;;  %v35265_v51 = vand.u32 4294901760, %v33824_v26  ;;  %v35266_v8 = vand.u32 4294901760, %v33832_v62 }
 0x92b   :  { %23418 = vmatmul.mubr.f32.gmra.mrb[38].mxu0 %v23417_v6  ;;  %26317 = vmatprep.subr.bf16.mxu1 %v33773_v41  ;;  %v23447_v37 = vand.u32 4294901760, %v23446_v13  ;;  %v35263_v45 = vld [vmem:[#allocation101_spill] sm:$0xff]  ;;  %v35275_v13 = vand.u32 4294901760, %v33878_v7 }
 0x92c   :  { %23427 = vmatprep.mubr.f32.mxu0 %v23426_v25  ;;  %26275 = vmatpush3.bf16.msra.mxu0 %v26274_v55  ;;  %v23441_v6 = vand.u32 4294901760, %v23440_v1  ;;  %v26280_v25 = vpack.c.bf16 %v35154_v5, %v35152_v47  ;;  %v35258_v55 = vld [vmem:[#allocation29_spill] sm:$0xff]  ;;  %v35261_v5 = vld [vmem:[#allocation100_spill] sm:$0xff] }
 0x92d   :  { %26277 = vmatprep.subr.bf16.mxu0 %v26276_v17  ;;  %v26282_v29 = vpack.c.bf16 %v35258_v55, %v33123_v32  ;;  %v35260_v17 = vld [vmem:[#allocation99_spill] sm:$0xff]  ;;  %v26286_v47 = vpack.c.bf16 %v35261_v5, %v33167_v27  ;;  %v26288_v32 = vpack.c.bf16 %v33222_v63, %v33217_v20  ;;  %v26294_v27 = vpack.c.bf16 %v33340_v38, %v33325_v18  ;;  %v35264_v63 = vld [vmem:[#allocation54_spill] sm:$0xff] }
 0x92e   :  { %26319 = vmatpush3.bf16.msra.mxu1 %v33792_v59  ;;  %v26284_v53 = vpack.c.bf16 %v35260_v17, %v35259_v15  ;;  %v26296_v20 = vpack.c.bf16 %v35264_v63, %v33355_v3  ;;  %v35267_v38 = vand.u32 4294901760, %v33487_v28  ;;  %v35268_v18 = vand.u32 4294901760, %v33492_v0 }
 0x92f   :  { %23433 = vmatmul.mubr.f32.gmra.mrb[40].mxu0 %v23432_v31  ;;  %26321 = vmatprep.subr.bf16.mxu1 %v33799_v42  ;;  %v26298_v31 = vpack.c.bf16 %v33393_v21, %v33388_v52  ;;  %v35269_v3 = vand.u32 4294901760, %v33851_v4  ;;  %v35271_v52 = vand.u32 4294901760, %v33520_v40  ;;  %v35272_v21 = vand.u32 4294901760, %v33534_v43 }
 0x930   :  { %23442 = vmatprep.mubr.f32.mxu0 %v23441_v6  ;;  %26279 = vmatpush3.bf16.msra.mxu0 %v26278_v46  ;;  %v35270_v46 = vand.u32 4294901760, %v33858_v57  ;;  %v35273_v0 = vand.u32 4294901760, %v33540_v9  ;;  %v35277_v40 = vand.u32 4294901760, %v35251_v44  ;;  %v35278_v43 = vand.u32 4294901760, %v35252_v35 }
 0x931   :  { %26281 = vmatprep.subr.bf16.mxu0 %v26280_v25  ;;  %v26334_v28 = vpack.c.bf16 %v35272_v21, %v35271_v52 }
 0x932   :  { %26323 = vmatpush3.bf16.msra.mxu1 %v33815_v10  ;;  %v26338_v9 = vpack.c.bf16 %v35278_v43, %v35277_v40 }
 0x933   :  { %23448 = vmatmul.mubr.f32.gmra.mrb[42].mxu0 %v23447_v37  ;;  %26325 = vmatprep.subr.bf16.mxu1 %v33821_v49 }
 0x934   :  { %23836 = vmatprep.mubr.f32.mxu0 %v33691_v19  ;;  %26283 = vmatpush3.bf16.msra.mxu0 %v26282_v29  ;;  %v35262_v19 = vld [vmem:[#allocation103_spill] sm:$0xff] }
 0x935   :  { %26285 = vmatprep.subr.bf16.mxu0 %v26284_v53  ;;  %v26292_v1 = vpack.c.bf16 %v35263_v45, %v35262_v19 }
 0x936   :  { %26327 = vmatpush3.bf16.msra.mxu1 %v33841_v39 }
 0x937   :  { %26329 = vmatprep.subr.bf16.mxu1 %v33847_v54 }
 0x938   :  { %26287 = vmatpush3.bf16.msra.mxu0 %v26286_v47 }
 0x939   :  { %26289 = vmatprep.subr.bf16.mxu0 %v26288_v32 }
 0x93a   :  { %26331 = vmatpush3.bf16.msra.mxu1 %v33870_v60 }
 0x93b   :  { %26365 = vmatprep.subr.bf16.mxu1 %v33645_v56  ;;  %v26332_v56 = vpack.c.bf16 %v35268_v18, %v35267_v38 }
 0x93c   :  { %26291 = vmatpush3.bf16.msra.mxu0 %v26290_v30 }
 0x93d   :  { %26293 = vmatprep.subr.bf16.mxu0 %v26292_v1  ;;  %23974 = vmatmul.mubr.f32.vlgmr.msra.gmra.mrb[52].mxu1 %v35265_v51 }
 0x93e   :  { %23981 = vmatprep.mubr.f32.mxu1 %v35266_v8  ;;  %26367 = vmatpush3.bf16.msra.mxu1 %v33675_v50  ;;  %v35274_v50 = vand.u32 4294901760, %v35250_v23 }
 0x93f   :  { %26369 = vmatprep.subr.bf16.mxu1 %v33681_v14 }
 0x940   :  { %26295 = vmatpush3.bf16.msra.mxu0 %v26294_v27  ;;  %v26336_v14 = vpack.c.bf16 %v35274_v50, %v35273_v0 }
 0x941   :  { %26297 = vmatprep.subr.bf16.mxu0 %v26296_v20  ;;  %23985 = vmatmul.mubr.f32.gmra.mrb[54].mxu1 %v35269_v3 }
 0x942   :  { %23992 = vmatprep.mubr.f32.mxu1 %v35270_v46  ;;  %26371 = vmatpush3.bf16.msra.mxu1 %v33714_v22  ;;  %v35276_v22 = vand.u32 4294901760, %v33886_v2 }
 0x943   :  { %26373 = vmatprep.subr.bf16.mxu1 %v33721_v58  ;;  %v35279_v58 = vld [vmem:[#allocation108_spill] sm:$0xff] }
 0x944   :  { %26299 = vmatpush3.bf16.msra.mxu0 %v26298_v31 }
 0x945   :  { %26333 = vmatprep.subr.bf16.mxu0 %v26332_v56  ;;  %23996 = vmatmul.mubr.f32.gmra.mrb[56].mxu1 %v35275_v13 }
 0x946   :  { %24003 = vmatprep.mubr.f32.mxu1 %v35276_v22  ;;  %26375 = vmatpush3.bf16.msra.mxu1 %v33730_v16  ;;  %v35280_v16 = vld [vmem:[#allocation66_spill] sm:$0xff] }
 0x947   :  { %23839 = vmatmul.mubr.f32.vlgmr.msra.gmra.mrb[44].mxu0 %v33824_v26  ;;  %26377 = vmatprep.subr.bf16.mxu1 %v33736_v48  ;;  %v35281_v48 = vld [vmem:[#allocation73_spill] sm:$0xff] }
 0x948   :  { %23845 = vmatprep.mubr.f32.mxu0 %v33832_v62  ;;  %26335 = vmatpush3.bf16.msra.mxu0 %v26334_v28  ;;  %v35282_v26 = vld [vmem:[#allocation97_spill] sm:$0xff]  ;;  %v35285_v62 = vld [vmem:[#allocation104_spill] sm:$0xff] }
 0x949   :  { %26337 = vmatprep.subr.bf16.mxu0 %v26336_v14  ;;  %24007 = vmatmul.mubr.f32.gmra.mrb[58].mxu1 %v23445_v34 }
 0x94a   :  { %24298 = vmatprep.mubr.f32.mxu1 %v35279_v58  ;;  %26379 = vmatpush3.bf16.msra.mxu1 %v33766_v24  ;;  %v35283_v24 = vld [vmem:[#allocation107_spill] sm:$0xff] }
 0x94b   :  { %23848 = vmatmul.mubr.f32.gmra.mrb[46].mxu0 %v33851_v4  ;;  %26381 = vmatprep.subr.bf16.mxu1 %v33773_v41  ;;  %v35284_v41 = vld [vmem:[#allocation78_spill] sm:$0xff] }
 0x94c   :  { %23854 = vmatprep.mubr.f32.mxu0 %v33858_v57  ;;  %26339 = vmatpush3.bf16.msra.mxu0 %v26338_v9  ;;  %v35288_v4 = vld [vmem:[#allocation86_spill] sm:$0xff] }
 0x94d   :  { %26341 = vmatprep.subr.bf16.mxu0 %v35280_v16  ;;  %v35292_v57 = vld [vmem:[#allocation74_spill] sm:$0xff] }
 0x94e   :  { %26383 = vmatpush3.bf16.msra.mxu1 %v33792_v59  ;;  %v35286_v59 = vld [vmem:[#allocation24_spill] sm:$0xff] }
 0x94f   :  { %23857 = vmatmul.mubr.f32.gmra.mrb[48].mxu0 %v33878_v7  ;;  %26385 = vmatprep.subr.bf16.mxu1 %v33799_v42  ;;  %v35287_v42 = vld [vmem:[#allocation53_spill] sm:$0xff] }
 0x950   :  { %23863 = vmatprep.mubr.f32.mxu0 %v33886_v2  ;;  %26343 = vmatpush3.bf16.msra.mxu0 %v35281_v48 }
 0x951   :  { %26345 = vmatprep.subr.bf16.mxu0 %v35282_v26 }
 0x952   :  { %26387 = vmatpush3.bf16.msra.mxu1 %v33815_v10  ;;  %v35289_v10 = vld [vmem:[#allocation32_spill] sm:$0xff] }
 0x953   :  { %23866 = vmatmul.mubr.f32.gmra.mrb[50].mxu0 %v33899_v11  ;;  %26389 = vmatprep.subr.bf16.mxu1 %v33821_v49  ;;  %v35290_v49 = vld [vmem:[#allocation35_spill] sm:$0xff] }
 0x954   :  { %24173 = vmatprep.mubr.f32.mxu0 %v35279_v58  ;;  %26347 = vmatpush3.bf16.msra.mxu0 %v35283_v24 }
 0x955   :  { %26349 = vmatprep.subr.bf16.mxu0 %v35284_v41 }
 0x956   :  { %26391 = vmatpush3.bf16.msra.mxu1 %v33841_v39  ;;  %v35291_v39 = vld [vmem:[#allocation102_spill] sm:$0xff] }
 0x957   :  { %26393 = vmatprep.subr.bf16.mxu1 %v33847_v54  ;;  %v35293_v54 = vld [vmem:[#allocation77_spill] sm:$0xff] }
 0x958   :  { %26351 = vmatpush3.bf16.msra.mxu0 %v35285_v62 }
 0x959   :  { %26353 = vmatprep.subr.bf16.mxu0 %v35286_v59 }
 0x95a   :  { %26395 = vmatpush3.bf16.msra.mxu1 %v33870_v60  ;;  %v35294_v60 = vld [vmem:[#allocation30_spill] sm:$0xff] }
 0x95c   :  { %26355 = vmatpush3.bf16.msra.mxu0 %v35287_v42 }
 0x95d   :  { %26357 = vmatprep.subr.bf16.mxu0 %v35288_v4  ;;  %24300 = vmatmul.mubr.f32.vlgmr.msra.gmra.mrb[60].mxu1 %v33801_v12 }
 0x95e   :  { %24305 = vmatprep.mubr.f32.mxu1 %v33806_v36 }
 0x960   :  { %26359 = vmatpush3.bf16.msra.mxu0 %v35289_v10 }
 0x961   :  { %26361 = vmatprep.subr.bf16.mxu0 %v35290_v49  ;;  %24307 = vmatmul.mubr.f32.gmra.mrb[62].mxu1 %v33826_v33 }
 0x962   :  { %24312 = vmatprep.mubr.f32.mxu1 %v35292_v57 }
 0x964   :  { %26363 = vmatpush3.bf16.msra.mxu0 %v35291_v39 }
 0x965   :  { %24314 = vmatmul.mubr.f32.gmra.mrb[64].mxu1 %v35293_v54 }
 0x966   :  { %24319 = vmatprep.mubr.f32.mxu1 %v35294_v60 }
 0x967   :  { %24175 = vmatmul.mubr.f32.vlgmr.msra.gmra.mrb[52].mxu0 %v33801_v12 }
 0x968   :  { %24180 = vmatprep.mubr.f32.mxu0 %v33806_v36 }
 0x969   :  { %24321 = vmatmul.mubr.f32.gmra.mrb[66].mxu1 %v33880_v61 }
 0x96b   :  { %24182 = vmatmul.mubr.f32.gmra.mrb[54].mxu0 %v33826_v33 }
 0x96c   :  { %24187 = vmatprep.mubr.f32.mxu0 %v35292_v57 }
 0x96f   :  { %24189 = vmatmul.mubr.f32.gmra.mrb[56].mxu0 %v35293_v54 }
 0x970   :  { %24194 = vmatprep.mubr.f32.mxu0 %v35294_v60 }
 0x973   :  { %24196 = vmatmul.mubr.f32.gmra.mrb[58].mxu0 %v33880_v61 }
 0x985   :  { %v25026_v7 = vpop.f32.mrb[20].mxu1 }
 0x986   :  { %v25027_v12 = vpop.f32.mrb[21].mxu1 }
 0x987   :  { %v25028_v35 = vadd.f32 %v25027_v12, %v25026_v7  ;;  %v24326_v12 = vld [vmem:[%s34093_s8] sm:$0xff] }
 0x989   :  { %v25029_v2 = vpop.f32.mrb[22].mxu1 }
 0x98a   :  { %v25030_v34 = vpop.f32.mrb[23].mxu1 }
 0x98b   :  { %v25031_v36 = vadd.f32 %v25030_v34, %v25029_v2  ;;  %v24342_v34 = vsel %vm24340_vm3, %v24326_v12, 0 }
 0x98d   :  { %v24982_v11 = vpop.f32.mrb[12].mxu0  ;;  %v25032_v23 = vpop.f32.mrb[24].mxu1 }
 0x98e   :  { %v24983_v44 = vpop.f32.mrb[13].mxu0  ;;  %v25033_v33 = vpop.f32.mrb[25].mxu1 }
 0x98f   :  { %v24984_v6 = vadd.f32 %v24983_v44, %v24982_v11  ;;  %v25034_v25 = vadd.f32 %v25033_v33, %v25032_v23  ;;  %v34055_v11 = vand.u32 4294901760, %v24342_v34 }
 0x991   :  { %v22652_v37 = vadd.f32 %v25028_v35, %v24984_v6  ;;  %v24985_v55 = vpop.f32.mrb[14].mxu0  ;;  %v24327_v35 = vld [vmem:[%s34093_s8 + $0x8] sm:$0xff]  ;;  %25533 = vmatprep.mubr.f32.mxu0 %v34055_v11 }
 0x992   :  { %v25035_v29 = vpop.f32.mrb[26].mxu1  ;;  %v24986_v15 = vpop.f32.mrb[15].mxu0 }
 0x993   :  { %v25036_v17 = vpop.f32.mrb[27].mxu1  ;;  %v24987_v53 = vadd.f32 %v24986_v15, %v24985_v55 }
 0x994   :  { %v25037_v5 = vadd.f32 %v25036_v17, %v25035_v29 }
 0x995   :  { %v22659_v61 = vadd.f32 %v25031_v36, %v24987_v53  ;;  %v34053_v36 = vsel %vm24340_vm3, %v24327_v35, 0 }
 0x998   :  { %v24988_v47 = vpop.f32.mrb[16].mxu0 }
 0x999   :  { %v24989_v32 = vpop.f32.mrb[17].mxu0 }
 0x99a   :  { %v24990_v30 = vadd.f32 %v24989_v32, %v24988_v47 }
 0x99c   :  { %v22666_v19 = vadd.f32 %v25034_v25, %v24990_v30  ;;  %v24991_v45 = vpop.f32.mrb[18].mxu0  ;;  %v34058_v25 = vsub.f32 %v24342_v34, %v34055_v11 }
 0x99d   :  { %v24992_v1 = vpop.f32.mrb[19].mxu0 }
 0x99e   :  { %v24993_v27 = vadd.f32 %v24992_v1, %v24991_v45  ;;  %v24418_v29 = vand.u32 4294901760, %v34058_v25 }
 0x9a0   :  { %v22673_v63 = vadd.f32 %v25037_v5, %v24993_v27  ;;  %v24419_v47 = vsub.f32 %v34058_v25, %v24418_v29 }
 0x9a2   :  { %v24420_v45 = vand.u32 4294901760, %v24419_v47 }
 0x9a4   :  { %25522 = vmatprep.mubr.f32.mxu1 %v24420_v45 }
 0x9aa   :  { %v25114_v20 = vpop.f32.mrb[28].mxu1 }
 0x9ab   :  { %v25115_v51 = vpop.f32.mrb[29].mxu1 }
 0x9ac   :  { %v25116_v8 = vadd.f32 %v25115_v51, %v25114_v20 }
 0x9b0   :  { %v25117_v31 = vpop.f32.mrb[30].mxu1 }
 0x9b1   :  { %v25118_v38 = vpop.f32.mrb[31].mxu1 }
 0x9b2   :  { %v25119_v18 = vadd.f32 %v25118_v38, %v25117_v31 }
 0x9b4   :  { %v25070_v56 = vpop.f32.mrb[20].mxu0 }
 0x9b5   :  { %v25120_v3 = vpop.f32.mrb[32].mxu1  ;;  %v25071_v46 = vpop.f32.mrb[21].mxu0 }
 0x9b6   :  { %v25121_v52 = vpop.f32.mrb[33].mxu1  ;;  %v25072_v21 = vadd.f32 %v25071_v46, %v25070_v56 }
 0x9b7   :  { %v25122_v28 = vadd.f32 %v25121_v52, %v25120_v3 }
 0x9b8   :  { %v22811_v0 = vadd.f32 %v25072_v21, %v22652_v37 }
 0x9b9   :  { %v25073_v50 = vpop.f32.mrb[22].mxu0 }
 0x9ba   :  { %v25123_v14 = vpop.f32.mrb[34].mxu1  ;;  %v25074_v13 = vpop.f32.mrb[23].mxu0  ;;  %v22946_v9 = vadd.f32 %v25116_v8, %v22811_v0 }
 0x9bb   :  { %v25124_v22 = vpop.f32.mrb[35].mxu1  ;;  %v25075_v40 = vadd.f32 %v25074_v13, %v25073_v50 }
 0x9bc   :  { %v25125_v43 = vadd.f32 %v25124_v22, %v25123_v14 }
 0x9bd   :  { %v22820_v58 = vadd.f32 %v25075_v40, %v22659_v61  ;;  %v25076_v16 = vpop.f32.mrb[24].mxu0 }
 0x9be   :  { %v25077_v48 = vpop.f32.mrb[25].mxu0 }
 0x9bf   :  { %v25078_v26 = vadd.f32 %v25077_v48, %v25076_v16  ;;  %v22957_v24 = vadd.f32 %v25119_v18, %v22820_v58 }
 0x9c1   :  { %v22829_v41 = vadd.f32 %v25078_v26, %v22666_v19 }
 0x9c2   :  { %v25079_v62 = vpop.f32.mrb[26].mxu0 }
 0x9c3   :  { %v25080_v59 = vpop.f32.mrb[27].mxu0  ;;  %v22968_v4 = vadd.f32 %v25122_v28, %v22829_v41 }
 0x9c4   :  { %v25081_v42 = vadd.f32 %v25080_v59, %v25079_v62 }
 0x9c6   :  { %v22838_v10 = vadd.f32 %v25081_v42, %v22673_v63 }
 0x9c8   :  { %v22979_v49 = vadd.f32 %v25125_v43, %v22838_v10 }
 0x9cf   :  { %v25202_v39 = vpop.f32.mrb[36].mxu1 }
 0x9d0   :  { %v25203_v57 = vpop.f32.mrb[37].mxu1 }
 0x9d1   :  { %v25204_v54 = vadd.f32 %v25203_v57, %v25202_v39 }
 0x9d3   :  { %v25205_v60 = vpop.f32.mrb[38].mxu1 }
 0x9d4   :  { %v25206_v7 = vpop.f32.mrb[39].mxu1 }
 0x9d5   :  { %v25207_v2 = vadd.f32 %v25206_v7, %v25205_v60 }
 0x9d6   :  { %v25158_v23 = vpop.f32.mrb[28].mxu0 }
 0x9d7   :  { %v25208_v44 = vpop.f32.mrb[40].mxu1  ;;  %v25159_v33 = vpop.f32.mrb[29].mxu0 }
 0x9d8   :  { %v25209_v6 = vpop.f32.mrb[41].mxu1  ;;  %v25160_v37 = vadd.f32 %v25159_v33, %v25158_v23 }
 0x9d9   :  { %v25210_v55 = vadd.f32 %v25209_v6, %v25208_v44 }
 0x9da   :  { %v23147_v15 = vadd.f32 %v25160_v37, %v22946_v9  ;;  %v25161_v17 = vpop.f32.mrb[30].mxu0 }
 0x9db   :  { %v25211_v53 = vpop.f32.mrb[42].mxu1  ;;  %v25162_v5 = vpop.f32.mrb[31].mxu0 }
 0x9dc   :  { %v25212_v61 = vpop.f32.mrb[43].mxu1  ;;  %v25163_v32 = vadd.f32 %v25162_v5, %v25161_v17  ;;  %v23272_v19 = vadd.f32 %v25204_v54, %v23147_v15 }
 0x9dd   :  { %v25213_v30 = vadd.f32 %v25212_v61, %v25211_v53 }
 0x9de   :  { %v23154_v1 = vadd.f32 %v25163_v32, %v22957_v24  ;;  %v25164_v27 = vpop.f32.mrb[32].mxu0 }
 0x9df   :  { %v25165_v63 = vpop.f32.mrb[33].mxu0 }
 0x9e0   :  { %v25166_v20 = vadd.f32 %v25165_v63, %v25164_v27  ;;  %v23279_v51 = vadd.f32 %v25207_v2, %v23154_v1 }
 0x9e2   :  { %v23161_v8 = vadd.f32 %v25166_v20, %v22968_v4 }
 0x9e3   :  { %v25167_v31 = vpop.f32.mrb[34].mxu0 }
 0x9e4   :  { %v25168_v38 = vpop.f32.mrb[35].mxu0  ;;  %v23286_v56 = vadd.f32 %v25210_v55, %v23161_v8 }
 0x9e5   :  { %v25169_v18 = vadd.f32 %v25168_v38, %v25167_v31 }
 0x9e7   :  { %v23168_v3 = vadd.f32 %v25169_v18, %v22979_v49 }
 0x9e9   :  { %v23293_v46 = vadd.f32 %v25213_v30, %v23168_v3 }
 0x9f0   :  { %v25290_v52 = vpop.f32.mrb[44].mxu1 }
 0x9f1   :  { %v25291_v21 = vpop.f32.mrb[45].mxu1 }
 0x9f2   :  { %v25292_v28 = vadd.f32 %v25291_v21, %v25290_v52 }
 0x9f4   :  { %v25293_v0 = vpop.f32.mrb[46].mxu1 }
 0x9f5   :  { %v25294_v50 = vpop.f32.mrb[47].mxu1 }
 0x9f6   :  { %v25295_v14 = vadd.f32 %v25294_v50, %v25293_v0 }
 0x9f8   :  { %v25296_v22 = vpop.f32.mrb[48].mxu1 }
 0x9f9   :  { %v25297_v43 = vpop.f32.mrb[49].mxu1 }
 0x9fa   :  { %v25246_v13 = vpop.f32.mrb[36].mxu0  ;;  %v25298_v58 = vadd.f32 %v25297_v43, %v25296_v22 }
 0x9fb   :  { %v25247_v40 = vpop.f32.mrb[37].mxu0 }
 0x9fc   :  { %v25248_v9 = vadd.f32 %v25247_v40, %v25246_v13  ;;  %v25299_v26 = vpop.f32.mrb[50].mxu1 }
 0x9fd   :  { %v25300_v41 = vpop.f32.mrb[51].mxu1 }
 0x9fe   :  { %v23405_v16 = vadd.f32 %v25248_v9, %v23272_v19  ;;  %v25249_v48 = vpop.f32.mrb[38].mxu0  ;;  %v25301_v59 = vadd.f32 %v25300_v41, %v25299_v26 }
 0x9ff   :  { %v25250_v24 = vpop.f32.mrb[39].mxu0 }
 0xa00   :  { %v25251_v62 = vadd.f32 %v25250_v24, %v25249_v48  ;;  %v23682_v42 = vadd.f32 %v25292_v28, %v23405_v16 }
 0xa02   :  { %v23420_v4 = vadd.f32 %v25251_v62, %v23279_v51  ;;  %v25252_v10 = vpop.f32.mrb[40].mxu0 }
 0xa03   :  { %v25253_v49 = vpop.f32.mrb[41].mxu0 }
 0xa04   :  { %v25254_v39 = vadd.f32 %v25253_v49, %v25252_v10  ;;  %v23689_v57 = vadd.f32 %v25295_v14, %v23420_v4 }
 0xa06   :  { %v23435_v54 = vadd.f32 %v25254_v39, %v23286_v56  ;;  %v25255_v60 = vpop.f32.mrb[42].mxu0 }
 0xa07   :  { %v25256_v7 = vpop.f32.mrb[43].mxu0 }
 0xa08   :  { %v25257_v12 = vadd.f32 %v25256_v7, %v25255_v60  ;;  %v23696_v35 = vadd.f32 %v25298_v58, %v23435_v54 }
 0xa0a   :  { %v23450_v2 = vadd.f32 %v25257_v12, %v23293_v46 }
 0xa0c   :  { %v23703_v34 = vadd.f32 %v25301_v59, %v23450_v2 }
 0xa10   :  { %v25378_v23 = vpop.f32.mrb[52].mxu1 }
 0xa11   :  { %v25379_v44 = vpop.f32.mrb[53].mxu1 }
 0xa12   :  { %v25380_v33 = vadd.f32 %v25379_v44, %v25378_v23 }
 0xa14   :  { %v25381_v6 = vpop.f32.mrb[54].mxu1 }
 0xa15   :  { %v25382_v37 = vpop.f32.mrb[55].mxu1 }
 0xa16   :  { %v25383_v55 = vadd.f32 %v25382_v37, %v25381_v6 }
 0xa18   :  { %v25384_v17 = vpop.f32.mrb[56].mxu1 }
 0xa19   :  { %v25385_v5 = vpop.f32.mrb[57].mxu1 }
 0xa1a   :  { %v25334_v15 = vpop.f32.mrb[44].mxu0  ;;  %v25386_v47 = vadd.f32 %v25385_v5, %v25384_v17 }
 0xa1b   :  { %v25335_v53 = vpop.f32.mrb[45].mxu0 }
 0xa1c   :  { %v25336_v61 = vadd.f32 %v25335_v53, %v25334_v15  ;;  %v25387_v19 = vpop.f32.mrb[58].mxu1 }
 0xa1d   :  { %v25388_v1 = vpop.f32.mrb[59].mxu1 }
 0xa1e   :  { %v23841_v32 = vadd.f32 %v25336_v61, %v23682_v42  ;;  %v25337_v30 = vpop.f32.mrb[46].mxu0  ;;  %v25389_v63 = vadd.f32 %v25388_v1, %v25387_v19 }
 0xa1f   :  { %v25338_v45 = vpop.f32.mrb[47].mxu0 }
 0xa20   :  { %v25339_v27 = vadd.f32 %v25338_v45, %v25337_v30  ;;  %v23976_v20 = vadd.f32 %v25380_v33, %v23841_v32 }
 0xa22   :  { %v23850_v51 = vadd.f32 %v25339_v27, %v23689_v57  ;;  %v25340_v8 = vpop.f32.mrb[48].mxu0  ;;  %v34066_v57 = vand.u32 4294901760, %v34053_v36 }
 0xa23   :  { %v25341_v31 = vpop.f32.mrb[49].mxu0 }
 0xa24   :  { %v25342_v38 = vadd.f32 %v25341_v31, %v25340_v8  ;;  %v23987_v18 = vadd.f32 %v25383_v55, %v23850_v51  ;;  %v24427_v23 = vsub.f32 %v34053_v36, %v34066_v57 }
 0xa26   :  { %v23859_v56 = vadd.f32 %v25342_v38, %v23696_v35  ;;  %v25343_v3 = vpop.f32.mrb[50].mxu0 }
 0xa27   :  { %v25344_v46 = vpop.f32.mrb[51].mxu0 }
 0xa28   :  { %v25345_v52 = vadd.f32 %v25344_v46, %v25343_v3  ;;  %v23998_v21 = vadd.f32 %v25386_v47, %v23859_v56  ;;  %v24428_v47 = vand.u32 4294901760, %v24427_v23 }
 0xa2a   :  { %v23868_v28 = vadd.f32 %v25345_v52, %v23703_v34 }
 0xa2c   :  { %v24009_v0 = vadd.f32 %v25389_v63, %v23868_v28 }
 0xa30   :  { %v25466_v50 = vpop.f32.mrb[60].mxu1 }
 0xa31   :  { %v25467_v14 = vpop.f32.mrb[61].mxu1 }
 0xa32   :  { %v25468_v13 = vadd.f32 %v25467_v14, %v25466_v50 }
 0xa34   :  { %v25469_v22 = vpop.f32.mrb[62].mxu1 }
 0xa35   :  { %v25470_v40 = vpop.f32.mrb[63].mxu1 }
 0xa36   :  { %v25471_v43 = vadd.f32 %v25470_v40, %v25469_v22  ;;  %v24338_v40 = vpop.permute.xlu0 %24337 }
 0xa38   :  { %v25472_v58 = vpop.f32.mrb[64].mxu1 }
 0xa39   :  { %v25473_v48 = vpop.f32.mrb[65].mxu1 }
 0xa3a   :  { %v25422_v9 = vpop.f32.mrb[52].mxu0  ;;  %v25474_v24 = vadd.f32 %v25473_v48, %v25472_v58 }
 0xa3b   :  { %v25423_v16 = vpop.f32.mrb[53].mxu0 }
 0xa3c   :  { %v25424_v26 = vadd.f32 %v25423_v16, %v25422_v9  ;;  %v25475_v59 = vpop.f32.mrb[66].mxu1 }
 0xa3d   :  { %v25476_v4 = vpop.f32.mrb[67].mxu1 }
 0xa3e   :  { %v24177_v41 = vadd.f32 %v25424_v26, %v23976_v20  ;;  %v25425_v62 = vpop.f32.mrb[54].mxu0  ;;  %v25477_v39 = vadd.f32 %v25476_v4, %v25475_v59  ;;  %v24429_v20 = vsub.f32 %v24427_v23, %v24428_v47 }
 0xa3f   :  { %v25426_v42 = vpop.f32.mrb[55].mxu0 }
 0xa40   :  { %v24302_v10 = vadd.f32 %v25468_v13, %v24177_v41  ;;  %v25427_v49 = vadd.f32 %v25426_v42, %v25425_v62  ;;  %v24430_v46 = vand.u32 4294901760, %v24429_v20 }
 0xa42   :  { %v24348_v54 = vand.u32 4294901760, %v24302_v10  ;;  %v24184_v60 = vadd.f32 %v25427_v49, %v23987_v18  ;;  %v25428_v7 = vpop.f32.mrb[56].mxu0 }
 0xa43   :  { %v25429_v12 = vpop.f32.mrb[57].mxu0 }
 0xa44   :  { %v24438_v35 = vsub.f32 %v24302_v10, %v24348_v54  ;;  %v24309_v2 = vadd.f32 %v25471_v43, %v24184_v60  ;;  %v25430_v34 = vadd.f32 %v25429_v12, %v25428_v7  ;;  %v24333_v43 = vpop.permute.xlu1 %24332 }
 0xa46   :  { %v24351_v44 = vand.u32 4294901760, %v24309_v2  ;;  %v24191_v33 = vadd.f32 %v25430_v34, %v23998_v21  ;;  %v25431_v6 = vpop.f32.mrb[58].mxu0  ;;  %v24439_v37 = vand.u32 4294901760, %v24438_v35 }
 0xa47   :  { %v25432_v55 = vpop.f32.mrb[59].mxu0 }
 0xa48   :  { %v26396_v15 = vpack.c.bf16 %v24351_v44, %v24348_v54  ;;  %v24445_v17 = vsub.f32 %v24309_v2, %v24351_v44  ;;  %v24316_v53 = vadd.f32 %v25474_v24, %v24191_v33  ;;  %v25433_v5 = vadd.f32 %v25432_v55, %v25431_v6 }
 0xa49   :  { %v24440_v61 = vsub.f32 %v24438_v35, %v24439_v37 }
 0xa4a   :  { %v24354_v32 = vand.u32 4294901760, %v24316_v53  ;;  %v24198_v30 = vadd.f32 %v25433_v5, %v24009_v0  ;;  %26397 = vmatprep.subr.bf16.mxu1 %v26396_v15  ;;  %v24446_v19 = vand.u32 4294901760, %v24445_v17  ;;  %v26412_v45 = vpack.c.bf16 %v24445_v17, %v24438_v35 }
 0xa4b   :  { %26399 = vmatpush3.bf16.msra.mxu1 %v26396_v15  ;;  %v24441_v8 = vand.u32 4294901760, %v24440_v61 }
 0xa4c   :  { %v24452_v1 = vsub.f32 %v24316_v53, %v24354_v32  ;;  %v24323_v27 = vadd.f32 %v25477_v39, %v24198_v30  ;;  %v24447_v36 = vsub.f32 %v24445_v17, %v24446_v19  ;;  %v26428_v63 = vpack.c.bf16 %v24446_v19, %v24439_v37 }
 0xa4e   :  { %v24357_v51 = vand.u32 4294901760, %v24323_v27  ;;  %v24448_v31 = vand.u32 4294901760, %v24447_v36  ;;  %v24453_v38 = vand.u32 4294901760, %v24452_v1 }
 0xa50   :  { %v26400_v18 = vpack.c.bf16 %v24357_v51, %v24354_v32  ;;  %v24459_v56 = vsub.f32 %v24323_v27, %v24357_v51  ;;  %v26404_v3 = vpack.c.bf16 %v24448_v31, %v24441_v8  ;;  %v24454_v52 = vsub.f32 %v24452_v1, %v24453_v38 }
 0xa52   :  { %26401 = vmatprep.subr.bf16.mxu1 %v26400_v18  ;;  %26405 = vmatprep.subr.bf16.mxu0 %v26404_v3  ;;  %v24460_v21 = vand.u32 4294901760, %v24459_v56  ;;  %v26416_v28 = vpack.c.bf16 %v24459_v56, %v24452_v1  ;;  %v24455_v14 = vand.u32 4294901760, %v24454_v52 }
 0xa53   :  { %26403 = vmatpush3.bf16.msra.mxu1 %v26400_v18  ;;  %26407 = vmatpush3.bf16.msra.mxu0 %v26404_v3 }
 0xa54   :  { %v24461_v0 = vsub.f32 %v24459_v56, %v24460_v21  ;;  %v26432_v50 = vpack.c.bf16 %v24460_v21, %v24453_v38 }
 0xa56   :  { %25523 = vmatmul.mubr.f32.vlgmr.msra.gmra.mrb[68].mxu1 %v24430_v46  ;;  %v24462_v13 = vand.u32 4294901760, %v24461_v0 }
 0xa58   :  { %v26408_v22 = vpack.c.bf16 %v24462_v13, %v24455_v14 }
 0xa5a   :  { %26409 = vmatprep.subr.bf16.mxu0 %v26408_v22 }
 0xa5b   :  { %26411 = vmatpush3.bf16.msra.mxu0 %v26408_v22 }
 0xa5c   :  { %26413 = vmatprep.subr.bf16.mxu0 %v26412_v45 }
 0xa5e   :  { %25534 = vmatmul.mubr.f32.vlgmr.msra.gmra.mrb[60].mxu0 %v34066_v57 }
 0xa5f   :  { %26415 = vmatpush3.bf16.msra.mxu0 %v26412_v45  ;;  %25544 = vmatprep.mubr.f32.mxu0 %v34058_v25 }
 0xa60   :  { %26417 = vmatprep.subr.bf16.mxu0 %v26416_v28 }
 0xa63   :  { %26419 = vmatpush3.bf16.msra.mxu0 %v26416_v28 }
 0xa64   :  { %26421 = vmatprep.subr.bf16.mxu0 %v26396_v15 }
 0xa66   :  { %25545 = vmatmul.mubr.f32.vlgmr.msra.gmra.mrb[60].mxu0 %v24427_v23 }
 0xa67   :  { %26423 = vmatpush3.bf16.msra.mxu0 %v26396_v15  ;;  %25555 = vmatprep.mubr.f32.mxu0 %v24418_v29 }
 0xa68   :  { %26425 = vmatprep.subr.bf16.mxu0 %v26400_v18 }
 0xa6b   :  { %26427 = vmatpush3.bf16.msra.mxu0 %v26400_v18 }
 0xa6c   :  { %26429 = vmatprep.subr.bf16.mxu0 %v26428_v63 }
 0xa6e   :  { %25556 = vmatmul.mubr.f32.vlgmr.msra.gmra.mrb[60].mxu0 %v24428_v47 }
 0xa6f   :  { %26431 = vmatpush3.bf16.msra.mxu0 %v26428_v63  ;;  %25566 = vmatprep.mubr.f32.mxu0 %v34055_v11 }
 0xa70   :  { %26433 = vmatprep.subr.bf16.mxu0 %v26432_v50 }
 0xa73   :  { %26435 = vmatpush3.bf16.msra.mxu0 %v26432_v50 }
 0xa74   :  { %26437 = vmatprep.subr.bf16.mxu0 %v26396_v15 }
 0xa76   :  { %25567 = vmatmul.mubr.f32.vlgmr.msra.gmra.mrb[60].mxu0 %v34066_v57 }
 0xa77   :  { %26439 = vmatpush3.bf16.msra.mxu0 %v26396_v15  ;;  %25577 = vmatprep.mubr.f32.mxu0 %v34055_v11 }
 0xa78   :  { %26441 = vmatprep.subr.bf16.mxu0 %v26400_v18 }
 0xa7b   :  { %26443 = vmatpush3.bf16.msra.mxu0 %v26400_v18 }
 0xa7e   :  { %25578 = vmatmul.mubr.f32.vlgmr.msra.gmra.mrb[60].mxu0 %v34066_v57 }
 0xb29   :  { %v25524_v25 = vpop.f32.mrb[68].mxu1 }
 0xb2a   :  { %v24422_v29 = vpop.f32.mrb[69].mxu1  ;;  %v24433_v9 = vadd.f32 %v25524_v25, %v24338_v40 }
 0xb2b   :  { %v24423_v58 = vadd.f32 %v24422_v29, %v24333_v43 }
 0xb51   :  { %v25579_v16 = vpop.f32.mrb[60].mxu0 }
 0xb52   :  { %v26453_v48 = vadd.f32 %v25579_v16, %v24433_v9  ;;  %v24865_v26 = vpop.f32.mrb[61].mxu0 }
 0xb53   :  { %v26455_v24 = vadd.f32 %v24865_v26, %v24423_v58 }
 0xb54   :  { %v24949_v41 = vclamps-f32 %v26453_v48, 1.0 }
 0xb55   :  { %v24948_v62 = vclamps-f32 %v26455_v24, 1.0 }
 0xb56   :  { %24881 = vst.msk [vmem:[%s34094_s10 + $0x8] sm:$0xff] %vm24879_vm4, %v24949_v41 }
 0xb57   :  { %24880 = vst.msk [vmem:[%s34094_s10] sm:$0xff] %vm24879_vm4, %v24948_v62 }

</bundles_post_ra>
